<compile_context>
chip_gen: v7x
topology: tpu7x:2x2x1
jax: 0.10.0
libtpu: 0.0.40
codegen_flags: <defaults>
</compile_context>

<pallas_src>
import jax
import jax.numpy as jnp
from jax.experimental import pallas as pl
from jax.experimental.pallas import tpu as pltpu

SEQ_LEN = 16907          # must equal H * (W - KW + 1)
KW = 200                 # conv kernel width (1, 200)
H = 11                   # rows of the 2-D "image"
W = 1736                 # columns; OW = 1537; 11 * 1537 = 16907
OW = W - KW + 1
assert H * OW == SEQ_LEN
FC1_OUT = 512
H_DIM = 100
OUT_DIM = 10

# ---- conv tiling constants (lane-dense, MXU-matmul formulation) ----
TILE = 256                        # output columns per tile (lane dim)
NT = (OW + TILE - 1) // TILE      # 7 tiles
OWP = NT * TILE                   # 1792 (padded output width)
SLABP = 512                       # lane-aligned slab (>= TILE + KW - 1 = 455)
WP = (NT - 1) * TILE + SLABP      # 2048 (padded input width)

# ---- fc1 K-streaming constants ----
TK = 4352                         # 34 * 128 -> 4 grid steps
KP = ((SEQ_LEN + TK - 1) // TK) * TK   # 17408
N2 = 128                          # h_dim (100) padded to lane width
N3 = 128                          # out_dim (10) padded to lane width

# Set to jnp.bfloat16 to halve the dominant fc1 W1 DMA (~2x on the MLP);
# kept f32 by default to match the PyTorch module's numerics exactly.
W1_STREAM_DTYPE = jnp.float32


# ------------------------- Conv(1,200) + ReLU kernel -------------------------
def _conv_relu_kernel(b_ref, x_ref, s_ref, o_ref):
    # b_ref: (1,1) SMEM conv bias
    # x_ref: (Rp, WP)  VMEM, rows = B*H (padded)
    # s_ref: (SLABP, TILE) VMEM banded Toeplitz weights
    # o_ref: (Rp, OWP) VMEM full output block
    bias = b_ref[0, 0]
    for t in range(NT):                                  # 7 unrolled MXU dots
        slab = x_ref[:, t * TILE: t * TILE + SLABP]      # static, lane-aligned
        acc = jnp.dot(slab, s_ref[...], preferred_element_type=jnp.float32)
        o_ref[:, t * TILE:(t + 1) * TILE] = jnp.maximum(acc + bias, 0.0)


def conv1x200_relu(x, S, conv_b2d):
    """x: (B, H, W) f32 -> flattened conv+ReLU activations (B, H*OW) f32."""
    B, Hh, Ww = x.shape
    R = B * Hh
    Rp = ((R + 7) // 8) * 8

    xp = jnp.zeros((Rp, WP), jnp.float32).at[:R, :Ww].set(
        x.reshape(R, Ww).astype(jnp.float32))

    out = pl.pallas_call(
        _conv_relu_kernel,
        out_shape=jax.ShapeDtypeStruct((Rp, OWP), jnp.float32),
        grid=(1,),                                        # single step: nothing to pipeline
        in_specs=[
            pl.BlockSpec(memory_space=pltpu.MemorySpace.SMEM),  # conv bias
            pl.BlockSpec((Rp, WP), lambda i: (0, 0)),           # X (resident)
            pl.BlockSpec((SLABP, TILE), lambda i: (0, 0)),      # Toeplitz S
        ],
        out_specs=pl.BlockSpec((Rp, OWP), lambda i: (0, 0)),
        compiler_params=pltpu.CompilerParams(
            dimension_semantics=("arbitrary",)),
    )(conv_b2d, xp, S)

    return out[:R, :OW].reshape(B, Hh * OW)


# --------------------- Fused 3-layer MLP (fc1/fc2/fc3) kernel -----------------
def _mlp_kernel(x_ref, w1_ref, b1_ref, w2_ref, b2_ref, w3_ref, b3_ref,
                o_ref, acc_ref):
    k = pl.program_id(0)

    @pl.when(k == 0)
    def _():
        acc_ref[...] = jnp.zeros_like(acc_ref)

    # fc1 partial accumulation over the (padded) 16907-wide reduction axis.
    # W1 may be streamed in bf16; upcast in-kernel (compute is not the bound).
    acc_ref[...] += jnp.dot(x_ref[...], w1_ref[...].astype(jnp.float32),
                            preferred_element_type=jnp.float32)

    @pl.when(k == pl.num_programs(0) - 1)
    def _():
        h1 = jnp.maximum(acc_ref[...] + b1_ref[...], 0.0)        # fc1 + ReLU
        # dropout1 has p=0.0 -> identity (omitted)
        h2 = jnp.maximum(
            jnp.dot(h1, w2_ref[...], preferred_element_type=jnp.float32)
            + b2_ref[...], 0.0)                                  # fc2 + ReLU
        # dropout2 has p=0.0 -> identity (omitted)
        o_ref[...] = (jnp.dot(h2, w3_ref[...],
                              preferred_element_type=jnp.float32)
                      + b3_ref[...])                             # fc3


def mlp(x_flat, p):
    B, K = x_flat.shape
    Mp = max(8, ((B + 7) // 8) * 8)

    # Only the tiny (B, 16907) activation is padded per call; weights were
    # padded once in prepare_params().
    xp = jnp.zeros((Mp, KP), jnp.float32).at[:B, :K].set(x_flat)

    out = pl.pallas_call(
        _mlp_kernel,
        out_shape=jax.ShapeDtypeStruct((Mp, N3), jnp.float32),
        grid_spec=pltpu.PrefetchScalarGridSpec(
            num_scalar_prefetch=0,
            grid=(KP // TK,),                                    # 4 steps
            in_specs=[
                pl.BlockSpec((Mp, TK), lambda k: (0, k)),        # x tile
                pl.BlockSpec((TK, FC1_OUT), lambda k: (k, 0)),   # W1 tile (streamed)
                pl.BlockSpec((1, FC1_OUT), lambda k: (0, 0)),    # b1
                pl.BlockSpec((FC1_OUT, N2), lambda k: (0, 0)),   # W2 (resident)
                pl.BlockSpec((1, N2), lambda k: (0, 0)),         # b2
                pl.BlockSpec((N2, N3), lambda k: (0, 0)),        # W3 (resident)
                pl.BlockSpec((1, N3), lambda k: (0, 0)),         # b3
            ],
            out_specs=pl.BlockSpec((Mp, N3), lambda k: (0, 0)),
            scratch_shapes=[pltpu.VMEM((Mp, FC1_OUT), jnp.float32)],
        ),
        compiler_params=pltpu.CompilerParams(
            dimension_semantics=("arbitrary",),        # K is a reduction axis
            vmem_limit_bytes=48 * 1024 * 1024),        # fits v5e/v6e/v7x
    )(xp, p["w1p"], p["b1p"], p["w2p"], p["b2p"], p["w3p"], p["b3p"])
    return out[:B, :OUT_DIM]


# ----------------------- One-time weight padding / packing --------------------
def prepare_params(params):
    """Pad/pack all weights ONCE (keep this out of the per-call jit path)."""
    w = params["conv_w"].astype(jnp.float32)

    # Banded Toeplitz: S[m, l] = w[m - l] for 0 <= m - l < KW, else 0.
    # y[r, TILE*t + l] = sum_m x[r, TILE*t + m] * S[m, l]
    m = jnp.arange(SLABP)[:, None]
    l = jnp.arange(TILE)[None, :]
    d = m - l
    S = jnp.where((d >= 0) & (d < KW), w[jnp.clip(d, 0, KW - 1)], 0.0)

    w1p = (jnp.zeros((KP, FC1_OUT), jnp.float32)
           .at[:SEQ_LEN, :].set(params["w1"].astype(jnp.float32))
           .astype(W1_STREAM_DTYPE))
    b1p = params["b1"].reshape(1, FC1_OUT).astype(jnp.float32)
    w2p = (jnp.zeros((FC1_OUT, N2), jnp.float32)
           .at[:, :H_DIM].set(params["w2"].astype(jnp.float32)))
    b2p = jnp.zeros((1, N2), jnp.float32).at[0, :H_DIM].set(params["b2"])
    w3p = (jnp.zeros((N2, N3), jnp.float32)
           .at[:H_DIM, :OUT_DIM].set(params["w3"].astype(jnp.float32)))
    b3p = jnp.zeros((1, N3), jnp.float32).at[0, :OUT_DIM].set(params["b3"])

    return {
        "S": S,
        "conv_b2d": params["conv_b"].reshape(1, 1).astype(jnp.float32),
        "w1p": w1p, "b1p": b1p,
        "w2p": w2p, "b2p": b2p,
        "w3p": w3p, "b3p": b3p,
    }


# --------------------------------- Forward ------------------------------------
def identity_forward(x, prepped):
    x_flat = conv1x200_relu(x, prepped["S"], prepped["conv_b2d"])  # (B, 16907)
    return mlp(x_flat, prepped)                                    # (B, 10)


def init_params(key):
    ks = jax.random.split(key, 8)

    def uni(k, shape, fan_in):
        bound = 1.0 / float(fan_in) ** 0.5
        return jax.random.uniform(k, shape, jnp.float32, -bound, bound)

    return {
        "conv_w": uni(ks[0], (KW,), KW),                # Conv2d(1,1,(1,200)) weight
        "conv_b": uni(ks[1], (), KW),                   # Conv2d bias (scalar)
        "w1": uni(ks[2], (SEQ_LEN, FC1_OUT), SEQ_LEN),  # fc1 (stored transposed)
        "b1": uni(ks[3], (FC1_OUT,), SEQ_LEN),
        "w2": uni(ks[4], (FC1_OUT, H_DIM), FC1_OUT),    # fc2 (stored transposed)
        "b2": uni(ks[5], (H_DIM,), FC1_OUT),
        "w3": uni(ks[6], (H_DIM, OUT_DIM), H_DIM),      # fc3 (stored transposed)
        "b3": uni(ks[7], (OUT_DIM,), H_DIM),
    }


def reference_forward(x, params):
    """Pure-JAX reference matching the PyTorch module (dropout p=0 => identity)."""
    y = jax.lax.conv_general_dilated(
        x[:, None, :, :].astype(jnp.float32),
        params["conv_w"].reshape(1, 1, 1, KW).astype(jnp.float32),
        window_strides=(1, 1), padding="VALID")          # (B,1,H,OW), NCHW/OIHW
    y = jnp.maximum(y + params["conv_b"], 0.0)
    y = y.reshape(x.shape[0], -1)                         # (B, 16907)
    h1 = jnp.maximum(y @ params["w1"] + params["b1"], 0.0)
    h2 = jnp.maximum(h1 @ params["w2"] + params["b2"], 0.0)
    return h2 @ params["w3"] + params["b3"]


if __name__ == "__main__":
    key = jax.random.PRNGKey(0)
    pkey, xkey = jax.random.split(key)
    raw = init_params(pkey)
    prepped = prepare_params(raw)      # one-time pad/pack (NOT in the per-call path)

    B = 2
    # forward input x: (B, H, W); inside forward PyTorch adds the C=1 axis.
    x = jax.random.normal(xkey, (B, H, W), jnp.float32)

    fwd = jax.jit(identity_forward)
    out = jax.block_until_ready(fwd(x, prepped))
    assert out.shape == (B, OUT_DIM) and out.dtype == jnp.float32

    # Correctness vs. pure-JAX reference (valid for the default f32 W1 stream).
    ref = reference_forward(x, raw)
    assert jnp.allclose(out, ref, atol=5e-3, rtol=5e-3), \
        float(jnp.max(jnp.abs(out - ref)))

    print("KERNEL_OK")
</pallas_src>

<mosaic_0001>
module attributes {stable_mosaic.version = 11 : i64} {
  func.func @_conv_relu_kernel(%arg0: i32, %arg1: memref<1x1xf32, #tpu.memory_space<smem>>, %arg2: memref<24x2048xf32, #tpu.memory_space<vmem>>, %arg3: memref<512x256xf32, #tpu.memory_space<vmem>>, %arg4: memref<24x1792xf32, #tpu.memory_space<vmem>>) attributes {dimension_semantics = [#tpu.dimension_semantics<arbitrary>], iteration_bounds = array<i64: 1>, scalar_prefetch = 0 : i64, scratch_operands = 0 : i64, tpu.core_type = #tpu.core_type<tc>, window_params = [{transform_indices = @transform_0, window_bounds = array<i64: 1, 1>}, {pipeline_mode = #tpu.pipeline_mode<synchronous>, transform_indices = @transform_1, window_bounds = array<i64: 24, 2048>}, {pipeline_mode = #tpu.pipeline_mode<synchronous>, transform_indices = @transform_2, window_bounds = array<i64: 512, 256>}, {pipeline_mode = #tpu.pipeline_mode<synchronous>, transform_indices = @transform_3, window_bounds = array<i64: 24, 1792>}]} {
    %c0 = arith.constant 0 : index
    %c0_0 = arith.constant 0 : index
    %0 = memref.load %arg1[%c0, %c0_0] : memref<1x1xf32, #tpu.memory_space<smem>>
    %c0_1 = arith.constant 0 : index
    %c0_2 = arith.constant 0 : index
    %1 = vector.load %arg2[%c0_1, %c0_2] : memref<24x2048xf32, #tpu.memory_space<vmem>>, vector<24x512xf32>
    %c0_3 = arith.constant 0 : index
    %c0_4 = arith.constant 0 : index
    %2 = vector.load %arg3[%c0_3, %c0_4] : memref<512x256xf32, #tpu.memory_space<vmem>>, vector<512x256xf32>
    %cst = arith.constant dense<0.000000e+00> : vector<24x256xf32>
    %3 = tpu.matmul %1, %2, %cst {dimension_numbers = #tpu.dot_dimension_numbers<[1], [0], [0], [1], [0, 0, 1, 1], [], []>} : vector<24x512xf32>, vector<512x256xf32>, vector<24x256xf32> -> vector<24x256xf32>
    %4 = vector.broadcast %0 : f32 to vector<24x256xf32>
    %5 = arith.addf %3, %4 : vector<24x256xf32>
    %cst_5 = arith.constant 0.000000e+00 : f32
    %6 = vector.broadcast %cst_5 : f32 to vector<24x256xf32>
    %7 = arith.maximumf %5, %6 : vector<24x256xf32>
    %c0_6 = arith.constant 0 : index
    %c0_7 = arith.constant 0 : index
    %8 = vector.load %arg4[%c0_6, %c0_7] : memref<24x1792xf32, #tpu.memory_space<vmem>>, vector<24x256xf32>
    tpu.vector_store %arg4[%c0_6, %c0_7], %7 {strides = array<i32>} : memref<24x1792xf32, #tpu.memory_space<vmem>>, vector<24x256xf32>,
    %c0_8 = arith.constant 0 : index
    %c256 = arith.constant 256 : index
    %9 = vector.load %arg2[%c0_8, %c256] : memref<24x2048xf32, #tpu.memory_space<vmem>>, vector<24x512xf32>
    %c0_9 = arith.constant 0 : index
    %c0_10 = arith.constant 0 : index
    %10 = vector.load %arg3[%c0_9, %c0_10] : memref<512x256xf32, #tpu.memory_space<vmem>>, vector<512x256xf32>
    %cst_11 = arith.constant dense<0.000000e+00> : vector<24x256xf32>
    %11 = tpu.matmul %9, %10, %cst_11 {dimension_numbers = #tpu.dot_dimension_numbers<[1], [0], [0], [1], [0, 0, 1, 1], [], []>} : vector<24x512xf32>, vector<512x256xf32>, vector<24x256xf32> -> vector<24x256xf32>
    %12 = vector.broadcast %0 : f32 to vector<24x256xf32>
    %13 = arith.addf %11, %12 : vector<24x256xf32>
    %cst_12 = arith.constant 0.000000e+00 : f32
    %14 = vector.broadcast %cst_12 : f32 to vector<24x256xf32>
    %15 = arith.maximumf %13, %14 : vector<24x256xf32>
    %c0_13 = arith.constant 0 : index
    %c256_14 = arith.constant 256 : index
    %16 = vector.load %arg4[%c0_13, %c256_14] : memref<24x1792xf32, #tpu.memory_space<vmem>>, vector<24x256xf32>
    tpu.vector_store %arg4[%c0_13, %c256_14], %15 {strides = array<i32>} : memref<24x1792xf32, #tpu.memory_space<vmem>>, vector<24x256xf32>,
    %c0_15 = arith.constant 0 : index
    %c512 = arith.constant 512 : index
    %17 = vector.load %arg2[%c0_15, %c512] : memref<24x2048xf32, #tpu.memory_space<vmem>>, vector<24x512xf32>
    %c0_16 = arith.constant 0 : index
    %c0_17 = arith.constant 0 : index
    %18 = vector.load %arg3[%c0_16, %c0_17] : memref<512x256xf32, #tpu.memory_space<vmem>>, vector<512x256xf32>
    %cst_18 = arith.constant dense<0.000000e+00> : vector<24x256xf32>
    %19 = tpu.matmul %17, %18, %cst_18 {dimension_numbers = #tpu.dot_dimension_numbers<[1], [0], [0], [1], [0, 0, 1, 1], [], []>} : vector<24x512xf32>, vector<512x256xf32>, vector<24x256xf32> -> vector<24x256xf32>
    %20 = vector.broadcast %0 : f32 to vector<24x256xf32>
    %21 = arith.addf %19, %20 : vector<24x256xf32>
    %cst_19 = arith.constant 0.000000e+00 : f32
    %22 = vector.broadcast %cst_19 : f32 to vector<24x256xf32>
    %23 = arith.maximumf %21, %22 : vector<24x256xf32>
    %c0_20 = arith.constant 0 : index
    %c512_21 = arith.constant 512 : index
    %24 = vector.load %arg4[%c0_20, %c512_21] : memref<24x1792xf32, #tpu.memory_space<vmem>>, vector<24x256xf32>
    tpu.vector_store %arg4[%c0_20, %c512_21], %23 {strides = array<i32>} : memref<24x1792xf32, #tpu.memory_space<vmem>>, vector<24x256xf32>,
    %c0_22 = arith.constant 0 : index
    %c768 = arith.constant 768 : index
    %25 = vector.load %arg2[%c0_22, %c768] : memref<24x2048xf32, #tpu.memory_space<vmem>>, vector<24x512xf32>
    %c0_23 = arith.constant 0 : index
    %c0_24 = arith.constant 0 : index
    %26 = vector.load %arg3[%c0_23, %c0_24] : memref<512x256xf32, #tpu.memory_space<vmem>>, vector<512x256xf32>
    %cst_25 = arith.constant dense<0.000000e+00> : vector<24x256xf32>
    %27 = tpu.matmul %25, %26, %cst_25 {dimension_numbers = #tpu.dot_dimension_numbers<[1], [0], [0], [1], [0, 0, 1, 1], [], []>} : vector<24x512xf32>, vector<512x256xf32>, vector<24x256xf32> -> vector<24x256xf32>
    %28 = vector.broadcast %0 : f32 to vector<24x256xf32>
    %29 = arith.addf %27, %28 : vector<24x256xf32>
    %cst_26 = arith.constant 0.000000e+00 : f32
    %30 = vector.broadcast %cst_26 : f32 to vector<24x256xf32>
    %31 = arith.maximumf %29, %30 : vector<24x256xf32>
    %c0_27 = arith.constant 0 : index
    %c768_28 = arith.constant 768 : index
    %32 = vector.load %arg4[%c0_27, %c768_28] : memref<24x1792xf32, #tpu.memory_space<vmem>>, vector<24x256xf32>
    tpu.vector_store %arg4[%c0_27, %c768_28], %31 {strides = array<i32>} : memref<24x1792xf32, #tpu.memory_space<vmem>>, vector<24x256xf32>,
    %c0_29 = arith.constant 0 : index
    %c1024 = arith.constant 1024 : index
    %33 = vector.load %arg2[%c0_29, %c1024] : memref<24x2048xf32, #tpu.memory_space<vmem>>, vector<24x512xf32>
    %c0_30 = arith.constant 0 : index
    %c0_31 = arith.constant 0 : index
    %34 = vector.load %arg3[%c0_30, %c0_31] : memref<512x256xf32, #tpu.memory_space<vmem>>, vector<512x256xf32>
    %cst_32 = arith.constant dense<0.000000e+00> : vector<24x256xf32>
    %35 = tpu.matmul %33, %34, %cst_32 {dimension_numbers = #tpu.dot_dimension_numbers<[1], [0], [0], [1], [0, 0, 1, 1], [], []>} : vector<24x512xf32>, vector<512x256xf32>, vector<24x256xf32> -> vector<24x256xf32>
    %36 = vector.broadcast %0 : f32 to vector<24x256xf32>
    %37 = arith.addf %35, %36 : vector<24x256xf32>
    %cst_33 = arith.constant 0.000000e+00 : f32
    %38 = vector.broadcast %cst_33 : f32 to vector<24x256xf32>
    %39 = arith.maximumf %37, %38 : vector<24x256xf32>
    %c0_34 = arith.constant 0 : index
    %c1024_35 = arith.constant 1024 : index
    %40 = vector.load %arg4[%c0_34, %c1024_35] : memref<24x1792xf32, #tpu.memory_space<vmem>>, vector<24x256xf32>
    tpu.vector_store %arg4[%c0_34, %c1024_35], %39 {strides = array<i32>} : memref<24x1792xf32, #tpu.memory_space<vmem>>, vector<24x256xf32>,
    %c0_36 = arith.constant 0 : index
    %c1280 = arith.constant 1280 : index
    %41 = vector.load %arg2[%c0_36, %c1280] : memref<24x2048xf32, #tpu.memory_space<vmem>>, vector<24x512xf32>
    %c0_37 = arith.constant 0 : index
    %c0_38 = arith.constant 0 : index
    %42 = vector.load %arg3[%c0_37, %c0_38] : memref<512x256xf32, #tpu.memory_space<vmem>>, vector<512x256xf32>
    %cst_39 = arith.constant dense<0.000000e+00> : vector<24x256xf32>
    %43 = tpu.matmul %41, %42, %cst_39 {dimension_numbers = #tpu.dot_dimension_numbers<[1], [0], [0], [1], [0, 0, 1, 1], [], []>} : vector<24x512xf32>, vector<512x256xf32>, vector<24x256xf32> -> vector<24x256xf32>
    %44 = vector.broadcast %0 : f32 to vector<24x256xf32>
    %45 = arith.addf %43, %44 : vector<24x256xf32>
    %cst_40 = arith.constant 0.000000e+00 : f32
    %46 = vector.broadcast %cst_40 : f32 to vector<24x256xf32>
    %47 = arith.maximumf %45, %46 : vector<24x256xf32>
    %c0_41 = arith.constant 0 : index
    %c1280_42 = arith.constant 1280 : index
    %48 = vector.load %arg4[%c0_41, %c1280_42] : memref<24x1792xf32, #tpu.memory_space<vmem>>, vector<24x256xf32>
    tpu.vector_store %arg4[%c0_41, %c1280_42], %47 {strides = array<i32>} : memref<24x1792xf32, #tpu.memory_space<vmem>>, vector<24x256xf32>,
    %c0_43 = arith.constant 0 : index
    %c1536 = arith.constant 1536 : index
    %49 = vector.load %arg2[%c0_43, %c1536] : memref<24x2048xf32, #tpu.memory_space<vmem>>, vector<24x512xf32>
    %c0_44 = arith.constant 0 : index
    %c0_45 = arith.constant 0 : index
    %50 = vector.load %arg3[%c0_44, %c0_45] : memref<512x256xf32, #tpu.memory_space<vmem>>, vector<512x256xf32>
    %cst_46 = arith.constant dense<0.000000e+00> : vector<24x256xf32>
    %51 = tpu.matmul %49, %50, %cst_46 {dimension_numbers = #tpu.dot_dimension_numbers<[1], [0], [0], [1], [0, 0, 1, 1], [], []>} : vector<24x512xf32>, vector<512x256xf32>, vector<24x256xf32> -> vector<24x256xf32>
    %52 = vector.broadcast %0 : f32 to vector<24x256xf32>
    %53 = arith.addf %51, %52 : vector<24x256xf32>
    %cst_47 = arith.constant 0.000000e+00 : f32
    %54 = vector.broadcast %cst_47 : f32 to vector<24x256xf32>
    %55 = arith.maximumf %53, %54 : vector<24x256xf32>
    %c0_48 = arith.constant 0 : index
    %c1536_49 = arith.constant 1536 : index
    %56 = vector.load %arg4[%c0_48, %c1536_49] : memref<24x1792xf32, #tpu.memory_space<vmem>>, vector<24x256xf32>
    tpu.vector_store %arg4[%c0_48, %c1536_49], %55 {strides = array<i32>} : memref<24x1792xf32, #tpu.memory_space<vmem>>, vector<24x256xf32>,
    return
  }
  func.func @transform_0(%arg0: i32) -> (i32, i32) {
    %c0_i32 = arith.constant 0 : i32
    %c0_i32_0 = arith.constant 0 : i32
    %c0_i32_1 = arith.constant 0 : i32
    return %c0_i32, %c0_i32_0 : i32, i32
  }
  func.func @transform_1(%arg0: i32) -> (i32, i32) {
    %c0_i32 = arith.constant 0 : i32
    %c0_i32_0 = arith.constant 0 : i32
    %c0_i32_1 = arith.constant 0 : i32
    return %c0_i32, %c0_i32_0 : i32, i32
  }
  func.func @transform_2(%arg0: i32) -> (i32, i32) {
    %c0_i32 = arith.constant 0 : i32
    %c0_i32_0 = arith.constant 0 : i32
    %c0_i32_1 = arith.constant 0 : i32
    return %c0_i32, %c0_i32_0 : i32, i32
  }
  func.func @transform_3(%arg0: i32) -> (i32, i32) {
    %c0_i32 = arith.constant 0 : i32
    %c0_i32_0 = arith.constant 0 : i32
    %c0_i32_1 = arith.constant 0 : i32
    return %c0_i32, %c0_i32_0 : i32, i32
  }
}

module attributes {stable_mosaic.version = 11 : i64} {
  func.func @_mlp_kernel(%arg0: i32, %arg1: memref<8x4352xf32, #tpu.memory_space<vmem>>, %arg2: memref<4352x512xf32, #tpu.memory_space<vmem>>, %arg3: memref<1x512xf32, #tpu.memory_space<vmem>>, %arg4: memref<512x128xf32, #tpu.memory_space<vmem>>, %arg5: memref<1x128xf32, #tpu.memory_space<vmem>>, %arg6: memref<128x128xf32, #tpu.memory_space<vmem>>, %arg7: memref<1x128xf32, #tpu.memory_space<vmem>>, %arg8: memref<8x128xf32, #tpu.memory_space<vmem>>, %arg9: memref<8x512xf32, #tpu.memory_space<vmem>>) attributes {dimension_semantics = [#tpu.dimension_semantics<arbitrary>], iteration_bounds = array<i64: 4>, scalar_prefetch = 0 : i64, scratch_operands = 1 : i64, tpu.core_type = #tpu.core_type<tc>, window_params = [{transform_indices = @transform_0, window_bounds = array<i64: 8, 4352>}, {transform_indices = @transform_1, window_bounds = array<i64: 4352, 512>}, {pipeline_mode = #tpu.pipeline_mode<synchronous>, transform_indices = @transform_2, window_bounds = array<i64: 1, 512>}, {pipeline_mode = #tpu.pipeline_mode<synchronous>, transform_indices = @transform_3, window_bounds = array<i64: 512, 128>}, {pipeline_mode = #tpu.pipeline_mode<synchronous>, transform_indices = @transform_4, window_bounds = array<i64: 1, 128>}, {pipeline_mode = #tpu.pipeline_mode<synchronous>, transform_indices = @transform_5, window_bounds = array<i64: 128, 128>}, {pipeline_mode = #tpu.pipeline_mode<synchronous>, transform_indices = @transform_6, window_bounds = array<i64: 1, 128>}, {pipeline_mode = #tpu.pipeline_mode<synchronous>, transform_indices = @transform_7, window_bounds = array<i64: 8, 128>}]} {
    %c0_i32 = arith.constant 0 : i32
    %0 = arith.cmpi eq, %arg0, %c0_i32 : i32
    %1 = arith.extui %0 : i1 to i32
    %c0_i32_0 = arith.constant 0 : i32
    %2 = arith.cmpi ne, %1, %c0_i32_0 : i32
    scf.if %2 {
      %cst_9 = arith.constant 0.000000e+00 : f32
      %12 = vector.broadcast %cst_9 : f32 to vector<8x512xf32>
      %c0_10 = arith.constant 0 : index
      %c0_11 = arith.constant 0 : index
      %13 = vector.load %arg9[%c0_10, %c0_11] : memref<8x512xf32, #tpu.memory_space<vmem>>, vector<8x512xf32>
      tpu.vector_store %arg9[%c0_10, %c0_11], %12 {strides = array<i32>} : memref<8x512xf32, #tpu.memory_space<vmem>>, vector<8x512xf32>,
    } else {
    }
    %c0 = arith.constant 0 : index
    %c0_1 = arith.constant 0 : index
    %3 = vector.load %arg9[%c0, %c0_1] : memref<8x512xf32, #tpu.memory_space<vmem>>, vector<8x512xf32>
    %c0_2 = arith.constant 0 : index
    %c0_3 = arith.constant 0 : index
    %4 = vector.load %arg1[%c0_2, %c0_3] : memref<8x4352xf32, #tpu.memory_space<vmem>>, vector<8x4352xf32>
    %c0_4 = arith.constant 0 : index
    %c0_5 = arith.constant 0 : index
    %5 = vector.load %arg2[%c0_4, %c0_5] : memref<4352x512xf32, #tpu.memory_space<vmem>>, vector<4352x512xf32>
    %cst = arith.constant dense<0.000000e+00> : vector<8x512xf32>
    %6 = tpu.matmul %4, %5, %cst {dimension_numbers = #tpu.dot_dimension_numbers<[1], [0], [0], [1], [0, 0, 1, 1], [], []>} : vector<8x4352xf32>, vector<4352x512xf32>, vector<8x512xf32> -> vector<8x512xf32>
    %7 = arith.addf %3, %6 : vector<8x512xf32>
    %c0_6 = arith.constant 0 : index
    %c0_7 = arith.constant 0 : index
    %8 = vector.load %arg9[%c0_6, %c0_7] : memref<8x512xf32, #tpu.memory_space<vmem>>, vector<8x512xf32>
    tpu.vector_store %arg9[%c0_6, %c0_7], %7 {strides = array<i32>} : memref<8x512xf32, #tpu.memory_space<vmem>>, vector<8x512xf32>,
    %c3_i32 = arith.constant 3 : i32
    %9 = arith.cmpi eq, %arg0, %c3_i32 : i32
    %10 = arith.extui %9 : i1 to i32
    %c0_i32_8 = arith.constant 0 : i32
    %11 = arith.cmpi ne, %10, %c0_i32_8 : i32
    scf.if %11 {
      %c0_9 = arith.constant 0 : index
      %c0_10 = arith.constant 0 : index
      %12 = vector.load %arg9[%c0_9, %c0_10] : memref<8x512xf32, #tpu.memory_space<vmem>>, vector<8x512xf32>
      %c0_11 = arith.constant 0 : index
      %c0_12 = arith.constant 0 : index
      %13 = vector.load %arg3[%c0_11, %c0_12] : memref<1x512xf32, #tpu.memory_space<vmem>>, vector<1x512xf32>
      %14 = vector.broadcast %13 : vector<1x512xf32> to vector<8x512xf32>
      %15 = arith.addf %12, %14 : vector<8x512xf32>
      %cst_13 = arith.constant 0.000000e+00 : f32
      %16 = vector.broadcast %cst_13 : f32 to vector<8x512xf32>
      %17 = arith.maximumf %15, %16 : vector<8x512xf32>
      %c0_14 = arith.constant 0 : index
      %c0_15 = arith.constant 0 : index
      %18 = vector.load %arg4[%c0_14, %c0_15] : memref<512x128xf32, #tpu.memory_space<vmem>>, vector<512x128xf32>
      %cst_16 = arith.constant dense<0.000000e+00> : vector<8x128xf32>
      %19 = tpu.matmul %17, %18, %cst_16 {dimension_numbers = #tpu.dot_dimension_numbers<[1], [0], [0], [1], [0, 0, 1, 1], [], []>} : vector<8x512xf32>, vector<512x128xf32>, vector<8x128xf32> -> vector<8x128xf32>
      %c0_17 = arith.constant 0 : index
      %c0_18 = arith.constant 0 : index
      %20 = vector.load %arg5[%c0_17, %c0_18] : memref<1x128xf32, #tpu.memory_space<vmem>>, vector<1x128xf32>
      %21 = vector.broadcast %20 : vector<1x128xf32> to vector<8x128xf32>
      %22 = arith.addf %19, %21 : vector<8x128xf32>
      %cst_19 = arith.constant 0.000000e+00 : f32
      %23 = vector.broadcast %cst_19 : f32 to vector<8x128xf32>
      %24 = arith.maximumf %22, %23 : vector<8x128xf32>
      %c0_20 = arith.constant 0 : index
      %c0_21 = arith.constant 0 : index
      %25 = vector.load %arg6[%c0_20, %c0_21] : memref<128x128xf32, #tpu.memory_space<vmem>>, vector<128x128xf32>
      %cst_22 = arith.constant dense<0.000000e+00> : vector<8x128xf32>
      %26 = tpu.matmul %24, %25, %cst_22 {dimension_numbers = #tpu.dot_dimension_numbers<[1], [0], [0], [1], [0, 0, 1, 1], [], []>} : vector<8x128xf32>, vector<128x128xf32>, vector<8x128xf32> -> vector<8x128xf32>
      %c0_23 = arith.constant 0 : index
      %c0_24 = arith.constant 0 : index
      %27 = vector.load %arg7[%c0_23, %c0_24] : memref<1x128xf32, #tpu.memory_space<vmem>>, vector<1x128xf32>
      %28 = vector.broadcast %27 : vector<1x128xf32> to vector<8x128xf32>
      %29 = arith.addf %26, %28 : vector<8x128xf32>
      %c0_25 = arith.constant 0 : index
      %c0_26 = arith.constant 0 : index
      %30 = vector.load %arg8[%c0_25, %c0_26] : memref<8x128xf32, #tpu.memory_space<vmem>>, vector<8x128xf32>
      tpu.vector_store %arg8[%c0_25, %c0_26], %29 {strides = array<i32>} : memref<8x128xf32, #tpu.memory_space<vmem>>, vector<8x128xf32>,
    } else {
    }
    return
  }
  func.func @transform_0(%arg0: i32) -> (i32, i32) {
    %c0_i32 = arith.constant 0 : i32
    %c0_i32_0 = arith.constant 0 : i32
    return %c0_i32, %arg0 : i32, i32
  }
  func.func @transform_1(%arg0: i32) -> (i32, i32) {
    %c0_i32 = arith.constant 0 : i32
    %c0_i32_0 = arith.constant 0 : i32
    return %arg0, %c0_i32 : i32, i32
  }
  func.func @transform_2(%arg0: i32) -> (i32, i32) {
    %c0_i32 = arith.constant 0 : i32
    %c0_i32_0 = arith.constant 0 : i32
    %c0_i32_1 = arith.constant 0 : i32
    return %c0_i32, %c0_i32_0 : i32, i32
  }
  func.func @transform_3(%arg0: i32) -> (i32, i32) {
    %c0_i32 = arith.constant 0 : i32
    %c0_i32_0 = arith.constant 0 : i32
    %c0_i32_1 = arith.constant 0 : i32
    return %c0_i32, %c0_i32_0 : i32, i32
  }
  func.func @transform_4(%arg0: i32) -> (i32, i32) {
    %c0_i32 = arith.constant 0 : i32
    %c0_i32_0 = arith.constant 0 : i32
    %c0_i32_1 = arith.constant 0 : i32
    return %c0_i32, %c0_i32_0 : i32, i32
  }
  func.func @transform_5(%arg0: i32) -> (i32, i32) {
    %c0_i32 = arith.constant 0 : i32
    %c0_i32_0 = arith.constant 0 : i32
    %c0_i32_1 = arith.constant 0 : i32
    return %c0_i32, %c0_i32_0 : i32, i32
  }
  func.func @transform_6(%arg0: i32) -> (i32, i32) {
    %c0_i32 = arith.constant 0 : i32
    %c0_i32_0 = arith.constant 0 : i32
    %c0_i32_1 = arith.constant 0 : i32
    return %c0_i32, %c0_i32_0 : i32, i32
  }
  func.func @transform_7(%arg0: i32) -> (i32, i32) {
    %c0_i32 = arith.constant 0 : i32
    %c0_i32_0 = arith.constant 0 : i32
    %c0_i32_1 = arith.constant 0 : i32
    return %c0_i32, %c0_i32_0 : i32, i32
  }
}

</mosaic_0001>

<bundles_post_ra>
// kernel: identity_forward.2
= control target key start
LH: loop header
LB: loop body
LE: loop exit
PB: predicated region body
PF: predicated region fallthrough
CT: control target
= control target key end

     0   :  { %9 = vsyncpa [#allocation4], 0  ;;  %s3269_s12 = smov [#allocation3]   ;;  %s3921_s0 = inlined_call_operand.<no memory space> [shape: f32[1,1], index: 0, kind: input, shape index: {}]   ;;  %s3922_s1 = inlined_call_operand.vmem [shape: f32[24,2048], index: 1, kind: input, shape index: {}]   ;;  %s3923_s2 = inlined_call_operand.hbm [shape: f32[512,256], index: 2, kind: input, shape index: {}]   ;;  %s3924_s3 = inlined_call_operand.vmem [shape: f32[24,1792], index: 3, kind: output, shape index: {}]  }
   0x1   :  { %s19_s13 = sshll.u32 %s3269_s12, 4  ;;  %s3245_s16 = scalar_lea.hbm %s3923_s2, 16384  ;;  %s20_s13 = int_to_ptr.vmem [resolvable:$true] %s19_s13 }
   0x2   :  { %p3246_p0 = scmp.ne.s32.totalorder %s3923_s2, %s3245_s16  ;;  %p3249_p1 = scmp.lt.u32.totalorder %s3245_s16, %s3923_s2 }
   0x4   :  { %p3251_p2 = pnand %p3249_p1, %p3246_p0 }
   0x6   :  { %3254 = shalt.err (!%p3251_p2)
}
   0x7   :  { %s3255_s21 = scalar_lea.vmem %s20_s13, 16384  ;;  %p3260_p4 = scmp.lt.s32.totalorder %s20_s13, %s20_s13 }
   0x8   :  { %p3256_p3 = scmp.ne.s32.totalorder %s20_s13, %s3255_s21  ;;  %p3261_p5 = scmp.lt.s32.totalorder %s3255_s21, %s3255_s21 }
   0xa   :  { %p3262_p6 = por %p3261_p5, %p3260_p4 }
   0xc   :  { %p3263_p7 = pnand %p3262_p6, %p3256_p3 }
   0xe   :  { %3266 = shalt.err (!%p3263_p7)
}
   0xf   :  { %s3270_s22 = smov 256   ;;  %s3271_s23 = smov 16  }
  0x10   :  { %25 = dma.hbm_to_vmem [thread:$0]  %s3923_s2, 16384, %s20_s13, [#allocation4], %s3270_s22, %s3270_s22, %s3271_s23  }
  0x11   :  { %3267 = dma.done.wait [#allocation4], 16384  }
  0x12   :  { %3268 = vsyncadd [#allocation4], 4294950912  ;;  %v43_v0 = vld [vmem:[#allocation3 + $0x8] sm:$0xff]  ;;  %v45_v1 = vld [vmem:[#allocation3 + $0x18] sm:$0xff] }
  0x13   :  { %v107_v2 = vld [vmem:[#allocation3 + $0x208] sm:$0xff]  ;;  %v3304_v3 = vpack.c.bf16 %v45_v1, %v43_v0  ;;  %v109_v4 = vld [vmem:[#allocation3 + $0x218] sm:$0xff]  ;;  %v42_v5 = vld [vmem:[#allocation3] sm:$0xff] }
  0x14   :  { %v44_v6 = vld [vmem:[#allocation3 + $0x10] sm:$0xff]  ;;  %v2326_v7 = vpack.c.bf16 %v109_v4, %v107_v2  ;;  %v106_v9 = vld [vmem:[#allocation3 + $0x200] sm:$0xff]  ;;  %v47_v11 = vld [vmem:[#allocation3 + $0x28] sm:$0xff] }
  0x15   :  { %v3306_v8 = vpack.c.bf16 %v44_v6, %v42_v5  ;;  %v108_v10 = vld [vmem:[#allocation3 + $0x210] sm:$0xff]  ;;  %2263 = vmatprep.subr.bf16.mxu1 %v3304_v3  ;;  %v49_v13 = vld [vmem:[#allocation3 + $0x38] sm:$0xff]  ;;  %v111_v14 = vld [vmem:[#allocation3 + $0x228] sm:$0xff] }
  0x16   :  { %v2328_v12 = vpack.c.bf16 %v108_v10, %v106_v9  ;;  %v113_v15 = vld [vmem:[#allocation3 + $0x238] sm:$0xff]  ;;  %2327 = vmatprep.subr.bf16.mxu0 %v2326_v7  ;;  %v3310_v16 = vpack.c.bf16 %v49_v13, %v47_v11  ;;  %v46_v18 = vld [vmem:[#allocation3 + $0x20] sm:$0xff]  ;;  %v48_v19 = vld [vmem:[#allocation3 + $0x30] sm:$0xff] }
  0x17   :  { %2265 = vmatpush1.bf16.msra.mxu1 %v3306_v8  ;;  %v2330_v17 = vpack.c.bf16 %v113_v15, %v111_v14  ;;  %v110_v20 = vld [vmem:[#allocation3 + $0x220] sm:$0xff]  ;;  %v3312_v21 = vpack.c.bf16 %v48_v19, %v46_v18  ;;  %v112_v22 = vld [vmem:[#allocation3 + $0x230] sm:$0xff]  ;;  %v51_v23 = vld [vmem:[#allocation3 + $0x48] sm:$0xff] }
  0x18   :  { %2329 = vmatpush1.bf16.msra.mxu0 %v2328_v12  ;;  %v53_v24 = vld [vmem:[#allocation3 + $0x58] sm:$0xff]  ;;  %2267 = vmatprep.subr.bf16.mxu1 %v3310_v16  ;;  %v2332_v25 = vpack.c.bf16 %v112_v22, %v110_v20  ;;  %v115_v27 = vld [vmem:[#allocation3 + $0x248] sm:$0xff]  ;;  %v50_v29 = vld [vmem:[#allocation3 + $0x40] sm:$0xff] }
  0x19   :  { %2331 = vmatprep.subr.bf16.mxu0 %v2330_v17  ;;  %v3315_v26 = vpack.c.bf16 %v53_v24, %v51_v23  ;;  %v117_v28 = vld [vmem:[#allocation3 + $0x258] sm:$0xff]  ;;  %v52_v31 = vld [vmem:[#allocation3 + $0x50] sm:$0xff]  ;;  %v114_v32 = vld [vmem:[#allocation3 + $0x240] sm:$0xff] }
  0x1a   :  { %v2334_v30 = vpack.c.bf16 %v117_v28, %v115_v27  ;;  %v116_v33 = vld [vmem:[#allocation3 + $0x250] sm:$0xff]  ;;  %v3318_v34 = vpack.c.bf16 %v52_v31, %v50_v29  ;;  %v55_v35 = vld [vmem:[#allocation3 + $0x68] sm:$0xff]  ;;  %v57_v36 = vld [vmem:[#allocation3 + $0x78] sm:$0xff] }
  0x1b   :  { %2269 = vmatpush1.bf16.msra.mxu1 %v3312_v21  ;;  %v119_v37 = vld [vmem:[#allocation3 + $0x268] sm:$0xff]  ;;  %v2336_v38 = vpack.c.bf16 %v116_v33, %v114_v32  ;;  %v3321_v39 = vpack.c.bf16 %v57_v36, %v55_v35  ;;  %v121_v40 = vld [vmem:[#allocation3 + $0x278] sm:$0xff]  ;;  %v54_v41 = vld [vmem:[#allocation3 + $0x60] sm:$0xff] }
  0x1c   :  { %2333 = vmatpush1.bf16.msra.mxu0 %v2332_v25  ;;  %2271 = vmatprep.subr.bf16.mxu1 %v3315_v26  ;;  %v56_v42 = vld [vmem:[#allocation3 + $0x70] sm:$0xff]  ;;  %v2338_v43 = vpack.c.bf16 %v121_v40, %v119_v37  ;;  %v118_v44 = vld [vmem:[#allocation3 + $0x260] sm:$0xff]  ;;  %v59_v46 = vld [vmem:[#allocation3 + $0x88] sm:$0xff] }
  0x1d   :  { %2335 = vmatprep.subr.bf16.mxu0 %v2334_v30  ;;  %v120_v45 = vld [vmem:[#allocation3 + $0x270] sm:$0xff]  ;;  %v61_v47 = vld [vmem:[#allocation3 + $0x98] sm:$0xff]  ;;  %v123_v48 = vld [vmem:[#allocation3 + $0x288] sm:$0xff]  ;;  %v3324_v50 = vpack.c.bf16 %v56_v42, %v54_v41 }
  0x1e   :  { %v125_v49 = vld [vmem:[#allocation3 + $0x298] sm:$0xff]  ;;  %v2340_v51 = vpack.c.bf16 %v120_v45, %v118_v44  ;;  %v3327_v52 = vpack.c.bf16 %v61_v47, %v59_v46  ;;  %v58_v53 = vld [vmem:[#allocation3 + $0x80] sm:$0xff]  ;;  %v60_v54 = vld [vmem:[#allocation3 + $0x90] sm:$0xff] }
  0x1f   :  { %2273 = vmatpush1.bf16.msra.mxu1 %v3318_v34  ;;  %v122_v55 = vld [vmem:[#allocation3 + $0x280] sm:$0xff]  ;;  %v2342_v56 = vpack.c.bf16 %v125_v49, %v123_v48  ;;  %v124_v57 = vld [vmem:[#allocation3 + $0x290] sm:$0xff]  ;;  %v63_v58 = vld [vmem:[#allocation3 + $0xa8] sm:$0xff]  ;;  %v3330_v62 = vpack.c.bf16 %v60_v54, %v58_v53 }
  0x20   :  { %2337 = vmatpush1.bf16.msra.mxu0 %v2336_v38  ;;  %2275 = vmatprep.subr.bf16.mxu1 %v3321_v39  ;;  %v65_v59 = vld [vmem:[#allocation3 + $0xb8] sm:$0xff]  ;;  %v127_v60 = vld [vmem:[#allocation3 + $0x2a8] sm:$0xff]  ;;  %v2344_v63 = vpack.c.bf16 %v124_v57, %v122_v55  ;;  %v62_v1 = vld [vmem:[#allocation3 + $0xa0] sm:$0xff] }
  0x21   :  { %2339 = vmatprep.subr.bf16.mxu0 %v2338_v43  ;;  %v129_v61 = vld [vmem:[#allocation3 + $0x2b8] sm:$0xff]  ;;  %v3333_v0 = vpack.c.bf16 %v65_v59, %v63_v58  ;;  %v64_v2 = vld [vmem:[#allocation3 + $0xb0] sm:$0xff]  ;;  %v126_v4 = vld [vmem:[#allocation3 + $0x2a0] sm:$0xff] }
  0x22   :  { %v2346_v5 = vpack.c.bf16 %v129_v61, %v127_v60  ;;  %v128_v6 = vld [vmem:[#allocation3 + $0x2b0] sm:$0xff]  ;;  %v67_v7 = vld [vmem:[#allocation3 + $0xc8] sm:$0xff]  ;;  %v69_v9 = vld [vmem:[#allocation3 + $0xd8] sm:$0xff]  ;;  %v3336_v12 = vpack.c.bf16 %v64_v2, %v62_v1 }
  0x23   :  { %2277 = vmatpush1.bf16.msra.mxu1 %v3324_v50  ;;  %v131_v10 = vld [vmem:[#allocation3 + $0x2c8] sm:$0xff]  ;;  %v133_v11 = vld [vmem:[#allocation3 + $0x2d8] sm:$0xff]  ;;  %v2348_v13 = vpack.c.bf16 %v128_v6, %v126_v4  ;;  %v3339_v14 = vpack.c.bf16 %v69_v9, %v67_v7  ;;  %v66_v15 = vld [vmem:[#allocation3 + $0xc0] sm:$0xff] }
  0x24   :  { %2341 = vmatpush1.bf16.msra.mxu0 %v2340_v51  ;;  %2279 = vmatprep.subr.bf16.mxu1 %v3327_v52  ;;  %v68_v17 = vld [vmem:[#allocation3 + $0xd0] sm:$0xff]  ;;  %v130_v18 = vld [vmem:[#allocation3 + $0x2c0] sm:$0xff]  ;;  %v2350_v19 = vpack.c.bf16 %v133_v11, %v131_v10  ;;  %v71_v22 = vld [vmem:[#allocation3 + $0xe8] sm:$0xff] }
  0x25   :  { %2343 = vmatprep.subr.bf16.mxu0 %v2342_v56  ;;  %v132_v20 = vld [vmem:[#allocation3 + $0x2d0] sm:$0xff]  ;;  %v73_v23 = vld [vmem:[#allocation3 + $0xf8] sm:$0xff]  ;;  %v135_v24 = vld [vmem:[#allocation3 + $0x2e8] sm:$0xff]  ;;  %v3342_v27 = vpack.c.bf16 %v68_v17, %v66_v15 }
  0x26   :  { %v137_v25 = vld [vmem:[#allocation3 + $0x2f8] sm:$0xff]  ;;  %v2352_v28 = vpack.c.bf16 %v132_v20, %v130_v18  ;;  %v3345_v29 = vpack.c.bf16 %v73_v23, %v71_v22  ;;  %v70_v30 = vld [vmem:[#allocation3 + $0xe0] sm:$0xff]  ;;  %v72_v31 = vld [vmem:[#allocation3 + $0xf0] sm:$0xff] }
  0x27   :  { %2281 = vmatpush1.bf16.msra.mxu1 %v3330_v62  ;;  %v134_v32 = vld [vmem:[#allocation3 + $0x2e0] sm:$0xff]  ;;  %v2354_v33 = vpack.c.bf16 %v137_v25, %v135_v24  ;;  %v136_v35 = vld [vmem:[#allocation3 + $0x2f0] sm:$0xff]  ;;  %v75_v36 = vld [vmem:[#allocation3 + $0x108] sm:$0xff]  ;;  %v3348_v41 = vpack.c.bf16 %v72_v31, %v70_v30 }
  0x28   :  { %2345 = vmatpush1.bf16.msra.mxu0 %v2344_v63  ;;  %2283 = vmatprep.subr.bf16.mxu1 %v3333_v0  ;;  %v77_v37 = vld [vmem:[#allocation3 + $0x118] sm:$0xff]  ;;  %v139_v38 = vld [vmem:[#allocation3 + $0x308] sm:$0xff]  ;;  %v2356_v42 = vpack.c.bf16 %v136_v35, %v134_v32  ;;  %v74_v44 = vld [vmem:[#allocation3 + $0x100] sm:$0xff] }
  0x29   :  { %2347 = vmatprep.subr.bf16.mxu0 %v2346_v5  ;;  %v141_v40 = vld [vmem:[#allocation3 + $0x318] sm:$0xff]  ;;  %v3351_v43 = vpack.c.bf16 %v77_v37, %v75_v36  ;;  %v76_v45 = vld [vmem:[#allocation3 + $0x110] sm:$0xff]  ;;  %v138_v46 = vld [vmem:[#allocation3 + $0x300] sm:$0xff] }
  0x2a   :  { %v2358_v47 = vpack.c.bf16 %v141_v40, %v139_v38  ;;  %v140_v48 = vld [vmem:[#allocation3 + $0x310] sm:$0xff]  ;;  %v79_v49 = vld [vmem:[#allocation3 + $0x128] sm:$0xff]  ;;  %v81_v51 = vld [vmem:[#allocation3 + $0x138] sm:$0xff]  ;;  %v3354_v55 = vpack.c.bf16 %v76_v45, %v74_v44 }
  0x2b   :  { %2285 = vmatpush1.bf16.msra.mxu1 %v3336_v12  ;;  %v143_v53 = vld [vmem:[#allocation3 + $0x328] sm:$0xff]  ;;  %v145_v54 = vld [vmem:[#allocation3 + $0x338] sm:$0xff]  ;;  %v2360_v56 = vpack.c.bf16 %v140_v48, %v138_v46  ;;  %v3357_v57 = vpack.c.bf16 %v81_v51, %v79_v49  ;;  %v78_v58 = vld [vmem:[#allocation3 + $0x120] sm:$0xff] }
  0x2c   :  { %2349 = vmatpush1.bf16.msra.mxu0 %v2348_v13  ;;  %2287 = vmatprep.subr.bf16.mxu1 %v3339_v14  ;;  %v80_v59 = vld [vmem:[#allocation3 + $0x130] sm:$0xff]  ;;  %v142_v60 = vld [vmem:[#allocation3 + $0x320] sm:$0xff]  ;;  %v2362_v61 = vpack.c.bf16 %v145_v54, %v143_v53  ;;  %v83_v1 = vld [vmem:[#allocation3 + $0x148] sm:$0xff] }
  0x2d   :  { %2351 = vmatprep.subr.bf16.mxu0 %v2350_v19  ;;  %v144_v63 = vld [vmem:[#allocation3 + $0x330] sm:$0xff]  ;;  %v85_v2 = vld [vmem:[#allocation3 + $0x158] sm:$0xff]  ;;  %v147_v4 = vld [vmem:[#allocation3 + $0x348] sm:$0xff]  ;;  %v3360_v6 = vpack.c.bf16 %v80_v59, %v78_v58 }
  0x2e   :  { %v149_v5 = vld [vmem:[#allocation3 + $0x358] sm:$0xff]  ;;  %v2364_v7 = vpack.c.bf16 %v144_v63, %v142_v60  ;;  %v3363_v9 = vpack.c.bf16 %v85_v2, %v83_v1  ;;  %v82_v10 = vld [vmem:[#allocation3 + $0x140] sm:$0xff]  ;;  %v84_v11 = vld [vmem:[#allocation3 + $0x150] sm:$0xff] }
  0x2f   :  { %2289 = vmatpush1.bf16.msra.mxu1 %v3342_v27  ;;  %v146_v13 = vld [vmem:[#allocation3 + $0x340] sm:$0xff]  ;;  %v2366_v15 = vpack.c.bf16 %v149_v5, %v147_v4  ;;  %v148_v17 = vld [vmem:[#allocation3 + $0x350] sm:$0xff]  ;;  %v87_v18 = vld [vmem:[#allocation3 + $0x168] sm:$0xff]  ;;  %v3366_v23 = vpack.c.bf16 %v84_v11, %v82_v10 }
  0x30   :  { %2353 = vmatpush1.bf16.msra.mxu0 %v2352_v28  ;;  %2291 = vmatprep.subr.bf16.mxu1 %v3345_v29  ;;  %v89_v19 = vld [vmem:[#allocation3 + $0x178] sm:$0xff]  ;;  %v151_v20 = vld [vmem:[#allocation3 + $0x368] sm:$0xff]  ;;  %v86_v24 = vld [vmem:[#allocation3 + $0x160] sm:$0xff]  ;;  %v2368_v25 = vpack.c.bf16 %v148_v17, %v146_v13 }
  0x31   :  { %2355 = vmatprep.subr.bf16.mxu0 %v2354_v33  ;;  %v153_v22 = vld [vmem:[#allocation3 + $0x378] sm:$0xff]  ;;  %v3369_v28 = vpack.c.bf16 %v89_v19, %v87_v18  ;;  %v88_v30 = vld [vmem:[#allocation3 + $0x170] sm:$0xff]  ;;  %v150_v31 = vld [vmem:[#allocation3 + $0x360] sm:$0xff] }
  0x32   :  { %v152_v32 = vld [vmem:[#allocation3 + $0x370] sm:$0xff]  ;;  %v2370_v33 = vpack.c.bf16 %v153_v22, %v151_v20  ;;  %v91_v35 = vld [vmem:[#allocation3 + $0x188] sm:$0xff]  ;;  %v93_v36 = vld [vmem:[#allocation3 + $0x198] sm:$0xff]  ;;  %v3380_v44 = vpack.c.bf16 %v88_v30, %v86_v24 }
  0x33   :  { %2293 = vmatpush1.bf16.msra.mxu1 %v3348_v41  ;;  %v31_v37 = vld [vmem:[%s3922_s1 + $0x8] sm:$0xff]  ;;  %v157_v40 = vld [vmem:[#allocation3 + $0x398] sm:$0xff]  ;;  %v2372_v45 = vpack.c.bf16 %v152_v32, %v150_v31  ;;  %v3384_v46 = vpack.c.bf16 %v93_v36, %v91_v35  ;;  %v92_v48 = vld [vmem:[#allocation3 + $0x190] sm:$0xff] }
  0x34   :  { %2357 = vmatpush1.bf16.msra.mxu0 %v2356_v42  ;;  %2295 = vmatprep.subr.bf16.mxu1 %v3351_v43  ;;  %v155_v38 = vld [vmem:[#allocation3 + $0x388] sm:$0xff]  ;;  %v3377_v42 = vld [vmem:[%s3922_s1 + $0x18] sm:$0xff]  ;;  %v154_v49 = vld [vmem:[#allocation3 + $0x380] sm:$0xff] }
  0x35   :  { %2359 = vmatprep.subr.bf16.mxu0 %v2358_v47  ;;  %235 = vmatprep.mubr.f32.mxu1 %v31_v37  ;;  %v90_v47 = vld [vmem:[#allocation3 + $0x180] sm:$0xff]  ;;  %v2374_v51 = vpack.c.bf16 %v157_v40, %v155_v38  ;;  %v156_v53 = vld [vmem:[#allocation3 + $0x390] sm:$0xff]  ;;  %v95_v54 = vld [vmem:[#allocation3 + $0x1a8] sm:$0xff] }
  0x36   :  { %318 = vmatprep.mubr.f32.mxu0 %v3377_v42  ;;  %v159_v58 = vld [vmem:[#allocation3 + $0x3a8] sm:$0xff]  ;;  %v161_v59 = vld [vmem:[#allocation3 + $0x3b8] sm:$0xff]  ;;  %v3387_v60 = vpack.c.bf16 %v92_v48, %v90_v47  ;;  %v94_v1 = vld [vmem:[#allocation3 + $0x1a0] sm:$0xff] }
  0x37   :  { %2297 = vmatpush1.bf16.msra.mxu1 %v3354_v55  ;;  %v96_v2 = vld [vmem:[#allocation3 + $0x1b0] sm:$0xff]  ;;  %v158_v4 = vld [vmem:[#allocation3 + $0x3a0] sm:$0xff]  ;;  %v2378_v5 = vpack.c.bf16 %v161_v59, %v159_v58  ;;  %v99_v10 = vld [vmem:[#allocation3 + $0x1c8] sm:$0xff] }
  0x38   :  { %2361 = vmatpush1.bf16.msra.mxu0 %v2360_v56  ;;  %2299 = vmatprep.subr.bf16.mxu1 %v3357_v57  ;;  %v97_v56 = vld [vmem:[#allocation3 + $0x1b8] sm:$0xff]  ;;  %v163_v13 = vld [vmem:[#allocation3 + $0x3c8] sm:$0xff]  ;;  %v3393_v17 = vpack.c.bf16 %v96_v2, %v94_v1  ;;  %v98_v20 = vld [vmem:[#allocation3 + $0x1c0] sm:$0xff] }
  0x39   :  { %2363 = vmatprep.subr.bf16.mxu0 %v2362_v61  ;;  %v2376_v61 = vpack.c.bf16 %v156_v53, %v154_v49  ;;  %v3390_v63 = vpack.c.bf16 %v97_v56, %v95_v54  ;;  %v101_v11 = vld [vmem:[#allocation3 + $0x1d8] sm:$0xff]  ;;  %v100_v22 = vld [vmem:[#allocation3 + $0x1d0] sm:$0xff]  ;;  %v162_v24 = vld [vmem:[#allocation3 + $0x3c0] sm:$0xff] }
  0x3a   :  { %v3396_v19 = vpack.c.bf16 %v101_v11, %v99_v10  ;;  %v164_v30 = vld [vmem:[#allocation3 + $0x3d0] sm:$0xff]  ;;  %v103_v31 = vld [vmem:[#allocation3 + $0x1e8] sm:$0xff]  ;;  %v105_v32 = vld [vmem:[#allocation3 + $0x1f8] sm:$0xff]  ;;  %v3399_v36 = vpack.c.bf16 %v100_v22, %v98_v20 }
  0x3b   :  { %2301 = vmatpush1.bf16.msra.mxu1 %v3360_v6  ;;  %v169_v35 = vld [vmem:[#allocation3 + $0x3f8] sm:$0xff]  ;;  %v2384_v37 = vpack.c.bf16 %v164_v30, %v162_v24  ;;  %v3402_v38 = vpack.c.bf16 %v105_v32, %v103_v31  ;;  %v102_v40 = vld [vmem:[#allocation3 + $0x1e0] sm:$0xff]  ;;  %v168_v49 = vld [vmem:[#allocation3 + $0x3f0] sm:$0xff] }
  0x3c   :  { %2365 = vmatpush1.bf16.msra.mxu0 %v2364_v7  ;;  %2303 = vmatprep.subr.bf16.mxu1 %v3363_v9  ;;  %v160_v7 = vld [vmem:[#allocation3 + $0x3b0] sm:$0xff]  ;;  %v166_v48 = vld [vmem:[#allocation3 + $0x3e0] sm:$0xff]  ;;  %v35_v58 = vld [vmem:[%s3922_s1 + $0x88] sm:$0xff] }
  0x3d   :  { %2367 = vmatprep.subr.bf16.mxu0 %v2366_v15  ;;  %v165_v15 = vld [vmem:[#allocation3 + $0x3d8] sm:$0xff]  ;;  %v2380_v18 = vpack.c.bf16 %v160_v7, %v158_v4  ;;  %v2388_v53 = vpack.c.bf16 %v168_v49, %v166_v48  ;;  %v30_v54 = vld [vmem:[%s3922_s1] sm:$0xff]  ;;  %v3415_v56 = vld [vmem:[%s3922_s1 + $0x10] sm:$0xff] }
  0x3e   :  { %v34_v59 = vld [vmem:[%s3922_s1 + $0x80] sm:$0xff]  ;;  %v39_v1 = vld [vmem:[%s3922_s1 + $0x108] sm:$0xff]  ;;  %v3459_v2 = vld [vmem:[%s3922_s1 + $0x110] sm:$0xff] }
  0x3f   :  { %2305 = vmatpush1.bf16.msra.mxu1 %v3366_v23  ;;  %v439_v7 = vld [vmem:[#allocation3 + $0x270] sm:$0xff]  ;;  %v3554_v10 = vld [vmem:[%s3922_s1 + $0x120] sm:$0xff]  ;;  %v442_v11 = vld [vmem:[#allocation3 + $0x288] sm:$0xff] }
  0x40   :  { %2369 = vmatpush1.bf16.msra.mxu0 %v2368_v25  ;;  %2307 = vmatprep.subr.bf16.mxu1 %v3369_v28  ;;  %v2382_v25 = vpack.c.bf16 %v165_v15, %v163_v13  ;;  %v444_v13 = vld [vmem:[#allocation3 + $0x298] sm:$0xff]  ;;  %v443_v20 = vld [vmem:[#allocation3 + $0x290] sm:$0xff]  ;;  %v446_v22 = vld [vmem:[#allocation3 + $0x2a8] sm:$0xff] }
  0x41   :  { %2371 = vmatprep.subr.bf16.mxu0 %v2370_v33  ;;  %v167_v33 = vld [vmem:[#allocation3 + $0x3e8] sm:$0xff]  ;;  %v448_v24 = vld [vmem:[#allocation3 + $0x2b8] sm:$0xff]  ;;  %v445_v31 = vld [vmem:[#allocation3 + $0x2a0] sm:$0xff] }
  0x42   :  { %v2386_v47 = vpack.c.bf16 %v169_v35, %v167_v33  ;;  %v2474_v30 = vpack.c.bf16 %v448_v24, %v446_v22  ;;  %v447_v32 = vld [vmem:[#allocation3 + $0x2b0] sm:$0xff]  ;;  %v450_v33 = vld [vmem:[#allocation3 + $0x2c8] sm:$0xff]  ;;  %v452_v35 = vld [vmem:[#allocation3 + $0x2d8] sm:$0xff] }
  0x43   :  { %2309 = vmatpush1.bf16.msra.mxu1 %v3380_v44  ;;  %v481_v22 = vld [vmem:[#allocation3 + $0x3c0] sm:$0xff]  ;;  %v483_v24 = vld [vmem:[#allocation3 + $0x3d0] sm:$0xff] }
  0x44   :  { %2373 = vmatpush1.bf16.msra.mxu0 %v2372_v45  ;;  %2311 = vmatprep.subr.bf16.mxu1 %v3384_v46  ;;  %v104_v45 = vld [vmem:[#allocation3 + $0x1f0] sm:$0xff] }
  0x45   :  { %2375 = vmatprep.subr.bf16.mxu0 %v2374_v51  ;;  %v3405_v51 = vpack.c.bf16 %v104_v45, %v102_v40  ;;  %v451_v40 = vld [vmem:[#allocation3 + $0x2d0] sm:$0xff]  ;;  %v454_v45 = vld [vmem:[#allocation3 + $0x2e8] sm:$0xff] }
  0x47   :  { %2313 = vmatpush1.bf16.msra.mxu1 %v3387_v60 }
  0x48   :  { %2377 = vmatpush1.bf16.msra.mxu0 %v2376_v61  ;;  %2315 = vmatprep.subr.bf16.mxu1 %v3390_v63  ;;  %v3430_v61 = vld [vmem:[%s3922_s1 + $0x98] sm:$0xff] }
  0x49   :  { %2379 = vmatprep.subr.bf16.mxu0 %v2378_v5  ;;  %v437_v5 = vld [vmem:[#allocation3 + $0x260] sm:$0xff] }
  0x4a   :  { %v2468_v15 = vpack.c.bf16 %v439_v7, %v437_v5 }
  0x4b   :  { %2317 = vmatpush1.bf16.msra.mxu1 %v3393_v17 }
  0x4c   :  { %2381 = vmatpush1.bf16.msra.mxu0 %v2380_v18  ;;  %2319 = vmatprep.subr.bf16.mxu1 %v3396_v19  ;;  %v2470_v18 = vpack.c.bf16 %v444_v13, %v442_v11  ;;  %v477_v11 = vld [vmem:[#allocation3 + $0x3a0] sm:$0xff]  ;;  %v479_v13 = vld [vmem:[#allocation3 + $0x3b0] sm:$0xff] }
  0x4d   :  { %2383 = vmatprep.subr.bf16.mxu0 %v2382_v25 }
  0x4f   :  { %2321 = vmatpush1.bf16.msra.mxu1 %v3399_v36 }
  0x50   :  { %2385 = vmatpush1.bf16.msra.mxu0 %v2384_v37  ;;  %2323 = vmatprep.subr.bf16.mxu1 %v3402_v38  ;;  %v2478_v37 = vpack.c.bf16 %v452_v35, %v450_v33  ;;  %v485_v33 = vld [vmem:[#allocation3 + $0x3e0] sm:$0xff]  ;;  %v487_v35 = vld [vmem:[#allocation3 + $0x3f0] sm:$0xff] }
  0x51   :  { %2387 = vmatprep.subr.bf16.mxu0 %v2386_v47  ;;  %v456_v47 = vld [vmem:[#allocation3 + $0x2f8] sm:$0xff] }
  0x52   :  { %v2482_v49 = vpack.c.bf16 %v456_v47, %v454_v45  ;;  %v997_v45 = vld [vmem:[#allocation3] sm:$0xff]  ;;  %v999_v47 = vld [vmem:[#allocation3 + $0x10] sm:$0xff] }
  0x53   :  { %2325 = vmatpush1.bf16.msra.mxu1 %v3405_v51 }
  0x54   :  { %2389 = vmatpush1.bf16.msra.mxu0 %v2388_v53  ;;  %2391 = vmatprep.subr.bf16.mxu1 %v3304_v3  ;;  %v455_v53 = vld [vmem:[#allocation3 + $0x2f0] sm:$0xff] }
  0x55   :  { %2519 = vmatprep.subr.bf16.mxu0 %v3304_v3  ;;  %v3437_v3 = vld [vmem:[%s3922_s1 + $0x90] sm:$0xff] }
  0x56   :  { %236 = vmatmul.mubr.f32.vlgmr.msra.gmra.mrb[0].mxu1 %v30_v54  ;;  %v458_v54 = vld [vmem:[#allocation3 + $0x308] sm:$0xff] }
  0x57   :  { %319 = vmatmul.mubr.f32.vlgmr.msra.gmra.mrb[0].mxu0 %v3415_v56  ;;  %2393 = vmatpush1.bf16.msra.mxu1 %v3306_v8 }
  0x58   :  { %2521 = vmatpush1.bf16.msra.mxu0 %v3306_v8  ;;  %2395 = vmatprep.subr.bf16.mxu1 %v3310_v16  ;;  %v38_v8 = vld [vmem:[%s3922_s1 + $0x100] sm:$0xff] }
  0x59   :  { %2523 = vmatprep.subr.bf16.mxu0 %v3310_v16  ;;  %241 = vmatprep.mubr.f32.mxu1 %v35_v58  ;;  %v3452_v16 = vld [vmem:[%s3922_s1 + $0x118] sm:$0xff] }
  0x5a   :  { %242 = vmatmul.mubr.f32.gmra.mrb[2].mxu1 %v34_v59  ;;  %324 = vmatprep.mubr.f32.mxu0 %v3430_v61 }
  0x5b   :  { %2397 = vmatpush1.bf16.msra.mxu1 %v3312_v21  ;;  %325 = vmatmul.mubr.f32.gmra.mrb[2].mxu0 %v3437_v3 }
  0x5c   :  { %2525 = vmatpush1.bf16.msra.mxu0 %v3312_v21  ;;  %2399 = vmatprep.subr.bf16.mxu1 %v3315_v26  ;;  %v3468_v21 = vld [vmem:[%s3922_s1 + $0x28] sm:$0xff] }
  0x5d   :  { %2527 = vmatprep.subr.bf16.mxu0 %v3315_v26  ;;  %247 = vmatprep.mubr.f32.mxu1 %v39_v1  ;;  %v426_v26 = vld [vmem:[#allocation3 + $0x208] sm:$0xff] }
  0x5e   :  { %248 = vmatmul.mubr.f32.gmra.mrb[4].mxu1 %v38_v8  ;;  %330 = vmatprep.mubr.f32.mxu0 %v3452_v16  ;;  %v462_v1 = vld [vmem:[#allocation3 + $0x328] sm:$0xff]  ;;  %v464_v8 = vld [vmem:[#allocation3 + $0x338] sm:$0xff] }
  0x5f   :  { %2401 = vmatpush1.bf16.msra.mxu1 %v3318_v34  ;;  %331 = vmatmul.mubr.f32.gmra.mrb[4].mxu0 %v3459_v2 }
  0x60   :  { %2529 = vmatpush1.bf16.msra.mxu0 %v3318_v34  ;;  %2403 = vmatprep.subr.bf16.mxu1 %v3321_v39  ;;  %v428_v34 = vld [vmem:[#allocation3 + $0x218] sm:$0xff] }
  0x61   :  { %2531 = vmatprep.subr.bf16.mxu0 %v3321_v39  ;;  %553 = vmatprep.mubr.f32.mxu1 %v3377_v42  ;;  %v2454_v39 = vpack.c.bf16 %v428_v34, %v426_v26  ;;  %v3540_v42 = vld [vmem:[%s3922_s1 + $0xa0] sm:$0xff]  ;;  %v463_v26 = vld [vmem:[#allocation3 + $0x330] sm:$0xff]  ;;  %v466_v34 = vld [vmem:[#allocation3 + $0x348] sm:$0xff] }
  0x62   :  { %871 = vmatprep.mubr.f32.mxu0 %v3468_v21 }
  0x63   :  { %2405 = vmatpush1.bf16.msra.mxu1 %v3324_v50 }
  0x64   :  { %2533 = vmatpush1.bf16.msra.mxu0 %v3324_v50  ;;  %2407 = vmatprep.subr.bf16.mxu1 %v3327_v52  ;;  %v425_v50 = vld [vmem:[#allocation3 + $0x200] sm:$0xff] }
  0x65   :  { %2535 = vmatprep.subr.bf16.mxu0 %v3327_v52  ;;  %v427_v52 = vld [vmem:[#allocation3 + $0x210] sm:$0xff] }
  0x67   :  { %2409 = vmatpush1.bf16.msra.mxu1 %v3330_v62 }
  0x68   :  { %2537 = vmatpush1.bf16.msra.mxu0 %v3330_v62  ;;  %2411 = vmatprep.subr.bf16.mxu1 %v3333_v0  ;;  %v430_v62 = vld [vmem:[#allocation3 + $0x228] sm:$0xff] }
  0x69   :  { %2539 = vmatprep.subr.bf16.mxu0 %v3333_v0  ;;  %v432_v0 = vld [vmem:[#allocation3 + $0x238] sm:$0xff] }
  0x6b   :  { %2413 = vmatpush1.bf16.msra.mxu1 %v3336_v12 }
  0x6c   :  { %2541 = vmatpush1.bf16.msra.mxu0 %v3336_v12  ;;  %2415 = vmatprep.subr.bf16.mxu1 %v3339_v14  ;;  %v2456_v12 = vpack.c.bf16 %v427_v52, %v425_v50 }
  0x6d   :  { %2543 = vmatprep.subr.bf16.mxu0 %v3339_v14  ;;  %v3528_v14 = vld [vmem:[%s3922_s1 + $0x20] sm:$0xff] }
  0x6f   :  { %2417 = vmatpush1.bf16.msra.mxu1 %v3342_v27 }
  0x70   :  { %2545 = vmatpush1.bf16.msra.mxu0 %v3342_v27  ;;  %2419 = vmatprep.subr.bf16.mxu1 %v3345_v29  ;;  %v2458_v27 = vpack.c.bf16 %v432_v0, %v430_v62  ;;  %v465_v62 = vld [vmem:[#allocation3 + $0x340] sm:$0xff]  ;;  %v467_v0 = vld [vmem:[#allocation3 + $0x350] sm:$0xff] }
  0x71   :  { %2547 = vmatprep.subr.bf16.mxu0 %v3345_v29  ;;  %v429_v29 = vld [vmem:[#allocation3 + $0x220] sm:$0xff] }
  0x73   :  { %2421 = vmatpush1.bf16.msra.mxu1 %v3348_v41 }
  0x74   :  { %2549 = vmatpush1.bf16.msra.mxu0 %v3348_v41  ;;  %2423 = vmatprep.subr.bf16.mxu1 %v3351_v43  ;;  %v431_v41 = vld [vmem:[#allocation3 + $0x230] sm:$0xff] }
  0x75   :  { %2551 = vmatprep.subr.bf16.mxu0 %v3351_v43  ;;  %v434_v43 = vld [vmem:[#allocation3 + $0x248] sm:$0xff] }
  0x77   :  { %2425 = vmatpush1.bf16.msra.mxu1 %v3354_v55 }
  0x78   :  { %2553 = vmatpush1.bf16.msra.mxu0 %v3354_v55  ;;  %2427 = vmatprep.subr.bf16.mxu1 %v3357_v57  ;;  %v436_v55 = vld [vmem:[#allocation3 + $0x258] sm:$0xff] }
  0x79   :  { %2555 = vmatprep.subr.bf16.mxu0 %v3357_v57  ;;  %v2460_v57 = vpack.c.bf16 %v431_v41, %v429_v29  ;;  %v2496_v29 = vpack.c.bf16 %v467_v0, %v465_v62  ;;  %v1014_v62 = vld [vmem:[#allocation3 + $0x88] sm:$0xff]  ;;  %v1016_v0 = vld [vmem:[#allocation3 + $0x98] sm:$0xff] }
  0x7b   :  { %2429 = vmatpush1.bf16.msra.mxu1 %v3360_v6 }
  0x7c   :  { %2557 = vmatpush1.bf16.msra.mxu0 %v3360_v6  ;;  %2431 = vmatprep.subr.bf16.mxu1 %v3363_v9  ;;  %v3535_v6 = vld [vmem:[%s3922_s1 + $0xa8] sm:$0xff] }
  0x7d   :  { %2559 = vmatprep.subr.bf16.mxu0 %v3363_v9  ;;  %v2462_v9 = vpack.c.bf16 %v436_v55, %v434_v43  ;;  %v469_v43 = vld [vmem:[#allocation3 + $0x360] sm:$0xff]  ;;  %v471_v55 = vld [vmem:[#allocation3 + $0x370] sm:$0xff] }
  0x7f   :  { %2433 = vmatpush1.bf16.msra.mxu1 %v3366_v23 }
  0x80   :  { %2561 = vmatpush1.bf16.msra.mxu0 %v3366_v23  ;;  %2435 = vmatprep.subr.bf16.mxu1 %v3369_v28  ;;  %v433_v23 = vld [vmem:[#allocation3 + $0x240] sm:$0xff] }
  0x81   :  { %2563 = vmatprep.subr.bf16.mxu0 %v3369_v28  ;;  %v435_v28 = vld [vmem:[#allocation3 + $0x250] sm:$0xff] }
  0x83   :  { %2437 = vmatpush1.bf16.msra.mxu1 %v3380_v44 }
  0x84   :  { %2565 = vmatpush1.bf16.msra.mxu0 %v3380_v44  ;;  %2439 = vmatprep.subr.bf16.mxu1 %v3384_v46  ;;  %v438_v44 = vld [vmem:[#allocation3 + $0x268] sm:$0xff] }
  0x85   :  { %2567 = vmatprep.subr.bf16.mxu0 %v3384_v46  ;;  %v440_v46 = vld [vmem:[#allocation3 + $0x278] sm:$0xff] }
  0x86   :  { %v2466_v4 = vpack.c.bf16 %v440_v46, %v438_v44  ;;  %v473_v44 = vld [vmem:[#allocation3 + $0x380] sm:$0xff]  ;;  %v475_v46 = vld [vmem:[#allocation3 + $0x390] sm:$0xff] }
  0x87   :  { %2441 = vmatpush1.bf16.msra.mxu1 %v3387_v60  ;;  %v2504_v5 = vpack.c.bf16 %v475_v46, %v473_v44  ;;  %v1024_v44 = vld [vmem:[#allocation3 + $0xd8] sm:$0xff] }
  0x88   :  { %2569 = vmatpush1.bf16.msra.mxu0 %v3387_v60  ;;  %2443 = vmatprep.subr.bf16.mxu1 %v3390_v63  ;;  %v2464_v60 = vpack.c.bf16 %v435_v28, %v433_v23  ;;  %v2500_v23 = vpack.c.bf16 %v471_v55, %v469_v43  ;;  %v1018_v43 = vld [vmem:[#allocation3 + $0xa8] sm:$0xff]  ;;  %v1020_v55 = vld [vmem:[#allocation3 + $0xb8] sm:$0xff] }
  0x89   :  { %2571 = vmatprep.subr.bf16.mxu0 %v3390_v63  ;;  %v3549_v63 = vld [vmem:[%s3922_s1 + $0x128] sm:$0xff] }
  0x8b   :  { %2445 = vmatpush1.bf16.msra.mxu1 %v3393_v17 }
  0x8c   :  { %2573 = vmatpush1.bf16.msra.mxu0 %v3393_v17  ;;  %2447 = vmatprep.subr.bf16.mxu1 %v3396_v19  ;;  %v3563_v17 = vld [vmem:[%s3922_s1 + $0x38] sm:$0xff] }
  0x8d   :  { %2575 = vmatprep.subr.bf16.mxu0 %v3396_v19  ;;  %v441_v19 = vld [vmem:[#allocation3 + $0x280] sm:$0xff] }
  0x8e   :  { %v2472_v25 = vpack.c.bf16 %v443_v20, %v441_v19  ;;  %v2508_v19 = vpack.c.bf16 %v479_v13, %v477_v11 }
  0x8f   :  { %2449 = vmatpush1.bf16.msra.mxu1 %v3399_v36 }
  0x90   :  { %2577 = vmatpush1.bf16.msra.mxu0 %v3399_v36  ;;  %2451 = vmatprep.subr.bf16.mxu1 %v3402_v38  ;;  %v2476_v36 = vpack.c.bf16 %v447_v32, %v445_v31  ;;  %v2512_v31 = vpack.c.bf16 %v483_v24, %v481_v22 }
  0x91   :  { %2579 = vmatprep.subr.bf16.mxu0 %v3402_v38  ;;  %v449_v38 = vld [vmem:[#allocation3 + $0x2c0] sm:$0xff] }
  0x92   :  { %v2480_v48 = vpack.c.bf16 %v451_v40, %v449_v38  ;;  %v2516_v38 = vpack.c.bf16 %v487_v35, %v485_v33 }
  0x93   :  { %2453 = vmatpush1.bf16.msra.mxu1 %v3405_v51 }
  0x94   :  { %2581 = vmatpush1.bf16.msra.mxu0 %v3405_v51  ;;  %2455 = vmatprep.subr.bf16.mxu1 %v2454_v39  ;;  %v453_v51 = vld [vmem:[#allocation3 + $0x2e0] sm:$0xff] }
  0x95   :  { %2583 = vmatprep.subr.bf16.mxu0 %v2454_v39  ;;  %v2484_v58 = vpack.c.bf16 %v455_v53, %v453_v51  ;;  %v468_v39 = vld [vmem:[#allocation3 + $0x358] sm:$0xff]  ;;  %v2648_v51 = vpack.c.bf16 %v999_v47, %v997_v45  ;;  %v3570_v53 = vld [vmem:[%s3922_s1 + $0x30] sm:$0xff] }
  0x96   :  { %554 = vmatmul.mubr.f32.vlgmr.msra.gmra.mrb[6].mxu1 %v3415_v56  ;;  %v460_v56 = vld [vmem:[#allocation3 + $0x318] sm:$0xff]  ;;  %v2494_v52 = vpack.c.bf16 %v468_v39, %v466_v34  ;;  %v3597_v39 = vld [vmem:[%s3922_s1 + $0x130] sm:$0xff] }
  0x97   :  { %2457 = vmatpush1.bf16.msra.mxu1 %v2456_v12  ;;  %872 = vmatmul.mubr.f32.vlgmr.msra.gmra.mrb[6].mxu0 %v3528_v14  ;;  %v2486_v59 = vpack.c.bf16 %v460_v56, %v458_v54  ;;  %v1001_v54 = vld [vmem:[#allocation3 + $0x20] sm:$0xff]  ;;  %v1003_v56 = vld [vmem:[#allocation3 + $0x30] sm:$0xff] }
  0x98   :  { %2585 = vmatpush1.bf16.msra.mxu0 %v2456_v12  ;;  %2459 = vmatprep.subr.bf16.mxu1 %v2458_v27  ;;  %v470_v12 = vld [vmem:[#allocation3 + $0x368] sm:$0xff] }
  0x99   :  { %2587 = vmatprep.subr.bf16.mxu0 %v2458_v27  ;;  %559 = vmatprep.mubr.f32.mxu1 %v3430_v61  ;;  %v457_v61 = vld [vmem:[#allocation3 + $0x300] sm:$0xff]  ;;  %v472_v27 = vld [vmem:[#allocation3 + $0x378] sm:$0xff] }
  0x9a   :  { %877 = vmatprep.mubr.f32.mxu0 %v3535_v6  ;;  %560 = vmatmul.mubr.f32.gmra.mrb[8].mxu1 %v3437_v3  ;;  %v459_v3 = vld [vmem:[#allocation3 + $0x310] sm:$0xff]  ;;  %v2498_v41 = vpack.c.bf16 %v472_v27, %v470_v12  ;;  %v3605_v12 = vld [vmem:[%s3922_s1 + $0x48] sm:$0xff]  ;;  %v2662_v27 = vpack.c.bf16 %v1016_v0, %v1014_v62  ;;  %v1049_v62 = vld [vmem:[#allocation3 + $0x1a0] sm:$0xff] }
  0x9b   :  { %2461 = vmatpush1.bf16.msra.mxu1 %v2460_v57  ;;  %878 = vmatmul.mubr.f32.gmra.mrb[8].mxu0 %v3540_v42  ;;  %v1051_v0 = vld [vmem:[#allocation3 + $0x1b0] sm:$0xff] }
  0x9c   :  { %2589 = vmatpush1.bf16.msra.mxu0 %v2460_v57  ;;  %2463 = vmatprep.subr.bf16.mxu1 %v2462_v9  ;;  %v474_v57 = vld [vmem:[#allocation3 + $0x388] sm:$0xff] }
  0x9d   :  { %2591 = vmatprep.subr.bf16.mxu0 %v2462_v9  ;;  %565 = vmatprep.mubr.f32.mxu1 %v3452_v16  ;;  %v2488_v16 = vpack.c.bf16 %v459_v3, %v457_v61  ;;  %v476_v9 = vld [vmem:[#allocation3 + $0x398] sm:$0xff]  ;;  %v1006_v61 = vld [vmem:[#allocation3 + $0x48] sm:$0xff] }
  0x9e   :  { %883 = vmatprep.mubr.f32.mxu0 %v3549_v63  ;;  %566 = vmatmul.mubr.f32.gmra.mrb[10].mxu1 %v3459_v2  ;;  %v2490_v2 = vpack.c.bf16 %v464_v8, %v462_v1  ;;  %v2502_v28 = vpack.c.bf16 %v476_v9, %v474_v57  ;;  %v1008_v3 = vld [vmem:[#allocation3 + $0x58] sm:$0xff]  ;;  %v2652_v1 = vpack.c.bf16 %v1003_v56, %v1001_v54  ;;  %v3583_v8 = vld [vmem:[%s3922_s1 + $0xb0] sm:$0xff]  ;;  %v1017_v9 = vld [vmem:[#allocation3 + $0xa0] sm:$0xff] }
  0x9f   :  { %2465 = vmatpush1.bf16.msra.mxu1 %v2464_v60  ;;  %884 = vmatmul.mubr.f32.gmra.mrb[10].mxu0 %v3554_v10  ;;  %v2666_v57 = vpack.c.bf16 %v1020_v55, %v1018_v43  ;;  %v1044_v54 = vld [vmem:[#allocation3 + $0x178] sm:$0xff]  ;;  %v1053_v43 = vld [vmem:[#allocation3 + $0x1c0] sm:$0xff]  ;;  %v1055_v55 = vld [vmem:[#allocation3 + $0x1d0] sm:$0xff] }
  0xa0   :  { %2593 = vmatpush1.bf16.msra.mxu0 %v2464_v60  ;;  %2467 = vmatprep.subr.bf16.mxu1 %v2466_v4  ;;  %v478_v60 = vld [vmem:[#allocation3 + $0x3a8] sm:$0xff] }
  0xa1   :  { %2595 = vmatprep.subr.bf16.mxu0 %v2466_v4  ;;  %636 = vmatprep.mubr.f32.mxu1 %v3468_v21  ;;  %v461_v21 = vld [vmem:[#allocation3 + $0x320] sm:$0xff]  ;;  %v480_v4 = vld [vmem:[#allocation3 + $0x3b8] sm:$0xff] }
  0xa2   :  { %954 = vmatprep.mubr.f32.mxu0 %v3563_v17  ;;  %v2492_v50 = vpack.c.bf16 %v463_v26, %v461_v21  ;;  %v2506_v7 = vpack.c.bf16 %v480_v4, %v478_v60  ;;  %v1010_v21 = vld [vmem:[#allocation3 + $0x68] sm:$0xff]  ;;  %v1012_v26 = vld [vmem:[#allocation3 + $0x78] sm:$0xff]  ;;  %v1021_v4 = vld [vmem:[#allocation3 + $0xc0] sm:$0xff] }
  0xa3   :  { %2469 = vmatpush1.bf16.msra.mxu1 %v2468_v15 }
  0xa4   :  { %2597 = vmatpush1.bf16.msra.mxu0 %v2468_v15  ;;  %2471 = vmatprep.subr.bf16.mxu1 %v2470_v18  ;;  %v482_v15 = vld [vmem:[#allocation3 + $0x3c8] sm:$0xff] }
  0xa5   :  { %2599 = vmatprep.subr.bf16.mxu0 %v2470_v18  ;;  %v484_v18 = vld [vmem:[#allocation3 + $0x3d8] sm:$0xff] }
  0xa6   :  { %v2510_v20 = vpack.c.bf16 %v484_v18, %v482_v15  ;;  %v1025_v15 = vld [vmem:[#allocation3 + $0xe0] sm:$0xff]  ;;  %v1027_v18 = vld [vmem:[#allocation3 + $0xf0] sm:$0xff] }
  0xa7   :  { %2473 = vmatpush1.bf16.msra.mxu1 %v2472_v25  ;;  %v2676_v22 = vpack.c.bf16 %v1027_v18, %v1025_v15  ;;  %v3612_v18 = vld [vmem:[%s3922_s1 + $0x40] sm:$0xff] }
  0xa8   :  { %2601 = vmatpush1.bf16.msra.mxu0 %v2472_v25  ;;  %2475 = vmatprep.subr.bf16.mxu1 %v2474_v30  ;;  %v486_v25 = vld [vmem:[#allocation3 + $0x3e8] sm:$0xff] }
  0xa9   :  { %2603 = vmatprep.subr.bf16.mxu0 %v2474_v30  ;;  %v488_v30 = vld [vmem:[#allocation3 + $0x3f8] sm:$0xff] }
  0xaa   :  { %v2514_v32 = vpack.c.bf16 %v488_v30, %v486_v25  ;;  %v1029_v25 = vld [vmem:[#allocation3 + $0x100] sm:$0xff]  ;;  %v1031_v30 = vld [vmem:[#allocation3 + $0x110] sm:$0xff] }
  0xab   :  { %2477 = vmatpush1.bf16.msra.mxu1 %v2476_v36  ;;  %v2680_v33 = vpack.c.bf16 %v1031_v30, %v1029_v25  ;;  %v1072_v25 = vld [vmem:[#allocation3 + $0x258] sm:$0xff] }
  0xac   :  { %2605 = vmatpush1.bf16.msra.mxu0 %v2476_v36  ;;  %2479 = vmatprep.subr.bf16.mxu1 %v2478_v37  ;;  %v998_v36 = vld [vmem:[#allocation3 + $0x8] sm:$0xff] }
  0xad   :  { %2607 = vmatprep.subr.bf16.mxu0 %v2478_v37  ;;  %v1000_v37 = vld [vmem:[#allocation3 + $0x18] sm:$0xff] }
  0xae   :  { %v2646_v40 = vpack.c.bf16 %v1000_v37, %v998_v36  ;;  %v1033_v36 = vld [vmem:[#allocation3 + $0x120] sm:$0xff]  ;;  %v1035_v37 = vld [vmem:[#allocation3 + $0x130] sm:$0xff] }
  0xaf   :  { %2481 = vmatpush1.bf16.msra.mxu1 %v2480_v48  ;;  %v2684_v45 = vpack.c.bf16 %v1035_v37, %v1033_v36  ;;  %v3624_v36 = vld [vmem:[%s3922_s1 + $0xc0] sm:$0xff]  ;;  %v1076_v37 = vld [vmem:[#allocation3 + $0x278] sm:$0xff] }
  0xb0   :  { %2609 = vmatpush1.bf16.msra.mxu0 %v2480_v48  ;;  %2483 = vmatprep.subr.bf16.mxu1 %v2482_v49  ;;  %v1002_v48 = vld [vmem:[#allocation3 + $0x28] sm:$0xff] }
  0xb1   :  { %2611 = vmatprep.subr.bf16.mxu0 %v2482_v49  ;;  %v1004_v49 = vld [vmem:[#allocation3 + $0x38] sm:$0xff] }
  0xb3   :  { %2485 = vmatpush1.bf16.msra.mxu1 %v2484_v58 }
  0xb4   :  { %2613 = vmatpush1.bf16.msra.mxu0 %v2484_v58  ;;  %2487 = vmatprep.subr.bf16.mxu1 %v2486_v59  ;;  %v2650_v58 = vpack.c.bf16 %v1004_v49, %v1002_v48  ;;  %v1037_v48 = vld [vmem:[#allocation3 + $0x140] sm:$0xff]  ;;  %v1039_v49 = vld [vmem:[#allocation3 + $0x150] sm:$0xff] }
  0xb5   :  { %2615 = vmatprep.subr.bf16.mxu0 %v2486_v59  ;;  %v3576_v59 = vld [vmem:[%s3922_s1 + $0xb8] sm:$0xff]  ;;  %v2688_v56 = vpack.c.bf16 %v1039_v49, %v1037_v48  ;;  %v1075_v48 = vld [vmem:[#allocation3 + $0x270] sm:$0xff] }
  0xb6   :  { %v1080_v49 = vld [vmem:[#allocation3 + $0x298] sm:$0xff] }
  0xb7   :  { %2489 = vmatpush1.bf16.msra.mxu1 %v2488_v16 }
  0xb8   :  { %2617 = vmatpush1.bf16.msra.mxu0 %v2488_v16  ;;  %2491 = vmatprep.subr.bf16.mxu1 %v2490_v2  ;;  %v1007_v16 = vld [vmem:[#allocation3 + $0x50] sm:$0xff] }
  0xb9   :  { %2619 = vmatprep.subr.bf16.mxu0 %v2490_v2  ;;  %v2654_v2 = vpack.c.bf16 %v1008_v3, %v1006_v61  ;;  %v1041_v61 = vld [vmem:[#allocation3 + $0x160] sm:$0xff]  ;;  %v1043_v3 = vld [vmem:[#allocation3 + $0x170] sm:$0xff] }
  0xbb   :  { %2493 = vmatpush1.bf16.msra.mxu1 %v2492_v50 }
  0xbc   :  { %2621 = vmatpush1.bf16.msra.mxu0 %v2492_v50  ;;  %2495 = vmatprep.subr.bf16.mxu1 %v2494_v52  ;;  %v2658_v50 = vpack.c.bf16 %v1012_v26, %v1010_v21  ;;  %v1045_v21 = vld [vmem:[#allocation3 + $0x180] sm:$0xff]  ;;  %v1047_v26 = vld [vmem:[#allocation3 + $0x190] sm:$0xff] }
  0xbd   :  { %2623 = vmatprep.subr.bf16.mxu0 %v2494_v52  ;;  %v1011_v52 = vld [vmem:[#allocation3 + $0x70] sm:$0xff] }
  0xbf   :  { %2497 = vmatpush1.bf16.msra.mxu1 %v2496_v29 }
  0xc0   :  { %2625 = vmatpush1.bf16.msra.mxu0 %v2496_v29  ;;  %2499 = vmatprep.subr.bf16.mxu1 %v2498_v41  ;;  %v1013_v29 = vld [vmem:[#allocation3 + $0x80] sm:$0xff] }
  0xc1   :  { %2627 = vmatprep.subr.bf16.mxu0 %v2498_v41  ;;  %v1015_v41 = vld [vmem:[#allocation3 + $0x90] sm:$0xff] }
  0xc3   :  { %2501 = vmatpush1.bf16.msra.mxu1 %v2500_v23 }
  0xc4   :  { %2629 = vmatpush1.bf16.msra.mxu0 %v2500_v23  ;;  %2503 = vmatprep.subr.bf16.mxu1 %v2502_v28  ;;  %v1019_v23 = vld [vmem:[#allocation3 + $0xb0] sm:$0xff] }
  0xc5   :  { %2631 = vmatprep.subr.bf16.mxu0 %v2502_v28  ;;  %v1022_v28 = vld [vmem:[#allocation3 + $0xc8] sm:$0xff]  ;;  %v2668_v46 = vpack.c.bf16 %v1019_v23, %v1017_v9  ;;  %v2704_v9 = vpack.c.bf16 %v1055_v55, %v1053_v43 }
  0xc6   :  { %v2670_v60 = vpack.c.bf16 %v1024_v44, %v1022_v28  ;;  %v1057_v28 = vld [vmem:[#allocation3 + $0x1e0] sm:$0xff]  ;;  %v1059_v44 = vld [vmem:[#allocation3 + $0x1f0] sm:$0xff] }
  0xc7   :  { %2505 = vmatpush1.bf16.msra.mxu1 %v2504_v5 }
  0xc8   :  { %2633 = vmatpush1.bf16.msra.mxu0 %v2504_v5  ;;  %2507 = vmatprep.subr.bf16.mxu1 %v2506_v7  ;;  %v1023_v5 = vld [vmem:[#allocation3 + $0xd0] sm:$0xff] }
  0xc9   :  { %2635 = vmatprep.subr.bf16.mxu0 %v2506_v7  ;;  %v1028_v7 = vld [vmem:[#allocation3 + $0xf8] sm:$0xff]  ;;  %v2672_v11 = vpack.c.bf16 %v1023_v5, %v1021_v4  ;;  %v2708_v4 = vpack.c.bf16 %v1059_v44, %v1057_v28  ;;  %v1094_v44 = vld [vmem:[#allocation3 + $0x308] sm:$0xff] }
  0xcb   :  { %2509 = vmatpush1.bf16.msra.mxu1 %v2508_v19 }
  0xcc   :  { %2637 = vmatpush1.bf16.msra.mxu0 %v2508_v19  ;;  %2511 = vmatprep.subr.bf16.mxu1 %v2510_v20  ;;  %v1030_v19 = vld [vmem:[#allocation3 + $0x108] sm:$0xff] }
  0xcd   :  { %2639 = vmatprep.subr.bf16.mxu0 %v2510_v20  ;;  %v1032_v20 = vld [vmem:[#allocation3 + $0x118] sm:$0xff] }
  0xce   :  { %v2678_v24 = vpack.c.bf16 %v1032_v20, %v1030_v19  ;;  %v1065_v20 = vld [vmem:[#allocation3 + $0x220] sm:$0xff] }
  0xcf   :  { %2513 = vmatpush1.bf16.msra.mxu1 %v2512_v31 }
  0xd0   :  { %2641 = vmatpush1.bf16.msra.mxu0 %v2512_v31  ;;  %2515 = vmatprep.subr.bf16.mxu1 %v2514_v32  ;;  %v1034_v31 = vld [vmem:[#allocation3 + $0x128] sm:$0xff] }
  0xd1   :  { %2643 = vmatprep.subr.bf16.mxu0 %v2514_v32  ;;  %v1036_v32 = vld [vmem:[#allocation3 + $0x138] sm:$0xff] }
  0xd2   :  { %v2682_v35 = vpack.c.bf16 %v1036_v32, %v1034_v31  ;;  %v3619_v31 = vld [vmem:[%s3922_s1 + $0xc8] sm:$0xff] }
  0xd3   :  { %2517 = vmatpush1.bf16.msra.mxu1 %v2516_v38 }
  0xd4   :  { %2645 = vmatpush1.bf16.msra.mxu0 %v2516_v38  ;;  %2647 = vmatprep.subr.bf16.mxu1 %v2646_v40  ;;  %v1038_v38 = vld [vmem:[#allocation3 + $0x148] sm:$0xff] }
  0xd5   :  { %2775 = vmatprep.subr.bf16.mxu0 %v2646_v40  ;;  %v1040_v40 = vld [vmem:[#allocation3 + $0x158] sm:$0xff] }
  0xd6   :  { %637 = vmatmul.mubr.f32.vlgmr.msra.gmra.mrb[6].mxu1 %v3528_v14  ;;  %v1005_v14 = vld [vmem:[#allocation3 + $0x40] sm:$0xff]  ;;  %v2686_v47 = vpack.c.bf16 %v1040_v40, %v1038_v38  ;;  %v3633_v40 = vld [vmem:[%s3922_s1 + $0x148] sm:$0xff] }
  0xd7   :  { %955 = vmatmul.mubr.f32.vlgmr.msra.gmra.mrb[6].mxu0 %v3570_v53  ;;  %2649 = vmatpush1.bf16.msra.mxu1 %v2648_v51  ;;  %v2656_v34 = vpack.c.bf16 %v1007_v16, %v1005_v14  ;;  %v1048_v14 = vld [vmem:[#allocation3 + $0x198] sm:$0xff]  ;;  %v2692_v16 = vpack.c.bf16 %v1043_v3, %v1041_v61  ;;  %v1079_v61 = vld [vmem:[#allocation3 + $0x290] sm:$0xff] }
  0xd8   :  { %2777 = vmatpush1.bf16.msra.mxu0 %v2648_v51  ;;  %642 = vmatprep.mubr.f32.mxu1 %v3535_v6  ;;  %v3590_v6 = vld [vmem:[%s3922_s1 + $0x138] sm:$0xff]  ;;  %v1042_v51 = vld [vmem:[#allocation3 + $0x168] sm:$0xff] }
  0xd9   :  { %960 = vmatprep.mubr.f32.mxu0 %v3576_v59  ;;  %2651 = vmatprep.subr.bf16.mxu1 %v2650_v58  ;;  %v1084_v3 = vld [vmem:[#allocation3 + $0x2b8] sm:$0xff] }
  0xda   :  { %643 = vmatmul.mubr.f32.gmra.mrb[8].mxu1 %v3540_v42  ;;  %2779 = vmatprep.subr.bf16.mxu0 %v2650_v58  ;;  %v1009_v42 = vld [vmem:[#allocation3 + $0x60] sm:$0xff]  ;;  %v2690_v58 = vpack.c.bf16 %v1044_v54, %v1042_v51  ;;  %v3647_v54 = vld [vmem:[%s3922_s1 + $0x58] sm:$0xff] }
  0xdb   :  { %961 = vmatmul.mubr.f32.gmra.mrb[8].mxu0 %v3583_v8  ;;  %2653 = vmatpush1.bf16.msra.mxu1 %v2652_v1 }
  0xdc   :  { %2781 = vmatpush1.bf16.msra.mxu0 %v2652_v1  ;;  %648 = vmatprep.mubr.f32.mxu1 %v3549_v63  ;;  %v2660_v63 = vpack.c.bf16 %v1011_v52, %v1009_v42  ;;  %v1046_v1 = vld [vmem:[#allocation3 + $0x188] sm:$0xff]  ;;  %v2696_v42 = vpack.c.bf16 %v1047_v26, %v1045_v21  ;;  %v1088_v21 = vld [vmem:[#allocation3 + $0x2d8] sm:$0xff]  ;;  %v3654_v26 = vstv %s3921_s0 }
  0xdd   :  { %966 = vmatprep.mubr.f32.mxu0 %v3590_v6  ;;  %2655 = vmatprep.subr.bf16.mxu1 %v2654_v2 }
  0xde   :  { %649 = vmatmul.mubr.f32.gmra.mrb[10].mxu1 %v3554_v10  ;;  %2783 = vmatprep.subr.bf16.mxu0 %v2654_v2  ;;  %v2664_v10 = vpack.c.bf16 %v1015_v41, %v1013_v29  ;;  %v2694_v2 = vpack.c.bf16 %v1048_v14, %v1046_v1  ;;  %v2700_v29 = vpack.c.bf16 %v1051_v0, %v1049_v62  ;;  %v1081_v14 = vld [vmem:[#allocation3 + $0x2a0] sm:$0xff]  ;;  %v1090_v62 = vld [vmem:[#allocation3 + $0x2e8] sm:$0xff]  ;;  %v1092_v0 = vld [vmem:[#allocation3 + $0x2f8] sm:$0xff] }
  0xdf   :  { %967 = vmatmul.mubr.f32.gmra.mrb[10].mxu0 %v3597_v39  ;;  %2657 = vmatpush1.bf16.msra.mxu1 %v2656_v34 }
  0xe0   :  { %2785 = vmatpush1.bf16.msra.mxu0 %v2656_v34  ;;  %2659 = vmatprep.subr.bf16.mxu1 %v2658_v50  ;;  %v1050_v34 = vld [vmem:[#allocation3 + $0x1a8] sm:$0xff] }
  0xe1   :  { %2787 = vmatprep.subr.bf16.mxu0 %v2658_v50  ;;  %1189 = vmatprep.mubr.f32.mxu1 %v3563_v17  ;;  %v1026_v17 = vld [vmem:[#allocation3 + $0xe8] sm:$0xff]  ;;  %v1052_v50 = vld [vmem:[#allocation3 + $0x1b8] sm:$0xff] }
  0xe2   :  { %1507 = vmatprep.mubr.f32.mxu0 %v3605_v12  ;;  %v2674_v13 = vpack.c.bf16 %v1028_v7, %v1026_v17  ;;  %v2698_v52 = vpack.c.bf16 %v1052_v50, %v1050_v34  ;;  %v1061_v17 = vld [vmem:[#allocation3 + $0x200] sm:$0xff]  ;;  %v1063_v7 = vld [vmem:[#allocation3 + $0x210] sm:$0xff] }
  0xe3   :  { %2661 = vmatpush1.bf16.msra.mxu1 %v2660_v63  ;;  %v2712_v15 = vpack.c.bf16 %v1063_v7, %v1061_v17  ;;  %v1085_v50 = vld [vmem:[#allocation3 + $0x2c0] sm:$0xff] }
  0xe4   :  { %2789 = vmatpush1.bf16.msra.mxu0 %v2660_v63  ;;  %2663 = vmatprep.subr.bf16.mxu1 %v2662_v27  ;;  %v1054_v63 = vld [vmem:[#allocation3 + $0x1c8] sm:$0xff] }
  0xe5   :  { %2791 = vmatprep.subr.bf16.mxu0 %v2662_v27  ;;  %v1056_v27 = vld [vmem:[#allocation3 + $0x1d8] sm:$0xff] }
  0xe6   :  { %v2702_v41 = vpack.c.bf16 %v1056_v27, %v1054_v63 }
  0xe7   :  { %2665 = vmatpush1.bf16.msra.mxu1 %v2664_v10 }
  0xe8   :  { %2793 = vmatpush1.bf16.msra.mxu0 %v2664_v10  ;;  %2667 = vmatprep.subr.bf16.mxu1 %v2666_v57  ;;  %v1058_v10 = vld [vmem:[#allocation3 + $0x1e8] sm:$0xff] }
  0xe9   :  { %2795 = vmatprep.subr.bf16.mxu0 %v2666_v57  ;;  %v1060_v57 = vld [vmem:[#allocation3 + $0x1f8] sm:$0xff] }
  0xea   :  { %v2706_v23 = vpack.c.bf16 %v1060_v57, %v1058_v10  ;;  %v2738_v57 = vpack.c.bf16 %v1092_v0, %v1090_v62  ;;  %v1105_v62 = vld [vmem:[#allocation3 + $0x360] sm:$0xff]  ;;  %v1107_v0 = vld [vmem:[#allocation3 + $0x370] sm:$0xff] }
  0xeb   :  { %2669 = vmatpush1.bf16.msra.mxu1 %v2668_v46 }
  0xec   :  { %2797 = vmatpush1.bf16.msra.mxu0 %v2668_v46  ;;  %2671 = vmatprep.subr.bf16.mxu1 %v2670_v60  ;;  %v1062_v46 = vld [vmem:[#allocation3 + $0x208] sm:$0xff] }
  0xed   :  { %2799 = vmatprep.subr.bf16.mxu0 %v2670_v60  ;;  %v1064_v60 = vld [vmem:[#allocation3 + $0x218] sm:$0xff] }
  0xee   :  { %v2710_v5 = vpack.c.bf16 %v1064_v60, %v1062_v46  ;;  %v1096_v46 = vld [vmem:[#allocation3 + $0x318] sm:$0xff] }
  0xef   :  { %2673 = vmatpush1.bf16.msra.mxu1 %v2672_v11 }
  0xf0   :  { %2801 = vmatpush1.bf16.msra.mxu0 %v2672_v11  ;;  %2675 = vmatprep.subr.bf16.mxu1 %v2674_v13  ;;  %v1066_v11 = vld [vmem:[#allocation3 + $0x228] sm:$0xff] }
  0xf1   :  { %2803 = vmatprep.subr.bf16.mxu0 %v2674_v13  ;;  %v1068_v13 = vld [vmem:[#allocation3 + $0x238] sm:$0xff] }
  0xf2   :  { %v2714_v19 = vpack.c.bf16 %v1068_v13, %v1066_v11 }
  0xf3   :  { %2677 = vmatpush1.bf16.msra.mxu1 %v2676_v22 }
  0xf4   :  { %2805 = vmatpush1.bf16.msra.mxu0 %v2676_v22  ;;  %2679 = vmatprep.subr.bf16.mxu1 %v2678_v24  ;;  %v1067_v22 = vld [vmem:[#allocation3 + $0x230] sm:$0xff] }
  0xf5   :  { %2807 = vmatprep.subr.bf16.mxu0 %v2678_v24  ;;  %v1070_v24 = vld [vmem:[#allocation3 + $0x248] sm:$0xff]  ;;  %v2716_v30 = vpack.c.bf16 %v1067_v22, %v1065_v20  ;;  %v2742_v20 = vpack.c.bf16 %v1096_v46, %v1094_v44  ;;  %v1093_v22 = vld [vmem:[#allocation3 + $0x300] sm:$0xff]  ;;  %v1115_v44 = vld [vmem:[#allocation3 + $0x3b0] sm:$0xff] }
  0xf6   :  { %v2718_v32 = vpack.c.bf16 %v1072_v25, %v1070_v24  ;;  %v1095_v24 = vld [vmem:[#allocation3 + $0x310] sm:$0xff]  ;;  %v1118_v46 = vld [vmem:[#allocation3 + $0x3c8] sm:$0xff] }
  0xf7   :  { %2681 = vmatpush1.bf16.msra.mxu1 %v2680_v33 }
  0xf8   :  { %2809 = vmatpush1.bf16.msra.mxu0 %v2680_v33  ;;  %2683 = vmatprep.subr.bf16.mxu1 %v2682_v35  ;;  %v1069_v33 = vld [vmem:[#allocation3 + $0x240] sm:$0xff] }
  0xf9   :  { %2811 = vmatprep.subr.bf16.mxu0 %v2682_v35  ;;  %v1071_v35 = vld [vmem:[#allocation3 + $0x250] sm:$0xff] }
  0xfa   :  { %v2720_v38 = vpack.c.bf16 %v1071_v35, %v1069_v33 }
  0xfb   :  { %2685 = vmatpush1.bf16.msra.mxu1 %v2684_v45 }
  0xfc   :  { %2813 = vmatpush1.bf16.msra.mxu0 %v2684_v45  ;;  %2687 = vmatprep.subr.bf16.mxu1 %v2686_v47 }
  0xfd   :  { %2815 = vmatprep.subr.bf16.mxu0 %v2686_v47  ;;  %v1073_v47 = vld [vmem:[#allocation3 + $0x260] sm:$0xff] }
  0xfe   :  { %v2724_v51 = vpack.c.bf16 %v1075_v48, %v1073_v47  ;;  %v2744_v47 = vpack.c.bf16 %v1095_v24, %v1093_v22  ;;  %v1123_v22 = vld [vmem:[#allocation3 + $0x3f0] sm:$0xff]  ;;  %v1634_v24 = vld [vmem:[#allocation3 + $0x8] sm:$0xff] }
  0xff   :  { %2689 = vmatpush1.bf16.msra.mxu1 %v2688_v56 }
 0x100   :  { %2817 = vmatpush1.bf16.msra.mxu0 %v2688_v56  ;;  %2691 = vmatprep.subr.bf16.mxu1 %v2690_v58 }
 0x101   :  { %2819 = vmatprep.subr.bf16.mxu0 %v2690_v58  ;;  %v1077_v58 = vld [vmem:[#allocation3 + $0x280] sm:$0xff] }
 0x103   :  { %2693 = vmatpush1.bf16.msra.mxu1 %v2692_v16 }
 0x104   :  { %2821 = vmatpush1.bf16.msra.mxu0 %v2692_v16  ;;  %2695 = vmatprep.subr.bf16.mxu1 %v2694_v2  ;;  %v1083_v16 = vld [vmem:[#allocation3 + $0x2b0] sm:$0xff] }
 0x105   :  { %2823 = vmatprep.subr.bf16.mxu0 %v2694_v2  ;;  %v1086_v2 = vld [vmem:[#allocation3 + $0x2c8] sm:$0xff]  ;;  %v2732_v34 = vpack.c.bf16 %v1083_v16, %v1081_v14 }
 0x107   :  { %2697 = vmatpush1.bf16.msra.mxu1 %v2696_v42 }
 0x108   :  { %2825 = vmatpush1.bf16.msra.mxu0 %v2696_v42  ;;  %2699 = vmatprep.subr.bf16.mxu1 %v2698_v52  ;;  %v1087_v42 = vld [vmem:[#allocation3 + $0x2d0] sm:$0xff] }
 0x109   :  { %2827 = vmatprep.subr.bf16.mxu0 %v2698_v52  ;;  %v2736_v55 = vpack.c.bf16 %v1087_v42, %v1085_v50  ;;  %v1108_v50 = vld [vmem:[#allocation3 + $0x378] sm:$0xff] }
 0x10b   :  { %2701 = vmatpush1.bf16.msra.mxu1 %v2700_v29 }
 0x10c   :  { %2829 = vmatpush1.bf16.msra.mxu0 %v2700_v29  ;;  %2703 = vmatprep.subr.bf16.mxu1 %v2702_v41 }
 0x10d   :  { %2831 = vmatprep.subr.bf16.mxu0 %v2702_v41 }
 0x10f   :  { %2705 = vmatpush1.bf16.msra.mxu1 %v2704_v9 }
 0x110   :  { %2833 = vmatpush1.bf16.msra.mxu0 %v2704_v9  ;;  %2707 = vmatprep.subr.bf16.mxu1 %v2706_v23  ;;  %v1089_v9 = vld [vmem:[#allocation3 + $0x2e0] sm:$0xff] }
 0x111   :  { %2835 = vmatprep.subr.bf16.mxu0 %v2706_v23  ;;  %v1091_v23 = vld [vmem:[#allocation3 + $0x2f0] sm:$0xff] }
 0x112   :  { %v2740_v13 = vpack.c.bf16 %v1091_v23, %v1089_v9 }
 0x113   :  { %2709 = vmatpush1.bf16.msra.mxu1 %v2708_v4 }
 0x114   :  { %2837 = vmatpush1.bf16.msra.mxu0 %v2708_v4  ;;  %2711 = vmatprep.subr.bf16.mxu1 %v2710_v5 }
 0x115   :  { %2839 = vmatprep.subr.bf16.mxu0 %v2710_v5 }
 0x116   :  { %1190 = vmatmul.mubr.f32.vlgmr.msra.gmra.mrb[12].mxu1 %v3570_v53  ;;  %v1074_v53 = vld [vmem:[#allocation3 + $0x268] sm:$0xff] }
 0x117   :  { %2713 = vmatpush1.bf16.msra.mxu1 %v2712_v15  ;;  %1508 = vmatmul.mubr.f32.vlgmr.msra.gmra.mrb[12].mxu0 %v3612_v18  ;;  %v2722_v45 = vpack.c.bf16 %v1076_v37, %v1074_v53 }
 0x118   :  { %2841 = vmatpush1.bf16.msra.mxu0 %v2712_v15  ;;  %2715 = vmatprep.subr.bf16.mxu1 %v2714_v19 }
 0x119   :  { %2843 = vmatprep.subr.bf16.mxu0 %v2714_v19  ;;  %1195 = vmatprep.mubr.f32.mxu1 %v3576_v59  ;;  %v3638_v59 = vld [vmem:[%s3922_s1 + $0x140] sm:$0xff] }
 0x11a   :  { %1513 = vmatprep.mubr.f32.mxu0 %v3619_v31  ;;  %1196 = vmatmul.mubr.f32.gmra.mrb[14].mxu1 %v3583_v8  ;;  %v1078_v8 = vld [vmem:[#allocation3 + $0x288] sm:$0xff] }
 0x11b   :  { %2717 = vmatpush1.bf16.msra.mxu1 %v2716_v30  ;;  %1514 = vmatmul.mubr.f32.gmra.mrb[14].mxu0 %v3624_v36  ;;  %v2726_v56 = vpack.c.bf16 %v1080_v49, %v1078_v8 }
 0x11c   :  { %2845 = vmatpush1.bf16.msra.mxu0 %v2716_v30  ;;  %2719 = vmatprep.subr.bf16.mxu1 %v2718_v32  ;;  %v1098_v30 = vld [vmem:[#allocation3 + $0x328] sm:$0xff] }
 0x11d   :  { %2847 = vmatprep.subr.bf16.mxu0 %v2718_v32  ;;  %1201 = vmatprep.mubr.f32.mxu1 %v3590_v6  ;;  %v1082_v6 = vld [vmem:[#allocation3 + $0x2a8] sm:$0xff]  ;;  %v1100_v32 = vld [vmem:[#allocation3 + $0x338] sm:$0xff] }
 0x11e   :  { %1519 = vmatprep.mubr.f32.mxu0 %v3633_v40  ;;  %1202 = vmatmul.mubr.f32.gmra.mrb[16].mxu1 %v3597_v39  ;;  %v2728_v39 = vpack.c.bf16 %v1079_v61, %v1077_v58  ;;  %v2730_v1 = vpack.c.bf16 %v1084_v3, %v1082_v6  ;;  %v1099_v58 = vld [vmem:[#allocation3 + $0x330] sm:$0xff]  ;;  %v1102_v6 = vld [vmem:[#allocation3 + $0x348] sm:$0xff]  ;;  %v1104_v3 = vld [vmem:[#allocation3 + $0x358] sm:$0xff] }
 0x11f   :  { %2721 = vmatpush1.bf16.msra.mxu1 %v2720_v38  ;;  %1520 = vmatmul.mubr.f32.gmra.mrb[16].mxu0 %v3638_v59 }
 0x120   :  { %2849 = vmatpush1.bf16.msra.mxu0 %v2720_v38  ;;  %2723 = vmatprep.subr.bf16.mxu1 %v2722_v45 }
 0x121   :  { %2851 = vmatprep.subr.bf16.mxu0 %v2722_v45  ;;  %1272 = vmatprep.mubr.f32.mxu1 %v3605_v12  ;;  %v2734_v12 = vpack.c.bf16 %v1088_v21, %v1086_v2  ;;  %v2750_v2 = vpack.c.bf16 %v1104_v3, %v1102_v6  ;;  %v1101_v21 = vld [vmem:[#allocation3 + $0x340] sm:$0xff]  ;;  %v1643_v3 = vld [vmem:[#allocation3 + $0x50] sm:$0xff] }
 0x122   :  { %1590 = vmatprep.mubr.f32.mxu0 %v3647_v54  ;;  %v1641_v6 = vld [vmem:[#allocation3 + $0x40] sm:$0xff] }
 0x123   :  { %2725 = vmatpush1.bf16.msra.mxu1 %v2724_v51 }
 0x124   :  { %2853 = vmatpush1.bf16.msra.mxu0 %v2724_v51  ;;  %2727 = vmatprep.subr.bf16.mxu1 %v2726_v56  ;;  %v2746_v51 = vpack.c.bf16 %v1100_v32, %v1098_v30 }
 0x125   :  { %2855 = vmatprep.subr.bf16.mxu0 %v2726_v56  ;;  %v1097_v56 = vld [vmem:[#allocation3 + $0x320] sm:$0xff] }
 0x126   :  { %v2748_v14 = vpack.c.bf16 %v1099_v58, %v1097_v56  ;;  %v1644_v56 = vld [vmem:[#allocation3 + $0x58] sm:$0xff] }
 0x127   :  { %2729 = vmatpush1.bf16.msra.mxu1 %v2728_v39 }
 0x128   :  { %2857 = vmatpush1.bf16.msra.mxu0 %v2728_v39  ;;  %2731 = vmatprep.subr.bf16.mxu1 %v2730_v1 }
 0x129   :  { %v237_v52 = vpop.f32.mrb[0].mxu1  ;;  %2859 = vmatprep.subr.bf16.mxu0 %v2730_v1 }
 0x12a   :  { %v238_v63 = vadd.f32 %v237_v52, %v3654_v26  ;;  %v320_v27 = vpop.f32.mrb[0].mxu0  ;;  %v239_v29 = vpop.f32.mrb[1].mxu1 }
 0x12b   :  { %v240_v41 = vadd.f32 %v239_v29, %v3654_v26  ;;  %v322_v43 = vpop.f32.mrb[1].mxu0  ;;  %2733 = vmatpush1.bf16.msra.mxu1 %v2732_v34  ;;  %v2756_v29 = vpack.c.bf16 %v1107_v0, %v1105_v62  ;;  %v1651_v62 = vld [vmem:[#allocation3 + $0x90] sm:$0xff]  ;;  %v1654_v0 = vld [vmem:[#allocation3 + $0xa8] sm:$0xff] }
 0x12c   :  { %v321_v10 = vadd.f32 %v320_v27, %v238_v63  ;;  %2861 = vmatpush1.bf16.msra.mxu0 %v2732_v34  ;;  %2735 = vmatprep.subr.bf16.mxu1 %v2734_v12  ;;  %v1103_v34 = vld [vmem:[#allocation3 + $0x350] sm:$0xff]  ;;  %v1110_v63 = vld [vmem:[#allocation3 + $0x388] sm:$0xff]  ;;  %v1112_v27 = vld [vmem:[#allocation3 + $0x398] sm:$0xff] }
 0x12d   :  { %v323_v28 = vadd.f32 %v322_v43, %v240_v41  ;;  %2863 = vmatprep.subr.bf16.mxu0 %v2734_v12  ;;  %v243_v60 = vpop.f32.mrb[2].mxu1  ;;  %v1106_v12 = vld [vmem:[#allocation3 + $0x368] sm:$0xff]  ;;  %v2752_v42 = vpack.c.bf16 %v1103_v34, %v1101_v21  ;;  %v2758_v41 = vpack.c.bf16 %v1112_v27, %v1110_v63  ;;  %v1109_v43 = vld [vmem:[#allocation3 + $0x380] sm:$0xff]  ;;  %v1647_v34 = vld [vmem:[#allocation3 + $0x70] sm:$0xff] }
 0x12e   :  { %v337_v4 = vmax.f32 %v321_v10, 0.0  ;;  %v244_v5 = vadd.f32 %v243_v60, %v3654_v26  ;;  %v245_v17 = vpop.f32.mrb[3].mxu1  ;;  %v326_v7 = vpop.f32.mrb[2].mxu0  ;;  %v2754_v52 = vpack.c.bf16 %v1108_v50, %v1106_v12  ;;  %v1114_v10 = vld [vmem:[#allocation3 + $0x3a8] sm:$0xff]  ;;  %v1120_v60 = vld [vmem:[#allocation3 + $0x3d8] sm:$0xff]  ;;  %v1645_v21 = vld [vmem:[#allocation3 + $0x60] sm:$0xff] }
 0x12f   :  { %v338_v11 = vmax.f32 %v323_v28, 0.0  ;;  %2737 = vmatpush1.bf16.msra.mxu1 %v2736_v55  ;;  %v246_v15 = vadd.f32 %v245_v17, %v3654_v26  ;;  %v328_v19 = vpop.f32.mrb[3].mxu0  ;;  %v1113_v28 = vld [vmem:[#allocation3 + $0x3a0] sm:$0xff]  ;;  %v1652_v12 = vld [vmem:[#allocation3 + $0x98] sm:$0xff]  ;;  %v2916_v50 = vpack.c.bf16 %v1647_v34, %v1645_v21  ;;  %v1687_v21 = vld [vmem:[#allocation3 + $0x1b0] sm:$0xff] }
 0x130   :  { %343 = vst [vmem:[%s3924_s3] sm:$0xff] %v337_v4  ;;  %2865 = vmatpush1.bf16.msra.mxu0 %v2736_v55  ;;  %2739 = vmatprep.subr.bf16.mxu1 %v2738_v57  ;;  %v327_v25 = vadd.f32 %v326_v7, %v244_v5  ;;  %v1111_v55 = vld [vmem:[#allocation3 + $0x390] sm:$0xff]  ;;  %v2764_v4 = vpack.c.bf16 %v1115_v44, %v1113_v28  ;;  %v1117_v17 = vld [vmem:[#allocation3 + $0x3c0] sm:$0xff]  ;;  %v1656_v63 = vld [vmem:[#allocation3 + $0xb8] sm:$0xff] }
 0x131   :  { %344 = vst [vmem:[%s3924_s3 + $0x8] sm:$0xff] %v338_v11  ;;  %2867 = vmatprep.subr.bf16.mxu0 %v2738_v57  ;;  %v329_v33 = vadd.f32 %v328_v19, %v246_v15  ;;  %v249_v35 = vpop.f32.mrb[4].mxu1  ;;  %v1116_v57 = vld [vmem:[#allocation3 + $0x3b8] sm:$0xff]  ;;  %v2760_v9 = vpack.c.bf16 %v1111_v55, %v1109_v43  ;;  %v2766_v5 = vpack.c.bf16 %v1120_v60, %v1118_v46  ;;  %v1119_v7 = vld [vmem:[#allocation3 + $0x3d0] sm:$0xff]  ;;  %v1122_v11 = vld [vmem:[#allocation3 + $0x3e8] sm:$0xff] }
 0x132   :  { %v339_v53 = vmax.f32 %v327_v25, 0.0  ;;  %v250_v37 = vadd.f32 %v249_v35, %v3654_v26  ;;  %v251_v38 = vpop.f32.mrb[5].mxu1  ;;  %v332_v45 = vpop.f32.mrb[4].mxu0  ;;  %v2762_v23 = vpack.c.bf16 %v1116_v57, %v1114_v10  ;;  %v2768_v15 = vpack.c.bf16 %v1119_v7, %v1117_v17  ;;  %v1636_v25 = vld [vmem:[#allocation3 + $0x18] sm:$0xff]  ;;  %v1635_v35 = vld [vmem:[#allocation3 + $0x10] sm:$0xff]  ;;  %v1658_v43 = vld [vmem:[#allocation3 + $0xc8] sm:$0xff] }
 0x133   :  { %2741 = vmatpush1.bf16.msra.mxu1 %v2740_v13  ;;  %v340_v48 = vmax.f32 %v329_v33, 0.0  ;;  %v252_v8 = vadd.f32 %v251_v38, %v3654_v26  ;;  %v334_v49 = vpop.f32.mrb[5].mxu0  ;;  %v2902_v32 = vpack.c.bf16 %v1636_v25, %v1634_v24  ;;  %v1633_v33 = vld [vmem:[#allocation3] sm:$0xff]  ;;  %v2922_v27 = vpack.c.bf16 %v1656_v63, %v1654_v0  ;;  %v1660_v55 = vld [vmem:[#allocation3 + $0xd8] sm:$0xff]  ;;  %v1690_v34 = vld [vmem:[#allocation3 + $0x1c8] sm:$0xff] }
 0x134   :  { %2869 = vmatpush1.bf16.msra.mxu0 %v2740_v13  ;;  %2743 = vmatprep.subr.bf16.mxu1 %v2742_v20  ;;  %345 = vst [vmem:[%s3924_s3 + $0x70] sm:$0xff] %v339_v53  ;;  %v333_v61 = vadd.f32 %v332_v45, %v250_v37  ;;  %v1124_v13 = vld [vmem:[#allocation3 + $0x3f8] sm:$0xff]  ;;  %v1638_v53 = vld [vmem:[#allocation3 + $0x28] sm:$0xff]  ;;  %v2904_v38 = vpack.c.bf16 %v1635_v35, %v1633_v33  ;;  %v3683_v45 = vld [vmem:[%s3922_s1 + $0x50] sm:$0xff] }
 0x135   :  { %2871 = vmatprep.subr.bf16.mxu0 %v2742_v20  ;;  %346 = vst [vmem:[%s3924_s3 + $0x78] sm:$0xff] %v340_v48  ;;  %v335_v39 = vadd.f32 %v334_v49, %v252_v8  ;;  %v2770_v19 = vpack.c.bf16 %v1124_v13, %v1122_v11  ;;  %v1121_v20 = vld [vmem:[#allocation3 + $0x3e0] sm:$0xff]  ;;  %v1640_v37 = vld [vmem:[#allocation3 + $0x38] sm:$0xff]  ;;  %v1639_v48 = vld [vmem:[#allocation3 + $0x30] sm:$0xff]  ;;  %v2926_v57 = vpack.c.bf16 %v1660_v55, %v1658_v43 }
 0x136   :  { %v341_v1 = vmax.f32 %v333_v61, 0.0  ;;  %v2772_v30 = vpack.c.bf16 %v1123_v22, %v1121_v20  ;;  %v2906_v8 = vpack.c.bf16 %v1640_v37, %v1638_v53  ;;  %v1310_v49 = vld [vmem:[%s3922_s1 + $0xd8] sm:$0xff]  ;;  %v1309_v61 = vld [vmem:[%s3922_s1 + $0xd0] sm:$0xff]  ;;  %v1661_v60 = vld [vmem:[#allocation3 + $0xe0] sm:$0xff] }
 0x137   :  { %2745 = vmatpush1.bf16.msra.mxu1 %v2744_v47  ;;  %v342_v16 = vmax.f32 %v335_v39, 0.0  ;;  %v1646_v39 = vld [vmem:[#allocation3 + $0x68] sm:$0xff]  ;;  %v1664_v28 = vld [vmem:[#allocation3 + $0xf8] sm:$0xff]  ;;  %v1665_v13 = vld [vmem:[#allocation3 + $0x100] sm:$0xff] }
 0x138   :  { %2873 = vmatpush1.bf16.msra.mxu0 %v2744_v47  ;;  %2747 = vmatprep.subr.bf16.mxu1 %v2746_v51  ;;  %347 = vst [vmem:[%s3924_s3 + $0xe0] sm:$0xff] %v341_v1  ;;  %v1637_v47 = vld [vmem:[#allocation3 + $0x20] sm:$0xff]  ;;  %v1648_v1 = vld [vmem:[#allocation3 + $0x78] sm:$0xff] }
 0x139   :  { %2875 = vmatprep.subr.bf16.mxu0 %v2746_v51  ;;  %348 = vst [vmem:[%s3924_s3 + $0xe8] sm:$0xff] %v342_v16  ;;  %v1642_v51 = vld [vmem:[#allocation3 + $0x48] sm:$0xff]  ;;  %v2908_v58 = vpack.c.bf16 %v1639_v48, %v1637_v47  ;;  %v1313_v16 = vld [vmem:[%s3922_s1 + $0x150] sm:$0xff]  ;;  %v1668_v17 = vld [vmem:[#allocation3 + $0x118] sm:$0xff] }
 0x13a   :  { %v1672_v20 = vld [vmem:[#allocation3 + $0x138] sm:$0xff]  ;;  %v1669_v25 = vld [vmem:[#allocation3 + $0x120] sm:$0xff]  ;;  %v1678_v47 = vld [vmem:[#allocation3 + $0x168] sm:$0xff] }
 0x13b   :  { %2749 = vmatpush1.bf16.msra.mxu1 %v2748_v14  ;;  %v1676_v33 = vld [vmem:[#allocation3 + $0x158] sm:$0xff]  ;;  %v1673_v37 = vld [vmem:[#allocation3 + $0x140] sm:$0xff] }
 0x13c   :  { %2877 = vmatpush1.bf16.msra.mxu0 %v2748_v14  ;;  %2751 = vmatprep.subr.bf16.mxu1 %v2750_v2  ;;  %v1314_v14 = vld [vmem:[%s3922_s1 + $0x158] sm:$0xff] }
 0x13d   :  { %2879 = vmatprep.subr.bf16.mxu0 %v2750_v2  ;;  %v2914_v2 = vpack.c.bf16 %v1648_v1, %v1646_v39  ;;  %v1680_v48 = vld [vmem:[#allocation3 + $0x178] sm:$0xff]  ;;  %v1683_v39 = vld [vmem:[#allocation3 + $0x190] sm:$0xff]  ;;  %v1686_v1 = vld [vmem:[#allocation3 + $0x1a8] sm:$0xff] }
 0x13e   :  { %v1696_v0 = vld [vmem:[#allocation3 + $0x1f8] sm:$0xff] }
 0x13f   :  { %2753 = vmatpush1.bf16.msra.mxu1 %v2752_v42  ;;  %v1700_v43 = vld [vmem:[#allocation3 + $0x218] sm:$0xff] }
 0x140   :  { %2881 = vmatpush1.bf16.msra.mxu0 %v2752_v42  ;;  %2755 = vmatprep.subr.bf16.mxu1 %v2754_v52 }
 0x141   :  { %2883 = vmatprep.subr.bf16.mxu0 %v2754_v52  ;;  %v1649_v52 = vld [vmem:[#allocation3 + $0x80] sm:$0xff] }
 0x143   :  { %2757 = vmatpush1.bf16.msra.mxu1 %v2756_v29 }
 0x144   :  { %2885 = vmatpush1.bf16.msra.mxu0 %v2756_v29  ;;  %2759 = vmatprep.subr.bf16.mxu1 %v2758_v41  ;;  %v1653_v29 = vld [vmem:[#allocation3 + $0xa0] sm:$0xff] }
 0x145   :  { %2887 = vmatprep.subr.bf16.mxu0 %v2758_v41  ;;  %v1655_v41 = vld [vmem:[#allocation3 + $0xb0] sm:$0xff] }
 0x146   :  { %v2924_v10 = vpack.c.bf16 %v1655_v41, %v1653_v29  ;;  %v1695_v29 = vld [vmem:[#allocation3 + $0x1f0] sm:$0xff]  ;;  %v1698_v41 = vld [vmem:[#allocation3 + $0x208] sm:$0xff] }
 0x147   :  { %2761 = vmatpush1.bf16.msra.mxu1 %v2760_v9 }
 0x148   :  { %2889 = vmatpush1.bf16.msra.mxu0 %v2760_v9  ;;  %2763 = vmatprep.subr.bf16.mxu1 %v2762_v23  ;;  %v1657_v9 = vld [vmem:[#allocation3 + $0xc0] sm:$0xff] }
 0x149   :  { %2891 = vmatprep.subr.bf16.mxu0 %v2762_v23  ;;  %v1659_v23 = vld [vmem:[#allocation3 + $0xd0] sm:$0xff] }
 0x14a   :  { %v2928_v44 = vpack.c.bf16 %v1659_v23, %v1657_v9  ;;  %v1699_v9 = vld [vmem:[#allocation3 + $0x210] sm:$0xff]  ;;  %v1702_v23 = vld [vmem:[#allocation3 + $0x228] sm:$0xff] }
 0x14b   :  { %2765 = vmatpush1.bf16.msra.mxu1 %v2764_v4 }
 0x14c   :  { %2893 = vmatpush1.bf16.msra.mxu0 %v2764_v4  ;;  %2767 = vmatprep.subr.bf16.mxu1 %v2766_v5  ;;  %v1663_v4 = vld [vmem:[#allocation3 + $0xf0] sm:$0xff] }
 0x14d   :  { %2895 = vmatprep.subr.bf16.mxu0 %v2766_v5  ;;  %v1666_v5 = vld [vmem:[#allocation3 + $0x108] sm:$0xff]  ;;  %v2932_v7 = vpack.c.bf16 %v1663_v4, %v1661_v60  ;;  %v1701_v60 = vld [vmem:[#allocation3 + $0x220] sm:$0xff]  ;;  %v1703_v4 = vld [vmem:[#allocation3 + $0x230] sm:$0xff] }
 0x14e   :  { %v2934_v11 = vpack.c.bf16 %v1668_v17, %v1666_v5  ;;  %v1706_v5 = vld [vmem:[#allocation3 + $0x248] sm:$0xff]  ;;  %v1708_v17 = vld [vmem:[#allocation3 + $0x258] sm:$0xff] }
 0x14f   :  { %2769 = vmatpush1.bf16.msra.mxu1 %v2768_v15 }
 0x150   :  { %2897 = vmatpush1.bf16.msra.mxu0 %v2768_v15  ;;  %2771 = vmatprep.subr.bf16.mxu1 %v2770_v19  ;;  %v1667_v15 = vld [vmem:[#allocation3 + $0x110] sm:$0xff] }
 0x151   :  { %2899 = vmatprep.subr.bf16.mxu0 %v2770_v19  ;;  %v1670_v19 = vld [vmem:[#allocation3 + $0x128] sm:$0xff]  ;;  %v2936_v22 = vpack.c.bf16 %v1667_v15, %v1665_v13  ;;  %v1625_v15 = vld [vmem:[%s3922_s1 + $0xd0] sm:$0xff] }
 0x152   :  { %v2938_v24 = vpack.c.bf16 %v1672_v20, %v1670_v19  ;;  %v3723_v13 = vld [vmem:[%s3922_s1 + $0xe8] sm:$0xff]  ;;  %v1705_v19 = vld [vmem:[#allocation3 + $0x240] sm:$0xff]  ;;  %v1707_v20 = vld [vmem:[#allocation3 + $0x250] sm:$0xff] }
 0x153   :  { %2773 = vmatpush1.bf16.msra.mxu1 %v2772_v30 }
 0x154   :  { %2901 = vmatpush1.bf16.msra.mxu0 %v2772_v30  ;;  %2903 = vmatprep.subr.bf16.mxu1 %v2902_v32  ;;  %v1671_v30 = vld [vmem:[#allocation3 + $0x130] sm:$0xff] }
 0x155   :  { %3031 = vmatprep.subr.bf16.mxu0 %v2902_v32  ;;  %v1674_v32 = vld [vmem:[#allocation3 + $0x148] sm:$0xff]  ;;  %v2940_v35 = vpack.c.bf16 %v1671_v30, %v1669_v25  ;;  %v1712_v25 = vld [vmem:[#allocation3 + $0x278] sm:$0xff] }
 0x156   :  { %1273 = vmatmul.mubr.f32.vlgmr.msra.gmra.mrb[12].mxu1 %v3612_v18  ;;  %v2910_v18 = vpack.c.bf16 %v1644_v56, %v1642_v51  ;;  %v2942_v53 = vpack.c.bf16 %v1676_v33, %v1674_v32  ;;  %v1677_v51 = vld [vmem:[#allocation3 + $0x160] sm:$0xff]  ;;  %v1679_v56 = vld [vmem:[#allocation3 + $0x170] sm:$0xff]  ;;  %v1630_v30 = vld [vmem:[%s3922_s1 + $0x158] sm:$0xff]  ;;  %v2976_v32 = vpack.c.bf16 %v1707_v20, %v1705_v19 }
 0x157   :  { %1591 = vmatmul.mubr.f32.vlgmr.msra.gmra.mrb[12].mxu0 %v3683_v45  ;;  %2905 = vmatpush1.bf16.msra.mxu1 %v2904_v38  ;;  %v3741_v33 = vld [vmem:[%s3922_s1 + $0x168] sm:$0xff] }
 0x158   :  { %3033 = vmatpush1.bf16.msra.mxu0 %v2904_v38  ;;  %1278 = vmatprep.mubr.f32.mxu1 %v3619_v31  ;;  %v2912_v31 = vpack.c.bf16 %v1643_v3, %v1641_v6  ;;  %v1675_v38 = vld [vmem:[#allocation3 + $0x150] sm:$0xff]  ;;  %v2948_v6 = vpack.c.bf16 %v1679_v56, %v1677_v51  ;;  %v1942_v51 = vld [vmem:[%s3922_s1 + $0x78] sm:$0xff] }
 0x159   :  { %1596 = vmatprep.mubr.f32.mxu0 %v1310_v49  ;;  %2907 = vmatprep.subr.bf16.mxu1 %v2906_v8  ;;  %v2946_v49 = vpack.c.bf16 %v1680_v48, %v1678_v47  ;;  %v3749_v47 = vld [vmem:[%s3922_s1 + $0x160] sm:$0xff]  ;;  %v1714_v48 = vld [vmem:[#allocation3 + $0x288] sm:$0xff] }
 0x15a   :  { %1279 = vmatmul.mubr.f32.gmra.mrb[14].mxu1 %v3624_v36  ;;  %3035 = vmatprep.subr.bf16.mxu0 %v2906_v8  ;;  %v1650_v36 = vld [vmem:[#allocation3 + $0x88] sm:$0xff]  ;;  %v2944_v8 = vpack.c.bf16 %v1675_v38, %v1673_v37  ;;  %v1709_v37 = vld [vmem:[#allocation3 + $0x260] sm:$0xff]  ;;  %v1711_v38 = vld [vmem:[#allocation3 + $0x270] sm:$0xff] }
 0x15b   :  { %1597 = vmatmul.mubr.f32.gmra.mrb[14].mxu0 %v1309_v61  ;;  %2909 = vmatpush1.bf16.msra.mxu1 %v2908_v58  ;;  %v2918_v42 = vpack.c.bf16 %v1652_v12, %v1650_v36  ;;  %v1684_v61 = vld [vmem:[#allocation3 + $0x198] sm:$0xff] }
 0x15c   :  { %3037 = vmatpush1.bf16.msra.mxu0 %v2908_v58  ;;  %1284 = vmatprep.mubr.f32.mxu1 %v3633_v40  ;;  %v3706_v40 = vld [vmem:[%s3922_s1 + $0x68] sm:$0xff]  ;;  %v1692_v36 = vld [vmem:[#allocation3 + $0x1d8] sm:$0xff] }
 0x15d   :  { %1602 = vmatprep.mubr.f32.mxu0 %v1314_v14  ;;  %2911 = vmatprep.subr.bf16.mxu1 %v2910_v18  ;;  %v1682_v58 = vld [vmem:[#allocation3 + $0x188] sm:$0xff]  ;;  %v1688_v14 = vld [vmem:[#allocation3 + $0x1b8] sm:$0xff] }
 0x15e   :  { %1285 = vmatmul.mubr.f32.gmra.mrb[16].mxu1 %v3638_v59  ;;  %3039 = vmatprep.subr.bf16.mxu0 %v2910_v18  ;;  %v2920_v59 = vpack.c.bf16 %v1651_v62, %v1649_v52  ;;  %v2950_v3 = vpack.c.bf16 %v1684_v61, %v1682_v58  ;;  %v1681_v18 = vld [vmem:[#allocation3 + $0x180] sm:$0xff]  ;;  %v1691_v52 = vld [vmem:[#allocation3 + $0x1d0] sm:$0xff]  ;;  %v1694_v62 = vld [vmem:[#allocation3 + $0x1e8] sm:$0xff] }
 0x15f   :  { %1603 = vmatmul.mubr.f32.gmra.mrb[16].mxu0 %v1313_v16  ;;  %2913 = vmatpush1.bf16.msra.mxu1 %v2912_v31  ;;  %v2954_v16 = vpack.c.bf16 %v1688_v14, %v1686_v1  ;;  %v1713_v58 = vld [vmem:[#allocation3 + $0x280] sm:$0xff]  ;;  %v1715_v61 = vld [vmem:[#allocation3 + $0x290] sm:$0xff] }
 0x160   :  { %3041 = vmatpush1.bf16.msra.mxu0 %v2912_v31  ;;  %2915 = vmatprep.subr.bf16.mxu1 %v2914_v2  ;;  %v2952_v31 = vpack.c.bf16 %v1683_v39, %v1681_v18  ;;  %v2984_v18 = vpack.c.bf16 %v1715_v61, %v1713_v58  ;;  %v1717_v1 = vld [vmem:[#allocation3 + $0x2a0] sm:$0xff]  ;;  %v1719_v14 = vld [vmem:[#allocation3 + $0x2b0] sm:$0xff] }
 0x161   :  { %3043 = vmatprep.subr.bf16.mxu0 %v2914_v2  ;;  %1825 = vmatprep.mubr.f32.mxu1 %v3647_v54  ;;  %v1662_v54 = vld [vmem:[#allocation3 + $0xe8] sm:$0xff]  ;;  %v1685_v2 = vld [vmem:[#allocation3 + $0x1a0] sm:$0xff] }
 0x162   :  { %2143 = vmatprep.mubr.f32.mxu0 %v3706_v40  ;;  %v2930_v46 = vpack.c.bf16 %v1664_v28, %v1662_v54  ;;  %v2956_v12 = vpack.c.bf16 %v1687_v21, %v1685_v2  ;;  %v1704_v54 = vld [vmem:[#allocation3 + $0x238] sm:$0xff]  ;;  %v2988_v2 = vpack.c.bf16 %v1719_v14, %v1717_v1  ;;  %v1735_v1 = vld [vmem:[#allocation3 + $0x330] sm:$0xff] }
 0x163   :  { %2917 = vmatpush1.bf16.msra.mxu1 %v2916_v50 }
 0x164   :  { %3045 = vmatpush1.bf16.msra.mxu0 %v2916_v50  ;;  %2919 = vmatprep.subr.bf16.mxu1 %v2918_v42  ;;  %v2958_v50 = vpack.c.bf16 %v1692_v36, %v1690_v34  ;;  %v1721_v34 = vld [vmem:[#allocation3 + $0x2c0] sm:$0xff]  ;;  %v1723_v36 = vld [vmem:[#allocation3 + $0x2d0] sm:$0xff] }
 0x165   :  { %3047 = vmatprep.subr.bf16.mxu0 %v2918_v42  ;;  %v1689_v42 = vld [vmem:[#allocation3 + $0x1c0] sm:$0xff] }
 0x166   :  { %v2960_v63 = vpack.c.bf16 %v1691_v52, %v1689_v42 }
 0x167   :  { %2921 = vmatpush1.bf16.msra.mxu1 %v2920_v59 }
 0x168   :  { %3049 = vmatpush1.bf16.msra.mxu0 %v2920_v59  ;;  %2923 = vmatprep.subr.bf16.mxu1 %v2922_v27  ;;  %v2962_v59 = vpack.c.bf16 %v1696_v0, %v1694_v62 }
 0x169   :  { %3051 = vmatprep.subr.bf16.mxu0 %v2922_v27  ;;  %v1693_v27 = vld [vmem:[#allocation3 + $0x1e0] sm:$0xff] }
 0x16a   :  { %v2964_v55 = vpack.c.bf16 %v1695_v29, %v1693_v27  ;;  %v2992_v27 = vpack.c.bf16 %v1723_v36, %v1721_v34 }
 0x16b   :  { %2925 = vmatpush1.bf16.msra.mxu1 %v2924_v10 }
 0x16c   :  { %3053 = vmatpush1.bf16.msra.mxu0 %v2924_v10  ;;  %2927 = vmatprep.subr.bf16.mxu1 %v2926_v57  ;;  %v2966_v10 = vpack.c.bf16 %v1700_v43, %v1698_v41 }
 0x16d   :  { %3055 = vmatprep.subr.bf16.mxu0 %v2926_v57  ;;  %v1697_v57 = vld [vmem:[#allocation3 + $0x200] sm:$0xff] }
 0x16e   :  { %v2968_v28 = vpack.c.bf16 %v1699_v9, %v1697_v57 }
 0x16f   :  { %2929 = vmatpush1.bf16.msra.mxu1 %v2928_v44 }
 0x170   :  { %3057 = vmatpush1.bf16.msra.mxu0 %v2928_v44  ;;  %2931 = vmatprep.subr.bf16.mxu1 %v2930_v46  ;;  %v3713_v44 = vld [vmem:[%s3922_s1 + $0x60] sm:$0xff] }
 0x171   :  { %3059 = vmatprep.subr.bf16.mxu0 %v2930_v46  ;;  %v2970_v46 = vpack.c.bf16 %v1704_v54, %v1702_v23  ;;  %v1730_v54 = vld [vmem:[#allocation3 + $0x308] sm:$0xff] }
 0x173   :  { %2933 = vmatpush1.bf16.msra.mxu1 %v2932_v7 }
 0x174   :  { %3061 = vmatpush1.bf16.msra.mxu0 %v2932_v7  ;;  %2935 = vmatprep.subr.bf16.mxu1 %v2934_v11  ;;  %v1626_v7 = vld [vmem:[%s3922_s1 + $0xd8] sm:$0xff] }
 0x175   :  { %3063 = vmatprep.subr.bf16.mxu0 %v2934_v11  ;;  %v2972_v11 = vpack.c.bf16 %v1703_v4, %v1701_v60 }
 0x177   :  { %2937 = vmatpush1.bf16.msra.mxu1 %v2936_v22 }
 0x178   :  { %3065 = vmatpush1.bf16.msra.mxu0 %v2936_v22  ;;  %2939 = vmatprep.subr.bf16.mxu1 %v2938_v24  ;;  %v3731_v22 = vld [vmem:[%s3922_s1 + $0xe0] sm:$0xff] }
 0x179   :  { %3067 = vmatprep.subr.bf16.mxu0 %v2938_v24  ;;  %v1710_v24 = vld [vmem:[#allocation3 + $0x268] sm:$0xff] }
 0x17b   :  { %2941 = vmatpush1.bf16.msra.mxu1 %v2940_v35 }
 0x17c   :  { %3069 = vmatpush1.bf16.msra.mxu0 %v2940_v35  ;;  %2943 = vmatprep.subr.bf16.mxu1 %v2942_v53  ;;  %v1629_v35 = vld [vmem:[%s3922_s1 + $0x150] sm:$0xff] }
 0x17d   :  { %3071 = vmatprep.subr.bf16.mxu0 %v2942_v53  ;;  %v2978_v53 = vpack.c.bf16 %v1712_v25, %v1710_v24  ;;  %v1729_v24 = vld [vmem:[#allocation3 + $0x300] sm:$0xff]  ;;  %v1731_v25 = vld [vmem:[#allocation3 + $0x310] sm:$0xff] }
 0x17e   :  { %v3000_v61 = vpack.c.bf16 %v1731_v25, %v1729_v24  ;;  %v1759_v24 = vld [vmem:[#allocation3 + $0x3f0] sm:$0xff] }
 0x17f   :  { %2945 = vmatpush1.bf16.msra.mxu1 %v2944_v8 }
 0x180   :  { %3073 = vmatpush1.bf16.msra.mxu0 %v2944_v8  ;;  %2947 = vmatprep.subr.bf16.mxu1 %v2946_v49  ;;  %v1716_v8 = vld [vmem:[#allocation3 + $0x298] sm:$0xff] }
 0x181   :  { %3075 = vmatprep.subr.bf16.mxu0 %v2946_v49  ;;  %v2980_v49 = vpack.c.bf16 %v1711_v38, %v1709_v37  ;;  %v2982_v56 = vpack.c.bf16 %v1716_v8, %v1714_v48  ;;  %v1736_v37 = vld [vmem:[#allocation3 + $0x338] sm:$0xff] }
 0x183   :  { %2949 = vmatpush1.bf16.msra.mxu1 %v2948_v6 }
 0x184   :  { %3077 = vmatpush1.bf16.msra.mxu0 %v2948_v6  ;;  %2951 = vmatprep.subr.bf16.mxu1 %v2950_v3  ;;  %v1718_v6 = vld [vmem:[#allocation3 + $0x2a8] sm:$0xff] }
 0x185   :  { %3079 = vmatprep.subr.bf16.mxu0 %v2950_v3  ;;  %v1720_v3 = vld [vmem:[#allocation3 + $0x2b8] sm:$0xff] }
 0x186   :  { %v2986_v39 = vpack.c.bf16 %v1720_v3, %v1718_v6 }
 0x187   :  { %2953 = vmatpush1.bf16.msra.mxu1 %v2952_v31 }
 0x188   :  { %3081 = vmatpush1.bf16.msra.mxu0 %v2952_v31  ;;  %2955 = vmatprep.subr.bf16.mxu1 %v2954_v16  ;;  %v1722_v31 = vld [vmem:[#allocation3 + $0x2c8] sm:$0xff] }
 0x189   :  { %3083 = vmatprep.subr.bf16.mxu0 %v2954_v16  ;;  %v1724_v16 = vld [vmem:[#allocation3 + $0x2d8] sm:$0xff] }
 0x18a   :  { %v2990_v21 = vpack.c.bf16 %v1724_v16, %v1722_v31  ;;  %v1738_v16 = vld [vmem:[#allocation3 + $0x348] sm:$0xff] }
 0x18b   :  { %2957 = vmatpush1.bf16.msra.mxu1 %v2956_v12 }
 0x18c   :  { %3085 = vmatpush1.bf16.msra.mxu0 %v2956_v12  ;;  %2959 = vmatprep.subr.bf16.mxu1 %v2958_v50 }
 0x18d   :  { %3087 = vmatprep.subr.bf16.mxu0 %v2958_v50  ;;  %v1728_v50 = vld [vmem:[#allocation3 + $0x2f8] sm:$0xff] }
 0x18f   :  { %2961 = vmatpush1.bf16.msra.mxu1 %v2960_v63 }
 0x190   :  { %3089 = vmatpush1.bf16.msra.mxu0 %v2960_v63  ;;  %2963 = vmatprep.subr.bf16.mxu1 %v2962_v59 }
 0x191   :  { %3091 = vmatprep.subr.bf16.mxu0 %v2962_v59 }
 0x193   :  { %2965 = vmatpush1.bf16.msra.mxu1 %v2964_v55 }
 0x194   :  { %3093 = vmatpush1.bf16.msra.mxu0 %v2964_v55  ;;  %2967 = vmatprep.subr.bf16.mxu1 %v2966_v10  ;;  %v1725_v55 = vld [vmem:[#allocation3 + $0x2e0] sm:$0xff] }
 0x195   :  { %3095 = vmatprep.subr.bf16.mxu0 %v2966_v10  ;;  %v1727_v10 = vld [vmem:[#allocation3 + $0x2f0] sm:$0xff] }
 0x196   :  { %1826 = vmatmul.mubr.f32.vlgmr.msra.gmra.mrb[18].mxu1 %v3683_v45  ;;  %v2974_v45 = vpack.c.bf16 %v1708_v17, %v1706_v5 }
 0x197   :  { %2969 = vmatpush1.bf16.msra.mxu1 %v2968_v28  ;;  %2144 = vmatmul.mubr.f32.vlgmr.msra.gmra.mrb[18].mxu0 %v3713_v44 }
 0x198   :  { %3097 = vmatpush1.bf16.msra.mxu0 %v2968_v28  ;;  %2971 = vmatprep.subr.bf16.mxu1 %v2970_v46  ;;  %v1732_v28 = vld [vmem:[#allocation3 + $0x318] sm:$0xff] }
 0x199   :  { %3099 = vmatprep.subr.bf16.mxu0 %v2970_v46  ;;  %1831 = vmatprep.mubr.f32.mxu1 %v1626_v7  ;;  %v2998_v20 = vpack.c.bf16 %v1732_v28, %v1730_v54  ;;  %v1749_v54 = vld [vmem:[#allocation3 + $0x3a0] sm:$0xff]  ;;  %v1751_v28 = vld [vmem:[#allocation3 + $0x3b0] sm:$0xff] }
 0x19a   :  { %2149 = vmatprep.mubr.f32.mxu0 %v3723_v13  ;;  %1832 = vmatmul.mubr.f32.gmra.mrb[20].mxu1 %v1625_v15  ;;  %v2996_v15 = vpack.c.bf16 %v1727_v10, %v1725_v55  ;;  %v1747_v55 = vld [vmem:[#allocation3 + $0x390] sm:$0xff]  ;;  %v1750_v10 = vld [vmem:[#allocation3 + $0x3a8] sm:$0xff] }
 0x19b   :  { %2973 = vmatpush1.bf16.msra.mxu1 %v2972_v11  ;;  %2150 = vmatmul.mubr.f32.gmra.mrb[20].mxu0 %v3731_v22 }
 0x19c   :  { %3101 = vmatpush1.bf16.msra.mxu0 %v2972_v11  ;;  %2975 = vmatprep.subr.bf16.mxu1 %v2974_v45 }
 0x19d   :  { %3103 = vmatprep.subr.bf16.mxu0 %v2974_v45  ;;  %1837 = vmatprep.mubr.f32.mxu1 %v1630_v30 }
 0x19e   :  { %2155 = vmatprep.mubr.f32.mxu0 %v3741_v33  ;;  %1838 = vmatmul.mubr.f32.gmra.mrb[22].mxu1 %v1629_v35 }
 0x19f   :  { %2977 = vmatpush1.bf16.msra.mxu1 %v2976_v32  ;;  %2156 = vmatmul.mubr.f32.gmra.mrb[22].mxu0 %v3749_v47 }
 0x1a0   :  { %3105 = vmatpush1.bf16.msra.mxu0 %v2976_v32  ;;  %2979 = vmatprep.subr.bf16.mxu1 %v2978_v53 }
 0x1a1   :  { %3107 = vmatprep.subr.bf16.mxu0 %v2978_v53  ;;  %1908 = vmatprep.mubr.f32.mxu1 %v3706_v40  ;;  %v1726_v40 = vld [vmem:[#allocation3 + $0x2e8] sm:$0xff] }
 0x1a2   :  { %2226 = vmatprep.mubr.f32.mxu0 %v1942_v51  ;;  %v2994_v43 = vpack.c.bf16 %v1728_v50, %v1726_v40  ;;  %v1734_v53 = vld [vmem:[#allocation3 + $0x328] sm:$0xff]  ;;  %v1739_v40 = vld [vmem:[#allocation3 + $0x350] sm:$0xff] }
 0x1a3   :  { %2981 = vmatpush1.bf16.msra.mxu1 %v2980_v49  ;;  %v1742_v50 = vld [vmem:[#allocation3 + $0x368] sm:$0xff] }
 0x1a4   :  { %3109 = vmatpush1.bf16.msra.mxu0 %v2980_v49  ;;  %2983 = vmatprep.subr.bf16.mxu1 %v2982_v56 }
 0x1a5   :  { %3111 = vmatprep.subr.bf16.mxu0 %v2982_v56 }
 0x1a7   :  { %2985 = vmatpush1.bf16.msra.mxu1 %v2984_v18 }
 0x1a8   :  { %3113 = vmatpush1.bf16.msra.mxu0 %v2984_v18  ;;  %2987 = vmatprep.subr.bf16.mxu1 %v2986_v39  ;;  %v3002_v18 = vpack.c.bf16 %v1736_v37, %v1734_v53  ;;  %v1950_v53 = vld [vmem:[%s3922_s1 + $0x178] sm:$0xff] }
 0x1a9   :  { %v638_v12 = vpop.f32.mrb[6].mxu1  ;;  %3115 = vmatprep.subr.bf16.mxu0 %v2986_v39  ;;  %v1733_v39 = vld [vmem:[#allocation3 + $0x320] sm:$0xff] }
 0x1aa   :  { %v3170_v42 = vadd.f32 %v638_v12, %v3654_v26  ;;  %v956_v52 = vpop.f32.mrb[6].mxu0  ;;  %v640_v62 = vpop.f32.mrb[7].mxu1  ;;  %v3004_v34 = vpack.c.bf16 %v1735_v1, %v1733_v39  ;;  %v1737_v12 = vld [vmem:[#allocation3 + $0x340] sm:$0xff] }
 0x1ab   :  { %v3176_v0 = vadd.f32 %v956_v52, %v3654_v26  ;;  %v3171_v63 = vadd.f32 %v640_v62, %v3654_v26  ;;  %v958_v59 = vpop.f32.mrb[7].mxu0  ;;  %2989 = vmatpush1.bf16.msra.mxu1 %v2988_v2  ;;  %v3008_v52 = vpack.c.bf16 %v1739_v40, %v1737_v12 }
 0x1ac   :  { %v655_v29 = vmax.f32 %v3170_v42, 0.0  ;;  %v3177_v41 = vadd.f32 %v958_v59, %v3654_v26  ;;  %3117 = vmatpush1.bf16.msra.mxu0 %v2988_v2  ;;  %2991 = vmatprep.subr.bf16.mxu1 %v2990_v21  ;;  %v1740_v2 = vld [vmem:[#allocation3 + $0x358] sm:$0xff]  ;;  %v1746_v59 = vld [vmem:[#allocation3 + $0x388] sm:$0xff] }
 0x1ad   :  { %v973_v57 = vmax.f32 %v3176_v0, 0.0  ;;  %v656_v9 = vmax.f32 %v3171_v63, 0.0  ;;  %v644_v23 = vpop.f32.mrb[8].mxu1  ;;  %3119 = vmatprep.subr.bf16.mxu0 %v2990_v21  ;;  %v3006_v36 = vpack.c.bf16 %v1740_v2, %v1738_v16  ;;  %v1744_v42 = vld [vmem:[#allocation3 + $0x378] sm:$0xff]  ;;  %v1741_v0 = vld [vmem:[#allocation3 + $0x360] sm:$0xff]  ;;  %v1743_v63 = vld [vmem:[#allocation3 + $0x370] sm:$0xff] }
 0x1ae   :  { %661 = vst [vmem:[%s3924_s3 + $0x10] sm:$0xff] %v655_v29  ;;  %v974_v46 = vmax.f32 %v3177_v41, 0.0  ;;  %v3172_v60 = vadd.f32 %v644_v23, %v3654_v26  ;;  %v962_v4 = vpop.f32.mrb[8].mxu0  ;;  %v646_v5 = vpop.f32.mrb[9].mxu1  ;;  %v3010_v62 = vpack.c.bf16 %v1744_v42, %v1742_v50  ;;  %v3012_v29 = vpack.c.bf16 %v1743_v63, %v1741_v0 }
 0x1af   :  { %979 = vst [vmem:[%s3924_s3 + $0x20] sm:$0xff] %v973_v57  ;;  %662 = vst [vmem:[%s3924_s3 + $0x18] sm:$0xff] %v656_v9  ;;  %v3178_v17 = vadd.f32 %v962_v4, %v3654_v26  ;;  %v3173_v7 = vadd.f32 %v646_v5, %v3654_v26  ;;  %v964_v11 = vpop.f32.mrb[9].mxu0  ;;  %2993 = vmatpush1.bf16.msra.mxu1 %v2992_v27  ;;  %v1752_v57 = vld [vmem:[#allocation3 + $0x3b8] sm:$0xff]  ;;  %v3020_v4 = vpack.c.bf16 %v1751_v28, %v1749_v54 }
 0x1b0   :  { %980 = vst [vmem:[%s3924_s3 + $0x28] sm:$0xff] %v974_v46  ;;  %v657_v45 = vmax.f32 %v3172_v60, 0.0  ;;  %v3179_v19 = vadd.f32 %v964_v11, %v3654_v26  ;;  %3121 = vmatpush1.bf16.msra.mxu0 %v2992_v27  ;;  %2995 = vmatprep.subr.bf16.mxu1 %v2994_v43  ;;  %v1748_v27 = vld [vmem:[#allocation3 + $0x398] sm:$0xff]  ;;  %v3018_v23 = vpack.c.bf16 %v1752_v57, %v1750_v10  ;;  %v1754_v46 = vld [vmem:[#allocation3 + $0x3c8] sm:$0xff] }
 0x1b1   :  { %v975_v30 = vmax.f32 %v3178_v17, 0.0  ;;  %v658_v32 = vmax.f32 %v3173_v7, 0.0  ;;  %v650_v35 = vpop.f32.mrb[10].mxu1  ;;  %3123 = vmatprep.subr.bf16.mxu0 %v2994_v43  ;;  %v3014_v41 = vpack.c.bf16 %v1748_v27, %v1746_v59  ;;  %v1745_v43 = vld [vmem:[#allocation3 + $0x380] sm:$0xff]  ;;  %v1756_v60 = vld [vmem:[#allocation3 + $0x3d8] sm:$0xff]  ;;  %v1755_v7 = vld [vmem:[#allocation3 + $0x3d0] sm:$0xff] }
 0x1b2   :  { %663 = vst [vmem:[%s3924_s3 + $0x80] sm:$0xff] %v657_v45  ;;  %v976_v38 = vmax.f32 %v3179_v19, 0.0  ;;  %v3174_v48 = vadd.f32 %v650_v35, %v3654_v26  ;;  %v968_v8 = vpop.f32.mrb[10].mxu0  ;;  %v652_v49 = vpop.f32.mrb[11].mxu1  ;;  %v3016_v9 = vpack.c.bf16 %v1747_v55, %v1745_v43  ;;  %v3022_v5 = vpack.c.bf16 %v1756_v60, %v1754_v46  ;;  %v1753_v17 = vld [vmem:[#allocation3 + $0x3c0] sm:$0xff]  ;;  %v1758_v11 = vld [vmem:[#allocation3 + $0x3e8] sm:$0xff] }
 0x1b3   :  { %981 = vst [vmem:[%s3924_s3 + $0x90] sm:$0xff] %v975_v30  ;;  %664 = vst [vmem:[%s3924_s3 + $0x88] sm:$0xff] %v658_v32  ;;  %v3180_v51 = vadd.f32 %v968_v8, %v3654_v26  ;;  %v3175_v56 = vadd.f32 %v652_v49, %v3654_v26  ;;  %v970_v58 = vpop.f32.mrb[11].mxu0  ;;  %2997 = vmatpush1.bf16.msra.mxu1 %v2996_v15  ;;  %v3024_v45 = vpack.c.bf16 %v1755_v7, %v1753_v17  ;;  %v1941_v30 = vld [vmem:[%s3922_s1 + $0x70] sm:$0xff]  ;;  %v1946_v32 = vld [vmem:[%s3922_s1 + $0xf8] sm:$0xff] }
 0x1b4   :  { %982 = vst [vmem:[%s3924_s3 + $0x98] sm:$0xff] %v976_v38  ;;  %v659_v6 = vmax.f32 %v3174_v48, 0.0  ;;  %v3181_v3 = vadd.f32 %v970_v58, %v3654_v26  ;;  %3125 = vmatpush1.bf16.msra.mxu0 %v2996_v15  ;;  %2999 = vmatprep.subr.bf16.mxu1 %v2998_v20  ;;  %v1760_v15 = vld [vmem:[#allocation3 + $0x3f8] sm:$0xff]  ;;  %v1945_v35 = vld [vmem:[%s3922_s1 + $0xf0] sm:$0xff] }
 0x1b5   :  { %v977_v14 = vmax.f32 %v3180_v51, 0.0  ;;  %v660_v31 = vmax.f32 %v3175_v56, 0.0  ;;  %3127 = vmatprep.subr.bf16.mxu0 %v2998_v20  ;;  %v3026_v19 = vpack.c.bf16 %v1760_v15, %v1758_v11  ;;  %v1757_v20 = vld [vmem:[#allocation3 + $0x3e0] sm:$0xff] }
 0x1b6   :  { %665 = vst [vmem:[%s3924_s3 + $0xf0] sm:$0xff] %v659_v6  ;;  %v978_v21 = vmax.f32 %v3181_v3, 0.0  ;;  %v3028_v25 = vpack.c.bf16 %v1759_v24, %v1757_v20 }
 0x1b7   :  { %983 = vst [vmem:[%s3924_s3 + $0x100] sm:$0xff] %v977_v14  ;;  %666 = vst [vmem:[%s3924_s3 + $0xf8] sm:$0xff] %v660_v31  ;;  %3001 = vmatpush1.bf16.msra.mxu1 %v3000_v61 }
 0x1b8   :  { %984 = vst [vmem:[%s3924_s3 + $0x108] sm:$0xff] %v978_v21  ;;  %3129 = vmatpush1.bf16.msra.mxu0 %v3000_v61  ;;  %3003 = vmatprep.subr.bf16.mxu1 %v3002_v18 }
 0x1b9   :  { %3131 = vmatprep.subr.bf16.mxu0 %v3002_v18 }
 0x1bb   :  { %3005 = vmatpush1.bf16.msra.mxu1 %v3004_v34 }
 0x1bc   :  { %3133 = vmatpush1.bf16.msra.mxu0 %v3004_v34  ;;  %3007 = vmatprep.subr.bf16.mxu1 %v3006_v36 }
 0x1bd   :  { %3135 = vmatprep.subr.bf16.mxu0 %v3006_v36 }
 0x1bf   :  { %3009 = vmatpush1.bf16.msra.mxu1 %v3008_v52 }
 0x1c0   :  { %3137 = vmatpush1.bf16.msra.mxu0 %v3008_v52  ;;  %3011 = vmatprep.subr.bf16.mxu1 %v3010_v62 }
 0x1c1   :  { %3139 = vmatprep.subr.bf16.mxu0 %v3010_v62 }
 0x1c3   :  { %3013 = vmatpush1.bf16.msra.mxu1 %v3012_v29 }
 0x1c4   :  { %3141 = vmatpush1.bf16.msra.mxu0 %v3012_v29  ;;  %3015 = vmatprep.subr.bf16.mxu1 %v3014_v41 }
 0x1c5   :  { %3143 = vmatprep.subr.bf16.mxu0 %v3014_v41 }
 0x1c7   :  { %3017 = vmatpush1.bf16.msra.mxu1 %v3016_v9 }
 0x1c8   :  { %3145 = vmatpush1.bf16.msra.mxu0 %v3016_v9  ;;  %3019 = vmatprep.subr.bf16.mxu1 %v3018_v23 }
 0x1c9   :  { %3147 = vmatprep.subr.bf16.mxu0 %v3018_v23 }
 0x1cb   :  { %3021 = vmatpush1.bf16.msra.mxu1 %v3020_v4 }
 0x1cc   :  { %3149 = vmatpush1.bf16.msra.mxu0 %v3020_v4  ;;  %3023 = vmatprep.subr.bf16.mxu1 %v3022_v5 }
 0x1cd   :  { %3151 = vmatprep.subr.bf16.mxu0 %v3022_v5 }
 0x1cf   :  { %3025 = vmatpush1.bf16.msra.mxu1 %v3024_v45 }
 0x1d0   :  { %3153 = vmatpush1.bf16.msra.mxu0 %v3024_v45  ;;  %3027 = vmatprep.subr.bf16.mxu1 %v3026_v19 }
 0x1d1   :  { %3155 = vmatprep.subr.bf16.mxu0 %v3026_v19 }
 0x1d3   :  { %3029 = vmatpush1.bf16.msra.mxu1 %v3028_v25 }
 0x1d4   :  { %3157 = vmatpush1.bf16.msra.mxu0 %v3028_v25 }
 0x1d6   :  { %1909 = vmatmul.mubr.f32.vlgmr.msra.gmra.mrb[18].mxu1 %v3713_v44  ;;  %v1949_v44 = vld [vmem:[%s3922_s1 + $0x170] sm:$0xff] }
 0x1d7   :  { %2227 = vmatmul.mubr.f32.vlgmr.msra.gmra.mrb[18].mxu0 %v1941_v30  ;;  %1914 = vmatprep.mubr.f32.mxu1 %v3723_v13 }
 0x1d8   :  { %2232 = vmatprep.mubr.f32.mxu0 %v1946_v32 }
 0x1da   :  { %1915 = vmatmul.mubr.f32.gmra.mrb[20].mxu1 %v3731_v22 }
 0x1db   :  { %2233 = vmatmul.mubr.f32.gmra.mrb[20].mxu0 %v1945_v35  ;;  %1920 = vmatprep.mubr.f32.mxu1 %v3741_v33 }
 0x1dc   :  { %2238 = vmatprep.mubr.f32.mxu0 %v1950_v53 }
 0x1de   :  { %1921 = vmatmul.mubr.f32.gmra.mrb[22].mxu1 %v3749_v47 }
 0x1df   :  { %2239 = vmatmul.mubr.f32.gmra.mrb[22].mxu0 %v1949_v44 }
 0x229   :  { %v1274_v13 = vpop.f32.mrb[12].mxu1 }
 0x22a   :  { %v3182_v37 = vadd.f32 %v1274_v13, %v3654_v26  ;;  %v1592_v38 = vpop.f32.mrb[12].mxu0  ;;  %v1276_v48 = vpop.f32.mrb[13].mxu1 }
 0x22b   :  { %v3188_v8 = vadd.f32 %v1592_v38, %v3654_v26  ;;  %v3183_v22 = vadd.f32 %v1276_v48, %v3654_v26  ;;  %v1594_v49 = vpop.f32.mrb[13].mxu0 }
 0x22c   :  { %v1291_v51 = vmax.f32 %v3182_v37, 0.0  ;;  %v3189_v33 = vadd.f32 %v1594_v49, %v3654_v26 }
 0x22d   :  { %v1609_v56 = vmax.f32 %v3188_v8, 0.0  ;;  %v1292_v58 = vmax.f32 %v3183_v22, 0.0  ;;  %v1280_v61 = vpop.f32.mrb[14].mxu1 }
 0x22e   :  { %1297 = vst [vmem:[%s3924_s3 + $0x30] sm:$0xff] %v1291_v51  ;;  %v1610_v47 = vmax.f32 %v3189_v33, 0.0  ;;  %v3184_v6 = vadd.f32 %v1280_v61, %v3654_v26  ;;  %v1598_v3 = vpop.f32.mrb[14].mxu0  ;;  %v1282_v18 = vpop.f32.mrb[15].mxu1 }
 0x22f   :  { %1615 = vst [vmem:[%s3924_s3 + $0x40] sm:$0xff] %v1609_v56  ;;  %1298 = vst [vmem:[%s3924_s3 + $0x38] sm:$0xff] %v1292_v58  ;;  %v3190_v39 = vadd.f32 %v1598_v3, %v3654_v26  ;;  %v3185_v1 = vadd.f32 %v1282_v18, %v3654_v26  ;;  %v1600_v14 = vpop.f32.mrb[15].mxu0 }
 0x230   :  { %1616 = vst [vmem:[%s3924_s3 + $0x48] sm:$0xff] %v1610_v47  ;;  %v1293_v31 = vmax.f32 %v3184_v6, 0.0  ;;  %v3191_v16 = vadd.f32 %v1600_v14, %v3654_v26 }
 0x231   :  { %v1611_v2 = vmax.f32 %v3190_v39, 0.0  ;;  %v1294_v21 = vmax.f32 %v3185_v1, 0.0  ;;  %v1286_v34 = vpop.f32.mrb[16].mxu1 }
 0x232   :  { %1299 = vst [vmem:[%s3924_s3 + $0xa0] sm:$0xff] %v1293_v31  ;;  %v1612_v36 = vmax.f32 %v3191_v16, 0.0  ;;  %v3186_v12 = vadd.f32 %v1286_v34, %v3654_v26  ;;  %v1604_v40 = vpop.f32.mrb[16].mxu0  ;;  %v1288_v50 = vpop.f32.mrb[17].mxu1 }
 0x233   :  { %1617 = vst [vmem:[%s3924_s3 + $0xb0] sm:$0xff] %v1611_v2  ;;  %1300 = vst [vmem:[%s3924_s3 + $0xa8] sm:$0xff] %v1294_v21  ;;  %v3192_v42 = vadd.f32 %v1604_v40, %v3654_v26  ;;  %v3187_v52 = vadd.f32 %v1288_v50, %v3654_v26  ;;  %v1606_v62 = vpop.f32.mrb[17].mxu0 }
 0x234   :  { %1618 = vst [vmem:[%s3924_s3 + $0xb8] sm:$0xff] %v1612_v36  ;;  %v1295_v0 = vmax.f32 %v3186_v12, 0.0  ;;  %v3193_v63 = vadd.f32 %v1606_v62, %v3654_v26 }
 0x235   :  { %v1613_v59 = vmax.f32 %v3192_v42, 0.0  ;;  %v1296_v27 = vmax.f32 %v3187_v52, 0.0 }
 0x236   :  { %1301 = vst [vmem:[%s3924_s3 + $0x110] sm:$0xff] %v1295_v0  ;;  %v1614_v29 = vmax.f32 %v3193_v63, 0.0 }
 0x237   :  { %1619 = vst [vmem:[%s3924_s3 + $0x120] sm:$0xff] %v1613_v59  ;;  %1302 = vst [vmem:[%s3924_s3 + $0x118] sm:$0xff] %v1296_v27 }
 0x238   :  { %1620 = vst [vmem:[%s3924_s3 + $0x128] sm:$0xff] %v1614_v29 }
 0x2a9   :  { %v1910_v41 = vpop.f32.mrb[18].mxu1 }
 0x2aa   :  { %v3194_v43 = vadd.f32 %v1910_v41, %v3654_v26  ;;  %v2228_v55 = vpop.f32.mrb[18].mxu0  ;;  %v1912_v10 = vpop.f32.mrb[19].mxu1 }
 0x2ab   :  { %v3200_v57 = vadd.f32 %v2228_v55, %v3654_v26  ;;  %v3195_v9 = vadd.f32 %v1912_v10, %v3654_v26  ;;  %v2230_v23 = vpop.f32.mrb[19].mxu0 }
 0x2ac   :  { %v1927_v54 = vmax.f32 %v3194_v43, 0.0  ;;  %v3201_v28 = vadd.f32 %v2230_v23, %v3654_v26 }
 0x2ad   :  { %v2245_v46 = vmax.f32 %v3200_v57, 0.0  ;;  %v1928_v60 = vmax.f32 %v3195_v9, 0.0  ;;  %v1916_v4 = vpop.f32.mrb[20].mxu1 }
 0x2ae   :  { %1933 = vst [vmem:[%s3924_s3 + $0x50] sm:$0xff] %v1927_v54  ;;  %v2246_v5 = vmax.f32 %v3201_v28, 0.0  ;;  %v3196_v17 = vadd.f32 %v1916_v4, %v3654_v26  ;;  %v2234_v7 = vpop.f32.mrb[20].mxu0  ;;  %v1918_v11 = vpop.f32.mrb[21].mxu1 }
 0x2af   :  { %2251 = vst [vmem:[%s3924_s3 + $0x60] sm:$0xff] %v2245_v46  ;;  %1934 = vst [vmem:[%s3924_s3 + $0x58] sm:$0xff] %v1928_v60  ;;  %v3202_v15 = vadd.f32 %v2234_v7, %v3654_v26  ;;  %v3197_v45 = vadd.f32 %v1918_v11, %v3654_v26  ;;  %v2236_v19 = vpop.f32.mrb[21].mxu0 }
 0x2b0   :  { %2252 = vst [vmem:[%s3924_s3 + $0x68] sm:$0xff] %v2246_v5  ;;  %v1929_v20 = vmax.f32 %v3196_v17, 0.0  ;;  %v3203_v24 = vadd.f32 %v2236_v19, %v3654_v26 }
 0x2b1   :  { %v2247_v25 = vmax.f32 %v3202_v15, 0.0  ;;  %v1930_v30 = vmax.f32 %v3197_v45, 0.0  ;;  %v1922_v32 = vpop.f32.mrb[22].mxu1 }
 0x2b2   :  { %1935 = vst [vmem:[%s3924_s3 + $0xc0] sm:$0xff] %v1929_v20  ;;  %v2248_v35 = vmax.f32 %v3203_v24, 0.0  ;;  %v3198_v53 = vadd.f32 %v1922_v32, %v3654_v26  ;;  %v2240_v44 = vpop.f32.mrb[22].mxu0  ;;  %v1924_v13 = vpop.f32.mrb[23].mxu1 }
 0x2b3   :  { %2253 = vst [vmem:[%s3924_s3 + $0xd0] sm:$0xff] %v2247_v25  ;;  %1936 = vst [vmem:[%s3924_s3 + $0xc8] sm:$0xff] %v1930_v30  ;;  %v3204_v37 = vadd.f32 %v2240_v44, %v3654_v26  ;;  %v3199_v38 = vadd.f32 %v1924_v13, %v3654_v26  ;;  %v2242_v48 = vpop.f32.mrb[23].mxu0 }
 0x2b4   :  { %2254 = vst [vmem:[%s3924_s3 + $0xd8] sm:$0xff] %v2248_v35  ;;  %v1931_v8 = vmax.f32 %v3198_v53, 0.0  ;;  %v3205_v22 = vadd.f32 %v2242_v48, %v3654_v26 }
 0x2b5   :  { %v2249_v49 = vmax.f32 %v3204_v37, 0.0  ;;  %v1932_v51 = vmax.f32 %v3199_v38, 0.0 }
 0x2b6   :  { %1937 = vst [vmem:[%s3924_s3 + $0x130] sm:$0xff] %v1931_v8  ;;  %v2250_v33 = vmax.f32 %v3205_v22, 0.0 }
 0x2b7   :  { %2255 = vst [vmem:[%s3924_s3 + $0x140] sm:$0xff] %v2249_v49  ;;  %1938 = vst [vmem:[%s3924_s3 + $0x138] sm:$0xff] %v1932_v51 }
 0x2b8   :  { %2256 = vst [vmem:[%s3924_s3 + $0x148] sm:$0xff] %v2250_v33 }
 0x2b9   :  { %2261 = vsyncpa [#allocation4], 1 }

// kernel: identity_forward.3
= control target key start
LH: loop header
LB: loop body
LE: loop exit
PB: predicated region body
PF: predicated region fallthrough
CT: control target
= control target key end

     0   :  { %s10778_s0 = inlined_call_operand.vmem [shape: f32[8,17408], index: 0, kind: input, shape index: {}]   ;;  %s10779_s1 = inlined_call_operand.hbm [shape: f32[17408,512], index: 1, kind: input, shape index: {}]   ;;  %s10780_s2 = inlined_call_operand.hbm [shape: f32[1,512], index: 2, kind: input, shape index: {}]   ;;  %s10781_s3 = inlined_call_operand.hbm [shape: f32[512,128], index: 3, kind: input, shape index: {}]   ;;  %s10782_s4 = inlined_call_operand.hbm [shape: f32[1,128], index: 4, kind: input, shape index: {}]   ;;  %s10783_s5 = inlined_call_operand.hbm [shape: f32[128,128], index: 5, kind: input, shape index: {}]   ;;  %s10784_s6 = inlined_call_operand.hbm [shape: f32[1,128], index: 6, kind: input, shape index: {}]   ;;  %s10785_s7 = inlined_call_operand.vmem [shape: f32[8,128], index: 7, kind: output, shape index: {}]  }
   0x1   :  { %10788 = sst [smem:[#allocation17_spill]] %s10780_s2 }
   0x2   :  { %12 = vsyncpa [#allocation4], 0 }
   0x3   :  { %14 = vsyncpa [#allocation4 + $0x1], 0 }
   0x4   :  { %15 = vsyncpa [#allocation6], 0 }
   0x5   :  { %16 = vsyncpa [#allocation9], 0 }
   0x6   :  { %17 = vsyncpa [#allocation12], 0  ;;  %s8310_s24 = smov 0   ;;  %s8312_s25 = smov 0  }
   0x7   :  { %s8314_s26 = smov 0   ;;  %s8316_s27 = smov 0  }
   0x8 LB: > { %s8256_s28 = smov [#allocation5]   ;;  %s8331_s30 = sadd.s32 4294967295, %s8254_s27   ;;  %s8254_s27 = sphi %s8316_s27, %s10807_s27   ;;  %s8250_s26 = sphi %s8314_s26, %s10806_s26   ;;  %s8246_s25 = sphi %s8312_s25, %s10805_s25   ;;  %s8242_s24 = sphi %s8310_s24, %s10804_s24  }
   0x9   : > { %s219_s29 = sshll.u32 %s8256_s28, 4  ;;  %p5463_p0 = scmp.ge.s32.totalorder %s8254_s27, 1  ;;  %s220_s29 = int_to_ptr.vmem [resolvable:$true] %s219_s29 }
   0xa   : > { %p10786_p1 = scmp.eq.s32.totalorder %s8331_s30, 0  ;;  %p206_p2 = scmp.lt.s32.totalorder %s8254_s27, 5 }
   0xb   : > { %s8257_s9 = smov [#allocation8]   ;;  %s8258_s11 = smov [#allocation7]  }
   0xc   : > { %p8337_p4 = pnand %p5463_p0, %p206_p2  ;;  %s243_s10 = sshll.u32 %s8257_s9, 4  ;;  %s8343_s10 = int_to_ptr.vmem [resolvable:$true] %s243_s10 }
   0xd   : > { %s229_s12 = sshll.u32 %s8258_s11, 4  ;;  %s10791_s2 = sld [smem:[#allocation17_spill]]  ;;  %s8351_s12 = int_to_ptr.vmem [resolvable:$true] %s229_s12 }
   0xe   : > { %s10789_s8 = scalar_select %p8337_p4, 1, 0 }
   0xf   : > { %p7962_p5 = pneg %p8337_p4 }
  0x11   : > { %p8347_p6 = pnand %p7962_p5, %p10786_p1 }
  0x13   : > { %s8038_s16 = scalar_lea.hbm %s10791_s2, 64  ;;  %p8361_p8 = pneg %p8347_p6 }
  0x14   : > { %p8039_p7 = scmp.ne.s32.totalorder %s10791_s2, %s8038_s16  ;;  %p8045_p11 = scmp.lt.u32.totalorder %s8038_s16, %s10791_s2 }
  0x16   : > { %p8041_p9 = pnand %p8361_p8, %p8039_p7 }
  0x18   : > { %p8042_p10 = pneg %p8041_p9 }
  0x1a   : > { %p8047_p12 = pnand %p8045_p11, %p8042_p10 }
  0x1c   : > { %8050 = shalt.err (!%p8047_p12)
}
  0x1d   : > { %s8051_s22 = scalar_lea.vmem %s220_s29, 64  ;;  %p8059_p5 = scmp.lt.s32.totalorder %s220_s29, %s220_s29 }
  0x1e   : > { %p8052_p13 = scmp.ne.s32.totalorder %s220_s29, %s8051_s22  ;;  %p8060_p3 = scmp.lt.s32.totalorder %s8051_s22, %s8051_s22 }
  0x20   : > { %p8054_p0 = pnand %p8052_p13, %p8361_p8  ;;  %p8061_p1 = por %p8060_p3, %p8059_p5 }
  0x22   : > { %p8055_p2 = pneg %p8054_p0 }
  0x24   : > { %p8062_p4 = pnand %p8061_p1, %p8055_p2 }
  0x26   : > { %8065 = shalt.err (!%p8062_p4)
}
  0x27   : > { %7965 = dma.hbm_to_vmem [thread:$0]  (!%p8347_p6), %s10791_s2, 64, %s220_s29, [#allocation6]  }
  0x28   : > { %s8066_s14 = scalar_lea.hbm %s10782_s4, 16 }
  0x29   : > { %p8067_p7 = scmp.ne.s32.totalorder %s10782_s4, %s8066_s14  ;;  %p8073_p1 = scmp.lt.u32.totalorder %s8066_s14, %s10782_s4 }
  0x2b   : > { %p8069_p9 = pnand %p8067_p7, %p8361_p8 }
  0x2d   : > { %p8070_p3 = pneg %p8069_p9 }
  0x2f   : > { %p8075_p4 = pnand %p8073_p1, %p8070_p3 }
  0x31   : > { %8078 = shalt.err (!%p8075_p4)
}
  0x32   : > { %s8079_s29 = scalar_lea.vmem %s8343_s10, 16  ;;  %s8086_s20 = scalar_lea.vmem %s8343_s10, 32 }
  0x33   : > { %p8080_p10 = scmp.ne.s32.totalorder %s8343_s10, %s8079_s29  ;;  %p8087_p13 = scmp.lt.s32.totalorder %s8343_s10, %s8343_s10 }
  0x34   : > { %p8088_p0 = scmp.lt.s32.totalorder %s8086_s20, %s8079_s29 }
  0x35   : > { %p8082_p11 = pnand %p8080_p10, %p8361_p8 }
  0x36   : > { %p8089_p2 = por %p8088_p0, %p8087_p13 }
  0x37   : > { %p8083_p12 = pneg %p8082_p11 }
  0x39   : > { %p8090_p5 = pnand %p8089_p2, %p8083_p12 }
  0x3b   : > { %8093 = shalt.err (!%p8090_p5)
}
  0x3c   : > { %7971 = dma.hbm_to_vmem [thread:$0]  (!%p8347_p6), %s10782_s4, 16, %s8343_s10, [#allocation9]  }
  0x3d   : > { %s8094_s9 = scalar_lea.hbm %s10781_s3, 8192 }
  0x3e   : > { %p8095_p7 = scmp.ne.s32.totalorder %s10781_s3, %s8094_s9  ;;  %p8101_p1 = scmp.lt.u32.totalorder %s8094_s9, %s10781_s3 }
  0x40   : > { %p8097_p9 = pnand %p8095_p7, %p8361_p8 }
  0x42   : > { %p8098_p3 = pneg %p8097_p9 }
  0x44   : > { %p8103_p4 = pnand %p8101_p1, %p8098_p3 }
  0x46   : > { %8106 = shalt.err (!%p8103_p4)
}
  0x47   : > { %s8107_s10 = scalar_lea.vmem %s8351_s12, 8192  ;;  %p8115_p13 = scmp.lt.s32.totalorder %s8351_s12, %s8351_s12 }
  0x48   : > { %p8108_p10 = scmp.ne.s32.totalorder %s8351_s12, %s8107_s10  ;;  %p8116_p0 = scmp.lt.s32.totalorder %s8107_s10, %s8107_s10 }
  0x4a   : > { %p8110_p11 = pnand %p8108_p10, %p8361_p8  ;;  %p8117_p2 = por %p8116_p0, %p8115_p13 }
  0x4c   : > { %p8111_p12 = pneg %p8110_p11 }
  0x4e   : > { %p8118_p5 = pnand %p8117_p2, %p8111_p12 }
  0x50   : > { %8121 = shalt.err (!%p8118_p5)
}
  0x51   : > { %s8259_s17 = smov 128   ;;  %s8260_s18 = smov 8  }
  0x52   : > { %7968 = dma.hbm_to_vmem [thread:$0]  (!%p8347_p6), %s10781_s3, 8192, %s8351_s12, [#allocation6], %s8259_s17, %s8259_s17, %s8260_s18  }
  0x53   : > { %s8261_s21 = smov [#allocation10]   ;;  %s8262_s23 = smov [#allocation11]  }
  0x54   : > { %s253_s22 = sshll.u32 %s8261_s21, 4  ;;  %s267_s28 = sshll.u32 %s8262_s23, 4  ;;  %s254_s22 = int_to_ptr.vmem [resolvable:$true] %s253_s22  ;;  %s268_s28 = int_to_ptr.vmem [resolvable:$true] %s267_s28 }
  0x55   : > { %s8122_s14 = scalar_lea.hbm %s10783_s5, 2048 }
  0x56   : > { %p8123_p7 = scmp.ne.s32.totalorder %s10783_s5, %s8122_s14  ;;  %p8129_p1 = scmp.lt.u32.totalorder %s8122_s14, %s10783_s5 }
  0x58   : > { %p8125_p9 = pnand %p8123_p7, %p8361_p8 }
  0x5a   : > { %p8126_p3 = pneg %p8125_p9 }
  0x5c   : > { %p8131_p4 = pnand %p8129_p1, %p8126_p3 }
  0x5e   : > { %8134 = shalt.err (!%p8131_p4)
}
  0x5f   : > { %s8135_s12 = scalar_lea.vmem %s254_s22, 2048  ;;  %p8143_p13 = scmp.lt.s32.totalorder %s254_s22, %s254_s22 }
  0x60   : > { %p8136_p10 = scmp.ne.s32.totalorder %s254_s22, %s8135_s12  ;;  %p8144_p0 = scmp.lt.s32.totalorder %s8135_s12, %s8135_s12 }
  0x62   : > { %p8138_p11 = pnand %p8136_p10, %p8361_p8  ;;  %p8145_p2 = por %p8144_p0, %p8143_p13 }
  0x64   : > { %p8139_p12 = pneg %p8138_p11 }
  0x66   : > { %p8146_p5 = pnand %p8145_p2, %p8139_p12 }
  0x68   : > { %8149 = shalt.err (!%p8146_p5)
}
  0x69   : > { %7974 = dma.hbm_to_vmem [thread:$0]  (!%p8347_p6), %s10783_s5, 2048, %s254_s22, [#allocation9], %s8259_s17, %s8259_s17, %s8260_s18  }
  0x6a   : > { %s8150_s23 = scalar_lea.hbm %s10784_s6, 16 }
  0x6b   : > { %p8151_p7 = scmp.ne.s32.totalorder %s10784_s6, %s8150_s23  ;;  %p8157_p1 = scmp.lt.u32.totalorder %s8150_s23, %s10784_s6 }
  0x6d   : > { %p8153_p9 = pnand %p8151_p7, %p8361_p8 }
  0x6f   : > { %p8154_p3 = pneg %p8153_p9 }
  0x71   : > { %p8159_p4 = pnand %p8157_p1, %p8154_p3 }
  0x73   : > { %8162 = shalt.err (!%p8159_p4)
}
  0x74   : > { %s8163_s16 = scalar_lea.vmem %s268_s28, 16  ;;  %s8170_s17 = scalar_lea.vmem %s268_s28, 32 }
  0x75   : > { %p8164_p10 = scmp.ne.s32.totalorder %s268_s28, %s8163_s16  ;;  %p8171_p13 = scmp.lt.s32.totalorder %s268_s28, %s268_s28 }
  0x76   : > { %p8172_p0 = scmp.lt.s32.totalorder %s8170_s17, %s8163_s16 }
  0x77   : > { %p8166_p11 = pnand %p8164_p10, %p8361_p8 }
  0x78   : > { %p8173_p2 = por %p8172_p0, %p8171_p13 }
  0x79   : > { %p8167_p12 = pneg %p8166_p11 }
  0x7b   : > { %p8174_p5 = pnand %p8173_p2, %p8167_p12 }
  0x7d   : > { %8177 = shalt.err (!%p8174_p5)
}
  0x7e   : > { %7977 = dma.hbm_to_vmem [thread:$0]  (!%p8347_p6), %s10784_s6, 16, %s268_s28, [#allocation12]  }
  0x7f   : > { %s8461_s19 = sadd.s32 1, %s8254_s27   ;;  %s56_s10 = sadd.s32 1, %s8250_s26 }
  0x80   : > { %s53_s13 = ssub.s32 %s8254_s27, %s8461_s19  ;;  %p63_p7 = scmp.ne.s32.totalorder %s8250_s26, %s8246_s25 }
  0x81   : > { %p54_p8 = scmp.eq.s32.totalorder %s53_s13, 0  ;;  %p64_p9 = scmp.eq.s32.totalorder %s8254_s27, 0 }
  0x82   : > { %p69_p3 = scmp.ne.s32.totalorder %s8246_s25, %s8242_s24  ;;  %p10793_p4 = scmp.eq.s32.totalorder %s8331_s30, 0 }
  0x83   : > { %s8472_s12 = scalar_select %p54_p8, %s8250_s26, %s56_s10  }
  0x84   : > { %p65_p1 = por %p64_p9, %p63_p7  ;;  %p8476_p10 = por %p10793_p4, %p69_p3 }
  0x85   : > { %p7987_p11 = scmp.lt.s32.totalorder %s8254_s27, 4  ;;  %s287_s20 = sand.u32 1, %s8250_s26  }
  0x86   : > { %s7938_s28 = smul.u32 17408, %s287_s20  ;;  %s8183_s18 = scalar_lea.hbm %s10779_s1, 1114112 }
  0x87   : > { %s5487_s2 = smul.u32 278528, %s8254_s27  ;;  %p8483_p6 = pnand %p7987_p11, %p65_p1 }
  0x88   : > { %s291_s11 = scalar_lea.vmem [#allocation3], %s7938_s28  ;;  %s8494_s27 = scalar_lea.sflag [#allocation4], %s287_s20 }
  0x89   : > { %s8490_s24 = scalar_lea.hbm %s10779_s1, %s5487_s2  ;;  %s299_s14 = sshll.u32 %s291_s11, 4  ;;  %s8492_s14 = int_to_ptr.vmem [resolvable:$true] %s299_s14 }
  0x8a   : > { %s8178_s15 = scalar_lea.hbm %s8490_s24, 278528  ;;  %p8180_p13 = pneg %p8483_p6 }
  0x8b   : > { %p8179_p12 = scmp.ne.s32.totalorder %s8490_s24, %s8178_s15  ;;  %p8184_p5 = scmp.lt.u32.totalorder %s8490_s24, %s10779_s1 }
  0x8c   : > { %p8185_p8 = scmp.lt.u32.totalorder %s8183_s18, %s8178_s15  ;;  %p8187_p9 = scmp.lt.u32.totalorder %s8178_s15, %s8490_s24 }
  0x8d   : > { %p8181_p0 = pnand %p8180_p13, %p8179_p12 }
  0x8e   : > { %p8186_p7 = por %p8185_p8, %p8184_p5 }
  0x8f   : > { %p8182_p2 = pneg %p8181_p0 }
  0x90   : > { %p8188_p3 = por %p8187_p9, %p8186_p7 }
  0x92   : > { %p8189_p1 = pnand %p8188_p3, %p8182_p2 }
  0x94   : > { %8192 = shalt.err (!%p8189_p1)
}
  0x95   : > { %s8193_s10 = scalar_lea.vmem %s8492_s14, 278528  ;;  %s8263_s20 = smov [#allocation3]  }
  0x96   : > { %p8194_p4 = scmp.ne.s32.totalorder %s8492_s14, %s8193_s10  ;;  %s8198_s28 = sshll.u32 %s8263_s20, 4  ;;  %s8199_s28 = int_to_ptr.vmem [resolvable:$false] %s8198_s28 }
  0x97   : > { %s8200_s2 = scalar_lea.vmem %s8199_s28, 557056  ;;  %p8201_p0 = scmp.lt.s32.totalorder %s8492_s14, %s8199_s28 }
  0x98   : > { %p8196_p11 = pnand %p8194_p4, %p8180_p13  ;;  %p8202_p5 = scmp.lt.s32.totalorder %s8200_s2, %s8193_s10 }
  0x9a   : > { %p8197_p12 = pneg %p8196_p11  ;;  %p8203_p8 = por %p8202_p5, %p8201_p0 }
  0x9c   : > { %p8204_p7 = pnand %p8203_p8, %p8197_p12 }
  0x9e   : > { %8207 = shalt.err (!%p8204_p7)
}
  0x9f   : > { %s8264_s23 = smov 512   ;;  %s8265_s9 = smov 32  }
  0xa0   : > { %7981 = dma.hbm_to_vmem [thread:$0]  (!%p8483_p6), %s8490_s24, 278528, %s8492_s14, %s8494_s27, %s8264_s23, %s8264_s23, %s8265_s9  }
  0xa1   : > { %p10796_p13 = scmp.ne.s32.totalorder %s10789_s8, 0 }
  0xa2   : > { %s313_s11 = sand.u32 (!%p10796_p13), 1, %s8246_s25  }
  0xa3   : > { %311 = sbr.rel (%p10796_p13) target bundleno = 1948 (0x79c), region = 48  ;;  %s314_s16 = scalar_lea.sflag (!%p10796_p13), [#allocation4], %s313_s11 }
  0xa4   : > { %s7939_s15 = smul.u32 (!%p10796_p13), 17408, %s313_s11 }
  0xa6   : > { %s8525_s17 = scalar_lea.vmem (!%p10796_p13), [#allocation3], %s7939_s15 }
  0xaa   : > { %8225 = dma.done.wait (%p8476_p10), %s314_s16, 278528  }
  0xab   : > { %8227 = vsyncadd (%p8476_p10), %s314_s16, 4294688768  ;;  %p10797_p2 = scmp.eq.s32.totalorder %s8331_s30, 0 }
  0xad   : > { %8229 = dma.done.wait (%p10797_p2), [#allocation6], 8256   ;;  %p10798_p6 = pmov %p10797_p2 }
  0xae   : > { %p10799_p9 = pmov %p10797_p2 }
  0xaf   : > { %8231 = vsyncadd (%p10798_p6), [#allocation6], 4294959040 }
  0xb0   : > { %8233 = dma.done.wait (%p10799_p9), [#allocation9], 2064   ;;  %p10800_p3 = pmov %p10797_p2 }
  0xb1   : > { %p10801_p1 = pmov %p10797_p2 }
  0xb2   : > { %8235 = vsyncadd (%p10800_p3), [#allocation9], 4294965232 }
  0xb3   : > { %8237 = dma.done.wait (%p10801_p1), [#allocation12], 16   ;;  %p10802_p4 = pmov %p10801_p1 }
  0xb4   : > { %s368_s8 = smul.u32 34, %s8331_s30  ;;  %p10803_p11 = scmp.ne.s32.totalorder %s8331_s30, 0 }
  0xb5   : > { %8239 = vsyncadd (%p10802_p4), [#allocation12], 4294967280  ;;  %v8266_v0 = vmov (!%p10803_p11), 0.0  }
  0xb6   : > { %p369_p10 = scmp.lt.s32.totalorder %s368_s8, 135  ;;  %378 = sbr.rel (%p10803_p11) target bundleno = 189 (0xbd), region = 76  ;;  %379 = vst [vmem:[#allocation2] sm:$0xff] (!%p10803_p11), %v8266_v0  ;;  %380 = vst [vmem:[#allocation2 + $0x8] sm:$0xff] (!%p10803_p11), %v8266_v0 }
  0xb7   : > { %381 = vst [vmem:[#allocation2 + $0x10] sm:$0xff] (!%p10803_p11), %v8266_v0  ;;  %382 = vst [vmem:[#allocation2 + $0x18] sm:$0xff] (!%p10803_p11), %v8266_v0 }
  0xb8   : > { %s10809_s8 = smov (!%p369_p10, %s368_s8), 135 }
  0xb9   : > { %s5478_s29 = sshll.u32 %s10809_s8, 3 }
  0xba   : > { %s8547_s14 = scalar_lea.vmem %s10778_s0, %s5478_s29 }
  0xbd PF: > { %v422_v1 = vld [vmem:[%s8525_s17 + $0x8] sm:$0xff]  ;;  %v424_v3 = vld [vmem:[%s8525_s17 + $0x18] sm:$0xff]  ;;  %v421_v6 = vld [vmem:[%s8525_s17] sm:$0xff]  ;;  %p5480_p12 = scmp.ne.s32.totalorder %s8331_s30, 3 }
  0xbe   : > { %v426_v2 = vld [vmem:[%s8525_s17 + $0x28] sm:$0xff]  ;;  %v428_v5 = vld [vmem:[%s8525_s17 + $0x38] sm:$0xff]  ;;  %v425_v7 = vld [vmem:[%s8525_s17 + $0x20] sm:$0xff]  ;;  %vm8268_vm0 = vmmov (!%p5480_p12), 0  }
  0xbf   : > { %v5610_v4 = vpack.c.bf16 %v426_v2, %v422_v1  ;;  %v6698_v8 = vpack.c.bf16 %v428_v5, %v424_v3  ;;  %v5612_v9 = vpack.c.bf16 %v425_v7, %v421_v6  ;;  %v423_v10 = vld [vmem:[%s8525_s17 + $0x10] sm:$0xff]  ;;  %v430_v12 = vld [vmem:[%s8525_s17 + $0x48] sm:$0xff]  ;;  %v432_v15 = vld [vmem:[%s8525_s17 + $0x58] sm:$0xff] }
  0xc0   : > { %v427_v11 = vld [vmem:[%s8525_s17 + $0x30] sm:$0xff]  ;;  %v434_v14 = vld [vmem:[%s8525_s17 + $0x68] sm:$0xff]  ;;  %v436_v16 = vld [vmem:[%s8525_s17 + $0x78] sm:$0xff] }
  0xc1   : > { %5611 = vmatprep.subr.bf16.mxu0 %v5610_v4  ;;  %v6700_v13 = vpack.c.bf16 %v427_v11, %v423_v10  ;;  %6699 = vmatprep.subr.bf16.mxu1 %v6698_v8  ;;  %v5614_v17 = vpack.c.bf16 %v434_v14, %v430_v12  ;;  %v6702_v18 = vpack.c.bf16 %v436_v16, %v432_v15  ;;  %v429_v19 = vld [vmem:[%s8525_s17 + $0x40] sm:$0xff]  ;;  %v431_v21 = vld [vmem:[%s8525_s17 + $0x50] sm:$0xff]  ;;  %v438_v24 = vld [vmem:[%s8525_s17 + $0x88] sm:$0xff] }
  0xc2   : > { %5613 = vmatpush1.bf16.msra.mxu0 %v5612_v9  ;;  %v433_v20 = vld [vmem:[%s8525_s17 + $0x60] sm:$0xff]  ;;  %v435_v23 = vld [vmem:[%s8525_s17 + $0x70] sm:$0xff]  ;;  %v442_v25 = vld [vmem:[%s8525_s17 + $0xa8] sm:$0xff] }
  0xc3   : > { %6701 = vmatpush1.bf16.msra.mxu1 %v6700_v13  ;;  %v5616_v22 = vpack.c.bf16 %v433_v20, %v429_v19  ;;  %5615 = vmatprep.subr.bf16.mxu0 %v5614_v17  ;;  %v6704_v26 = vpack.c.bf16 %v435_v23, %v431_v21  ;;  %v5618_v27 = vpack.c.bf16 %v442_v25, %v438_v24  ;;  %v440_v28 = vld [vmem:[%s8525_s17 + $0x98] sm:$0xff]  ;;  %v437_v30 = vld [vmem:[%s8525_s17 + $0x80] sm:$0xff]  ;;  %v439_v33 = vld [vmem:[%s8525_s17 + $0x90] sm:$0xff] }
  0xc4   : > { %6703 = vmatprep.subr.bf16.mxu1 %v6702_v18  ;;  %v444_v29 = vld [vmem:[%s8525_s17 + $0xb8] sm:$0xff]  ;;  %v441_v32 = vld [vmem:[%s8525_s17 + $0xa0] sm:$0xff]  ;;  %v443_v34 = vld [vmem:[%s8525_s17 + $0xb0] sm:$0xff] }
  0xc5   : > { %v6706_v31 = vpack.c.bf16 %v444_v29, %v440_v28  ;;  %v5620_v35 = vpack.c.bf16 %v441_v32, %v437_v30  ;;  %v446_v36 = vld [vmem:[%s8525_s17 + $0xc8] sm:$0xff]  ;;  %v448_v38 = vld [vmem:[%s8525_s17 + $0xd8] sm:$0xff]  ;;  %v6708_v39 = vpack.c.bf16 %v443_v34, %v439_v33  ;;  %v445_v42 = vld [vmem:[%s8525_s17 + $0xc0] sm:$0xff] }
  0xc6   : > { %5617 = vmatpush1.bf16.msra.mxu0 %v5616_v22  ;;  %v450_v37 = vld [vmem:[%s8525_s17 + $0xe8] sm:$0xff]  ;;  %v452_v41 = vld [vmem:[%s8525_s17 + $0xf8] sm:$0xff]  ;;  %v449_v43 = vld [vmem:[%s8525_s17 + $0xe0] sm:$0xff] }
  0xc7   : > { %6705 = vmatpush1.bf16.msra.mxu1 %v6704_v26  ;;  %5619 = vmatprep.subr.bf16.mxu0 %v5618_v27  ;;  %v5622_v40 = vpack.c.bf16 %v450_v37, %v446_v36  ;;  %v6710_v44 = vpack.c.bf16 %v452_v41, %v448_v38  ;;  %v447_v45 = vld [vmem:[%s8525_s17 + $0xd0] sm:$0xff]  ;;  %v454_v47 = vld [vmem:[%s8525_s17 + $0x108] sm:$0xff]  ;;  %v456_v49 = vld [vmem:[%s8525_s17 + $0x118] sm:$0xff]  ;;  %v5624_v51 = vpack.c.bf16 %v449_v43, %v445_v42 }
  0xc8   : > { %6707 = vmatprep.subr.bf16.mxu1 %v6706_v31  ;;  %v451_v46 = vld [vmem:[%s8525_s17 + $0xf0] sm:$0xff]  ;;  %v458_v48 = vld [vmem:[%s8525_s17 + $0x128] sm:$0xff]  ;;  %v460_v50 = vld [vmem:[%s8525_s17 + $0x138] sm:$0xff] }
  0xc9   : > { %v6712_v52 = vpack.c.bf16 %v451_v46, %v447_v45  ;;  %v5626_v53 = vpack.c.bf16 %v458_v48, %v454_v47  ;;  %v453_v54 = vld [vmem:[%s8525_s17 + $0x100] sm:$0xff]  ;;  %v455_v56 = vld [vmem:[%s8525_s17 + $0x110] sm:$0xff]  ;;  %v6714_v57 = vpack.c.bf16 %v460_v50, %v456_v49  ;;  %v462_v59 = vld [vmem:[%s8525_s17 + $0x148] sm:$0xff] }
  0xca   : > { %5621 = vmatpush1.bf16.msra.mxu0 %v5620_v35  ;;  %v457_v55 = vld [vmem:[%s8525_s17 + $0x120] sm:$0xff]  ;;  %v459_v58 = vld [vmem:[%s8525_s17 + $0x130] sm:$0xff]  ;;  %v466_v60 = vld [vmem:[%s8525_s17 + $0x168] sm:$0xff] }
  0xcb   : > { %6709 = vmatpush1.bf16.msra.mxu1 %v6708_v39  ;;  %5623 = vmatprep.subr.bf16.mxu0 %v5622_v40  ;;  %v464_v61 = vld [vmem:[%s8525_s17 + $0x158] sm:$0xff]  ;;  %v5628_v63 = vpack.c.bf16 %v457_v55, %v453_v54  ;;  %v6716_v0 = vpack.c.bf16 %v459_v58, %v455_v56  ;;  %v5630_v1 = vpack.c.bf16 %v466_v60, %v462_v59  ;;  %v461_v2 = vld [vmem:[%s8525_s17 + $0x140] sm:$0xff]  ;;  %v463_v4 = vld [vmem:[%s8525_s17 + $0x150] sm:$0xff] }
  0xcc   : > { %6711 = vmatprep.subr.bf16.mxu1 %v6710_v44  ;;  %v468_v62 = vld [vmem:[%s8525_s17 + $0x178] sm:$0xff]  ;;  %v465_v3 = vld [vmem:[%s8525_s17 + $0x160] sm:$0xff]  ;;  %v467_v6 = vld [vmem:[%s8525_s17 + $0x170] sm:$0xff] }
  0xcd   : > { %v6718_v5 = vpack.c.bf16 %v468_v62, %v464_v61  ;;  %v470_v7 = vld [vmem:[%s8525_s17 + $0x188] sm:$0xff]  ;;  %v472_v9 = vld [vmem:[%s8525_s17 + $0x198] sm:$0xff]  ;;  %v5632_v11 = vpack.c.bf16 %v465_v3, %v461_v2  ;;  %v6720_v12 = vpack.c.bf16 %v467_v6, %v463_v4  ;;  %v469_v14 = vld [vmem:[%s8525_s17 + $0x180] sm:$0xff] }
  0xce   : > { %5625 = vmatpush1.bf16.msra.mxu0 %v5624_v51  ;;  %v474_v8 = vld [vmem:[%s8525_s17 + $0x1a8] sm:$0xff]  ;;  %v476_v10 = vld [vmem:[%s8525_s17 + $0x1b8] sm:$0xff]  ;;  %v473_v15 = vld [vmem:[%s8525_s17 + $0x1a0] sm:$0xff] }
  0xcf   : > { %6713 = vmatpush1.bf16.msra.mxu1 %v6712_v52  ;;  %5627 = vmatprep.subr.bf16.mxu0 %v5626_v53  ;;  %v5634_v13 = vpack.c.bf16 %v474_v8, %v470_v7  ;;  %v471_v16 = vld [vmem:[%s8525_s17 + $0x190] sm:$0xff]  ;;  %v6722_v17 = vpack.c.bf16 %v476_v10, %v472_v9  ;;  %v478_v19 = vld [vmem:[%s8525_s17 + $0x1c8] sm:$0xff]  ;;  %v480_v21 = vld [vmem:[%s8525_s17 + $0x1d8] sm:$0xff]  ;;  %v5636_v23 = vpack.c.bf16 %v473_v15, %v469_v14 }
  0xd0   : > { %6715 = vmatprep.subr.bf16.mxu1 %v6714_v57  ;;  %v475_v18 = vld [vmem:[%s8525_s17 + $0x1b0] sm:$0xff]  ;;  %v482_v20 = vld [vmem:[%s8525_s17 + $0x1e8] sm:$0xff]  ;;  %v484_v22 = vld [vmem:[%s8525_s17 + $0x1f8] sm:$0xff] }
  0xd1   : > { %v6724_v24 = vpack.c.bf16 %v475_v18, %v471_v16  ;;  %v5638_v25 = vpack.c.bf16 %v482_v20, %v478_v19  ;;  %v477_v26 = vld [vmem:[%s8525_s17 + $0x1c0] sm:$0xff]  ;;  %v479_v28 = vld [vmem:[%s8525_s17 + $0x1d0] sm:$0xff]  ;;  %v6726_v29 = vpack.c.bf16 %v484_v22, %v480_v21  ;;  %v486_v31 = vld [vmem:[%s8525_s17 + $0x208] sm:$0xff] }
  0xd2   : > { %5629 = vmatpush1.bf16.msra.mxu0 %v5628_v63  ;;  %v481_v27 = vld [vmem:[%s8525_s17 + $0x1e0] sm:$0xff]  ;;  %v483_v30 = vld [vmem:[%s8525_s17 + $0x1f0] sm:$0xff]  ;;  %v490_v32 = vld [vmem:[%s8525_s17 + $0x228] sm:$0xff] }
  0xd3   : > { %6717 = vmatpush1.bf16.msra.mxu1 %v6716_v0  ;;  %5631 = vmatprep.subr.bf16.mxu0 %v5630_v1  ;;  %v488_v33 = vld [vmem:[%s8525_s17 + $0x218] sm:$0xff]  ;;  %v5640_v35 = vpack.c.bf16 %v481_v27, %v477_v26  ;;  %v6728_v36 = vpack.c.bf16 %v483_v30, %v479_v28  ;;  %v5642_v37 = vpack.c.bf16 %v490_v32, %v486_v31  ;;  %v485_v38 = vld [vmem:[%s8525_s17 + $0x200] sm:$0xff]  ;;  %v487_v40 = vld [vmem:[%s8525_s17 + $0x210] sm:$0xff] }
  0xd4   : > { %6719 = vmatprep.subr.bf16.mxu1 %v6718_v5  ;;  %v492_v34 = vld [vmem:[%s8525_s17 + $0x238] sm:$0xff]  ;;  %v489_v39 = vld [vmem:[%s8525_s17 + $0x220] sm:$0xff]  ;;  %v491_v42 = vld [vmem:[%s8525_s17 + $0x230] sm:$0xff] }
  0xd5   : > { %v6730_v41 = vpack.c.bf16 %v492_v34, %v488_v33  ;;  %v494_v43 = vld [vmem:[%s8525_s17 + $0x248] sm:$0xff]  ;;  %v496_v45 = vld [vmem:[%s8525_s17 + $0x258] sm:$0xff]  ;;  %v5644_v47 = vpack.c.bf16 %v489_v39, %v485_v38  ;;  %v6732_v48 = vpack.c.bf16 %v491_v42, %v487_v40  ;;  %v493_v50 = vld [vmem:[%s8525_s17 + $0x240] sm:$0xff] }
  0xd6   : > { %5633 = vmatpush1.bf16.msra.mxu0 %v5632_v11  ;;  %v498_v44 = vld [vmem:[%s8525_s17 + $0x268] sm:$0xff]  ;;  %v500_v46 = vld [vmem:[%s8525_s17 + $0x278] sm:$0xff]  ;;  %v497_v51 = vld [vmem:[%s8525_s17 + $0x260] sm:$0xff] }
  0xd7   : > { %6721 = vmatpush1.bf16.msra.mxu1 %v6720_v12  ;;  %5635 = vmatprep.subr.bf16.mxu0 %v5634_v13  ;;  %v5646_v49 = vpack.c.bf16 %v498_v44, %v494_v43  ;;  %v495_v52 = vld [vmem:[%s8525_s17 + $0x250] sm:$0xff]  ;;  %v6734_v53 = vpack.c.bf16 %v500_v46, %v496_v45  ;;  %v502_v55 = vld [vmem:[%s8525_s17 + $0x288] sm:$0xff]  ;;  %v504_v57 = vld [vmem:[%s8525_s17 + $0x298] sm:$0xff]  ;;  %v5648_v59 = vpack.c.bf16 %v497_v51, %v493_v50 }
  0xd8   : > { %6723 = vmatprep.subr.bf16.mxu1 %v6722_v17  ;;  %v499_v54 = vld [vmem:[%s8525_s17 + $0x270] sm:$0xff]  ;;  %v506_v56 = vld [vmem:[%s8525_s17 + $0x2a8] sm:$0xff]  ;;  %v508_v58 = vld [vmem:[%s8525_s17 + $0x2b8] sm:$0xff] }
  0xd9   : > { %v6736_v60 = vpack.c.bf16 %v499_v54, %v495_v52  ;;  %v5650_v61 = vpack.c.bf16 %v506_v56, %v502_v55  ;;  %v501_v62 = vld [vmem:[%s8525_s17 + $0x280] sm:$0xff]  ;;  %v503_v0 = vld [vmem:[%s8525_s17 + $0x290] sm:$0xff]  ;;  %v6738_v1 = vpack.c.bf16 %v508_v58, %v504_v57  ;;  %v510_v3 = vld [vmem:[%s8525_s17 + $0x2c8] sm:$0xff] }
  0xda   : > { %5637 = vmatpush1.bf16.msra.mxu0 %v5636_v23  ;;  %v505_v63 = vld [vmem:[%s8525_s17 + $0x2a0] sm:$0xff]  ;;  %v507_v2 = vld [vmem:[%s8525_s17 + $0x2b0] sm:$0xff]  ;;  %v514_v4 = vld [vmem:[%s8525_s17 + $0x2e8] sm:$0xff] }
  0xdb   : > { %6725 = vmatpush1.bf16.msra.mxu1 %v6724_v24  ;;  %5639 = vmatprep.subr.bf16.mxu0 %v5638_v25  ;;  %v512_v5 = vld [vmem:[%s8525_s17 + $0x2d8] sm:$0xff]  ;;  %v5652_v7 = vpack.c.bf16 %v505_v63, %v501_v62  ;;  %v509_v8 = vld [vmem:[%s8525_s17 + $0x2c0] sm:$0xff]  ;;  %v6740_v9 = vpack.c.bf16 %v507_v2, %v503_v0  ;;  %v5654_v10 = vpack.c.bf16 %v514_v4, %v510_v3  ;;  %v511_v12 = vld [vmem:[%s8525_s17 + $0x2d0] sm:$0xff] }
  0xdc   : > { %6727 = vmatprep.subr.bf16.mxu1 %v6726_v29  ;;  %v516_v6 = vld [vmem:[%s8525_s17 + $0x2f8] sm:$0xff]  ;;  %v513_v11 = vld [vmem:[%s8525_s17 + $0x2e0] sm:$0xff]  ;;  %v515_v13 = vld [vmem:[%s8525_s17 + $0x2f0] sm:$0xff] }
  0xdd   : > { %v6742_v14 = vpack.c.bf16 %v516_v6, %v512_v5  ;;  %v518_v15 = vld [vmem:[%s8525_s17 + $0x308] sm:$0xff]  ;;  %v520_v18 = vld [vmem:[%s8525_s17 + $0x318] sm:$0xff]  ;;  %v5656_v20 = vpack.c.bf16 %v513_v11, %v509_v8  ;;  %v6744_v21 = vpack.c.bf16 %v515_v13, %v511_v12  ;;  %v517_v23 = vld [vmem:[%s8525_s17 + $0x300] sm:$0xff] }
  0xde   : > { %5641 = vmatpush1.bf16.msra.mxu0 %v5640_v35  ;;  %v522_v16 = vld [vmem:[%s8525_s17 + $0x328] sm:$0xff]  ;;  %v524_v19 = vld [vmem:[%s8525_s17 + $0x338] sm:$0xff]  ;;  %v521_v24 = vld [vmem:[%s8525_s17 + $0x320] sm:$0xff] }
  0xdf   : > { %6729 = vmatpush1.bf16.msra.mxu1 %v6728_v36  ;;  %5643 = vmatprep.subr.bf16.mxu0 %v5642_v37  ;;  %v388_v17 = vld [vmem:[%s8547_s14 + $0x8] sm:$0xff]  ;;  %v5658_v22 = vpack.c.bf16 %v522_v16, %v518_v15  ;;  %v519_v25 = vld [vmem:[%s8525_s17 + $0x310] sm:$0xff]  ;;  %v6746_v26 = vpack.c.bf16 %v524_v19, %v520_v18  ;;  %v528_v30 = vld [vmem:[%s8525_s17 + $0x358] sm:$0xff]  ;;  %v5660_v32 = vpack.c.bf16 %v521_v24, %v517_v23 }
  0xe0   : > { %6731 = vmatprep.subr.bf16.mxu1 %v6730_v41  ;;  %2661 = vmatprep.mubr.f32.mxu0 %v388_v17  ;;  %v523_v27 = vld [vmem:[%s8525_s17 + $0x330] sm:$0xff]  ;;  %v526_v28 = vld [vmem:[%s8525_s17 + $0x348] sm:$0xff]  ;;  %v532_v31 = vld [vmem:[%s8525_s17 + $0x378] sm:$0xff] }
  0xe1   : > { %3868 = vmatprep.mubr.f32.mxu1 %v388_v17  ;;  %v530_v29 = vld [vmem:[%s8525_s17 + $0x368] sm:$0xff]  ;;  %v6748_v33 = vpack.c.bf16 %v523_v27, %v519_v25  ;;  %v525_v35 = vld [vmem:[%s8525_s17 + $0x340] sm:$0xff]  ;;  %v527_v37 = vld [vmem:[%s8525_s17 + $0x350] sm:$0xff]  ;;  %v6750_v38 = vpack.c.bf16 %v532_v31, %v528_v30 }
  0xe2   : > { %5645 = vmatpush1.bf16.msra.mxu0 %v5644_v47  ;;  %v5662_v34 = vpack.c.bf16 %v530_v29, %v526_v28  ;;  %v529_v36 = vld [vmem:[%s8525_s17 + $0x360] sm:$0xff]  ;;  %v531_v39 = vld [vmem:[%s8525_s17 + $0x370] sm:$0xff]  ;;  %v534_v40 = vld [vmem:[%s8525_s17 + $0x388] sm:$0xff] }
  0xe3   : > { %6733 = vmatpush1.bf16.msra.mxu1 %v6732_v48  ;;  %5647 = vmatprep.subr.bf16.mxu0 %v5646_v49  ;;  %v538_v41 = vld [vmem:[%s8525_s17 + $0x3a8] sm:$0xff]  ;;  %v536_v42 = vld [vmem:[%s8525_s17 + $0x398] sm:$0xff]  ;;  %v5664_v44 = vpack.c.bf16 %v529_v36, %v525_v35  ;;  %v6752_v45 = vpack.c.bf16 %v531_v39, %v527_v37  ;;  %v533_v47 = vld [vmem:[%s8525_s17 + $0x380] sm:$0xff] }
  0xe4   : > { %6735 = vmatprep.subr.bf16.mxu1 %v6734_v53  ;;  %v540_v43 = vld [vmem:[%s8525_s17 + $0x3b8] sm:$0xff]  ;;  %v5666_v46 = vpack.c.bf16 %v538_v41, %v534_v40  ;;  %v537_v48 = vld [vmem:[%s8525_s17 + $0x3a0] sm:$0xff]  ;;  %v535_v49 = vld [vmem:[%s8525_s17 + $0x390] sm:$0xff] }
  0xe5   : > { %v6754_v50 = vpack.c.bf16 %v540_v43, %v536_v42  ;;  %v539_v51 = vld [vmem:[%s8525_s17 + $0x3b0] sm:$0xff]  ;;  %v542_v52 = vld [vmem:[%s8525_s17 + $0x3c8] sm:$0xff]  ;;  %v544_v54 = vld [vmem:[%s8525_s17 + $0x3d8] sm:$0xff]  ;;  %v5668_v56 = vpack.c.bf16 %v537_v48, %v533_v47 }
  0xe6   : > { %5649 = vmatpush1.bf16.msra.mxu0 %v5648_v59  ;;  %v546_v53 = vld [vmem:[%s8525_s17 + $0x3e8] sm:$0xff]  ;;  %v548_v55 = vld [vmem:[%s8525_s17 + $0x3f8] sm:$0xff]  ;;  %v6756_v57 = vpack.c.bf16 %v539_v51, %v535_v49  ;;  %v541_v59 = vld [vmem:[%s8525_s17 + $0x3c0] sm:$0xff] }
  0xe7   : > { %6737 = vmatpush1.bf16.msra.mxu1 %v6736_v60  ;;  %5651 = vmatprep.subr.bf16.mxu0 %v5650_v61  ;;  %v5670_v58 = vpack.c.bf16 %v546_v53, %v542_v52  ;;  %v545_v60 = vld [vmem:[%s8525_s17 + $0x3e0] sm:$0xff]  ;;  %v543_v61 = vld [vmem:[%s8525_s17 + $0x3d0] sm:$0xff]  ;;  %v6758_v62 = vpack.c.bf16 %v548_v55, %v544_v54  ;;  %v550_v0 = vld [vmem:[%s8525_s17 + $0x408] sm:$0xff] }
  0xe8   : > { %6739 = vmatprep.subr.bf16.mxu1 %v6738_v1  ;;  %v547_v63 = vld [vmem:[%s8525_s17 + $0x3f0] sm:$0xff]  ;;  %v554_v1 = vld [vmem:[%s8525_s17 + $0x428] sm:$0xff]  ;;  %v552_v2 = vld [vmem:[%s8525_s17 + $0x418] sm:$0xff]  ;;  %v5672_v4 = vpack.c.bf16 %v545_v60, %v541_v59 }
  0xe9   : > { %v556_v3 = vld [vmem:[%s8525_s17 + $0x438] sm:$0xff]  ;;  %v6760_v5 = vpack.c.bf16 %v547_v63, %v543_v61  ;;  %v5674_v6 = vpack.c.bf16 %v554_v1, %v550_v0  ;;  %v553_v8 = vld [vmem:[%s8525_s17 + $0x420] sm:$0xff]  ;;  %v555_v11 = vld [vmem:[%s8525_s17 + $0x430] sm:$0xff] }
  0xea   : > { %5653 = vmatpush1.bf16.msra.mxu0 %v5652_v7  ;;  %v549_v7 = vld [vmem:[%s8525_s17 + $0x400] sm:$0xff]  ;;  %v558_v12 = vld [vmem:[%s8525_s17 + $0x448] sm:$0xff]  ;;  %v564_v15 = vld [vmem:[%s8525_s17 + $0x478] sm:$0xff] }
  0xeb   : > { %6741 = vmatpush1.bf16.msra.mxu1 %v6740_v9  ;;  %5655 = vmatprep.subr.bf16.mxu0 %v5654_v10  ;;  %v551_v9 = vld [vmem:[%s8525_s17 + $0x410] sm:$0xff]  ;;  %v6762_v10 = vpack.c.bf16 %v556_v3, %v552_v2  ;;  %v562_v13 = vld [vmem:[%s8525_s17 + $0x468] sm:$0xff]  ;;  %v387_v16 = vld [vmem:[%s8547_s14] sm:$0xff]  ;;  %v5676_v17 = vpack.c.bf16 %v553_v8, %v549_v7 }
  0xec   : > { %6743 = vmatprep.subr.bf16.mxu1 %v6742_v14  ;;  %v560_v14 = vld [vmem:[%s8525_s17 + $0x458] sm:$0xff]  ;;  %v6764_v18 = vpack.c.bf16 %v555_v11, %v551_v9  ;;  %v5678_v19 = vpack.c.bf16 %v562_v13, %v558_v12  ;;  %v563_v24 = vld [vmem:[%s8525_s17 + $0x470] sm:$0xff]  ;;  %v566_v25 = vld [vmem:[%s8525_s17 + $0x488] sm:$0xff] }
  0xed   : > { %v6766_v23 = vpack.c.bf16 %v564_v15, %v560_v14  ;;  %v568_v27 = vld [vmem:[%s8525_s17 + $0x498] sm:$0xff]  ;;  %v571_v36 = vld [vmem:[%s8525_s17 + $0x4b0] sm:$0xff]  ;;  %v574_v37 = vld [vmem:[%s8525_s17 + $0x4c8] sm:$0xff] }
  0xee   : > { %5657 = vmatpush1.bf16.msra.mxu0 %v5656_v20  ;;  %v557_v20 = vld [vmem:[%s8525_s17 + $0x440] sm:$0xff]  ;;  %v572_v28 = vld [vmem:[%s8525_s17 + $0x4b8] sm:$0xff]  ;;  %v579_v48 = vld [vmem:[%s8525_s17 + $0x4f0] sm:$0xff] }
  0xef   : > { %6745 = vmatpush1.bf16.msra.mxu1 %v6744_v21  ;;  %5659 = vmatprep.subr.bf16.mxu0 %v5658_v22  ;;  %v561_v21 = vld [vmem:[%s8525_s17 + $0x460] sm:$0xff]  ;;  %v559_v22 = vld [vmem:[%s8525_s17 + $0x450] sm:$0xff]  ;;  %v6770_v35 = vpack.c.bf16 %v572_v28, %v568_v27  ;;  %v576_v39 = vld [vmem:[%s8525_s17 + $0x4d8] sm:$0xff] }
  0xf0   : > { %6747 = vmatprep.subr.bf16.mxu1 %v6746_v26  ;;  %v570_v26 = vld [vmem:[%s8525_s17 + $0x4a8] sm:$0xff]  ;;  %v5680_v29 = vpack.c.bf16 %v561_v21, %v557_v20  ;;  %v6768_v30 = vpack.c.bf16 %v563_v24, %v559_v22  ;;  %v580_v40 = vld [vmem:[%s8525_s17 + $0x4f8] sm:$0xff]  ;;  %v587_v60 = vld [vmem:[%s8525_s17 + $0x530] sm:$0xff] }
  0xf1   : > { %v5682_v31 = vpack.c.bf16 %v570_v26, %v566_v25  ;;  %v6774_v47 = vpack.c.bf16 %v580_v40, %v576_v39  ;;  %v582_v49 = vld [vmem:[%s8525_s17 + $0x508] sm:$0xff]  ;;  %v584_v51 = vld [vmem:[%s8525_s17 + $0x518] sm:$0xff]  ;;  %v595_v8 = vld [vmem:[%s8525_s17 + $0x570] sm:$0xff] }
  0xf2   : > { %5661 = vmatpush1.bf16.msra.mxu0 %v5660_v32  ;;  %v565_v32 = vld [vmem:[%s8525_s17 + $0x480] sm:$0xff]  ;;  %v588_v52 = vld [vmem:[%s8525_s17 + $0x538] sm:$0xff]  ;;  %v590_v61 = vld [vmem:[%s8525_s17 + $0x548] sm:$0xff] }
  0xf3   : > { %6749 = vmatpush1.bf16.msra.mxu1 %v6748_v33  ;;  %5663 = vmatprep.subr.bf16.mxu0 %v5662_v34  ;;  %v569_v33 = vld [vmem:[%s8525_s17 + $0x4a0] sm:$0xff]  ;;  %v567_v34 = vld [vmem:[%s8525_s17 + $0x490] sm:$0xff]  ;;  %v6778_v59 = vpack.c.bf16 %v588_v52, %v584_v51  ;;  %v592_v63 = vld [vmem:[%s8525_s17 + $0x558] sm:$0xff] }
  0xf4   : > { %6751 = vmatprep.subr.bf16.mxu1 %v6750_v38  ;;  %v578_v38 = vld [vmem:[%s8525_s17 + $0x4e8] sm:$0xff]  ;;  %v5684_v41 = vpack.c.bf16 %v569_v33, %v565_v32  ;;  %v6772_v42 = vpack.c.bf16 %v571_v36, %v567_v34  ;;  %v596_v0 = vld [vmem:[%s8525_s17 + $0x578] sm:$0xff]  ;;  %v597_v14 = vld [vmem:[%s8525_s17 + $0x580] sm:$0xff] }
  0xf5   : > { %v5686_v43 = vpack.c.bf16 %v578_v38, %v574_v37  ;;  %v6782_v7 = vpack.c.bf16 %v596_v0, %v592_v63  ;;  %v598_v9 = vld [vmem:[%s8525_s17 + $0x588] sm:$0xff]  ;;  %v600_v11 = vld [vmem:[%s8525_s17 + $0x598] sm:$0xff]  ;;  %v611_v33 = vld [vmem:[%s8525_s17 + $0x5f0] sm:$0xff] }
  0xf6   : > { %5665 = vmatpush1.bf16.msra.mxu0 %v5664_v44  ;;  %v573_v44 = vld [vmem:[%s8525_s17 + $0x4c0] sm:$0xff]  ;;  %v604_v12 = vld [vmem:[%s8525_s17 + $0x5b8] sm:$0xff]  ;;  %v606_v21 = vld [vmem:[%s8525_s17 + $0x5c8] sm:$0xff] }
  0xf7   : > { %6753 = vmatpush1.bf16.msra.mxu1 %v6752_v45  ;;  %5667 = vmatprep.subr.bf16.mxu0 %v5666_v46  ;;  %v577_v45 = vld [vmem:[%s8525_s17 + $0x4e0] sm:$0xff]  ;;  %v575_v46 = vld [vmem:[%s8525_s17 + $0x4d0] sm:$0xff]  ;;  %v6786_v20 = vpack.c.bf16 %v604_v12, %v600_v11  ;;  %v610_v22 = vld [vmem:[%s8525_s17 + $0x5e8] sm:$0xff] }
  0xf8   : > { %6755 = vmatprep.subr.bf16.mxu1 %v6754_v50  ;;  %v586_v50 = vld [vmem:[%s8525_s17 + $0x528] sm:$0xff]  ;;  %v5688_v53 = vpack.c.bf16 %v577_v45, %v573_v44  ;;  %v6776_v54 = vpack.c.bf16 %v579_v48, %v575_v46  ;;  %v608_v24 = vld [vmem:[%s8525_s17 + $0x5d8] sm:$0xff]  ;;  %v5702_v28 = vpack.c.bf16 %v610_v22, %v606_v21  ;;  %v619_v45 = vld [vmem:[%s8525_s17 + $0x630] sm:$0xff] }
  0xf9   : > { %v5690_v55 = vpack.c.bf16 %v586_v50, %v582_v49  ;;  %v612_v25 = vld [vmem:[%s8525_s17 + $0x5f8] sm:$0xff]  ;;  %v614_v34 = vld [vmem:[%s8525_s17 + $0x608] sm:$0xff] }
  0xfa   : > { %5669 = vmatpush1.bf16.msra.mxu0 %v5668_v56  ;;  %v581_v56 = vld [vmem:[%s8525_s17 + $0x500] sm:$0xff]  ;;  %v6790_v32 = vpack.c.bf16 %v612_v25, %v608_v24  ;;  %v616_v36 = vld [vmem:[%s8525_s17 + $0x618] sm:$0xff]  ;;  %v622_v46 = vld [vmem:[%s8525_s17 + $0x648] sm:$0xff] }
  0xfb   : > { %6757 = vmatpush1.bf16.msra.mxu1 %v6756_v57  ;;  %5671 = vmatprep.subr.bf16.mxu0 %v5670_v58  ;;  %v585_v57 = vld [vmem:[%s8525_s17 + $0x520] sm:$0xff]  ;;  %v583_v58 = vld [vmem:[%s8525_s17 + $0x510] sm:$0xff]  ;;  %v620_v37 = vld [vmem:[%s8525_s17 + $0x638] sm:$0xff] }
  0xfc   : > { %6759 = vmatprep.subr.bf16.mxu1 %v6758_v62  ;;  %v594_v62 = vld [vmem:[%s8525_s17 + $0x568] sm:$0xff]  ;;  %v5692_v1 = vpack.c.bf16 %v585_v57, %v581_v56  ;;  %v6780_v2 = vpack.c.bf16 %v587_v60, %v583_v58  ;;  %v6794_v44 = vpack.c.bf16 %v620_v37, %v616_v36  ;;  %v624_v48 = vld [vmem:[%s8525_s17 + $0x658] sm:$0xff]  ;;  %v627_v57 = vld [vmem:[%s8525_s17 + $0x670] sm:$0xff] }
  0xfd   : > { %v5694_v3 = vpack.c.bf16 %v594_v62, %v590_v61  ;;  %v628_v49 = vld [vmem:[%s8525_s17 + $0x678] sm:$0xff]  ;;  %v630_v58 = vld [vmem:[%s8525_s17 + $0x688] sm:$0xff]  ;;  %v645_v25 = vld [vmem:[%s8525_s17 + $0x700] sm:$0xff] }
  0xfe   : > { %5673 = vmatpush1.bf16.msra.mxu0 %v5672_v4  ;;  %v589_v4 = vld [vmem:[%s8525_s17 + $0x540] sm:$0xff]  ;;  %v6798_v56 = vpack.c.bf16 %v628_v49, %v624_v48  ;;  %v632_v60 = vld [vmem:[%s8525_s17 + $0x698] sm:$0xff] }
  0xff   : > { %6761 = vmatpush1.bf16.msra.mxu1 %v6760_v5  ;;  %5675 = vmatprep.subr.bf16.mxu0 %v5674_v6  ;;  %v593_v5 = vld [vmem:[%s8525_s17 + $0x560] sm:$0xff]  ;;  %v591_v6 = vld [vmem:[%s8525_s17 + $0x550] sm:$0xff]  ;;  %v636_v61 = vld [vmem:[%s8525_s17 + $0x6b8] sm:$0xff] }
 0x100   : > { %6763 = vmatprep.subr.bf16.mxu1 %v6762_v10  ;;  %v602_v10 = vld [vmem:[%s8525_s17 + $0x5a8] sm:$0xff]  ;;  %v5696_v13 = vpack.c.bf16 %v593_v5, %v589_v4  ;;  %v6784_v15 = vpack.c.bf16 %v595_v8, %v591_v6  ;;  %v6802_v4 = vpack.c.bf16 %v636_v61, %v632_v60  ;;  %v635_v5 = vld [vmem:[%s8525_s17 + $0x6b0] sm:$0xff]  ;;  %v640_v8 = vld [vmem:[%s8525_s17 + $0x6d8] sm:$0xff] }
 0x101   : > { %2662 = vmatmul.mubr.f32.vlgmr.msra.gmra.mrb[0].mxu0 %v387_v16  ;;  %v638_v6 = vld [vmem:[%s8525_s17 + $0x6c8] sm:$0xff]  ;;  %v652_v21 = vld [vmem:[%s8525_s17 + $0x738] sm:$0xff]  ;;  %v653_v37 = vld [vmem:[%s8525_s17 + $0x740] sm:$0xff] }
 0x102   : > { %5677 = vmatpush1.bf16.msra.mxu0 %v5676_v17  ;;  %3869 = vmatmul.mubr.f32.vlgmr.msra.gmra.mrb[0].mxu1 %v387_v16  ;;  %v5698_v16 = vpack.c.bf16 %v602_v10, %v598_v9  ;;  %v601_v17 = vld [vmem:[%s8525_s17 + $0x5a0] sm:$0xff]  ;;  %v644_v9 = vld [vmem:[%s8525_s17 + $0x6f8] sm:$0xff] }
 0x103   : > { %6765 = vmatpush1.bf16.msra.mxu1 %v6764_v18  ;;  %5679 = vmatprep.subr.bf16.mxu0 %v5678_v19  ;;  %v599_v18 = vld [vmem:[%s8525_s17 + $0x590] sm:$0xff]  ;;  %v5700_v26 = vpack.c.bf16 %v601_v17, %v597_v14  ;;  %v641_v14 = vld [vmem:[%s8525_s17 + $0x6e0] sm:$0xff] }
 0x104   : > { %6767 = vmatprep.subr.bf16.mxu1 %v6766_v23  ;;  %v603_v19 = vld [vmem:[%s8525_s17 + $0x5b0] sm:$0xff]  ;;  %v390_v23 = vld [vmem:[%s8547_s14 + $0x18] sm:$0xff]  ;;  %v661_v49 = vld [vmem:[%s8525_s17 + $0x780] sm:$0xff] }
 0x105   : > { %2732 = vmatprep.mubr.f32.mxu0 %v390_v23  ;;  %3939 = vmatprep.mubr.f32.mxu1 %v390_v23  ;;  %v6788_v27 = vpack.c.bf16 %v603_v19, %v599_v18  ;;  %v643_v17 = vld [vmem:[%s8525_s17 + $0x6f0] sm:$0xff]  ;;  %v646_v18 = vld [vmem:[%s8525_s17 + $0x708] sm:$0xff]  ;;  %v669_v61 = vld [vmem:[%s8525_s17 + $0x7c0] sm:$0xff] }
 0x106   : > { %5681 = vmatpush1.bf16.msra.mxu0 %v5680_v29  ;;  %v605_v29 = vld [vmem:[%s8525_s17 + $0x5c0] sm:$0xff]  ;;  %v650_v19 = vld [vmem:[%s8525_s17 + $0x728] sm:$0xff] }
 0x107   : > { %6769 = vmatpush1.bf16.msra.mxu1 %v6768_v30  ;;  %5683 = vmatprep.subr.bf16.mxu0 %v5682_v31  ;;  %v609_v30 = vld [vmem:[%s8525_s17 + $0x5e0] sm:$0xff]  ;;  %v607_v31 = vld [vmem:[%s8525_s17 + $0x5d0] sm:$0xff]  ;;  %v5722_v24 = vpack.c.bf16 %v650_v19, %v646_v18 }
 0x108   : > { %6771 = vmatprep.subr.bf16.mxu1 %v6770_v35  ;;  %v618_v35 = vld [vmem:[%s8525_s17 + $0x628] sm:$0xff]  ;;  %v5704_v38 = vpack.c.bf16 %v609_v30, %v605_v29  ;;  %v6792_v39 = vpack.c.bf16 %v611_v33, %v607_v31  ;;  %v651_v29 = vld [vmem:[%s8525_s17 + $0x730] sm:$0xff]  ;;  %v660_v33 = vld [vmem:[%s8525_s17 + $0x778] sm:$0xff] }
 0x109   : > { %v5706_v40 = vpack.c.bf16 %v618_v35, %v614_v34  ;;  %v654_v30 = vld [vmem:[%s8525_s17 + $0x748] sm:$0xff]  ;;  %v389_v18 = vld [vmem:[%s8547_s14 + $0x10] sm:$0xff] }
 0x10a   : > { %5685 = vmatpush1.bf16.msra.mxu0 %v5684_v41  ;;  %v613_v41 = vld [vmem:[%s8525_s17 + $0x600] sm:$0xff]  ;;  %v658_v31 = vld [vmem:[%s8525_s17 + $0x768] sm:$0xff] }
 0x10b   : > { %6773 = vmatpush1.bf16.msra.mxu1 %v6772_v42  ;;  %5687 = vmatprep.subr.bf16.mxu0 %v5686_v43  ;;  %v617_v42 = vld [vmem:[%s8525_s17 + $0x620] sm:$0xff]  ;;  %v615_v43 = vld [vmem:[%s8525_s17 + $0x610] sm:$0xff]  ;;  %v5726_v36 = vpack.c.bf16 %v658_v31, %v654_v30  ;;  %v700_v30 = vld [vmem:[%s8525_s17 + $0x8b8] sm:$0xff] }
 0x10c   : > { %6775 = vmatprep.subr.bf16.mxu1 %v6774_v47  ;;  %v626_v47 = vld [vmem:[%s8525_s17 + $0x668] sm:$0xff]  ;;  %v5708_v50 = vpack.c.bf16 %v617_v42, %v613_v41  ;;  %v6796_v51 = vpack.c.bf16 %v619_v45, %v615_v43  ;;  %v659_v41 = vld [vmem:[%s8525_s17 + $0x770] sm:$0xff]  ;;  %v668_v45 = vld [vmem:[%s8525_s17 + $0x7b8] sm:$0xff] }
 0x10d   : > { %v5710_v52 = vpack.c.bf16 %v626_v47, %v622_v46  ;;  %v662_v42 = vld [vmem:[%s8525_s17 + $0x788] sm:$0xff] }
 0x10e   : > { %5689 = vmatpush1.bf16.msra.mxu0 %v5688_v53  ;;  %v621_v53 = vld [vmem:[%s8525_s17 + $0x640] sm:$0xff]  ;;  %v666_v43 = vld [vmem:[%s8525_s17 + $0x7a8] sm:$0xff] }
 0x10f   : > { %6777 = vmatpush1.bf16.msra.mxu1 %v6776_v54  ;;  %5691 = vmatprep.subr.bf16.mxu0 %v5690_v55  ;;  %v625_v54 = vld [vmem:[%s8525_s17 + $0x660] sm:$0xff]  ;;  %v623_v55 = vld [vmem:[%s8525_s17 + $0x650] sm:$0xff]  ;;  %v5730_v48 = vpack.c.bf16 %v666_v43, %v662_v42  ;;  %v392_v31 = vld [vmem:[%s8547_s14 + $0x28] sm:$0xff] }
 0x110   : > { %6779 = vmatprep.subr.bf16.mxu1 %v6778_v59  ;;  %v634_v59 = vld [vmem:[%s8525_s17 + $0x6a8] sm:$0xff]  ;;  %v5712_v62 = vpack.c.bf16 %v625_v54, %v621_v53  ;;  %v6800_v63 = vpack.c.bf16 %v627_v57, %v623_v55  ;;  %v667_v53 = vld [vmem:[%s8525_s17 + $0x7b0] sm:$0xff]  ;;  %v676_v57 = vld [vmem:[%s8525_s17 + $0x7f8] sm:$0xff] }
 0x111   : > { %v5714_v0 = vpack.c.bf16 %v634_v59, %v630_v58  ;;  %v670_v54 = vld [vmem:[%s8525_s17 + $0x7c8] sm:$0xff]  ;;  %v704_v42 = vld [vmem:[%s8525_s17 + $0x8d8] sm:$0xff] }
 0x112   : > { %5693 = vmatpush1.bf16.msra.mxu0 %v5692_v1  ;;  %v629_v1 = vld [vmem:[%s8525_s17 + $0x680] sm:$0xff]  ;;  %v674_v55 = vld [vmem:[%s8525_s17 + $0x7e8] sm:$0xff]  ;;  %v708_v43 = vld [vmem:[%s8525_s17 + $0x8f8] sm:$0xff] }
 0x113   : > { %6781 = vmatpush1.bf16.msra.mxu1 %v6780_v2  ;;  %5695 = vmatprep.subr.bf16.mxu0 %v5694_v3  ;;  %v633_v2 = vld [vmem:[%s8525_s17 + $0x6a0] sm:$0xff]  ;;  %v631_v3 = vld [vmem:[%s8525_s17 + $0x690] sm:$0xff]  ;;  %v5734_v60 = vpack.c.bf16 %v674_v55, %v670_v54  ;;  %v712_v54 = vld [vmem:[%s8525_s17 + $0x918] sm:$0xff] }
 0x114   : > { %6783 = vmatprep.subr.bf16.mxu1 %v6782_v7  ;;  %v642_v7 = vld [vmem:[%s8525_s17 + $0x6e8] sm:$0xff]  ;;  %v5716_v10 = vpack.c.bf16 %v633_v2, %v629_v1  ;;  %v6804_v11 = vpack.c.bf16 %v635_v5, %v631_v3  ;;  %v675_v1 = vld [vmem:[%s8525_s17 + $0x7f0] sm:$0xff]  ;;  %v684_v5 = vld [vmem:[%s8525_s17 + $0x838] sm:$0xff] }
 0x115   : > { %v5718_v12 = vpack.c.bf16 %v642_v7, %v638_v6  ;;  %v678_v2 = vld [vmem:[%s8525_s17 + $0x808] sm:$0xff]  ;;  %v716_v55 = vld [vmem:[%s8525_s17 + $0x938] sm:$0xff] }
 0x116   : > { %5697 = vmatpush1.bf16.msra.mxu0 %v5696_v13  ;;  %v637_v13 = vld [vmem:[%s8525_s17 + $0x6c0] sm:$0xff]  ;;  %v682_v3 = vld [vmem:[%s8525_s17 + $0x828] sm:$0xff] }
 0x117   : > { %6785 = vmatpush1.bf16.msra.mxu1 %v6784_v15  ;;  %5699 = vmatprep.subr.bf16.mxu0 %v5698_v16  ;;  %v639_v15 = vld [vmem:[%s8525_s17 + $0x6d0] sm:$0xff]  ;;  %v6806_v16 = vpack.c.bf16 %v644_v9, %v640_v8  ;;  %v5720_v22 = vpack.c.bf16 %v641_v14, %v637_v13  ;;  %v5738_v8 = vpack.c.bf16 %v682_v3, %v678_v2  ;;  %v677_v9 = vld [vmem:[%s8525_s17 + $0x800] sm:$0xff]  ;;  %v686_v14 = vld [vmem:[%s8525_s17 + $0x848] sm:$0xff] }
 0x118   : > { %6787 = vmatprep.subr.bf16.mxu1 %v6786_v20  ;;  %v648_v20 = vld [vmem:[%s8525_s17 + $0x718] sm:$0xff]  ;;  %v6808_v23 = vpack.c.bf16 %v643_v17, %v639_v15  ;;  %v683_v13 = vld [vmem:[%s8525_s17 + $0x830] sm:$0xff]  ;;  %v690_v15 = vld [vmem:[%s8525_s17 + $0x868] sm:$0xff] }
 0x119   : > { %v692_v17 = vld [vmem:[%s8525_s17 + $0x878] sm:$0xff] }
 0x11a   : > { %5701 = vmatpush1.bf16.msra.mxu0 %v5700_v26  ;;  %v649_v26 = vld [vmem:[%s8525_s17 + $0x720] sm:$0xff]  ;;  %v720_v2 = vld [vmem:[%s8525_s17 + $0x958] sm:$0xff] }
 0x11b   : > { %6789 = vmatpush1.bf16.msra.mxu1 %v6788_v27  ;;  %5703 = vmatprep.subr.bf16.mxu0 %v5702_v28  ;;  %v647_v27 = vld [vmem:[%s8525_s17 + $0x710] sm:$0xff]  ;;  %v6810_v28 = vpack.c.bf16 %v652_v21, %v648_v20  ;;  %v5724_v34 = vpack.c.bf16 %v649_v26, %v645_v25  ;;  %v5742_v21 = vpack.c.bf16 %v690_v15, %v686_v14  ;;  %v724_v3 = vld [vmem:[%s8525_s17 + $0x978] sm:$0xff] }
 0x11c   : > { %6791 = vmatprep.subr.bf16.mxu1 %v6790_v32  ;;  %v656_v32 = vld [vmem:[%s8525_s17 + $0x758] sm:$0xff]  ;;  %v6812_v35 = vpack.c.bf16 %v651_v29, %v647_v27  ;;  %v691_v26 = vld [vmem:[%s8525_s17 + $0x870] sm:$0xff]  ;;  %v694_v27 = vld [vmem:[%s8525_s17 + $0x888] sm:$0xff] }
 0x11d   : > { %v696_v29 = vld [vmem:[%s8525_s17 + $0x898] sm:$0xff] }
 0x11e   : > { %5705 = vmatpush1.bf16.msra.mxu0 %v5704_v38  ;;  %v657_v38 = vld [vmem:[%s8525_s17 + $0x760] sm:$0xff]  ;;  %v728_v14 = vld [vmem:[%s8525_s17 + $0x998] sm:$0xff] }
 0x11f   : > { %6793 = vmatpush1.bf16.msra.mxu1 %v6792_v39  ;;  %5707 = vmatprep.subr.bf16.mxu0 %v5706_v40  ;;  %v655_v39 = vld [vmem:[%s8525_s17 + $0x750] sm:$0xff]  ;;  %v6814_v40 = vpack.c.bf16 %v660_v33, %v656_v32  ;;  %v5728_v46 = vpack.c.bf16 %v657_v38, %v653_v37  ;;  %v6834_v38 = vpack.c.bf16 %v700_v30, %v696_v29  ;;  %v732_v15 = vld [vmem:[%s8525_s17 + $0x9b8] sm:$0xff] }
 0x120   : > { %6795 = vmatprep.subr.bf16.mxu1 %v6794_v44  ;;  %v664_v44 = vld [vmem:[%s8525_s17 + $0x798] sm:$0xff]  ;;  %v6816_v47 = vpack.c.bf16 %v659_v41, %v655_v39  ;;  %v695_v37 = vld [vmem:[%s8525_s17 + $0x890] sm:$0xff]  ;;  %v706_v41 = vld [vmem:[%s8525_s17 + $0x8e8] sm:$0xff] }
 0x121   : > { %v699_v39 = vld [vmem:[%s8525_s17 + $0x8b0] sm:$0xff] }
 0x122   : > { %5709 = vmatpush1.bf16.msra.mxu0 %v5708_v50  ;;  %v665_v50 = vld [vmem:[%s8525_s17 + $0x7a0] sm:$0xff] }
 0x123   : > { %6797 = vmatpush1.bf16.msra.mxu1 %v6796_v51  ;;  %5711 = vmatprep.subr.bf16.mxu0 %v5710_v52  ;;  %v663_v51 = vld [vmem:[%s8525_s17 + $0x790] sm:$0xff]  ;;  %v6818_v52 = vpack.c.bf16 %v668_v45, %v664_v44  ;;  %v5732_v58 = vpack.c.bf16 %v665_v50, %v661_v49  ;;  %v6836_v45 = vpack.c.bf16 %v699_v39, %v695_v37  ;;  %v746_v37 = vld [vmem:[%s8525_s17 + $0xa28] sm:$0xff]  ;;  %v748_v39 = vld [vmem:[%s8525_s17 + $0xa38] sm:$0xff] }
 0x124   : > { %6799 = vmatprep.subr.bf16.mxu1 %v6798_v56  ;;  %v672_v56 = vld [vmem:[%s8525_s17 + $0x7d8] sm:$0xff]  ;;  %v6820_v59 = vpack.c.bf16 %v667_v53, %v663_v51  ;;  %v703_v49 = vld [vmem:[%s8525_s17 + $0x8d0] sm:$0xff]  ;;  %v6838_v50 = vpack.c.bf16 %v708_v43, %v704_v42  ;;  %v714_v53 = vld [vmem:[%s8525_s17 + $0x928] sm:$0xff] }
 0x125   : > { %v707_v51 = vld [vmem:[%s8525_s17 + $0x8f0] sm:$0xff]  ;;  %v741_v43 = vld [vmem:[%s8525_s17 + $0xa00] sm:$0xff] }
 0x126   : > { %5713 = vmatpush1.bf16.msra.mxu0 %v5712_v62  ;;  %v673_v62 = vld [vmem:[%s8525_s17 + $0x7e0] sm:$0xff] }
 0x127   : > { %6801 = vmatpush1.bf16.msra.mxu1 %v6800_v63  ;;  %5715 = vmatprep.subr.bf16.mxu0 %v5714_v0  ;;  %v671_v63 = vld [vmem:[%s8525_s17 + $0x7d0] sm:$0xff]  ;;  %v6822_v0 = vpack.c.bf16 %v676_v57, %v672_v56  ;;  %v5736_v6 = vpack.c.bf16 %v673_v62, %v669_v61  ;;  %v6840_v57 = vpack.c.bf16 %v707_v51, %v703_v49  ;;  %v754_v49 = vld [vmem:[%s8525_s17 + $0xa68] sm:$0xff]  ;;  %v756_v51 = vld [vmem:[%s8525_s17 + $0xa78] sm:$0xff] }
 0x128   : > { %6803 = vmatprep.subr.bf16.mxu1 %v6802_v4  ;;  %v680_v4 = vld [vmem:[%s8525_s17 + $0x818] sm:$0xff]  ;;  %v6824_v7 = vpack.c.bf16 %v675_v1, %v671_v63  ;;  %v711_v61 = vld [vmem:[%s8525_s17 + $0x910] sm:$0xff]  ;;  %v6842_v62 = vpack.c.bf16 %v716_v55, %v712_v54  ;;  %v722_v1 = vld [vmem:[%s8525_s17 + $0x968] sm:$0xff] }
 0x129   : > { %v715_v63 = vld [vmem:[%s8525_s17 + $0x930] sm:$0xff]  ;;  %v749_v55 = vld [vmem:[%s8525_s17 + $0xa40] sm:$0xff] }
 0x12a   : > { %5717 = vmatpush1.bf16.msra.mxu0 %v5716_v10  ;;  %v681_v10 = vld [vmem:[%s8525_s17 + $0x820] sm:$0xff] }
 0x12b   : > { %6805 = vmatpush1.bf16.msra.mxu1 %v6804_v11  ;;  %5719 = vmatprep.subr.bf16.mxu0 %v5718_v12  ;;  %v679_v11 = vld [vmem:[%s8525_s17 + $0x810] sm:$0xff]  ;;  %v6826_v12 = vpack.c.bf16 %v684_v5, %v680_v4  ;;  %v5740_v19 = vpack.c.bf16 %v681_v10, %v677_v9  ;;  %v6844_v5 = vpack.c.bf16 %v715_v63, %v711_v61  ;;  %v762_v61 = vld [vmem:[%s8525_s17 + $0xaa8] sm:$0xff]  ;;  %v764_v63 = vld [vmem:[%s8525_s17 + $0xab8] sm:$0xff] }
 0x12c   : > { %6807 = vmatprep.subr.bf16.mxu1 %v6806_v16  ;;  %v688_v16 = vld [vmem:[%s8525_s17 + $0x858] sm:$0xff]  ;;  %v6828_v20 = vpack.c.bf16 %v683_v13, %v679_v11  ;;  %v719_v9 = vld [vmem:[%s8525_s17 + $0x950] sm:$0xff]  ;;  %v6846_v10 = vpack.c.bf16 %v724_v3, %v720_v2  ;;  %v730_v13 = vld [vmem:[%s8525_s17 + $0x9a8] sm:$0xff] }
 0x12d   : > { %v6830_v25 = vpack.c.bf16 %v692_v17, %v688_v16  ;;  %v723_v11 = vld [vmem:[%s8525_s17 + $0x970] sm:$0xff]  ;;  %v757_v3 = vld [vmem:[%s8525_s17 + $0xa80] sm:$0xff] }
 0x12e   : > { %5721 = vmatpush1.bf16.msra.mxu0 %v5720_v22  ;;  %v685_v22 = vld [vmem:[%s8525_s17 + $0x840] sm:$0xff]  ;;  %v6848_v17 = vpack.c.bf16 %v723_v11, %v719_v9  ;;  %v770_v9 = vld [vmem:[%s8525_s17 + $0xae8] sm:$0xff]  ;;  %v772_v11 = vld [vmem:[%s8525_s17 + $0xaf8] sm:$0xff] }
 0x12f   : > { %6809 = vmatpush1.bf16.msra.mxu1 %v6808_v23  ;;  %5723 = vmatprep.subr.bf16.mxu0 %v5722_v24  ;;  %v689_v23 = vld [vmem:[%s8525_s17 + $0x860] sm:$0xff]  ;;  %v687_v24 = vld [vmem:[%s8525_s17 + $0x850] sm:$0xff] }
 0x130   : > { %6811 = vmatprep.subr.bf16.mxu1 %v6810_v28  ;;  %v698_v28 = vld [vmem:[%s8525_s17 + $0x8a8] sm:$0xff]  ;;  %v5744_v32 = vpack.c.bf16 %v689_v23, %v685_v22  ;;  %v6832_v33 = vpack.c.bf16 %v691_v26, %v687_v24  ;;  %v6850_v22 = vpack.c.bf16 %v732_v15, %v728_v14  ;;  %v731_v23 = vld [vmem:[%s8525_s17 + $0x9b0] sm:$0xff]  ;;  %v736_v26 = vld [vmem:[%s8525_s17 + $0x9d8] sm:$0xff] }
 0x131   : > { %v734_v24 = vld [vmem:[%s8525_s17 + $0x9c8] sm:$0xff]  ;;  %v765_v15 = vld [vmem:[%s8525_s17 + $0xac0] sm:$0xff] }
 0x132   : > { %5725 = vmatpush1.bf16.msra.mxu0 %v5724_v34  ;;  %v5746_v34 = vpack.c.bf16 %v698_v28, %v694_v27  ;;  %v740_v27 = vld [vmem:[%s8525_s17 + $0x9f8] sm:$0xff] }
 0x133   : > { %6813 = vmatpush1.bf16.msra.mxu1 %v6812_v35  ;;  %5727 = vmatprep.subr.bf16.mxu0 %v5726_v36  ;;  %v693_v35 = vld [vmem:[%s8525_s17 + $0x880] sm:$0xff] }
 0x134   : > { %6815 = vmatprep.subr.bf16.mxu1 %v6814_v40  ;;  %v697_v36 = vld [vmem:[%s8525_s17 + $0x8a0] sm:$0xff]  ;;  %v702_v40 = vld [vmem:[%s8525_s17 + $0x8c8] sm:$0xff] }
 0x135   : > { %v5748_v44 = vpack.c.bf16 %v697_v36, %v693_v35  ;;  %v739_v35 = vld [vmem:[%s8525_s17 + $0x9f0] sm:$0xff]  ;;  %v742_v36 = vld [vmem:[%s8525_s17 + $0xa08] sm:$0xff] }
 0x136   : > { %5729 = vmatpush1.bf16.msra.mxu0 %v5728_v46  ;;  %v5750_v46 = vpack.c.bf16 %v706_v41, %v702_v40  ;;  %v5770_v42 = vpack.c.bf16 %v746_v37, %v742_v36 }
 0x137   : > { %6817 = vmatpush1.bf16.msra.mxu1 %v6816_v47  ;;  %5731 = vmatprep.subr.bf16.mxu0 %v5730_v48  ;;  %v701_v47 = vld [vmem:[%s8525_s17 + $0x8c0] sm:$0xff] }
 0x138   : > { %6819 = vmatprep.subr.bf16.mxu1 %v6818_v52  ;;  %v705_v48 = vld [vmem:[%s8525_s17 + $0x8e0] sm:$0xff]  ;;  %v710_v52 = vld [vmem:[%s8525_s17 + $0x908] sm:$0xff] }
 0x139   : > { %v5752_v56 = vpack.c.bf16 %v705_v48, %v701_v47  ;;  %v747_v47 = vld [vmem:[%s8525_s17 + $0xa30] sm:$0xff]  ;;  %v750_v48 = vld [vmem:[%s8525_s17 + $0xa48] sm:$0xff] }
 0x13a   : > { %5733 = vmatpush1.bf16.msra.mxu0 %v5732_v58  ;;  %v5754_v58 = vpack.c.bf16 %v714_v53, %v710_v52  ;;  %v5774_v54 = vpack.c.bf16 %v754_v49, %v750_v48 }
 0x13b   : > { %6821 = vmatpush1.bf16.msra.mxu1 %v6820_v59  ;;  %5735 = vmatprep.subr.bf16.mxu0 %v5734_v60  ;;  %v709_v59 = vld [vmem:[%s8525_s17 + $0x900] sm:$0xff] }
 0x13c   : > { %6823 = vmatprep.subr.bf16.mxu1 %v6822_v0  ;;  %v713_v60 = vld [vmem:[%s8525_s17 + $0x920] sm:$0xff]  ;;  %v718_v0 = vld [vmem:[%s8525_s17 + $0x948] sm:$0xff] }
 0x13d   : > { %v5756_v4 = vpack.c.bf16 %v713_v60, %v709_v59  ;;  %v755_v59 = vld [vmem:[%s8525_s17 + $0xa70] sm:$0xff]  ;;  %v758_v60 = vld [vmem:[%s8525_s17 + $0xa88] sm:$0xff] }
 0x13e   : > { %5737 = vmatpush1.bf16.msra.mxu0 %v5736_v6  ;;  %v5758_v6 = vpack.c.bf16 %v722_v1, %v718_v0  ;;  %v5778_v2 = vpack.c.bf16 %v762_v61, %v758_v60 }
 0x13f   : > { %6825 = vmatpush1.bf16.msra.mxu1 %v6824_v7  ;;  %5739 = vmatprep.subr.bf16.mxu0 %v5738_v8  ;;  %v717_v7 = vld [vmem:[%s8525_s17 + $0x940] sm:$0xff] }
 0x140   : > { %6827 = vmatprep.subr.bf16.mxu1 %v6826_v12  ;;  %v721_v8 = vld [vmem:[%s8525_s17 + $0x960] sm:$0xff]  ;;  %v726_v12 = vld [vmem:[%s8525_s17 + $0x988] sm:$0xff] }
 0x141   : > { %2733 = vmatmul.mubr.f32.vlgmr.msra.gmra.mrb[0].mxu0 %v389_v18  ;;  %v5760_v16 = vpack.c.bf16 %v721_v8, %v717_v7  ;;  %v763_v7 = vld [vmem:[%s8525_s17 + $0xab0] sm:$0xff]  ;;  %v766_v8 = vld [vmem:[%s8525_s17 + $0xac8] sm:$0xff] }
 0x142   : > { %5741 = vmatpush1.bf16.msra.mxu0 %v5740_v19  ;;  %3940 = vmatmul.mubr.f32.vlgmr.msra.gmra.mrb[0].mxu1 %v389_v18  ;;  %v5762_v18 = vpack.c.bf16 %v730_v13, %v726_v12  ;;  %v725_v19 = vld [vmem:[%s8525_s17 + $0x980] sm:$0xff]  ;;  %v5782_v14 = vpack.c.bf16 %v770_v9, %v766_v8 }
 0x143   : > { %6829 = vmatpush1.bf16.msra.mxu1 %v6828_v20  ;;  %5743 = vmatprep.subr.bf16.mxu0 %v5742_v21  ;;  %v729_v20 = vld [vmem:[%s8525_s17 + $0x9a0] sm:$0xff]  ;;  %v727_v21 = vld [vmem:[%s8525_s17 + $0x990] sm:$0xff] }
 0x144   : > { %6831 = vmatprep.subr.bf16.mxu1 %v6830_v25  ;;  %2803 = vmatprep.mubr.f32.mxu0 %v392_v31  ;;  %v738_v25 = vld [vmem:[%s8525_s17 + $0x9e8] sm:$0xff]  ;;  %v5764_v28 = vpack.c.bf16 %v729_v20, %v725_v19  ;;  %v6852_v29 = vpack.c.bf16 %v731_v23, %v727_v21  ;;  %v771_v19 = vld [vmem:[%s8525_s17 + $0xaf0] sm:$0xff]  ;;  %v780_v23 = vld [vmem:[%s8525_s17 + $0xb38] sm:$0xff] }
 0x145   : > { %4010 = vmatprep.mubr.f32.mxu1 %v392_v31  ;;  %v5766_v30 = vpack.c.bf16 %v738_v25, %v734_v24  ;;  %v733_v31 = vld [vmem:[%s8525_s17 + $0x9c0] sm:$0xff]  ;;  %v774_v20 = vld [vmem:[%s8525_s17 + $0xb08] sm:$0xff] }
 0x146   : > { %5745 = vmatpush1.bf16.msra.mxu0 %v5744_v32  ;;  %v737_v32 = vld [vmem:[%s8525_s17 + $0x9e0] sm:$0xff]  ;;  %v778_v21 = vld [vmem:[%s8525_s17 + $0xb28] sm:$0xff] }
 0x147   : > { %6833 = vmatpush1.bf16.msra.mxu1 %v6832_v33  ;;  %5747 = vmatprep.subr.bf16.mxu0 %v5746_v34  ;;  %v735_v33 = vld [vmem:[%s8525_s17 + $0x9d0] sm:$0xff]  ;;  %v6854_v34 = vpack.c.bf16 %v740_v27, %v736_v26  ;;  %v5768_v40 = vpack.c.bf16 %v737_v32, %v733_v31  ;;  %v5786_v26 = vpack.c.bf16 %v778_v21, %v774_v20  ;;  %v773_v27 = vld [vmem:[%s8525_s17 + $0xb00] sm:$0xff]  ;;  %v782_v32 = vld [vmem:[%s8525_s17 + $0xb48] sm:$0xff] }
 0x148   : > { %6835 = vmatprep.subr.bf16.mxu1 %v6834_v38  ;;  %v744_v38 = vld [vmem:[%s8525_s17 + $0xa18] sm:$0xff]  ;;  %v6856_v41 = vpack.c.bf16 %v739_v35, %v735_v33  ;;  %v779_v31 = vld [vmem:[%s8525_s17 + $0xb30] sm:$0xff]  ;;  %v786_v33 = vld [vmem:[%s8525_s17 + $0xb68] sm:$0xff] }
 0x149   : > { %v788_v35 = vld [vmem:[%s8525_s17 + $0xb78] sm:$0xff]  ;;  %v391_v20 = vld [vmem:[%s8547_s14 + $0x20] sm:$0xff] }
 0x14a   : > { %5749 = vmatpush1.bf16.msra.mxu0 %v5748_v44  ;;  %v745_v44 = vld [vmem:[%s8525_s17 + $0xa20] sm:$0xff] }
 0x14b   : > { %6837 = vmatpush1.bf16.msra.mxu1 %v6836_v45  ;;  %5751 = vmatprep.subr.bf16.mxu0 %v5750_v46  ;;  %v743_v45 = vld [vmem:[%s8525_s17 + $0xa10] sm:$0xff]  ;;  %v6858_v46 = vpack.c.bf16 %v748_v39, %v744_v38  ;;  %v5772_v52 = vpack.c.bf16 %v745_v44, %v741_v43  ;;  %v5790_v38 = vpack.c.bf16 %v786_v33, %v782_v32  ;;  %v781_v39 = vld [vmem:[%s8525_s17 + $0xb40] sm:$0xff]  ;;  %v790_v44 = vld [vmem:[%s8525_s17 + $0xb88] sm:$0xff] }
 0x14c   : > { %6839 = vmatprep.subr.bf16.mxu1 %v6838_v50  ;;  %v752_v50 = vld [vmem:[%s8525_s17 + $0xa58] sm:$0xff]  ;;  %v6860_v53 = vpack.c.bf16 %v747_v47, %v743_v45  ;;  %v787_v43 = vld [vmem:[%s8525_s17 + $0xb70] sm:$0xff]  ;;  %v794_v45 = vld [vmem:[%s8525_s17 + $0xba8] sm:$0xff] }
 0x14d   : > { %v796_v47 = vld [vmem:[%s8525_s17 + $0xbb8] sm:$0xff] }
 0x14e   : > { %5753 = vmatpush1.bf16.msra.mxu0 %v5752_v56  ;;  %v753_v56 = vld [vmem:[%s8525_s17 + $0xa60] sm:$0xff]  ;;  %v828_v32 = vld [vmem:[%s8525_s17 + $0xcb8] sm:$0xff] }
 0x14f   : > { %6841 = vmatpush1.bf16.msra.mxu1 %v6840_v57  ;;  %5755 = vmatprep.subr.bf16.mxu0 %v5754_v58  ;;  %v751_v57 = vld [vmem:[%s8525_s17 + $0xa50] sm:$0xff]  ;;  %v6862_v58 = vpack.c.bf16 %v756_v51, %v752_v50  ;;  %v5776_v0 = vpack.c.bf16 %v753_v56, %v749_v55  ;;  %v5794_v50 = vpack.c.bf16 %v794_v45, %v790_v44  ;;  %v789_v51 = vld [vmem:[%s8525_s17 + $0xb80] sm:$0xff]  ;;  %v798_v56 = vld [vmem:[%s8525_s17 + $0xbc8] sm:$0xff] }
 0x150   : > { %6843 = vmatprep.subr.bf16.mxu1 %v6842_v62  ;;  %v760_v62 = vld [vmem:[%s8525_s17 + $0xa98] sm:$0xff]  ;;  %v6864_v1 = vpack.c.bf16 %v755_v59, %v751_v57  ;;  %v795_v55 = vld [vmem:[%s8525_s17 + $0xbb0] sm:$0xff]  ;;  %v802_v57 = vld [vmem:[%s8525_s17 + $0xbe8] sm:$0xff] }
 0x151   : > { %v804_v59 = vld [vmem:[%s8525_s17 + $0xbf8] sm:$0xff] }
 0x152   : > { %5757 = vmatpush1.bf16.msra.mxu0 %v5756_v4  ;;  %v761_v4 = vld [vmem:[%s8525_s17 + $0xaa0] sm:$0xff]  ;;  %v394_v33 = vld [vmem:[%s8547_s14 + $0x38] sm:$0xff] }
 0x153   : > { %6845 = vmatpush1.bf16.msra.mxu1 %v6844_v5  ;;  %5759 = vmatprep.subr.bf16.mxu0 %v5758_v6  ;;  %v759_v5 = vld [vmem:[%s8525_s17 + $0xa90] sm:$0xff]  ;;  %v6866_v6 = vpack.c.bf16 %v764_v63, %v760_v62  ;;  %v5780_v12 = vpack.c.bf16 %v761_v4, %v757_v3  ;;  %v5798_v62 = vpack.c.bf16 %v802_v57, %v798_v56  ;;  %v797_v63 = vld [vmem:[%s8525_s17 + $0xbc0] sm:$0xff]  ;;  %v806_v4 = vld [vmem:[%s8525_s17 + $0xc08] sm:$0xff] }
 0x154   : > { %6847 = vmatprep.subr.bf16.mxu1 %v6846_v10  ;;  %v768_v10 = vld [vmem:[%s8525_s17 + $0xad8] sm:$0xff]  ;;  %v6868_v13 = vpack.c.bf16 %v763_v7, %v759_v5  ;;  %v803_v3 = vld [vmem:[%s8525_s17 + $0xbf0] sm:$0xff]  ;;  %v810_v5 = vld [vmem:[%s8525_s17 + $0xc28] sm:$0xff] }
 0x155   : > { %v812_v7 = vld [vmem:[%s8525_s17 + $0xc38] sm:$0xff] }
 0x156   : > { %5761 = vmatpush1.bf16.msra.mxu0 %v5760_v16  ;;  %v769_v16 = vld [vmem:[%s8525_s17 + $0xae0] sm:$0xff]  ;;  %v832_v44 = vld [vmem:[%s8525_s17 + $0xcd8] sm:$0xff] }
 0x157   : > { %6849 = vmatpush1.bf16.msra.mxu1 %v6848_v17  ;;  %5763 = vmatprep.subr.bf16.mxu0 %v5762_v18  ;;  %v767_v17 = vld [vmem:[%s8525_s17 + $0xad0] sm:$0xff]  ;;  %v6870_v18 = vpack.c.bf16 %v772_v11, %v768_v10  ;;  %v5784_v24 = vpack.c.bf16 %v769_v16, %v765_v15  ;;  %v5802_v10 = vpack.c.bf16 %v810_v5, %v806_v4  ;;  %v805_v11 = vld [vmem:[%s8525_s17 + $0xc00] sm:$0xff]  ;;  %v814_v16 = vld [vmem:[%s8525_s17 + $0xc48] sm:$0xff] }
 0x158   : > { %6851 = vmatprep.subr.bf16.mxu1 %v6850_v22  ;;  %v776_v22 = vld [vmem:[%s8525_s17 + $0xb18] sm:$0xff]  ;;  %v6872_v25 = vpack.c.bf16 %v771_v19, %v767_v17  ;;  %v811_v15 = vld [vmem:[%s8525_s17 + $0xc30] sm:$0xff]  ;;  %v818_v17 = vld [vmem:[%s8525_s17 + $0xc68] sm:$0xff] }
 0x159   : > { %v820_v19 = vld [vmem:[%s8525_s17 + $0xc78] sm:$0xff] }
 0x15a   : > { %5765 = vmatpush1.bf16.msra.mxu0 %v5764_v28  ;;  %v777_v28 = vld [vmem:[%s8525_s17 + $0xb20] sm:$0xff]  ;;  %v836_v45 = vld [vmem:[%s8525_s17 + $0xcf8] sm:$0xff] }
 0x15b   : > { %6853 = vmatpush1.bf16.msra.mxu1 %v6852_v29  ;;  %5767 = vmatprep.subr.bf16.mxu0 %v5766_v30  ;;  %v775_v29 = vld [vmem:[%s8525_s17 + $0xb10] sm:$0xff]  ;;  %v6874_v30 = vpack.c.bf16 %v780_v23, %v776_v22  ;;  %v5788_v36 = vpack.c.bf16 %v777_v28, %v773_v27  ;;  %v5806_v23 = vpack.c.bf16 %v818_v17, %v814_v16  ;;  %v840_v56 = vld [vmem:[%s8525_s17 + $0xd18] sm:$0xff] }
 0x15c   : > { %6855 = vmatprep.subr.bf16.mxu1 %v6854_v34  ;;  %v784_v34 = vld [vmem:[%s8525_s17 + $0xb58] sm:$0xff]  ;;  %v6876_v37 = vpack.c.bf16 %v779_v31, %v775_v29  ;;  %v819_v28 = vld [vmem:[%s8525_s17 + $0xc70] sm:$0xff]  ;;  %v822_v29 = vld [vmem:[%s8525_s17 + $0xc88] sm:$0xff] }
 0x15d   : > { %v824_v31 = vld [vmem:[%s8525_s17 + $0xc98] sm:$0xff] }
 0x15e   : > { %5769 = vmatpush1.bf16.msra.mxu0 %v5768_v40  ;;  %v785_v40 = vld [vmem:[%s8525_s17 + $0xb60] sm:$0xff]  ;;  %v844_v57 = vld [vmem:[%s8525_s17 + $0xd38] sm:$0xff] }
 0x15f   : > { %6857 = vmatpush1.bf16.msra.mxu1 %v6856_v41  ;;  %5771 = vmatprep.subr.bf16.mxu0 %v5770_v42  ;;  %v783_v41 = vld [vmem:[%s8525_s17 + $0xb50] sm:$0xff]  ;;  %v6878_v42 = vpack.c.bf16 %v788_v35, %v784_v34  ;;  %v5792_v48 = vpack.c.bf16 %v785_v40, %v781_v39  ;;  %v6898_v40 = vpack.c.bf16 %v828_v32, %v824_v31  ;;  %v848_v4 = vld [vmem:[%s8525_s17 + $0xd58] sm:$0xff] }
 0x160   : > { %6859 = vmatprep.subr.bf16.mxu1 %v6858_v46  ;;  %v792_v46 = vld [vmem:[%s8525_s17 + $0xb98] sm:$0xff]  ;;  %v6880_v49 = vpack.c.bf16 %v787_v43, %v783_v41  ;;  %v823_v39 = vld [vmem:[%s8525_s17 + $0xc90] sm:$0xff]  ;;  %v834_v43 = vld [vmem:[%s8525_s17 + $0xce8] sm:$0xff] }
 0x161   : > { %v827_v41 = vld [vmem:[%s8525_s17 + $0xcb0] sm:$0xff]  ;;  %v852_v5 = vld [vmem:[%s8525_s17 + $0xd78] sm:$0xff] }
 0x162   : > { %5773 = vmatpush1.bf16.msra.mxu0 %v5772_v52  ;;  %v793_v52 = vld [vmem:[%s8525_s17 + $0xba0] sm:$0xff]  ;;  %v856_v16 = vld [vmem:[%s8525_s17 + $0xd98] sm:$0xff] }
 0x163   : > { %6861 = vmatpush1.bf16.msra.mxu1 %v6860_v53  ;;  %5775 = vmatprep.subr.bf16.mxu0 %v5774_v54  ;;  %v791_v53 = vld [vmem:[%s8525_s17 + $0xb90] sm:$0xff]  ;;  %v6882_v54 = vpack.c.bf16 %v796_v47, %v792_v46  ;;  %v5796_v60 = vpack.c.bf16 %v793_v52, %v789_v51  ;;  %v6900_v47 = vpack.c.bf16 %v827_v41, %v823_v39  ;;  %v860_v17 = vld [vmem:[%s8525_s17 + $0xdb8] sm:$0xff]  ;;  %v874_v39 = vld [vmem:[%s8525_s17 + $0xe28] sm:$0xff] }
 0x164   : > { %6863 = vmatprep.subr.bf16.mxu1 %v6862_v58  ;;  %v800_v58 = vld [vmem:[%s8525_s17 + $0xbd8] sm:$0xff]  ;;  %v6884_v61 = vpack.c.bf16 %v795_v55, %v791_v53  ;;  %v831_v51 = vld [vmem:[%s8525_s17 + $0xcd0] sm:$0xff]  ;;  %v6902_v52 = vpack.c.bf16 %v836_v45, %v832_v44  ;;  %v842_v55 = vld [vmem:[%s8525_s17 + $0xd28] sm:$0xff] }
 0x165   : > { %v835_v53 = vld [vmem:[%s8525_s17 + $0xcf0] sm:$0xff]  ;;  %v876_v41 = vld [vmem:[%s8525_s17 + $0xe38] sm:$0xff]  ;;  %v869_v45 = vld [vmem:[%s8525_s17 + $0xe00] sm:$0xff] }
 0x166   : > { %5777 = vmatpush1.bf16.msra.mxu0 %v5776_v0  ;;  %v801_v0 = vld [vmem:[%s8525_s17 + $0xbe0] sm:$0xff] }
 0x167   : > { %6865 = vmatpush1.bf16.msra.mxu1 %v6864_v1  ;;  %5779 = vmatprep.subr.bf16.mxu0 %v5778_v2  ;;  %v799_v1 = vld [vmem:[%s8525_s17 + $0xbd0] sm:$0xff]  ;;  %v6886_v2 = vpack.c.bf16 %v804_v59, %v800_v58  ;;  %v5800_v8 = vpack.c.bf16 %v801_v0, %v797_v63  ;;  %v6904_v59 = vpack.c.bf16 %v835_v53, %v831_v51  ;;  %v882_v51 = vld [vmem:[%s8525_s17 + $0xe68] sm:$0xff]  ;;  %v884_v53 = vld [vmem:[%s8525_s17 + $0xe78] sm:$0xff] }
 0x168   : > { %6867 = vmatprep.subr.bf16.mxu1 %v6866_v6  ;;  %v808_v6 = vld [vmem:[%s8525_s17 + $0xc18] sm:$0xff]  ;;  %v6888_v9 = vpack.c.bf16 %v803_v3, %v799_v1  ;;  %v839_v63 = vld [vmem:[%s8525_s17 + $0xd10] sm:$0xff]  ;;  %v6906_v0 = vpack.c.bf16 %v844_v57, %v840_v56  ;;  %v850_v3 = vld [vmem:[%s8525_s17 + $0xd68] sm:$0xff] }
 0x169   : > { %v843_v1 = vld [vmem:[%s8525_s17 + $0xd30] sm:$0xff]  ;;  %v877_v57 = vld [vmem:[%s8525_s17 + $0xe40] sm:$0xff] }
 0x16a   : > { %5781 = vmatpush1.bf16.msra.mxu0 %v5780_v12  ;;  %v809_v12 = vld [vmem:[%s8525_s17 + $0xc20] sm:$0xff] }
 0x16b   : > { %6869 = vmatpush1.bf16.msra.mxu1 %v6868_v13  ;;  %5783 = vmatprep.subr.bf16.mxu0 %v5782_v14  ;;  %v807_v13 = vld [vmem:[%s8525_s17 + $0xc10] sm:$0xff]  ;;  %v6890_v14 = vpack.c.bf16 %v812_v7, %v808_v6  ;;  %v5804_v21 = vpack.c.bf16 %v809_v12, %v805_v11  ;;  %v6908_v7 = vpack.c.bf16 %v843_v1, %v839_v63  ;;  %v890_v63 = vld [vmem:[%s8525_s17 + $0xea8] sm:$0xff]  ;;  %v892_v1 = vld [vmem:[%s8525_s17 + $0xeb8] sm:$0xff] }
 0x16c   : > { %6871 = vmatprep.subr.bf16.mxu1 %v6870_v18  ;;  %v816_v18 = vld [vmem:[%s8525_s17 + $0xc58] sm:$0xff]  ;;  %v6892_v22 = vpack.c.bf16 %v811_v15, %v807_v13  ;;  %v847_v11 = vld [vmem:[%s8525_s17 + $0xd50] sm:$0xff]  ;;  %v6910_v12 = vpack.c.bf16 %v852_v5, %v848_v4  ;;  %v858_v15 = vld [vmem:[%s8525_s17 + $0xda8] sm:$0xff] }
 0x16d   : > { %v6894_v27 = vpack.c.bf16 %v820_v19, %v816_v18  ;;  %v851_v13 = vld [vmem:[%s8525_s17 + $0xd70] sm:$0xff]  ;;  %v885_v5 = vld [vmem:[%s8525_s17 + $0xe80] sm:$0xff] }
 0x16e   : > { %5785 = vmatpush1.bf16.msra.mxu0 %v5784_v24  ;;  %v813_v24 = vld [vmem:[%s8525_s17 + $0xc40] sm:$0xff]  ;;  %v6912_v19 = vpack.c.bf16 %v851_v13, %v847_v11  ;;  %v898_v11 = vld [vmem:[%s8525_s17 + $0xee8] sm:$0xff]  ;;  %v900_v13 = vld [vmem:[%s8525_s17 + $0xef8] sm:$0xff] }
 0x16f   : > { %6873 = vmatpush1.bf16.msra.mxu1 %v6872_v25  ;;  %5787 = vmatprep.subr.bf16.mxu0 %v5786_v26  ;;  %v817_v25 = vld [vmem:[%s8525_s17 + $0xc60] sm:$0xff]  ;;  %v815_v26 = vld [vmem:[%s8525_s17 + $0xc50] sm:$0xff] }
 0x170   : > { %6875 = vmatprep.subr.bf16.mxu1 %v6874_v30  ;;  %v826_v30 = vld [vmem:[%s8525_s17 + $0xca8] sm:$0xff]  ;;  %v5808_v34 = vpack.c.bf16 %v817_v25, %v813_v24  ;;  %v6896_v35 = vpack.c.bf16 %v819_v28, %v815_v26  ;;  %v6914_v24 = vpack.c.bf16 %v860_v17, %v856_v16  ;;  %v859_v25 = vld [vmem:[%s8525_s17 + $0xdb0] sm:$0xff]  ;;  %v864_v28 = vld [vmem:[%s8525_s17 + $0xdd8] sm:$0xff] }
 0x171   : > { %v862_v26 = vld [vmem:[%s8525_s17 + $0xdc8] sm:$0xff]  ;;  %v893_v17 = vld [vmem:[%s8525_s17 + $0xec0] sm:$0xff] }
 0x172   : > { %5789 = vmatpush1.bf16.msra.mxu0 %v5788_v36  ;;  %v5810_v36 = vpack.c.bf16 %v826_v30, %v822_v29  ;;  %v868_v29 = vld [vmem:[%s8525_s17 + $0xdf8] sm:$0xff] }
 0x173   : > { %6877 = vmatpush1.bf16.msra.mxu1 %v6876_v37  ;;  %5791 = vmatprep.subr.bf16.mxu0 %v5790_v38  ;;  %v821_v37 = vld [vmem:[%s8525_s17 + $0xc80] sm:$0xff] }
 0x174   : > { %6879 = vmatprep.subr.bf16.mxu1 %v6878_v42  ;;  %v825_v38 = vld [vmem:[%s8525_s17 + $0xca0] sm:$0xff]  ;;  %v830_v42 = vld [vmem:[%s8525_s17 + $0xcc8] sm:$0xff] }
 0x175   : > { %v5812_v46 = vpack.c.bf16 %v825_v38, %v821_v37  ;;  %v867_v37 = vld [vmem:[%s8525_s17 + $0xdf0] sm:$0xff]  ;;  %v870_v38 = vld [vmem:[%s8525_s17 + $0xe08] sm:$0xff] }
 0x176   : > { %5793 = vmatpush1.bf16.msra.mxu0 %v5792_v48  ;;  %v5814_v48 = vpack.c.bf16 %v834_v43, %v830_v42  ;;  %v5834_v44 = vpack.c.bf16 %v874_v39, %v870_v38 }
 0x177   : > { %6881 = vmatpush1.bf16.msra.mxu1 %v6880_v49  ;;  %5795 = vmatprep.subr.bf16.mxu0 %v5794_v50  ;;  %v829_v49 = vld [vmem:[%s8525_s17 + $0xcc0] sm:$0xff] }
 0x178   : > { %6883 = vmatprep.subr.bf16.mxu1 %v6882_v54  ;;  %v833_v50 = vld [vmem:[%s8525_s17 + $0xce0] sm:$0xff]  ;;  %v838_v54 = vld [vmem:[%s8525_s17 + $0xd08] sm:$0xff] }
 0x179   : > { %v5816_v58 = vpack.c.bf16 %v833_v50, %v829_v49  ;;  %v875_v49 = vld [vmem:[%s8525_s17 + $0xe30] sm:$0xff]  ;;  %v878_v50 = vld [vmem:[%s8525_s17 + $0xe48] sm:$0xff] }
 0x17a   : > { %5797 = vmatpush1.bf16.msra.mxu0 %v5796_v60  ;;  %v5818_v60 = vpack.c.bf16 %v842_v55, %v838_v54  ;;  %v5838_v56 = vpack.c.bf16 %v882_v51, %v878_v50 }
 0x17b   : > { %6885 = vmatpush1.bf16.msra.mxu1 %v6884_v61  ;;  %5799 = vmatprep.subr.bf16.mxu0 %v5798_v62  ;;  %v837_v61 = vld [vmem:[%s8525_s17 + $0xd00] sm:$0xff] }
 0x17c   : > { %6887 = vmatprep.subr.bf16.mxu1 %v6886_v2  ;;  %v841_v62 = vld [vmem:[%s8525_s17 + $0xd20] sm:$0xff]  ;;  %v846_v2 = vld [vmem:[%s8525_s17 + $0xd48] sm:$0xff] }
 0x17d   : > { %v5820_v6 = vpack.c.bf16 %v841_v62, %v837_v61  ;;  %v883_v61 = vld [vmem:[%s8525_s17 + $0xe70] sm:$0xff]  ;;  %v886_v62 = vld [vmem:[%s8525_s17 + $0xe88] sm:$0xff] }
 0x17e   : > { %5801 = vmatpush1.bf16.msra.mxu0 %v5800_v8  ;;  %v5822_v8 = vpack.c.bf16 %v850_v3, %v846_v2  ;;  %v5842_v4 = vpack.c.bf16 %v890_v63, %v886_v62 }
 0x17f   : > { %6889 = vmatpush1.bf16.msra.mxu1 %v6888_v9  ;;  %5803 = vmatprep.subr.bf16.mxu0 %v5802_v10  ;;  %v845_v9 = vld [vmem:[%s8525_s17 + $0xd40] sm:$0xff] }
 0x180   : > { %6891 = vmatprep.subr.bf16.mxu1 %v6890_v14  ;;  %v849_v10 = vld [vmem:[%s8525_s17 + $0xd60] sm:$0xff]  ;;  %v854_v14 = vld [vmem:[%s8525_s17 + $0xd88] sm:$0xff] }
 0x181   : > { %2804 = vmatmul.mubr.f32.vlgmr.msra.gmra.mrb[0].mxu0 %v391_v20  ;;  %v5824_v18 = vpack.c.bf16 %v849_v10, %v845_v9  ;;  %v891_v9 = vld [vmem:[%s8525_s17 + $0xeb0] sm:$0xff]  ;;  %v894_v10 = vld [vmem:[%s8525_s17 + $0xec8] sm:$0xff] }
 0x182   : > { %5805 = vmatpush1.bf16.msra.mxu0 %v5804_v21  ;;  %4011 = vmatmul.mubr.f32.vlgmr.msra.gmra.mrb[0].mxu1 %v391_v20  ;;  %v5826_v20 = vpack.c.bf16 %v858_v15, %v854_v14  ;;  %v853_v21 = vld [vmem:[%s8525_s17 + $0xd80] sm:$0xff]  ;;  %v5846_v16 = vpack.c.bf16 %v898_v11, %v894_v10 }
 0x183   : > { %6893 = vmatpush1.bf16.msra.mxu1 %v6892_v22  ;;  %5807 = vmatprep.subr.bf16.mxu0 %v5806_v23  ;;  %v857_v22 = vld [vmem:[%s8525_s17 + $0xda0] sm:$0xff]  ;;  %v855_v23 = vld [vmem:[%s8525_s17 + $0xd90] sm:$0xff] }
 0x184   : > { %6895 = vmatprep.subr.bf16.mxu1 %v6894_v27  ;;  %2874 = vmatprep.mubr.f32.mxu0 %v394_v33  ;;  %v866_v27 = vld [vmem:[%s8525_s17 + $0xde8] sm:$0xff]  ;;  %v5828_v30 = vpack.c.bf16 %v857_v22, %v853_v21  ;;  %v6916_v31 = vpack.c.bf16 %v859_v25, %v855_v23  ;;  %v899_v21 = vld [vmem:[%s8525_s17 + $0xef0] sm:$0xff]  ;;  %v908_v25 = vld [vmem:[%s8525_s17 + $0xf38] sm:$0xff] }
 0x185   : > { %4081 = vmatprep.mubr.f32.mxu1 %v394_v33  ;;  %v5830_v32 = vpack.c.bf16 %v866_v27, %v862_v26  ;;  %v861_v33 = vld [vmem:[%s8525_s17 + $0xdc0] sm:$0xff]  ;;  %v902_v22 = vld [vmem:[%s8525_s17 + $0xf08] sm:$0xff] }
 0x186   : > { %5809 = vmatpush1.bf16.msra.mxu0 %v5808_v34  ;;  %v865_v34 = vld [vmem:[%s8525_s17 + $0xde0] sm:$0xff]  ;;  %v906_v23 = vld [vmem:[%s8525_s17 + $0xf28] sm:$0xff] }
 0x187   : > { %6897 = vmatpush1.bf16.msra.mxu1 %v6896_v35  ;;  %5811 = vmatprep.subr.bf16.mxu0 %v5810_v36  ;;  %v863_v35 = vld [vmem:[%s8525_s17 + $0xdd0] sm:$0xff]  ;;  %v6918_v36 = vpack.c.bf16 %v868_v29, %v864_v28  ;;  %v5832_v42 = vpack.c.bf16 %v865_v34, %v861_v33  ;;  %v5850_v28 = vpack.c.bf16 %v906_v23, %v902_v22  ;;  %v901_v29 = vld [vmem:[%s8525_s17 + $0xf00] sm:$0xff]  ;;  %v910_v34 = vld [vmem:[%s8525_s17 + $0xf48] sm:$0xff] }
 0x188   : > { %6899 = vmatprep.subr.bf16.mxu1 %v6898_v40  ;;  %v872_v40 = vld [vmem:[%s8525_s17 + $0xe18] sm:$0xff]  ;;  %v6920_v43 = vpack.c.bf16 %v867_v37, %v863_v35  ;;  %v907_v33 = vld [vmem:[%s8525_s17 + $0xf30] sm:$0xff]  ;;  %v914_v35 = vld [vmem:[%s8525_s17 + $0xf68] sm:$0xff] }
 0x189   : > { %v916_v37 = vld [vmem:[%s8525_s17 + $0xf78] sm:$0xff]  ;;  %v393_v22 = vld [vmem:[%s8547_s14 + $0x30] sm:$0xff] }
 0x18a   : > { %5813 = vmatpush1.bf16.msra.mxu0 %v5812_v46  ;;  %v873_v46 = vld [vmem:[%s8525_s17 + $0xe20] sm:$0xff] }
 0x18b   : > { %6901 = vmatpush1.bf16.msra.mxu1 %v6900_v47  ;;  %5815 = vmatprep.subr.bf16.mxu0 %v5814_v48  ;;  %v871_v47 = vld [vmem:[%s8525_s17 + $0xe10] sm:$0xff]  ;;  %v6922_v48 = vpack.c.bf16 %v876_v41, %v872_v40  ;;  %v5836_v54 = vpack.c.bf16 %v873_v46, %v869_v45  ;;  %v5854_v40 = vpack.c.bf16 %v914_v35, %v910_v34  ;;  %v909_v41 = vld [vmem:[%s8525_s17 + $0xf40] sm:$0xff]  ;;  %v918_v46 = vld [vmem:[%s8525_s17 + $0xf88] sm:$0xff] }
 0x18c   : > { %6903 = vmatprep.subr.bf16.mxu1 %v6902_v52  ;;  %v880_v52 = vld [vmem:[%s8525_s17 + $0xe58] sm:$0xff]  ;;  %v6924_v55 = vpack.c.bf16 %v875_v49, %v871_v47  ;;  %v915_v45 = vld [vmem:[%s8525_s17 + $0xf70] sm:$0xff]  ;;  %v922_v47 = vld [vmem:[%s8525_s17 + $0xfa8] sm:$0xff] }
 0x18d   : > { %v924_v49 = vld [vmem:[%s8525_s17 + $0xfb8] sm:$0xff]  ;;  %v396_v35 = vld [vmem:[%s8547_s14 + $0x48] sm:$0xff] }
 0x18e   : > { %5817 = vmatpush1.bf16.msra.mxu0 %v5816_v58  ;;  %v881_v58 = vld [vmem:[%s8525_s17 + $0xe60] sm:$0xff]  ;;  %v956_v34 = vld [vmem:[%s8525_s17 + $0x10b8] sm:$0xff] }
 0x18f   : > { %6905 = vmatpush1.bf16.msra.mxu1 %v6904_v59  ;;  %5819 = vmatprep.subr.bf16.mxu0 %v5818_v60  ;;  %v879_v59 = vld [vmem:[%s8525_s17 + $0xe50] sm:$0xff]  ;;  %v6926_v60 = vpack.c.bf16 %v884_v53, %v880_v52  ;;  %v5840_v2 = vpack.c.bf16 %v881_v58, %v877_v57  ;;  %v5858_v52 = vpack.c.bf16 %v922_v47, %v918_v46  ;;  %v917_v53 = vld [vmem:[%s8525_s17 + $0xf80] sm:$0xff]  ;;  %v926_v58 = vld [vmem:[%s8525_s17 + $0xfc8] sm:$0xff] }
 0x190   : > { %6907 = vmatprep.subr.bf16.mxu1 %v6906_v0  ;;  %v888_v0 = vld [vmem:[%s8525_s17 + $0xe98] sm:$0xff]  ;;  %v6928_v3 = vpack.c.bf16 %v883_v61, %v879_v59  ;;  %v923_v57 = vld [vmem:[%s8525_s17 + $0xfb0] sm:$0xff]  ;;  %v930_v59 = vld [vmem:[%s8525_s17 + $0xfe8] sm:$0xff] }
 0x191   : > { %v932_v61 = vld [vmem:[%s8525_s17 + $0xff8] sm:$0xff] }
 0x192   : > { %5821 = vmatpush1.bf16.msra.mxu0 %v5820_v6  ;;  %v889_v6 = vld [vmem:[%s8525_s17 + $0xea0] sm:$0xff]  ;;  %v960_v46 = vld [vmem:[%s8525_s17 + $0x10d8] sm:$0xff] }
 0x193   : > { %6909 = vmatpush1.bf16.msra.mxu1 %v6908_v7  ;;  %5823 = vmatprep.subr.bf16.mxu0 %v5822_v8  ;;  %v887_v7 = vld [vmem:[%s8525_s17 + $0xe90] sm:$0xff]  ;;  %v6930_v8 = vpack.c.bf16 %v892_v1, %v888_v0  ;;  %v5844_v14 = vpack.c.bf16 %v889_v6, %v885_v5  ;;  %v5862_v0 = vpack.c.bf16 %v930_v59, %v926_v58  ;;  %v925_v1 = vld [vmem:[%s8525_s17 + $0xfc0] sm:$0xff]  ;;  %v934_v6 = vld [vmem:[%s8525_s17 + $0x1008] sm:$0xff] }
 0x194   : > { %6911 = vmatprep.subr.bf16.mxu1 %v6910_v12  ;;  %v896_v12 = vld [vmem:[%s8525_s17 + $0xed8] sm:$0xff]  ;;  %v6932_v15 = vpack.c.bf16 %v891_v9, %v887_v7  ;;  %v931_v5 = vld [vmem:[%s8525_s17 + $0xff0] sm:$0xff]  ;;  %v938_v7 = vld [vmem:[%s8525_s17 + $0x1028] sm:$0xff] }
 0x195   : > { %v940_v9 = vld [vmem:[%s8525_s17 + $0x1038] sm:$0xff] }
 0x196   : > { %5825 = vmatpush1.bf16.msra.mxu0 %v5824_v18  ;;  %v897_v18 = vld [vmem:[%s8525_s17 + $0xee0] sm:$0xff]  ;;  %v964_v47 = vld [vmem:[%s8525_s17 + $0x10f8] sm:$0xff] }
 0x197   : > { %6913 = vmatpush1.bf16.msra.mxu1 %v6912_v19  ;;  %5827 = vmatprep.subr.bf16.mxu0 %v5826_v20  ;;  %v895_v19 = vld [vmem:[%s8525_s17 + $0xed0] sm:$0xff]  ;;  %v6934_v20 = vpack.c.bf16 %v900_v13, %v896_v12  ;;  %v5848_v26 = vpack.c.bf16 %v897_v18, %v893_v17  ;;  %v5866_v12 = vpack.c.bf16 %v938_v7, %v934_v6  ;;  %v933_v13 = vld [vmem:[%s8525_s17 + $0x1000] sm:$0xff]  ;;  %v942_v18 = vld [vmem:[%s8525_s17 + $0x1048] sm:$0xff] }
 0x198   : > { %6915 = vmatprep.subr.bf16.mxu1 %v6914_v24  ;;  %v904_v24 = vld [vmem:[%s8525_s17 + $0xf18] sm:$0xff]  ;;  %v6936_v27 = vpack.c.bf16 %v899_v21, %v895_v19  ;;  %v939_v17 = vld [vmem:[%s8525_s17 + $0x1030] sm:$0xff]  ;;  %v946_v19 = vld [vmem:[%s8525_s17 + $0x1068] sm:$0xff] }
 0x199   : > { %v948_v21 = vld [vmem:[%s8525_s17 + $0x1078] sm:$0xff] }
 0x19a   : > { %5829 = vmatpush1.bf16.msra.mxu0 %v5828_v30  ;;  %v905_v30 = vld [vmem:[%s8525_s17 + $0xf20] sm:$0xff]  ;;  %v968_v58 = vld [vmem:[%s8525_s17 + $0x1118] sm:$0xff] }
 0x19b   : > { %6917 = vmatpush1.bf16.msra.mxu1 %v6916_v31  ;;  %5831 = vmatprep.subr.bf16.mxu0 %v5830_v32  ;;  %v903_v31 = vld [vmem:[%s8525_s17 + $0xf10] sm:$0xff]  ;;  %v6938_v32 = vpack.c.bf16 %v908_v25, %v904_v24  ;;  %v5852_v38 = vpack.c.bf16 %v905_v30, %v901_v29  ;;  %v5870_v25 = vpack.c.bf16 %v946_v19, %v942_v18  ;;  %v972_v59 = vld [vmem:[%s8525_s17 + $0x1138] sm:$0xff] }
 0x19c   : > { %6919 = vmatprep.subr.bf16.mxu1 %v6918_v36  ;;  %v912_v36 = vld [vmem:[%s8525_s17 + $0xf58] sm:$0xff]  ;;  %v6940_v39 = vpack.c.bf16 %v907_v33, %v903_v31  ;;  %v947_v30 = vld [vmem:[%s8525_s17 + $0x1070] sm:$0xff]  ;;  %v950_v31 = vld [vmem:[%s8525_s17 + $0x1088] sm:$0xff] }
 0x19d   : > { %v952_v33 = vld [vmem:[%s8525_s17 + $0x1098] sm:$0xff] }
 0x19e   : > { %5833 = vmatpush1.bf16.msra.mxu0 %v5832_v42  ;;  %v913_v42 = vld [vmem:[%s8525_s17 + $0xf60] sm:$0xff]  ;;  %v976_v6 = vld [vmem:[%s8525_s17 + $0x1158] sm:$0xff] }
 0x19f   : > { %6921 = vmatpush1.bf16.msra.mxu1 %v6920_v43  ;;  %5835 = vmatprep.subr.bf16.mxu0 %v5834_v44  ;;  %v911_v43 = vld [vmem:[%s8525_s17 + $0xf50] sm:$0xff]  ;;  %v6942_v44 = vpack.c.bf16 %v916_v37, %v912_v36  ;;  %v5856_v50 = vpack.c.bf16 %v913_v42, %v909_v41  ;;  %v6962_v42 = vpack.c.bf16 %v956_v34, %v952_v33  ;;  %v980_v7 = vld [vmem:[%s8525_s17 + $0x1178] sm:$0xff] }
 0x1a0   : > { %6923 = vmatprep.subr.bf16.mxu1 %v6922_v48  ;;  %v920_v48 = vld [vmem:[%s8525_s17 + $0xf98] sm:$0xff]  ;;  %v6944_v51 = vpack.c.bf16 %v915_v45, %v911_v43  ;;  %v951_v41 = vld [vmem:[%s8525_s17 + $0x1090] sm:$0xff]  ;;  %v962_v45 = vld [vmem:[%s8525_s17 + $0x10e8] sm:$0xff] }
 0x1a1   : > { %v955_v43 = vld [vmem:[%s8525_s17 + $0x10b0] sm:$0xff]  ;;  %v984_v18 = vld [vmem:[%s8525_s17 + $0x1198] sm:$0xff] }
 0x1a2   : > { %5837 = vmatpush1.bf16.msra.mxu0 %v5836_v54  ;;  %v921_v54 = vld [vmem:[%s8525_s17 + $0xfa0] sm:$0xff]  ;;  %v988_v19 = vld [vmem:[%s8525_s17 + $0x11b8] sm:$0xff] }
 0x1a3   : > { %6925 = vmatpush1.bf16.msra.mxu1 %v6924_v55  ;;  %5839 = vmatprep.subr.bf16.mxu0 %v5838_v56  ;;  %v919_v55 = vld [vmem:[%s8525_s17 + $0xf90] sm:$0xff]  ;;  %v6946_v56 = vpack.c.bf16 %v924_v49, %v920_v48  ;;  %v5860_v62 = vpack.c.bf16 %v921_v54, %v917_v53  ;;  %v6964_v49 = vpack.c.bf16 %v955_v43, %v951_v41  ;;  %v1002_v41 = vld [vmem:[%s8525_s17 + $0x1228] sm:$0xff]  ;;  %v1004_v43 = vld [vmem:[%s8525_s17 + $0x1238] sm:$0xff] }
 0x1a4   : > { %6927 = vmatprep.subr.bf16.mxu1 %v6926_v60  ;;  %v928_v60 = vld [vmem:[%s8525_s17 + $0xfd8] sm:$0xff]  ;;  %v6948_v63 = vpack.c.bf16 %v923_v57, %v919_v55  ;;  %v959_v53 = vld [vmem:[%s8525_s17 + $0x10d0] sm:$0xff]  ;;  %v6966_v54 = vpack.c.bf16 %v964_v47, %v960_v46  ;;  %v970_v57 = vld [vmem:[%s8525_s17 + $0x1128] sm:$0xff] }
 0x1a5   : > { %v963_v55 = vld [vmem:[%s8525_s17 + $0x10f0] sm:$0xff]  ;;  %v997_v47 = vld [vmem:[%s8525_s17 + $0x1200] sm:$0xff] }
 0x1a6   : > { %5841 = vmatpush1.bf16.msra.mxu0 %v5840_v2  ;;  %v929_v2 = vld [vmem:[%s8525_s17 + $0xfe0] sm:$0xff] }
 0x1a7   : > { %6929 = vmatpush1.bf16.msra.mxu1 %v6928_v3  ;;  %5843 = vmatprep.subr.bf16.mxu0 %v5842_v4  ;;  %v927_v3 = vld [vmem:[%s8525_s17 + $0xfd0] sm:$0xff]  ;;  %v6950_v4 = vpack.c.bf16 %v932_v61, %v928_v60  ;;  %v5864_v10 = vpack.c.bf16 %v929_v2, %v925_v1  ;;  %v6968_v61 = vpack.c.bf16 %v963_v55, %v959_v53  ;;  %v1010_v53 = vld [vmem:[%s8525_s17 + $0x1268] sm:$0xff]  ;;  %v1012_v55 = vld [vmem:[%s8525_s17 + $0x1278] sm:$0xff] }
 0x1a8   : > { %6931 = vmatprep.subr.bf16.mxu1 %v6930_v8  ;;  %v936_v8 = vld [vmem:[%s8525_s17 + $0x1018] sm:$0xff]  ;;  %v6952_v11 = vpack.c.bf16 %v931_v5, %v927_v3  ;;  %v967_v1 = vld [vmem:[%s8525_s17 + $0x1110] sm:$0xff]  ;;  %v6970_v2 = vpack.c.bf16 %v972_v59, %v968_v58  ;;  %v978_v5 = vld [vmem:[%s8525_s17 + $0x1168] sm:$0xff] }
 0x1a9   : > { %v971_v3 = vld [vmem:[%s8525_s17 + $0x1130] sm:$0xff]  ;;  %v1005_v59 = vld [vmem:[%s8525_s17 + $0x1240] sm:$0xff] }
 0x1aa   : > { %5845 = vmatpush1.bf16.msra.mxu0 %v5844_v14  ;;  %v937_v14 = vld [vmem:[%s8525_s17 + $0x1020] sm:$0xff] }
 0x1ab   : > { %6933 = vmatpush1.bf16.msra.mxu1 %v6932_v15  ;;  %5847 = vmatprep.subr.bf16.mxu0 %v5846_v16  ;;  %v935_v15 = vld [vmem:[%s8525_s17 + $0x1010] sm:$0xff]  ;;  %v6954_v16 = vpack.c.bf16 %v940_v9, %v936_v8  ;;  %v5868_v23 = vpack.c.bf16 %v937_v14, %v933_v13  ;;  %v6972_v9 = vpack.c.bf16 %v971_v3, %v967_v1  ;;  %v1018_v1 = vld [vmem:[%s8525_s17 + $0x12a8] sm:$0xff]  ;;  %v1020_v3 = vld [vmem:[%s8525_s17 + $0x12b8] sm:$0xff] }
 0x1ac   : > { %6935 = vmatprep.subr.bf16.mxu1 %v6934_v20  ;;  %v944_v20 = vld [vmem:[%s8525_s17 + $0x1058] sm:$0xff]  ;;  %v6956_v24 = vpack.c.bf16 %v939_v17, %v935_v15  ;;  %v975_v13 = vld [vmem:[%s8525_s17 + $0x1150] sm:$0xff]  ;;  %v6974_v14 = vpack.c.bf16 %v980_v7, %v976_v6  ;;  %v986_v17 = vld [vmem:[%s8525_s17 + $0x11a8] sm:$0xff] }
 0x1ad   : > { %v6958_v29 = vpack.c.bf16 %v948_v21, %v944_v20  ;;  %v979_v15 = vld [vmem:[%s8525_s17 + $0x1170] sm:$0xff]  ;;  %v1013_v7 = vld [vmem:[%s8525_s17 + $0x1280] sm:$0xff] }
 0x1ae   : > { %5849 = vmatpush1.bf16.msra.mxu0 %v5848_v26  ;;  %v941_v26 = vld [vmem:[%s8525_s17 + $0x1040] sm:$0xff]  ;;  %v6976_v21 = vpack.c.bf16 %v979_v15, %v975_v13  ;;  %v1026_v13 = vld [vmem:[%s8525_s17 + $0x12e8] sm:$0xff]  ;;  %v1028_v15 = vld [vmem:[%s8525_s17 + $0x12f8] sm:$0xff] }
 0x1af   : > { %6937 = vmatpush1.bf16.msra.mxu1 %v6936_v27  ;;  %5851 = vmatprep.subr.bf16.mxu0 %v5850_v28  ;;  %v945_v27 = vld [vmem:[%s8525_s17 + $0x1060] sm:$0xff]  ;;  %v943_v28 = vld [vmem:[%s8525_s17 + $0x1050] sm:$0xff] }
 0x1b0   : > { %6939 = vmatprep.subr.bf16.mxu1 %v6938_v32  ;;  %v954_v32 = vld [vmem:[%s8525_s17 + $0x10a8] sm:$0xff]  ;;  %v5872_v36 = vpack.c.bf16 %v945_v27, %v941_v26  ;;  %v6960_v37 = vpack.c.bf16 %v947_v30, %v943_v28  ;;  %v6978_v26 = vpack.c.bf16 %v988_v19, %v984_v18  ;;  %v987_v27 = vld [vmem:[%s8525_s17 + $0x11b0] sm:$0xff]  ;;  %v992_v30 = vld [vmem:[%s8525_s17 + $0x11d8] sm:$0xff] }
 0x1b1   : > { %v990_v28 = vld [vmem:[%s8525_s17 + $0x11c8] sm:$0xff]  ;;  %v1021_v19 = vld [vmem:[%s8525_s17 + $0x12c0] sm:$0xff] }
 0x1b2   : > { %5853 = vmatpush1.bf16.msra.mxu0 %v5852_v38  ;;  %v5874_v38 = vpack.c.bf16 %v954_v32, %v950_v31  ;;  %v996_v31 = vld [vmem:[%s8525_s17 + $0x11f8] sm:$0xff] }
 0x1b3   : > { %6941 = vmatpush1.bf16.msra.mxu1 %v6940_v39  ;;  %5855 = vmatprep.subr.bf16.mxu0 %v5854_v40  ;;  %v949_v39 = vld [vmem:[%s8525_s17 + $0x1080] sm:$0xff] }
 0x1b4   : > { %6943 = vmatprep.subr.bf16.mxu1 %v6942_v44  ;;  %v953_v40 = vld [vmem:[%s8525_s17 + $0x10a0] sm:$0xff]  ;;  %v958_v44 = vld [vmem:[%s8525_s17 + $0x10c8] sm:$0xff] }
 0x1b5   : > { %v5876_v48 = vpack.c.bf16 %v953_v40, %v949_v39  ;;  %v995_v39 = vld [vmem:[%s8525_s17 + $0x11f0] sm:$0xff]  ;;  %v998_v40 = vld [vmem:[%s8525_s17 + $0x1208] sm:$0xff] }
 0x1b6   : > { %5857 = vmatpush1.bf16.msra.mxu0 %v5856_v50  ;;  %v5878_v50 = vpack.c.bf16 %v962_v45, %v958_v44  ;;  %v5898_v46 = vpack.c.bf16 %v1002_v41, %v998_v40 }
 0x1b7   : > { %6945 = vmatpush1.bf16.msra.mxu1 %v6944_v51  ;;  %5859 = vmatprep.subr.bf16.mxu0 %v5858_v52  ;;  %v957_v51 = vld [vmem:[%s8525_s17 + $0x10c0] sm:$0xff] }
 0x1b8   : > { %6947 = vmatprep.subr.bf16.mxu1 %v6946_v56  ;;  %v961_v52 = vld [vmem:[%s8525_s17 + $0x10e0] sm:$0xff]  ;;  %v966_v56 = vld [vmem:[%s8525_s17 + $0x1108] sm:$0xff] }
 0x1b9   : > { %v5880_v60 = vpack.c.bf16 %v961_v52, %v957_v51  ;;  %v1003_v51 = vld [vmem:[%s8525_s17 + $0x1230] sm:$0xff]  ;;  %v1006_v52 = vld [vmem:[%s8525_s17 + $0x1248] sm:$0xff] }
 0x1ba   : > { %5861 = vmatpush1.bf16.msra.mxu0 %v5860_v62  ;;  %v5882_v62 = vpack.c.bf16 %v970_v57, %v966_v56  ;;  %v5902_v58 = vpack.c.bf16 %v1010_v53, %v1006_v52 }
 0x1bb   : > { %6949 = vmatpush1.bf16.msra.mxu1 %v6948_v63  ;;  %5863 = vmatprep.subr.bf16.mxu0 %v5862_v0  ;;  %v965_v63 = vld [vmem:[%s8525_s17 + $0x1100] sm:$0xff] }
 0x1bc   : > { %6951 = vmatprep.subr.bf16.mxu1 %v6950_v4  ;;  %v969_v0 = vld [vmem:[%s8525_s17 + $0x1120] sm:$0xff]  ;;  %v974_v4 = vld [vmem:[%s8525_s17 + $0x1148] sm:$0xff] }
 0x1bd   : > { %v5884_v8 = vpack.c.bf16 %v969_v0, %v965_v63  ;;  %v1011_v63 = vld [vmem:[%s8525_s17 + $0x1270] sm:$0xff]  ;;  %v1014_v0 = vld [vmem:[%s8525_s17 + $0x1288] sm:$0xff] }
 0x1be   : > { %5865 = vmatpush1.bf16.msra.mxu0 %v5864_v10  ;;  %v5886_v10 = vpack.c.bf16 %v978_v5, %v974_v4  ;;  %v5906_v6 = vpack.c.bf16 %v1018_v1, %v1014_v0 }
 0x1bf   : > { %6953 = vmatpush1.bf16.msra.mxu1 %v6952_v11  ;;  %5867 = vmatprep.subr.bf16.mxu0 %v5866_v12  ;;  %v973_v11 = vld [vmem:[%s8525_s17 + $0x1140] sm:$0xff] }
 0x1c0   : > { %6955 = vmatprep.subr.bf16.mxu1 %v6954_v16  ;;  %v977_v12 = vld [vmem:[%s8525_s17 + $0x1160] sm:$0xff]  ;;  %v982_v16 = vld [vmem:[%s8525_s17 + $0x1188] sm:$0xff] }
 0x1c1   : > { %2875 = vmatmul.mubr.f32.vlgmr.msra.gmra.mrb[0].mxu0 %v393_v22  ;;  %v5888_v20 = vpack.c.bf16 %v977_v12, %v973_v11  ;;  %v1019_v11 = vld [vmem:[%s8525_s17 + $0x12b0] sm:$0xff]  ;;  %v1022_v12 = vld [vmem:[%s8525_s17 + $0x12c8] sm:$0xff] }
 0x1c2   : > { %5869 = vmatpush1.bf16.msra.mxu0 %v5868_v23  ;;  %4082 = vmatmul.mubr.f32.vlgmr.msra.gmra.mrb[0].mxu1 %v393_v22  ;;  %v5890_v22 = vpack.c.bf16 %v986_v17, %v982_v16  ;;  %v981_v23 = vld [vmem:[%s8525_s17 + $0x1180] sm:$0xff]  ;;  %v5910_v18 = vpack.c.bf16 %v1026_v13, %v1022_v12 }
 0x1c3   : > { %6957 = vmatpush1.bf16.msra.mxu1 %v6956_v24  ;;  %5871 = vmatprep.subr.bf16.mxu0 %v5870_v25  ;;  %v985_v24 = vld [vmem:[%s8525_s17 + $0x11a0] sm:$0xff]  ;;  %v983_v25 = vld [vmem:[%s8525_s17 + $0x1190] sm:$0xff] }
 0x1c4   : > { %6959 = vmatprep.subr.bf16.mxu1 %v6958_v29  ;;  %2945 = vmatprep.mubr.f32.mxu0 %v396_v35  ;;  %v994_v29 = vld [vmem:[%s8525_s17 + $0x11e8] sm:$0xff]  ;;  %v5892_v32 = vpack.c.bf16 %v985_v24, %v981_v23  ;;  %v6980_v33 = vpack.c.bf16 %v987_v27, %v983_v25  ;;  %v1027_v23 = vld [vmem:[%s8525_s17 + $0x12f0] sm:$0xff]  ;;  %v1036_v27 = vld [vmem:[%s8525_s17 + $0x1338] sm:$0xff] }
 0x1c5   : > { %4152 = vmatprep.mubr.f32.mxu1 %v396_v35  ;;  %v5894_v34 = vpack.c.bf16 %v994_v29, %v990_v28  ;;  %v989_v35 = vld [vmem:[%s8525_s17 + $0x11c0] sm:$0xff]  ;;  %v1030_v24 = vld [vmem:[%s8525_s17 + $0x1308] sm:$0xff] }
 0x1c6   : > { %5873 = vmatpush1.bf16.msra.mxu0 %v5872_v36  ;;  %v993_v36 = vld [vmem:[%s8525_s17 + $0x11e0] sm:$0xff]  ;;  %v1034_v25 = vld [vmem:[%s8525_s17 + $0x1328] sm:$0xff] }
 0x1c7   : > { %6961 = vmatpush1.bf16.msra.mxu1 %v6960_v37  ;;  %5875 = vmatprep.subr.bf16.mxu0 %v5874_v38  ;;  %v991_v37 = vld [vmem:[%s8525_s17 + $0x11d0] sm:$0xff]  ;;  %v6982_v38 = vpack.c.bf16 %v996_v31, %v992_v30  ;;  %v5896_v44 = vpack.c.bf16 %v993_v36, %v989_v35  ;;  %v5914_v30 = vpack.c.bf16 %v1034_v25, %v1030_v24  ;;  %v1029_v31 = vld [vmem:[%s8525_s17 + $0x1300] sm:$0xff]  ;;  %v1038_v36 = vld [vmem:[%s8525_s17 + $0x1348] sm:$0xff] }
 0x1c8   : > { %6963 = vmatprep.subr.bf16.mxu1 %v6962_v42  ;;  %v1000_v42 = vld [vmem:[%s8525_s17 + $0x1218] sm:$0xff]  ;;  %v6984_v45 = vpack.c.bf16 %v995_v39, %v991_v37  ;;  %v1035_v35 = vld [vmem:[%s8525_s17 + $0x1330] sm:$0xff]  ;;  %v1042_v37 = vld [vmem:[%s8525_s17 + $0x1368] sm:$0xff] }
 0x1c9   : > { %v1044_v39 = vld [vmem:[%s8525_s17 + $0x1378] sm:$0xff]  ;;  %v395_v24 = vld [vmem:[%s8547_s14 + $0x40] sm:$0xff] }
 0x1ca   : > { %5877 = vmatpush1.bf16.msra.mxu0 %v5876_v48  ;;  %v1001_v48 = vld [vmem:[%s8525_s17 + $0x1220] sm:$0xff] }
 0x1cb   : > { %6965 = vmatpush1.bf16.msra.mxu1 %v6964_v49  ;;  %5879 = vmatprep.subr.bf16.mxu0 %v5878_v50  ;;  %v999_v49 = vld [vmem:[%s8525_s17 + $0x1210] sm:$0xff]  ;;  %v6986_v50 = vpack.c.bf16 %v1004_v43, %v1000_v42  ;;  %v5900_v56 = vpack.c.bf16 %v1001_v48, %v997_v47  ;;  %v5918_v42 = vpack.c.bf16 %v1042_v37, %v1038_v36  ;;  %v1037_v43 = vld [vmem:[%s8525_s17 + $0x1340] sm:$0xff]  ;;  %v1046_v48 = vld [vmem:[%s8525_s17 + $0x1388] sm:$0xff] }
 0x1cc   : > { %6967 = vmatprep.subr.bf16.mxu1 %v6966_v54  ;;  %v1008_v54 = vld [vmem:[%s8525_s17 + $0x1258] sm:$0xff]  ;;  %v6988_v57 = vpack.c.bf16 %v1003_v51, %v999_v49  ;;  %v1043_v47 = vld [vmem:[%s8525_s17 + $0x1370] sm:$0xff]  ;;  %v1050_v49 = vld [vmem:[%s8525_s17 + $0x13a8] sm:$0xff] }
 0x1cd   : > { %v1052_v51 = vld [vmem:[%s8525_s17 + $0x13b8] sm:$0xff] }
 0x1ce   : > { %5881 = vmatpush1.bf16.msra.mxu0 %v5880_v60  ;;  %v1009_v60 = vld [vmem:[%s8525_s17 + $0x1260] sm:$0xff]  ;;  %v1084_v36 = vld [vmem:[%s8525_s17 + $0x14b8] sm:$0xff] }
 0x1cf   : > { %6969 = vmatpush1.bf16.msra.mxu1 %v6968_v61  ;;  %5883 = vmatprep.subr.bf16.mxu0 %v5882_v62  ;;  %v1007_v61 = vld [vmem:[%s8525_s17 + $0x1250] sm:$0xff]  ;;  %v6990_v62 = vpack.c.bf16 %v1012_v55, %v1008_v54  ;;  %v5904_v4 = vpack.c.bf16 %v1009_v60, %v1005_v59  ;;  %v5922_v54 = vpack.c.bf16 %v1050_v49, %v1046_v48  ;;  %v1045_v55 = vld [vmem:[%s8525_s17 + $0x1380] sm:$0xff]  ;;  %v1054_v60 = vld [vmem:[%s8525_s17 + $0x13c8] sm:$0xff] }
 0x1d0   : > { %6971 = vmatprep.subr.bf16.mxu1 %v6970_v2  ;;  %v1016_v2 = vld [vmem:[%s8525_s17 + $0x1298] sm:$0xff]  ;;  %v6992_v5 = vpack.c.bf16 %v1011_v63, %v1007_v61  ;;  %v1051_v59 = vld [vmem:[%s8525_s17 + $0x13b0] sm:$0xff]  ;;  %v1058_v61 = vld [vmem:[%s8525_s17 + $0x13e8] sm:$0xff] }
 0x1d1   : > { %v1060_v63 = vld [vmem:[%s8525_s17 + $0x13f8] sm:$0xff] }
 0x1d2   : > { %5885 = vmatpush1.bf16.msra.mxu0 %v5884_v8  ;;  %v1017_v8 = vld [vmem:[%s8525_s17 + $0x12a0] sm:$0xff]  ;;  %v398_v37 = vld [vmem:[%s8547_s14 + $0x58] sm:$0xff] }
 0x1d3   : > { %6973 = vmatpush1.bf16.msra.mxu1 %v6972_v9  ;;  %5887 = vmatprep.subr.bf16.mxu0 %v5886_v10  ;;  %v1015_v9 = vld [vmem:[%s8525_s17 + $0x1290] sm:$0xff]  ;;  %v6994_v10 = vpack.c.bf16 %v1020_v3, %v1016_v2  ;;  %v5908_v16 = vpack.c.bf16 %v1017_v8, %v1013_v7  ;;  %v5926_v2 = vpack.c.bf16 %v1058_v61, %v1054_v60  ;;  %v1053_v3 = vld [vmem:[%s8525_s17 + $0x13c0] sm:$0xff]  ;;  %v1062_v8 = vld [vmem:[%s8525_s17 + $0x1408] sm:$0xff] }
 0x1d4   : > { %6975 = vmatprep.subr.bf16.mxu1 %v6974_v14  ;;  %v1024_v14 = vld [vmem:[%s8525_s17 + $0x12d8] sm:$0xff]  ;;  %v6996_v17 = vpack.c.bf16 %v1019_v11, %v1015_v9  ;;  %v1059_v7 = vld [vmem:[%s8525_s17 + $0x13f0] sm:$0xff]  ;;  %v1066_v9 = vld [vmem:[%s8525_s17 + $0x1428] sm:$0xff] }
 0x1d5   : > { %v1068_v11 = vld [vmem:[%s8525_s17 + $0x1438] sm:$0xff] }
 0x1d6   : > { %5889 = vmatpush1.bf16.msra.mxu0 %v5888_v20  ;;  %v1025_v20 = vld [vmem:[%s8525_s17 + $0x12e0] sm:$0xff]  ;;  %v1088_v48 = vld [vmem:[%s8525_s17 + $0x14d8] sm:$0xff] }
 0x1d7   : > { %6977 = vmatpush1.bf16.msra.mxu1 %v6976_v21  ;;  %5891 = vmatprep.subr.bf16.mxu0 %v5890_v22  ;;  %v1023_v21 = vld [vmem:[%s8525_s17 + $0x12d0] sm:$0xff]  ;;  %v6998_v22 = vpack.c.bf16 %v1028_v15, %v1024_v14  ;;  %v5912_v28 = vpack.c.bf16 %v1025_v20, %v1021_v19  ;;  %v5930_v14 = vpack.c.bf16 %v1066_v9, %v1062_v8  ;;  %v1061_v15 = vld [vmem:[%s8525_s17 + $0x1400] sm:$0xff]  ;;  %v1070_v20 = vld [vmem:[%s8525_s17 + $0x1448] sm:$0xff] }
 0x1d8   : > { %6979 = vmatprep.subr.bf16.mxu1 %v6978_v26  ;;  %v1032_v26 = vld [vmem:[%s8525_s17 + $0x1318] sm:$0xff]  ;;  %v7000_v29 = vpack.c.bf16 %v1027_v23, %v1023_v21  ;;  %v1067_v19 = vld [vmem:[%s8525_s17 + $0x1430] sm:$0xff]  ;;  %v1074_v21 = vld [vmem:[%s8525_s17 + $0x1468] sm:$0xff] }
 0x1d9   : > { %v1076_v23 = vld [vmem:[%s8525_s17 + $0x1478] sm:$0xff] }
 0x1da   : > { %5893 = vmatpush1.bf16.msra.mxu0 %v5892_v32  ;;  %v1033_v32 = vld [vmem:[%s8525_s17 + $0x1320] sm:$0xff]  ;;  %v1092_v49 = vld [vmem:[%s8525_s17 + $0x14f8] sm:$0xff] }
 0x1db   : > { %6981 = vmatpush1.bf16.msra.mxu1 %v6980_v33  ;;  %5895 = vmatprep.subr.bf16.mxu0 %v5894_v34  ;;  %v1031_v33 = vld [vmem:[%s8525_s17 + $0x1310] sm:$0xff]  ;;  %v7002_v34 = vpack.c.bf16 %v1036_v27, %v1032_v26  ;;  %v5916_v40 = vpack.c.bf16 %v1033_v32, %v1029_v31  ;;  %v5934_v27 = vpack.c.bf16 %v1074_v21, %v1070_v20  ;;  %v1096_v60 = vld [vmem:[%s8525_s17 + $0x1518] sm:$0xff] }
 0x1dc   : > { %6983 = vmatprep.subr.bf16.mxu1 %v6982_v38  ;;  %v1040_v38 = vld [vmem:[%s8525_s17 + $0x1358] sm:$0xff]  ;;  %v7004_v41 = vpack.c.bf16 %v1035_v35, %v1031_v33  ;;  %v1075_v32 = vld [vmem:[%s8525_s17 + $0x1470] sm:$0xff]  ;;  %v1078_v33 = vld [vmem:[%s8525_s17 + $0x1488] sm:$0xff] }
 0x1dd   : > { %v1080_v35 = vld [vmem:[%s8525_s17 + $0x1498] sm:$0xff] }
 0x1de   : > { %5897 = vmatpush1.bf16.msra.mxu0 %v5896_v44  ;;  %v1041_v44 = vld [vmem:[%s8525_s17 + $0x1360] sm:$0xff]  ;;  %v1100_v61 = vld [vmem:[%s8525_s17 + $0x1538] sm:$0xff] }
 0x1df   : > { %6985 = vmatpush1.bf16.msra.mxu1 %v6984_v45  ;;  %5899 = vmatprep.subr.bf16.mxu0 %v5898_v46  ;;  %v1039_v45 = vld [vmem:[%s8525_s17 + $0x1350] sm:$0xff]  ;;  %v7006_v46 = vpack.c.bf16 %v1044_v39, %v1040_v38  ;;  %v5920_v52 = vpack.c.bf16 %v1041_v44, %v1037_v43  ;;  %v7026_v44 = vpack.c.bf16 %v1084_v36, %v1080_v35  ;;  %v1104_v8 = vld [vmem:[%s8525_s17 + $0x1558] sm:$0xff] }
 0x1e0   : > { %6987 = vmatprep.subr.bf16.mxu1 %v6986_v50  ;;  %v1048_v50 = vld [vmem:[%s8525_s17 + $0x1398] sm:$0xff]  ;;  %v7008_v53 = vpack.c.bf16 %v1043_v47, %v1039_v45  ;;  %v1079_v43 = vld [vmem:[%s8525_s17 + $0x1490] sm:$0xff]  ;;  %v1090_v47 = vld [vmem:[%s8525_s17 + $0x14e8] sm:$0xff] }
 0x1e1   : > { %v1083_v45 = vld [vmem:[%s8525_s17 + $0x14b0] sm:$0xff]  ;;  %v1108_v9 = vld [vmem:[%s8525_s17 + $0x1578] sm:$0xff] }
 0x1e2   : > { %5901 = vmatpush1.bf16.msra.mxu0 %v5900_v56  ;;  %v1049_v56 = vld [vmem:[%s8525_s17 + $0x13a0] sm:$0xff]  ;;  %v1112_v20 = vld [vmem:[%s8525_s17 + $0x1598] sm:$0xff] }
 0x1e3   : > { %6989 = vmatpush1.bf16.msra.mxu1 %v6988_v57  ;;  %5903 = vmatprep.subr.bf16.mxu0 %v5902_v58  ;;  %v1047_v57 = vld [vmem:[%s8525_s17 + $0x1390] sm:$0xff]  ;;  %v7010_v58 = vpack.c.bf16 %v1052_v51, %v1048_v50  ;;  %v5924_v0 = vpack.c.bf16 %v1049_v56, %v1045_v55  ;;  %v7028_v51 = vpack.c.bf16 %v1083_v45, %v1079_v43  ;;  %v1116_v21 = vld [vmem:[%s8525_s17 + $0x15b8] sm:$0xff]  ;;  %v1130_v43 = vld [vmem:[%s8525_s17 + $0x1628] sm:$0xff] }
 0x1e4   : > { %6991 = vmatprep.subr.bf16.mxu1 %v6990_v62  ;;  %v1056_v62 = vld [vmem:[%s8525_s17 + $0x13d8] sm:$0xff]  ;;  %v7012_v1 = vpack.c.bf16 %v1051_v59, %v1047_v57  ;;  %v1087_v55 = vld [vmem:[%s8525_s17 + $0x14d0] sm:$0xff]  ;;  %v7030_v56 = vpack.c.bf16 %v1092_v49, %v1088_v48  ;;  %v1098_v59 = vld [vmem:[%s8525_s17 + $0x1528] sm:$0xff] }
 0x1e5   : > { %v1091_v57 = vld [vmem:[%s8525_s17 + $0x14f0] sm:$0xff]  ;;  %v1132_v45 = vld [vmem:[%s8525_s17 + $0x1638] sm:$0xff]  ;;  %v1125_v49 = vld [vmem:[%s8525_s17 + $0x1600] sm:$0xff] }
 0x1e6   : > { %5905 = vmatpush1.bf16.msra.mxu0 %v5904_v4  ;;  %v1057_v4 = vld [vmem:[%s8525_s17 + $0x13e0] sm:$0xff] }
 0x1e7   : > { %6993 = vmatpush1.bf16.msra.mxu1 %v6992_v5  ;;  %5907 = vmatprep.subr.bf16.mxu0 %v5906_v6  ;;  %v1055_v5 = vld [vmem:[%s8525_s17 + $0x13d0] sm:$0xff]  ;;  %v7014_v6 = vpack.c.bf16 %v1060_v63, %v1056_v62  ;;  %v5928_v12 = vpack.c.bf16 %v1057_v4, %v1053_v3  ;;  %v7032_v63 = vpack.c.bf16 %v1091_v57, %v1087_v55  ;;  %v1138_v55 = vld [vmem:[%s8525_s17 + $0x1668] sm:$0xff]  ;;  %v1140_v57 = vld [vmem:[%s8525_s17 + $0x1678] sm:$0xff] }
 0x1e8   : > { %6995 = vmatprep.subr.bf16.mxu1 %v6994_v10  ;;  %v1064_v10 = vld [vmem:[%s8525_s17 + $0x1418] sm:$0xff]  ;;  %v7016_v13 = vpack.c.bf16 %v1059_v7, %v1055_v5  ;;  %v1095_v3 = vld [vmem:[%s8525_s17 + $0x1510] sm:$0xff]  ;;  %v7034_v4 = vpack.c.bf16 %v1100_v61, %v1096_v60  ;;  %v1106_v7 = vld [vmem:[%s8525_s17 + $0x1568] sm:$0xff] }
 0x1e9   : > { %v1099_v5 = vld [vmem:[%s8525_s17 + $0x1530] sm:$0xff]  ;;  %v1133_v61 = vld [vmem:[%s8525_s17 + $0x1640] sm:$0xff] }
 0x1ea   : > { %5909 = vmatpush1.bf16.msra.mxu0 %v5908_v16  ;;  %v1065_v16 = vld [vmem:[%s8525_s17 + $0x1420] sm:$0xff] }
 0x1eb   : > { %6997 = vmatpush1.bf16.msra.mxu1 %v6996_v17  ;;  %5911 = vmatprep.subr.bf16.mxu0 %v5910_v18  ;;  %v1063_v17 = vld [vmem:[%s8525_s17 + $0x1410] sm:$0xff]  ;;  %v7018_v18 = vpack.c.bf16 %v1068_v11, %v1064_v10  ;;  %v5932_v25 = vpack.c.bf16 %v1065_v16, %v1061_v15  ;;  %v7036_v11 = vpack.c.bf16 %v1099_v5, %v1095_v3  ;;  %v1146_v3 = vld [vmem:[%s8525_s17 + $0x16a8] sm:$0xff]  ;;  %v1148_v5 = vld [vmem:[%s8525_s17 + $0x16b8] sm:$0xff] }
 0x1ec   : > { %6999 = vmatprep.subr.bf16.mxu1 %v6998_v22  ;;  %v1072_v22 = vld [vmem:[%s8525_s17 + $0x1458] sm:$0xff]  ;;  %v7020_v26 = vpack.c.bf16 %v1067_v19, %v1063_v17  ;;  %v1103_v15 = vld [vmem:[%s8525_s17 + $0x1550] sm:$0xff]  ;;  %v7038_v16 = vpack.c.bf16 %v1108_v9, %v1104_v8  ;;  %v1114_v19 = vld [vmem:[%s8525_s17 + $0x15a8] sm:$0xff] }
 0x1ed   : > { %v7022_v31 = vpack.c.bf16 %v1076_v23, %v1072_v22  ;;  %v1107_v17 = vld [vmem:[%s8525_s17 + $0x1570] sm:$0xff]  ;;  %v1141_v9 = vld [vmem:[%s8525_s17 + $0x1680] sm:$0xff] }
 0x1ee   : > { %5913 = vmatpush1.bf16.msra.mxu0 %v5912_v28  ;;  %v1069_v28 = vld [vmem:[%s8525_s17 + $0x1440] sm:$0xff]  ;;  %v7040_v23 = vpack.c.bf16 %v1107_v17, %v1103_v15  ;;  %v1154_v15 = vld [vmem:[%s8525_s17 + $0x16e8] sm:$0xff]  ;;  %v1156_v17 = vld [vmem:[%s8525_s17 + $0x16f8] sm:$0xff] }
 0x1ef   : > { %7001 = vmatpush1.bf16.msra.mxu1 %v7000_v29  ;;  %5915 = vmatprep.subr.bf16.mxu0 %v5914_v30  ;;  %v1073_v29 = vld [vmem:[%s8525_s17 + $0x1460] sm:$0xff]  ;;  %v1071_v30 = vld [vmem:[%s8525_s17 + $0x1450] sm:$0xff] }
 0x1f0   : > { %7003 = vmatprep.subr.bf16.mxu1 %v7002_v34  ;;  %v1082_v34 = vld [vmem:[%s8525_s17 + $0x14a8] sm:$0xff]  ;;  %v5936_v38 = vpack.c.bf16 %v1073_v29, %v1069_v28  ;;  %v7024_v39 = vpack.c.bf16 %v1075_v32, %v1071_v30  ;;  %v7042_v28 = vpack.c.bf16 %v1116_v21, %v1112_v20  ;;  %v1115_v29 = vld [vmem:[%s8525_s17 + $0x15b0] sm:$0xff]  ;;  %v1120_v32 = vld [vmem:[%s8525_s17 + $0x15d8] sm:$0xff] }
 0x1f1   : > { %v1118_v30 = vld [vmem:[%s8525_s17 + $0x15c8] sm:$0xff]  ;;  %v1149_v21 = vld [vmem:[%s8525_s17 + $0x16c0] sm:$0xff] }
 0x1f2   : > { %5917 = vmatpush1.bf16.msra.mxu0 %v5916_v40  ;;  %v5938_v40 = vpack.c.bf16 %v1082_v34, %v1078_v33  ;;  %v1124_v33 = vld [vmem:[%s8525_s17 + $0x15f8] sm:$0xff] }
 0x1f3   : > { %7005 = vmatpush1.bf16.msra.mxu1 %v7004_v41  ;;  %5919 = vmatprep.subr.bf16.mxu0 %v5918_v42  ;;  %v1077_v41 = vld [vmem:[%s8525_s17 + $0x1480] sm:$0xff] }
 0x1f4   : > { %7007 = vmatprep.subr.bf16.mxu1 %v7006_v46  ;;  %v1081_v42 = vld [vmem:[%s8525_s17 + $0x14a0] sm:$0xff]  ;;  %v1086_v46 = vld [vmem:[%s8525_s17 + $0x14c8] sm:$0xff] }
 0x1f5   : > { %v5940_v50 = vpack.c.bf16 %v1081_v42, %v1077_v41  ;;  %v1123_v41 = vld [vmem:[%s8525_s17 + $0x15f0] sm:$0xff]  ;;  %v1126_v42 = vld [vmem:[%s8525_s17 + $0x1608] sm:$0xff] }
 0x1f6   : > { %5921 = vmatpush1.bf16.msra.mxu0 %v5920_v52  ;;  %v5942_v52 = vpack.c.bf16 %v1090_v47, %v1086_v46  ;;  %v5962_v48 = vpack.c.bf16 %v1130_v43, %v1126_v42 }
 0x1f7   : > { %7009 = vmatpush1.bf16.msra.mxu1 %v7008_v53  ;;  %5923 = vmatprep.subr.bf16.mxu0 %v5922_v54  ;;  %v1085_v53 = vld [vmem:[%s8525_s17 + $0x14c0] sm:$0xff] }
 0x1f8   : > { %7011 = vmatprep.subr.bf16.mxu1 %v7010_v58  ;;  %v1089_v54 = vld [vmem:[%s8525_s17 + $0x14e0] sm:$0xff]  ;;  %v1094_v58 = vld [vmem:[%s8525_s17 + $0x1508] sm:$0xff] }
 0x1f9   : > { %v5944_v62 = vpack.c.bf16 %v1089_v54, %v1085_v53  ;;  %v1131_v53 = vld [vmem:[%s8525_s17 + $0x1630] sm:$0xff]  ;;  %v1134_v54 = vld [vmem:[%s8525_s17 + $0x1648] sm:$0xff] }
 0x1fa   : > { %5925 = vmatpush1.bf16.msra.mxu0 %v5924_v0  ;;  %v5946_v0 = vpack.c.bf16 %v1098_v59, %v1094_v58  ;;  %v5966_v60 = vpack.c.bf16 %v1138_v55, %v1134_v54 }
 0x1fb   : > { %7013 = vmatpush1.bf16.msra.mxu1 %v7012_v1  ;;  %5927 = vmatprep.subr.bf16.mxu0 %v5926_v2  ;;  %v1093_v1 = vld [vmem:[%s8525_s17 + $0x1500] sm:$0xff] }
 0x1fc   : > { %7015 = vmatprep.subr.bf16.mxu1 %v7014_v6  ;;  %v1097_v2 = vld [vmem:[%s8525_s17 + $0x1520] sm:$0xff]  ;;  %v1102_v6 = vld [vmem:[%s8525_s17 + $0x1548] sm:$0xff] }
 0x1fd   : > { %v5948_v10 = vpack.c.bf16 %v1097_v2, %v1093_v1  ;;  %v1139_v1 = vld [vmem:[%s8525_s17 + $0x1670] sm:$0xff]  ;;  %v1142_v2 = vld [vmem:[%s8525_s17 + $0x1688] sm:$0xff] }
 0x1fe   : > { %5929 = vmatpush1.bf16.msra.mxu0 %v5928_v12  ;;  %v5950_v12 = vpack.c.bf16 %v1106_v7, %v1102_v6  ;;  %v5970_v8 = vpack.c.bf16 %v1146_v3, %v1142_v2 }
 0x1ff   : > { %7017 = vmatpush1.bf16.msra.mxu1 %v7016_v13  ;;  %5931 = vmatprep.subr.bf16.mxu0 %v5930_v14  ;;  %v1101_v13 = vld [vmem:[%s8525_s17 + $0x1540] sm:$0xff] }
 0x200   : > { %7019 = vmatprep.subr.bf16.mxu1 %v7018_v18  ;;  %v1105_v14 = vld [vmem:[%s8525_s17 + $0x1560] sm:$0xff]  ;;  %v1110_v18 = vld [vmem:[%s8525_s17 + $0x1588] sm:$0xff] }
 0x201   : > { %2946 = vmatmul.mubr.f32.vlgmr.msra.gmra.mrb[0].mxu0 %v395_v24  ;;  %v5952_v22 = vpack.c.bf16 %v1105_v14, %v1101_v13  ;;  %v1147_v13 = vld [vmem:[%s8525_s17 + $0x16b0] sm:$0xff]  ;;  %v1150_v14 = vld [vmem:[%s8525_s17 + $0x16c8] sm:$0xff] }
 0x202   : > { %5933 = vmatpush1.bf16.msra.mxu0 %v5932_v25  ;;  %4153 = vmatmul.mubr.f32.vlgmr.msra.gmra.mrb[0].mxu1 %v395_v24  ;;  %v5954_v24 = vpack.c.bf16 %v1114_v19, %v1110_v18  ;;  %v1109_v25 = vld [vmem:[%s8525_s17 + $0x1580] sm:$0xff]  ;;  %v5974_v20 = vpack.c.bf16 %v1154_v15, %v1150_v14 }
 0x203   : > { %7021 = vmatpush1.bf16.msra.mxu1 %v7020_v26  ;;  %5935 = vmatprep.subr.bf16.mxu0 %v5934_v27  ;;  %v1113_v26 = vld [vmem:[%s8525_s17 + $0x15a0] sm:$0xff]  ;;  %v1111_v27 = vld [vmem:[%s8525_s17 + $0x1590] sm:$0xff] }
 0x204   : > { %7023 = vmatprep.subr.bf16.mxu1 %v7022_v31  ;;  %3016 = vmatprep.mubr.f32.mxu0 %v398_v37  ;;  %v1122_v31 = vld [vmem:[%s8525_s17 + $0x15e8] sm:$0xff]  ;;  %v5956_v34 = vpack.c.bf16 %v1113_v26, %v1109_v25  ;;  %v7044_v35 = vpack.c.bf16 %v1115_v29, %v1111_v27  ;;  %v1155_v25 = vld [vmem:[%s8525_s17 + $0x16f0] sm:$0xff]  ;;  %v1164_v29 = vld [vmem:[%s8525_s17 + $0x1738] sm:$0xff] }
 0x205   : > { %4223 = vmatprep.mubr.f32.mxu1 %v398_v37  ;;  %v5958_v36 = vpack.c.bf16 %v1122_v31, %v1118_v30  ;;  %v1117_v37 = vld [vmem:[%s8525_s17 + $0x15c0] sm:$0xff]  ;;  %v1158_v26 = vld [vmem:[%s8525_s17 + $0x1708] sm:$0xff] }
 0x206   : > { %5937 = vmatpush1.bf16.msra.mxu0 %v5936_v38  ;;  %v1121_v38 = vld [vmem:[%s8525_s17 + $0x15e0] sm:$0xff]  ;;  %v1162_v27 = vld [vmem:[%s8525_s17 + $0x1728] sm:$0xff] }
 0x207   : > { %7025 = vmatpush1.bf16.msra.mxu1 %v7024_v39  ;;  %5939 = vmatprep.subr.bf16.mxu0 %v5938_v40  ;;  %v1119_v39 = vld [vmem:[%s8525_s17 + $0x15d0] sm:$0xff]  ;;  %v7046_v40 = vpack.c.bf16 %v1124_v33, %v1120_v32  ;;  %v5960_v46 = vpack.c.bf16 %v1121_v38, %v1117_v37  ;;  %v5978_v32 = vpack.c.bf16 %v1162_v27, %v1158_v26  ;;  %v1157_v33 = vld [vmem:[%s8525_s17 + $0x1700] sm:$0xff]  ;;  %v1166_v38 = vld [vmem:[%s8525_s17 + $0x1748] sm:$0xff] }
 0x208   : > { %7027 = vmatprep.subr.bf16.mxu1 %v7026_v44  ;;  %v1128_v44 = vld [vmem:[%s8525_s17 + $0x1618] sm:$0xff]  ;;  %v7048_v47 = vpack.c.bf16 %v1123_v41, %v1119_v39  ;;  %v1163_v37 = vld [vmem:[%s8525_s17 + $0x1730] sm:$0xff]  ;;  %v1170_v39 = vld [vmem:[%s8525_s17 + $0x1768] sm:$0xff] }
 0x209   : > { %v1172_v41 = vld [vmem:[%s8525_s17 + $0x1778] sm:$0xff]  ;;  %v397_v26 = vld [vmem:[%s8547_s14 + $0x50] sm:$0xff] }
 0x20a   : > { %5941 = vmatpush1.bf16.msra.mxu0 %v5940_v50  ;;  %v1129_v50 = vld [vmem:[%s8525_s17 + $0x1620] sm:$0xff] }
 0x20b   : > { %7029 = vmatpush1.bf16.msra.mxu1 %v7028_v51  ;;  %5943 = vmatprep.subr.bf16.mxu0 %v5942_v52  ;;  %v1127_v51 = vld [vmem:[%s8525_s17 + $0x1610] sm:$0xff]  ;;  %v7050_v52 = vpack.c.bf16 %v1132_v45, %v1128_v44  ;;  %v5964_v58 = vpack.c.bf16 %v1129_v50, %v1125_v49  ;;  %v5982_v44 = vpack.c.bf16 %v1170_v39, %v1166_v38  ;;  %v1165_v45 = vld [vmem:[%s8525_s17 + $0x1740] sm:$0xff]  ;;  %v1174_v50 = vld [vmem:[%s8525_s17 + $0x1788] sm:$0xff] }
 0x20c   : > { %7031 = vmatprep.subr.bf16.mxu1 %v7030_v56  ;;  %v1136_v56 = vld [vmem:[%s8525_s17 + $0x1658] sm:$0xff]  ;;  %v7052_v59 = vpack.c.bf16 %v1131_v53, %v1127_v51  ;;  %v1171_v49 = vld [vmem:[%s8525_s17 + $0x1770] sm:$0xff]  ;;  %v1178_v51 = vld [vmem:[%s8525_s17 + $0x17a8] sm:$0xff] }
 0x20d   : > { %v1180_v53 = vld [vmem:[%s8525_s17 + $0x17b8] sm:$0xff]  ;;  %v400_v39 = vld [vmem:[%s8547_s14 + $0x68] sm:$0xff] }
 0x20e   : > { %5945 = vmatpush1.bf16.msra.mxu0 %v5944_v62  ;;  %v1137_v62 = vld [vmem:[%s8525_s17 + $0x1660] sm:$0xff]  ;;  %v1212_v38 = vld [vmem:[%s8525_s17 + $0x18b8] sm:$0xff] }
 0x20f   : > { %7033 = vmatpush1.bf16.msra.mxu1 %v7032_v63  ;;  %5947 = vmatprep.subr.bf16.mxu0 %v5946_v0  ;;  %v1135_v63 = vld [vmem:[%s8525_s17 + $0x1650] sm:$0xff]  ;;  %v7054_v0 = vpack.c.bf16 %v1140_v57, %v1136_v56  ;;  %v5968_v6 = vpack.c.bf16 %v1137_v62, %v1133_v61  ;;  %v5986_v56 = vpack.c.bf16 %v1178_v51, %v1174_v50  ;;  %v1173_v57 = vld [vmem:[%s8525_s17 + $0x1780] sm:$0xff]  ;;  %v1182_v62 = vld [vmem:[%s8525_s17 + $0x17c8] sm:$0xff] }
 0x210   : > { %7035 = vmatprep.subr.bf16.mxu1 %v7034_v4  ;;  %v1144_v4 = vld [vmem:[%s8525_s17 + $0x1698] sm:$0xff]  ;;  %v7056_v7 = vpack.c.bf16 %v1139_v1, %v1135_v63  ;;  %v1179_v61 = vld [vmem:[%s8525_s17 + $0x17b0] sm:$0xff]  ;;  %v1186_v63 = vld [vmem:[%s8525_s17 + $0x17e8] sm:$0xff] }
 0x211   : > { %v1188_v1 = vld [vmem:[%s8525_s17 + $0x17f8] sm:$0xff] }
 0x212   : > { %5949 = vmatpush1.bf16.msra.mxu0 %v5948_v10  ;;  %v1145_v10 = vld [vmem:[%s8525_s17 + $0x16a0] sm:$0xff]  ;;  %v1216_v50 = vld [vmem:[%s8525_s17 + $0x18d8] sm:$0xff] }
 0x213   : > { %7037 = vmatpush1.bf16.msra.mxu1 %v7036_v11  ;;  %5951 = vmatprep.subr.bf16.mxu0 %v5950_v12  ;;  %v1143_v11 = vld [vmem:[%s8525_s17 + $0x1690] sm:$0xff]  ;;  %v7058_v12 = vpack.c.bf16 %v1148_v5, %v1144_v4  ;;  %v5972_v18 = vpack.c.bf16 %v1145_v10, %v1141_v9  ;;  %v5990_v4 = vpack.c.bf16 %v1186_v63, %v1182_v62  ;;  %v1181_v5 = vld [vmem:[%s8525_s17 + $0x17c0] sm:$0xff]  ;;  %v1190_v10 = vld [vmem:[%s8525_s17 + $0x1808] sm:$0xff] }
 0x214   : > { %7039 = vmatprep.subr.bf16.mxu1 %v7038_v16  ;;  %v1152_v16 = vld [vmem:[%s8525_s17 + $0x16d8] sm:$0xff]  ;;  %v7060_v19 = vpack.c.bf16 %v1147_v13, %v1143_v11  ;;  %v1187_v9 = vld [vmem:[%s8525_s17 + $0x17f0] sm:$0xff]  ;;  %v1194_v11 = vld [vmem:[%s8525_s17 + $0x1828] sm:$0xff] }
 0x215   : > { %v1196_v13 = vld [vmem:[%s8525_s17 + $0x1838] sm:$0xff] }
 0x216   : > { %5953 = vmatpush1.bf16.msra.mxu0 %v5952_v22  ;;  %v1153_v22 = vld [vmem:[%s8525_s17 + $0x16e0] sm:$0xff]  ;;  %v1220_v51 = vld [vmem:[%s8525_s17 + $0x18f8] sm:$0xff] }
 0x217   : > { %7041 = vmatpush1.bf16.msra.mxu1 %v7040_v23  ;;  %5955 = vmatprep.subr.bf16.mxu0 %v5954_v24  ;;  %v1151_v23 = vld [vmem:[%s8525_s17 + $0x16d0] sm:$0xff]  ;;  %v7062_v24 = vpack.c.bf16 %v1156_v17, %v1152_v16  ;;  %v5976_v30 = vpack.c.bf16 %v1153_v22, %v1149_v21  ;;  %v5994_v16 = vpack.c.bf16 %v1194_v11, %v1190_v10  ;;  %v1189_v17 = vld [vmem:[%s8525_s17 + $0x1800] sm:$0xff]  ;;  %v1198_v22 = vld [vmem:[%s8525_s17 + $0x1848] sm:$0xff] }
 0x218   : > { %7043 = vmatprep.subr.bf16.mxu1 %v7042_v28  ;;  %v1160_v28 = vld [vmem:[%s8525_s17 + $0x1718] sm:$0xff]  ;;  %v7064_v31 = vpack.c.bf16 %v1155_v25, %v1151_v23  ;;  %v1195_v21 = vld [vmem:[%s8525_s17 + $0x1830] sm:$0xff]  ;;  %v1202_v23 = vld [vmem:[%s8525_s17 + $0x1868] sm:$0xff] }
 0x219   : > { %v1204_v25 = vld [vmem:[%s8525_s17 + $0x1878] sm:$0xff] }
 0x21a   : > { %5957 = vmatpush1.bf16.msra.mxu0 %v5956_v34  ;;  %v1161_v34 = vld [vmem:[%s8525_s17 + $0x1720] sm:$0xff]  ;;  %v1224_v62 = vld [vmem:[%s8525_s17 + $0x1918] sm:$0xff] }
 0x21b   : > { %7045 = vmatpush1.bf16.msra.mxu1 %v7044_v35  ;;  %5959 = vmatprep.subr.bf16.mxu0 %v5958_v36  ;;  %v1159_v35 = vld [vmem:[%s8525_s17 + $0x1710] sm:$0xff]  ;;  %v7066_v36 = vpack.c.bf16 %v1164_v29, %v1160_v28  ;;  %v5980_v42 = vpack.c.bf16 %v1161_v34, %v1157_v33  ;;  %v5998_v29 = vpack.c.bf16 %v1202_v23, %v1198_v22  ;;  %v1228_v63 = vld [vmem:[%s8525_s17 + $0x1938] sm:$0xff] }
 0x21c   : > { %7047 = vmatprep.subr.bf16.mxu1 %v7046_v40  ;;  %v1168_v40 = vld [vmem:[%s8525_s17 + $0x1758] sm:$0xff]  ;;  %v7068_v43 = vpack.c.bf16 %v1163_v37, %v1159_v35  ;;  %v1203_v34 = vld [vmem:[%s8525_s17 + $0x1870] sm:$0xff]  ;;  %v1206_v35 = vld [vmem:[%s8525_s17 + $0x1888] sm:$0xff] }
 0x21d   : > { %v1208_v37 = vld [vmem:[%s8525_s17 + $0x1898] sm:$0xff] }
 0x21e   : > { %5961 = vmatpush1.bf16.msra.mxu0 %v5960_v46  ;;  %v1169_v46 = vld [vmem:[%s8525_s17 + $0x1760] sm:$0xff]  ;;  %v1232_v10 = vld [vmem:[%s8525_s17 + $0x1958] sm:$0xff] }
 0x21f   : > { %7049 = vmatpush1.bf16.msra.mxu1 %v7048_v47  ;;  %5963 = vmatprep.subr.bf16.mxu0 %v5962_v48  ;;  %v1167_v47 = vld [vmem:[%s8525_s17 + $0x1750] sm:$0xff]  ;;  %v7070_v48 = vpack.c.bf16 %v1172_v41, %v1168_v40  ;;  %v5984_v54 = vpack.c.bf16 %v1169_v46, %v1165_v45  ;;  %v7090_v46 = vpack.c.bf16 %v1212_v38, %v1208_v37  ;;  %v1236_v11 = vld [vmem:[%s8525_s17 + $0x1978] sm:$0xff] }
 0x220   : > { %7051 = vmatprep.subr.bf16.mxu1 %v7050_v52  ;;  %v1176_v52 = vld [vmem:[%s8525_s17 + $0x1798] sm:$0xff]  ;;  %v7072_v55 = vpack.c.bf16 %v1171_v49, %v1167_v47  ;;  %v1207_v45 = vld [vmem:[%s8525_s17 + $0x1890] sm:$0xff]  ;;  %v1218_v49 = vld [vmem:[%s8525_s17 + $0x18e8] sm:$0xff] }
 0x221   : > { %v1211_v47 = vld [vmem:[%s8525_s17 + $0x18b0] sm:$0xff]  ;;  %v1240_v22 = vld [vmem:[%s8525_s17 + $0x1998] sm:$0xff] }
 0x222   : > { %5965 = vmatpush1.bf16.msra.mxu0 %v5964_v58  ;;  %v1177_v58 = vld [vmem:[%s8525_s17 + $0x17a0] sm:$0xff]  ;;  %v1244_v23 = vld [vmem:[%s8525_s17 + $0x19b8] sm:$0xff] }
 0x223   : > { %7053 = vmatpush1.bf16.msra.mxu1 %v7052_v59  ;;  %5967 = vmatprep.subr.bf16.mxu0 %v5966_v60  ;;  %v1175_v59 = vld [vmem:[%s8525_s17 + $0x1790] sm:$0xff]  ;;  %v7074_v60 = vpack.c.bf16 %v1180_v53, %v1176_v52  ;;  %v5988_v2 = vpack.c.bf16 %v1177_v58, %v1173_v57  ;;  %v7092_v53 = vpack.c.bf16 %v1211_v47, %v1207_v45  ;;  %v1258_v45 = vld [vmem:[%s8525_s17 + $0x1a28] sm:$0xff]  ;;  %v1260_v47 = vld [vmem:[%s8525_s17 + $0x1a38] sm:$0xff] }
 0x224   : > { %7055 = vmatprep.subr.bf16.mxu1 %v7054_v0  ;;  %v1184_v0 = vld [vmem:[%s8525_s17 + $0x17d8] sm:$0xff]  ;;  %v7076_v3 = vpack.c.bf16 %v1179_v61, %v1175_v59  ;;  %v1215_v57 = vld [vmem:[%s8525_s17 + $0x18d0] sm:$0xff]  ;;  %v7094_v58 = vpack.c.bf16 %v1220_v51, %v1216_v50  ;;  %v1226_v61 = vld [vmem:[%s8525_s17 + $0x1928] sm:$0xff] }
 0x225   : > { %v1219_v59 = vld [vmem:[%s8525_s17 + $0x18f0] sm:$0xff]  ;;  %v1253_v51 = vld [vmem:[%s8525_s17 + $0x1a00] sm:$0xff] }
 0x226   : > { %5969 = vmatpush1.bf16.msra.mxu0 %v5968_v6  ;;  %v1185_v6 = vld [vmem:[%s8525_s17 + $0x17e0] sm:$0xff] }
 0x227   : > { %7057 = vmatpush1.bf16.msra.mxu1 %v7056_v7  ;;  %5971 = vmatprep.subr.bf16.mxu0 %v5970_v8  ;;  %v1183_v7 = vld [vmem:[%s8525_s17 + $0x17d0] sm:$0xff]  ;;  %v7078_v8 = vpack.c.bf16 %v1188_v1, %v1184_v0  ;;  %v5992_v14 = vpack.c.bf16 %v1185_v6, %v1181_v5  ;;  %v7096_v1 = vpack.c.bf16 %v1219_v59, %v1215_v57  ;;  %v1266_v57 = vld [vmem:[%s8525_s17 + $0x1a68] sm:$0xff]  ;;  %v1268_v59 = vld [vmem:[%s8525_s17 + $0x1a78] sm:$0xff] }
 0x228   : > { %7059 = vmatprep.subr.bf16.mxu1 %v7058_v12  ;;  %v1192_v12 = vld [vmem:[%s8525_s17 + $0x1818] sm:$0xff]  ;;  %v7080_v15 = vpack.c.bf16 %v1187_v9, %v1183_v7  ;;  %v1223_v5 = vld [vmem:[%s8525_s17 + $0x1910] sm:$0xff]  ;;  %v7098_v6 = vpack.c.bf16 %v1228_v63, %v1224_v62  ;;  %v1234_v9 = vld [vmem:[%s8525_s17 + $0x1968] sm:$0xff] }
 0x229   : > { %v1227_v7 = vld [vmem:[%s8525_s17 + $0x1930] sm:$0xff]  ;;  %v1261_v63 = vld [vmem:[%s8525_s17 + $0x1a40] sm:$0xff] }
 0x22a   : > { %5973 = vmatpush1.bf16.msra.mxu0 %v5972_v18  ;;  %v1193_v18 = vld [vmem:[%s8525_s17 + $0x1820] sm:$0xff] }
 0x22b   : > { %7061 = vmatpush1.bf16.msra.mxu1 %v7060_v19  ;;  %5975 = vmatprep.subr.bf16.mxu0 %v5974_v20  ;;  %v1191_v19 = vld [vmem:[%s8525_s17 + $0x1810] sm:$0xff]  ;;  %v7082_v20 = vpack.c.bf16 %v1196_v13, %v1192_v12  ;;  %v5996_v27 = vpack.c.bf16 %v1193_v18, %v1189_v17  ;;  %v7100_v13 = vpack.c.bf16 %v1227_v7, %v1223_v5  ;;  %v1274_v5 = vld [vmem:[%s8525_s17 + $0x1aa8] sm:$0xff]  ;;  %v1276_v7 = vld [vmem:[%s8525_s17 + $0x1ab8] sm:$0xff] }
 0x22c   : > { %7063 = vmatprep.subr.bf16.mxu1 %v7062_v24  ;;  %v1200_v24 = vld [vmem:[%s8525_s17 + $0x1858] sm:$0xff]  ;;  %v7084_v28 = vpack.c.bf16 %v1195_v21, %v1191_v19  ;;  %v1231_v17 = vld [vmem:[%s8525_s17 + $0x1950] sm:$0xff]  ;;  %v7102_v18 = vpack.c.bf16 %v1236_v11, %v1232_v10  ;;  %v1242_v21 = vld [vmem:[%s8525_s17 + $0x19a8] sm:$0xff] }
 0x22d   : > { %v7086_v33 = vpack.c.bf16 %v1204_v25, %v1200_v24  ;;  %v1235_v19 = vld [vmem:[%s8525_s17 + $0x1970] sm:$0xff]  ;;  %v1269_v11 = vld [vmem:[%s8525_s17 + $0x1a80] sm:$0xff] }
 0x22e   : > { %5977 = vmatpush1.bf16.msra.mxu0 %v5976_v30  ;;  %v1197_v30 = vld [vmem:[%s8525_s17 + $0x1840] sm:$0xff]  ;;  %v7104_v25 = vpack.c.bf16 %v1235_v19, %v1231_v17  ;;  %v1282_v17 = vld [vmem:[%s8525_s17 + $0x1ae8] sm:$0xff]  ;;  %v1284_v19 = vld [vmem:[%s8525_s17 + $0x1af8] sm:$0xff] }
 0x22f   : > { %7065 = vmatpush1.bf16.msra.mxu1 %v7064_v31  ;;  %5979 = vmatprep.subr.bf16.mxu0 %v5978_v32  ;;  %v1201_v31 = vld [vmem:[%s8525_s17 + $0x1860] sm:$0xff]  ;;  %v1199_v32 = vld [vmem:[%s8525_s17 + $0x1850] sm:$0xff] }
 0x230   : > { %7067 = vmatprep.subr.bf16.mxu1 %v7066_v36  ;;  %v1210_v36 = vld [vmem:[%s8525_s17 + $0x18a8] sm:$0xff]  ;;  %v6000_v40 = vpack.c.bf16 %v1201_v31, %v1197_v30  ;;  %v7088_v41 = vpack.c.bf16 %v1203_v34, %v1199_v32  ;;  %v7106_v30 = vpack.c.bf16 %v1244_v23, %v1240_v22  ;;  %v1243_v31 = vld [vmem:[%s8525_s17 + $0x19b0] sm:$0xff]  ;;  %v1248_v34 = vld [vmem:[%s8525_s17 + $0x19d8] sm:$0xff] }
 0x231   : > { %v1246_v32 = vld [vmem:[%s8525_s17 + $0x19c8] sm:$0xff]  ;;  %v1277_v23 = vld [vmem:[%s8525_s17 + $0x1ac0] sm:$0xff] }
 0x232   : > { %5981 = vmatpush1.bf16.msra.mxu0 %v5980_v42  ;;  %v6002_v42 = vpack.c.bf16 %v1210_v36, %v1206_v35  ;;  %v1252_v35 = vld [vmem:[%s8525_s17 + $0x19f8] sm:$0xff] }
 0x233   : > { %7069 = vmatpush1.bf16.msra.mxu1 %v7068_v43  ;;  %5983 = vmatprep.subr.bf16.mxu0 %v5982_v44  ;;  %v1205_v43 = vld [vmem:[%s8525_s17 + $0x1880] sm:$0xff] }
 0x234   : > { %7071 = vmatprep.subr.bf16.mxu1 %v7070_v48  ;;  %v1209_v44 = vld [vmem:[%s8525_s17 + $0x18a0] sm:$0xff]  ;;  %v1214_v48 = vld [vmem:[%s8525_s17 + $0x18c8] sm:$0xff] }
 0x235   : > { %v6004_v52 = vpack.c.bf16 %v1209_v44, %v1205_v43  ;;  %v1251_v43 = vld [vmem:[%s8525_s17 + $0x19f0] sm:$0xff]  ;;  %v1254_v44 = vld [vmem:[%s8525_s17 + $0x1a08] sm:$0xff] }
 0x236   : > { %5985 = vmatpush1.bf16.msra.mxu0 %v5984_v54  ;;  %v6006_v54 = vpack.c.bf16 %v1218_v49, %v1214_v48  ;;  %v6026_v50 = vpack.c.bf16 %v1258_v45, %v1254_v44 }
 0x237   : > { %7073 = vmatpush1.bf16.msra.mxu1 %v7072_v55  ;;  %5987 = vmatprep.subr.bf16.mxu0 %v5986_v56  ;;  %v1213_v55 = vld [vmem:[%s8525_s17 + $0x18c0] sm:$0xff] }
 0x238   : > { %7075 = vmatprep.subr.bf16.mxu1 %v7074_v60  ;;  %v1217_v56 = vld [vmem:[%s8525_s17 + $0x18e0] sm:$0xff]  ;;  %v1222_v60 = vld [vmem:[%s8525_s17 + $0x1908] sm:$0xff] }
 0x239   : > { %v6008_v0 = vpack.c.bf16 %v1217_v56, %v1213_v55  ;;  %v1259_v55 = vld [vmem:[%s8525_s17 + $0x1a30] sm:$0xff]  ;;  %v1262_v56 = vld [vmem:[%s8525_s17 + $0x1a48] sm:$0xff] }
 0x23a   : > { %5989 = vmatpush1.bf16.msra.mxu0 %v5988_v2  ;;  %v6010_v2 = vpack.c.bf16 %v1226_v61, %v1222_v60  ;;  %v6030_v62 = vpack.c.bf16 %v1266_v57, %v1262_v56 }
 0x23b   : > { %7077 = vmatpush1.bf16.msra.mxu1 %v7076_v3  ;;  %5991 = vmatprep.subr.bf16.mxu0 %v5990_v4  ;;  %v1221_v3 = vld [vmem:[%s8525_s17 + $0x1900] sm:$0xff] }
 0x23c   : > { %7079 = vmatprep.subr.bf16.mxu1 %v7078_v8  ;;  %v1225_v4 = vld [vmem:[%s8525_s17 + $0x1920] sm:$0xff]  ;;  %v1230_v8 = vld [vmem:[%s8525_s17 + $0x1948] sm:$0xff] }
 0x23d   : > { %v6012_v12 = vpack.c.bf16 %v1225_v4, %v1221_v3  ;;  %v1267_v3 = vld [vmem:[%s8525_s17 + $0x1a70] sm:$0xff]  ;;  %v1270_v4 = vld [vmem:[%s8525_s17 + $0x1a88] sm:$0xff] }
 0x23e   : > { %5993 = vmatpush1.bf16.msra.mxu0 %v5992_v14  ;;  %v6014_v14 = vpack.c.bf16 %v1234_v9, %v1230_v8  ;;  %v6034_v10 = vpack.c.bf16 %v1274_v5, %v1270_v4 }
 0x23f   : > { %7081 = vmatpush1.bf16.msra.mxu1 %v7080_v15  ;;  %5995 = vmatprep.subr.bf16.mxu0 %v5994_v16  ;;  %v1229_v15 = vld [vmem:[%s8525_s17 + $0x1940] sm:$0xff] }
 0x240   : > { %7083 = vmatprep.subr.bf16.mxu1 %v7082_v20  ;;  %v1233_v16 = vld [vmem:[%s8525_s17 + $0x1960] sm:$0xff]  ;;  %v1238_v20 = vld [vmem:[%s8525_s17 + $0x1988] sm:$0xff] }
 0x241   : > { %3017 = vmatmul.mubr.f32.vlgmr.msra.gmra.mrb[0].mxu0 %v397_v26  ;;  %v6016_v24 = vpack.c.bf16 %v1233_v16, %v1229_v15  ;;  %v1275_v15 = vld [vmem:[%s8525_s17 + $0x1ab0] sm:$0xff]  ;;  %v1278_v16 = vld [vmem:[%s8525_s17 + $0x1ac8] sm:$0xff] }
 0x242   : > { %5997 = vmatpush1.bf16.msra.mxu0 %v5996_v27  ;;  %4224 = vmatmul.mubr.f32.vlgmr.msra.gmra.mrb[0].mxu1 %v397_v26  ;;  %v6018_v26 = vpack.c.bf16 %v1242_v21, %v1238_v20  ;;  %v1237_v27 = vld [vmem:[%s8525_s17 + $0x1980] sm:$0xff]  ;;  %v6038_v22 = vpack.c.bf16 %v1282_v17, %v1278_v16 }
 0x243   : > { %7085 = vmatpush1.bf16.msra.mxu1 %v7084_v28  ;;  %5999 = vmatprep.subr.bf16.mxu0 %v5998_v29  ;;  %v1241_v28 = vld [vmem:[%s8525_s17 + $0x19a0] sm:$0xff]  ;;  %v1239_v29 = vld [vmem:[%s8525_s17 + $0x1990] sm:$0xff] }
 0x244   : > { %7087 = vmatprep.subr.bf16.mxu1 %v7086_v33  ;;  %3087 = vmatprep.mubr.f32.mxu0 %v400_v39  ;;  %v1250_v33 = vld [vmem:[%s8525_s17 + $0x19e8] sm:$0xff]  ;;  %v6020_v36 = vpack.c.bf16 %v1241_v28, %v1237_v27  ;;  %v7108_v37 = vpack.c.bf16 %v1243_v31, %v1239_v29  ;;  %v1283_v27 = vld [vmem:[%s8525_s17 + $0x1af0] sm:$0xff]  ;;  %v1292_v31 = vld [vmem:[%s8525_s17 + $0x1b38] sm:$0xff] }
 0x245   : > { %4294 = vmatprep.mubr.f32.mxu1 %v400_v39  ;;  %v6022_v38 = vpack.c.bf16 %v1250_v33, %v1246_v32  ;;  %v1245_v39 = vld [vmem:[%s8525_s17 + $0x19c0] sm:$0xff]  ;;  %v1286_v28 = vld [vmem:[%s8525_s17 + $0x1b08] sm:$0xff] }
 0x246   : > { %6001 = vmatpush1.bf16.msra.mxu0 %v6000_v40  ;;  %v1249_v40 = vld [vmem:[%s8525_s17 + $0x19e0] sm:$0xff]  ;;  %v1290_v29 = vld [vmem:[%s8525_s17 + $0x1b28] sm:$0xff] }
 0x247   : > { %7089 = vmatpush1.bf16.msra.mxu1 %v7088_v41  ;;  %6003 = vmatprep.subr.bf16.mxu0 %v6002_v42  ;;  %v1247_v41 = vld [vmem:[%s8525_s17 + $0x19d0] sm:$0xff]  ;;  %v7110_v42 = vpack.c.bf16 %v1252_v35, %v1248_v34  ;;  %v6024_v48 = vpack.c.bf16 %v1249_v40, %v1245_v39  ;;  %v6042_v34 = vpack.c.bf16 %v1290_v29, %v1286_v28  ;;  %v1285_v35 = vld [vmem:[%s8525_s17 + $0x1b00] sm:$0xff]  ;;  %v1294_v40 = vld [vmem:[%s8525_s17 + $0x1b48] sm:$0xff] }
 0x248   : > { %7091 = vmatprep.subr.bf16.mxu1 %v7090_v46  ;;  %v1256_v46 = vld [vmem:[%s8525_s17 + $0x1a18] sm:$0xff]  ;;  %v7112_v49 = vpack.c.bf16 %v1251_v43, %v1247_v41  ;;  %v1291_v39 = vld [vmem:[%s8525_s17 + $0x1b30] sm:$0xff]  ;;  %v1298_v41 = vld [vmem:[%s8525_s17 + $0x1b68] sm:$0xff] }
 0x249   : > { %v1300_v43 = vld [vmem:[%s8525_s17 + $0x1b78] sm:$0xff]  ;;  %v399_v28 = vld [vmem:[%s8547_s14 + $0x60] sm:$0xff] }
 0x24a   : > { %6005 = vmatpush1.bf16.msra.mxu0 %v6004_v52  ;;  %v1257_v52 = vld [vmem:[%s8525_s17 + $0x1a20] sm:$0xff] }
 0x24b   : > { %7093 = vmatpush1.bf16.msra.mxu1 %v7092_v53  ;;  %6007 = vmatprep.subr.bf16.mxu0 %v6006_v54  ;;  %v1255_v53 = vld [vmem:[%s8525_s17 + $0x1a10] sm:$0xff]  ;;  %v7114_v54 = vpack.c.bf16 %v1260_v47, %v1256_v46  ;;  %v6028_v60 = vpack.c.bf16 %v1257_v52, %v1253_v51  ;;  %v6046_v46 = vpack.c.bf16 %v1298_v41, %v1294_v40  ;;  %v1293_v47 = vld [vmem:[%s8525_s17 + $0x1b40] sm:$0xff]  ;;  %v1302_v52 = vld [vmem:[%s8525_s17 + $0x1b88] sm:$0xff] }
 0x24c   : > { %7095 = vmatprep.subr.bf16.mxu1 %v7094_v58  ;;  %v1264_v58 = vld [vmem:[%s8525_s17 + $0x1a58] sm:$0xff]  ;;  %v7116_v61 = vpack.c.bf16 %v1259_v55, %v1255_v53  ;;  %v1299_v51 = vld [vmem:[%s8525_s17 + $0x1b70] sm:$0xff]  ;;  %v1306_v53 = vld [vmem:[%s8525_s17 + $0x1ba8] sm:$0xff] }
 0x24d   : > { %v1308_v55 = vld [vmem:[%s8525_s17 + $0x1bb8] sm:$0xff] }
 0x24e   : > { %6009 = vmatpush1.bf16.msra.mxu0 %v6008_v0  ;;  %v1265_v0 = vld [vmem:[%s8525_s17 + $0x1a60] sm:$0xff]  ;;  %v1340_v40 = vld [vmem:[%s8525_s17 + $0x1cb8] sm:$0xff] }
 0x24f   : > { %7097 = vmatpush1.bf16.msra.mxu1 %v7096_v1  ;;  %6011 = vmatprep.subr.bf16.mxu0 %v6010_v2  ;;  %v1263_v1 = vld [vmem:[%s8525_s17 + $0x1a50] sm:$0xff]  ;;  %v7118_v2 = vpack.c.bf16 %v1268_v59, %v1264_v58  ;;  %v6032_v8 = vpack.c.bf16 %v1265_v0, %v1261_v63  ;;  %v6050_v58 = vpack.c.bf16 %v1306_v53, %v1302_v52  ;;  %v1301_v59 = vld [vmem:[%s8525_s17 + $0x1b80] sm:$0xff]  ;;  %v1310_v0 = vld [vmem:[%s8525_s17 + $0x1bc8] sm:$0xff] }
 0x250   : > { %7099 = vmatprep.subr.bf16.mxu1 %v7098_v6  ;;  %v1272_v6 = vld [vmem:[%s8525_s17 + $0x1a98] sm:$0xff]  ;;  %v7120_v9 = vpack.c.bf16 %v1267_v3, %v1263_v1  ;;  %v1307_v63 = vld [vmem:[%s8525_s17 + $0x1bb0] sm:$0xff]  ;;  %v1314_v1 = vld [vmem:[%s8525_s17 + $0x1be8] sm:$0xff] }
 0x251   : > { %v1316_v3 = vld [vmem:[%s8525_s17 + $0x1bf8] sm:$0xff] }
 0x252   : > { %6013 = vmatpush1.bf16.msra.mxu0 %v6012_v12  ;;  %v1273_v12 = vld [vmem:[%s8525_s17 + $0x1aa0] sm:$0xff]  ;;  %v402_v41 = vld [vmem:[%s8547_s14 + $0x78] sm:$0xff] }
 0x253   : > { %7101 = vmatpush1.bf16.msra.mxu1 %v7100_v13  ;;  %6015 = vmatprep.subr.bf16.mxu0 %v6014_v14  ;;  %v1271_v13 = vld [vmem:[%s8525_s17 + $0x1a90] sm:$0xff]  ;;  %v7122_v14 = vpack.c.bf16 %v1276_v7, %v1272_v6  ;;  %v6036_v20 = vpack.c.bf16 %v1273_v12, %v1269_v11  ;;  %v6054_v6 = vpack.c.bf16 %v1314_v1, %v1310_v0  ;;  %v1309_v7 = vld [vmem:[%s8525_s17 + $0x1bc0] sm:$0xff]  ;;  %v1318_v12 = vld [vmem:[%s8525_s17 + $0x1c08] sm:$0xff] }
 0x254   : > { %7103 = vmatprep.subr.bf16.mxu1 %v7102_v18  ;;  %v1280_v18 = vld [vmem:[%s8525_s17 + $0x1ad8] sm:$0xff]  ;;  %v7124_v21 = vpack.c.bf16 %v1275_v15, %v1271_v13  ;;  %v1315_v11 = vld [vmem:[%s8525_s17 + $0x1bf0] sm:$0xff]  ;;  %v1322_v13 = vld [vmem:[%s8525_s17 + $0x1c28] sm:$0xff] }
 0x255   : > { %v1324_v15 = vld [vmem:[%s8525_s17 + $0x1c38] sm:$0xff] }
 0x256   : > { %6017 = vmatpush1.bf16.msra.mxu0 %v6016_v24  ;;  %v1281_v24 = vld [vmem:[%s8525_s17 + $0x1ae0] sm:$0xff]  ;;  %v1344_v52 = vld [vmem:[%s8525_s17 + $0x1cd8] sm:$0xff] }
 0x257   : > { %7105 = vmatpush1.bf16.msra.mxu1 %v7104_v25  ;;  %6019 = vmatprep.subr.bf16.mxu0 %v6018_v26  ;;  %v1279_v25 = vld [vmem:[%s8525_s17 + $0x1ad0] sm:$0xff]  ;;  %v7126_v26 = vpack.c.bf16 %v1284_v19, %v1280_v18  ;;  %v6040_v32 = vpack.c.bf16 %v1281_v24, %v1277_v23  ;;  %v6058_v18 = vpack.c.bf16 %v1322_v13, %v1318_v12  ;;  %v1317_v19 = vld [vmem:[%s8525_s17 + $0x1c00] sm:$0xff]  ;;  %v1326_v24 = vld [vmem:[%s8525_s17 + $0x1c48] sm:$0xff] }
 0x258   : > { %7107 = vmatprep.subr.bf16.mxu1 %v7106_v30  ;;  %v1288_v30 = vld [vmem:[%s8525_s17 + $0x1b18] sm:$0xff]  ;;  %v7128_v33 = vpack.c.bf16 %v1283_v27, %v1279_v25  ;;  %v1323_v23 = vld [vmem:[%s8525_s17 + $0x1c30] sm:$0xff]  ;;  %v1330_v25 = vld [vmem:[%s8525_s17 + $0x1c68] sm:$0xff] }
 0x259   : > { %v1332_v27 = vld [vmem:[%s8525_s17 + $0x1c78] sm:$0xff] }
 0x25a   : > { %6021 = vmatpush1.bf16.msra.mxu0 %v6020_v36  ;;  %v1289_v36 = vld [vmem:[%s8525_s17 + $0x1b20] sm:$0xff]  ;;  %v1348_v53 = vld [vmem:[%s8525_s17 + $0x1cf8] sm:$0xff] }
 0x25b   : > { %7109 = vmatpush1.bf16.msra.mxu1 %v7108_v37  ;;  %6023 = vmatprep.subr.bf16.mxu0 %v6022_v38  ;;  %v1287_v37 = vld [vmem:[%s8525_s17 + $0x1b10] sm:$0xff]  ;;  %v7130_v38 = vpack.c.bf16 %v1292_v31, %v1288_v30  ;;  %v6044_v44 = vpack.c.bf16 %v1289_v36, %v1285_v35  ;;  %v6062_v31 = vpack.c.bf16 %v1330_v25, %v1326_v24  ;;  %v1352_v0 = vld [vmem:[%s8525_s17 + $0x1d18] sm:$0xff] }
 0x25c   : > { %7111 = vmatprep.subr.bf16.mxu1 %v7110_v42  ;;  %v1296_v42 = vld [vmem:[%s8525_s17 + $0x1b58] sm:$0xff]  ;;  %v7132_v45 = vpack.c.bf16 %v1291_v39, %v1287_v37  ;;  %v1331_v36 = vld [vmem:[%s8525_s17 + $0x1c70] sm:$0xff]  ;;  %v1334_v37 = vld [vmem:[%s8525_s17 + $0x1c88] sm:$0xff] }
 0x25d   : > { %v1336_v39 = vld [vmem:[%s8525_s17 + $0x1c98] sm:$0xff] }
 0x25e   : > { %6025 = vmatpush1.bf16.msra.mxu0 %v6024_v48  ;;  %v1297_v48 = vld [vmem:[%s8525_s17 + $0x1b60] sm:$0xff]  ;;  %v1356_v1 = vld [vmem:[%s8525_s17 + $0x1d38] sm:$0xff] }
 0x25f   : > { %7113 = vmatpush1.bf16.msra.mxu1 %v7112_v49  ;;  %6027 = vmatprep.subr.bf16.mxu0 %v6026_v50  ;;  %v1295_v49 = vld [vmem:[%s8525_s17 + $0x1b50] sm:$0xff]  ;;  %v7134_v50 = vpack.c.bf16 %v1300_v43, %v1296_v42  ;;  %v6048_v56 = vpack.c.bf16 %v1297_v48, %v1293_v47  ;;  %v7154_v48 = vpack.c.bf16 %v1340_v40, %v1336_v39  ;;  %v1360_v12 = vld [vmem:[%s8525_s17 + $0x1d58] sm:$0xff] }
 0x260   : > { %7115 = vmatprep.subr.bf16.mxu1 %v7114_v54  ;;  %v1304_v54 = vld [vmem:[%s8525_s17 + $0x1b98] sm:$0xff]  ;;  %v7136_v57 = vpack.c.bf16 %v1299_v51, %v1295_v49  ;;  %v1335_v47 = vld [vmem:[%s8525_s17 + $0x1c90] sm:$0xff]  ;;  %v1346_v51 = vld [vmem:[%s8525_s17 + $0x1ce8] sm:$0xff] }
 0x261   : > { %v1339_v49 = vld [vmem:[%s8525_s17 + $0x1cb0] sm:$0xff]  ;;  %v1364_v13 = vld [vmem:[%s8525_s17 + $0x1d78] sm:$0xff] }
 0x262   : > { %6029 = vmatpush1.bf16.msra.mxu0 %v6028_v60  ;;  %v1305_v60 = vld [vmem:[%s8525_s17 + $0x1ba0] sm:$0xff]  ;;  %v1368_v24 = vld [vmem:[%s8525_s17 + $0x1d98] sm:$0xff] }
 0x263   : > { %7117 = vmatpush1.bf16.msra.mxu1 %v7116_v61  ;;  %6031 = vmatprep.subr.bf16.mxu0 %v6030_v62  ;;  %v1303_v61 = vld [vmem:[%s8525_s17 + $0x1b90] sm:$0xff]  ;;  %v7138_v62 = vpack.c.bf16 %v1308_v55, %v1304_v54  ;;  %v6052_v4 = vpack.c.bf16 %v1305_v60, %v1301_v59  ;;  %v7156_v55 = vpack.c.bf16 %v1339_v49, %v1335_v47  ;;  %v1372_v25 = vld [vmem:[%s8525_s17 + $0x1db8] sm:$0xff]  ;;  %v1386_v47 = vld [vmem:[%s8525_s17 + $0x1e28] sm:$0xff] }
 0x264   : > { %7119 = vmatprep.subr.bf16.mxu1 %v7118_v2  ;;  %v1312_v2 = vld [vmem:[%s8525_s17 + $0x1bd8] sm:$0xff]  ;;  %v7140_v5 = vpack.c.bf16 %v1307_v63, %v1303_v61  ;;  %v1343_v59 = vld [vmem:[%s8525_s17 + $0x1cd0] sm:$0xff]  ;;  %v7158_v60 = vpack.c.bf16 %v1348_v53, %v1344_v52  ;;  %v1354_v63 = vld [vmem:[%s8525_s17 + $0x1d28] sm:$0xff] }
 0x265   : > { %v1347_v61 = vld [vmem:[%s8525_s17 + $0x1cf0] sm:$0xff]  ;;  %v1388_v49 = vld [vmem:[%s8525_s17 + $0x1e38] sm:$0xff]  ;;  %v1381_v53 = vld [vmem:[%s8525_s17 + $0x1e00] sm:$0xff] }
 0x266   : > { %6033 = vmatpush1.bf16.msra.mxu0 %v6032_v8  ;;  %v1313_v8 = vld [vmem:[%s8525_s17 + $0x1be0] sm:$0xff] }
 0x267   : > { %7121 = vmatpush1.bf16.msra.mxu1 %v7120_v9  ;;  %6035 = vmatprep.subr.bf16.mxu0 %v6034_v10  ;;  %v1311_v9 = vld [vmem:[%s8525_s17 + $0x1bd0] sm:$0xff]  ;;  %v7142_v10 = vpack.c.bf16 %v1316_v3, %v1312_v2  ;;  %v6056_v16 = vpack.c.bf16 %v1313_v8, %v1309_v7  ;;  %v7160_v3 = vpack.c.bf16 %v1347_v61, %v1343_v59  ;;  %v1394_v59 = vld [vmem:[%s8525_s17 + $0x1e68] sm:$0xff]  ;;  %v1396_v61 = vld [vmem:[%s8525_s17 + $0x1e78] sm:$0xff] }
 0x268   : > { %7123 = vmatprep.subr.bf16.mxu1 %v7122_v14  ;;  %v1320_v14 = vld [vmem:[%s8525_s17 + $0x1c18] sm:$0xff]  ;;  %v7144_v17 = vpack.c.bf16 %v1315_v11, %v1311_v9  ;;  %v1351_v7 = vld [vmem:[%s8525_s17 + $0x1d10] sm:$0xff]  ;;  %v7162_v8 = vpack.c.bf16 %v1356_v1, %v1352_v0  ;;  %v1362_v11 = vld [vmem:[%s8525_s17 + $0x1d68] sm:$0xff] }
 0x269   : > { %v1355_v9 = vld [vmem:[%s8525_s17 + $0x1d30] sm:$0xff]  ;;  %v1389_v1 = vld [vmem:[%s8525_s17 + $0x1e40] sm:$0xff] }
 0x26a   : > { %6037 = vmatpush1.bf16.msra.mxu0 %v6036_v20  ;;  %v1321_v20 = vld [vmem:[%s8525_s17 + $0x1c20] sm:$0xff] }
 0x26b   : > { %7125 = vmatpush1.bf16.msra.mxu1 %v7124_v21  ;;  %6039 = vmatprep.subr.bf16.mxu0 %v6038_v22  ;;  %v1319_v21 = vld [vmem:[%s8525_s17 + $0x1c10] sm:$0xff]  ;;  %v7146_v22 = vpack.c.bf16 %v1324_v15, %v1320_v14  ;;  %v6060_v29 = vpack.c.bf16 %v1321_v20, %v1317_v19  ;;  %v7164_v15 = vpack.c.bf16 %v1355_v9, %v1351_v7  ;;  %v1402_v7 = vld [vmem:[%s8525_s17 + $0x1ea8] sm:$0xff]  ;;  %v1404_v9 = vld [vmem:[%s8525_s17 + $0x1eb8] sm:$0xff] }
 0x26c   : > { %7127 = vmatprep.subr.bf16.mxu1 %v7126_v26  ;;  %v1328_v26 = vld [vmem:[%s8525_s17 + $0x1c58] sm:$0xff]  ;;  %v7148_v30 = vpack.c.bf16 %v1323_v23, %v1319_v21  ;;  %v1359_v19 = vld [vmem:[%s8525_s17 + $0x1d50] sm:$0xff]  ;;  %v7166_v20 = vpack.c.bf16 %v1364_v13, %v1360_v12  ;;  %v1370_v23 = vld [vmem:[%s8525_s17 + $0x1da8] sm:$0xff] }
 0x26d   : > { %v7150_v35 = vpack.c.bf16 %v1332_v27, %v1328_v26  ;;  %v1363_v21 = vld [vmem:[%s8525_s17 + $0x1d70] sm:$0xff]  ;;  %v1397_v13 = vld [vmem:[%s8525_s17 + $0x1e80] sm:$0xff] }
 0x26e   : > { %6041 = vmatpush1.bf16.msra.mxu0 %v6040_v32  ;;  %v1325_v32 = vld [vmem:[%s8525_s17 + $0x1c40] sm:$0xff]  ;;  %v7168_v27 = vpack.c.bf16 %v1363_v21, %v1359_v19  ;;  %v1410_v19 = vld [vmem:[%s8525_s17 + $0x1ee8] sm:$0xff]  ;;  %v1412_v21 = vld [vmem:[%s8525_s17 + $0x1ef8] sm:$0xff] }
 0x26f   : > { %7129 = vmatpush1.bf16.msra.mxu1 %v7128_v33  ;;  %6043 = vmatprep.subr.bf16.mxu0 %v6042_v34  ;;  %v1329_v33 = vld [vmem:[%s8525_s17 + $0x1c60] sm:$0xff]  ;;  %v1327_v34 = vld [vmem:[%s8525_s17 + $0x1c50] sm:$0xff] }
 0x270   : > { %7131 = vmatprep.subr.bf16.mxu1 %v7130_v38  ;;  %v1338_v38 = vld [vmem:[%s8525_s17 + $0x1ca8] sm:$0xff]  ;;  %v6064_v42 = vpack.c.bf16 %v1329_v33, %v1325_v32  ;;  %v7152_v43 = vpack.c.bf16 %v1331_v36, %v1327_v34  ;;  %v7170_v32 = vpack.c.bf16 %v1372_v25, %v1368_v24  ;;  %v1371_v33 = vld [vmem:[%s8525_s17 + $0x1db0] sm:$0xff]  ;;  %v1376_v36 = vld [vmem:[%s8525_s17 + $0x1dd8] sm:$0xff] }
 0x271   : > { %v1374_v34 = vld [vmem:[%s8525_s17 + $0x1dc8] sm:$0xff]  ;;  %v1405_v25 = vld [vmem:[%s8525_s17 + $0x1ec0] sm:$0xff] }
 0x272   : > { %6045 = vmatpush1.bf16.msra.mxu0 %v6044_v44  ;;  %v6066_v44 = vpack.c.bf16 %v1338_v38, %v1334_v37  ;;  %v1380_v37 = vld [vmem:[%s8525_s17 + $0x1df8] sm:$0xff] }
 0x273   : > { %7133 = vmatpush1.bf16.msra.mxu1 %v7132_v45  ;;  %6047 = vmatprep.subr.bf16.mxu0 %v6046_v46  ;;  %v1333_v45 = vld [vmem:[%s8525_s17 + $0x1c80] sm:$0xff] }
 0x274   : > { %7135 = vmatprep.subr.bf16.mxu1 %v7134_v50  ;;  %v1337_v46 = vld [vmem:[%s8525_s17 + $0x1ca0] sm:$0xff]  ;;  %v1342_v50 = vld [vmem:[%s8525_s17 + $0x1cc8] sm:$0xff] }
 0x275   : > { %v6068_v54 = vpack.c.bf16 %v1337_v46, %v1333_v45  ;;  %v1379_v45 = vld [vmem:[%s8525_s17 + $0x1df0] sm:$0xff]  ;;  %v1382_v46 = vld [vmem:[%s8525_s17 + $0x1e08] sm:$0xff] }
 0x276   : > { %6049 = vmatpush1.bf16.msra.mxu0 %v6048_v56  ;;  %v6070_v56 = vpack.c.bf16 %v1346_v51, %v1342_v50  ;;  %v6090_v52 = vpack.c.bf16 %v1386_v47, %v1382_v46 }
 0x277   : > { %7137 = vmatpush1.bf16.msra.mxu1 %v7136_v57  ;;  %6051 = vmatprep.subr.bf16.mxu0 %v6050_v58  ;;  %v1341_v57 = vld [vmem:[%s8525_s17 + $0x1cc0] sm:$0xff] }
 0x278   : > { %7139 = vmatprep.subr.bf16.mxu1 %v7138_v62  ;;  %v1345_v58 = vld [vmem:[%s8525_s17 + $0x1ce0] sm:$0xff]  ;;  %v1350_v62 = vld [vmem:[%s8525_s17 + $0x1d08] sm:$0xff] }
 0x279   : > { %v6072_v2 = vpack.c.bf16 %v1345_v58, %v1341_v57  ;;  %v1387_v57 = vld [vmem:[%s8525_s17 + $0x1e30] sm:$0xff]  ;;  %v1390_v58 = vld [vmem:[%s8525_s17 + $0x1e48] sm:$0xff] }
 0x27a   : > { %6053 = vmatpush1.bf16.msra.mxu0 %v6052_v4  ;;  %v6074_v4 = vpack.c.bf16 %v1354_v63, %v1350_v62  ;;  %v6094_v0 = vpack.c.bf16 %v1394_v59, %v1390_v58 }
 0x27b   : > { %7141 = vmatpush1.bf16.msra.mxu1 %v7140_v5  ;;  %6055 = vmatprep.subr.bf16.mxu0 %v6054_v6  ;;  %v1349_v5 = vld [vmem:[%s8525_s17 + $0x1d00] sm:$0xff] }
 0x27c   : > { %7143 = vmatprep.subr.bf16.mxu1 %v7142_v10  ;;  %v1353_v6 = vld [vmem:[%s8525_s17 + $0x1d20] sm:$0xff]  ;;  %v1358_v10 = vld [vmem:[%s8525_s17 + $0x1d48] sm:$0xff] }
 0x27d   : > { %v6076_v14 = vpack.c.bf16 %v1353_v6, %v1349_v5  ;;  %v1395_v5 = vld [vmem:[%s8525_s17 + $0x1e70] sm:$0xff]  ;;  %v1398_v6 = vld [vmem:[%s8525_s17 + $0x1e88] sm:$0xff] }
 0x27e   : > { %6057 = vmatpush1.bf16.msra.mxu0 %v6056_v16  ;;  %v6078_v16 = vpack.c.bf16 %v1362_v11, %v1358_v10  ;;  %v6098_v12 = vpack.c.bf16 %v1402_v7, %v1398_v6 }
 0x27f   : > { %7145 = vmatpush1.bf16.msra.mxu1 %v7144_v17  ;;  %6059 = vmatprep.subr.bf16.mxu0 %v6058_v18  ;;  %v1357_v17 = vld [vmem:[%s8525_s17 + $0x1d40] sm:$0xff] }
 0x280   : > { %7147 = vmatprep.subr.bf16.mxu1 %v7146_v22  ;;  %v1361_v18 = vld [vmem:[%s8525_s17 + $0x1d60] sm:$0xff]  ;;  %v1366_v22 = vld [vmem:[%s8525_s17 + $0x1d88] sm:$0xff] }
 0x281   : > { %3088 = vmatmul.mubr.f32.vlgmr.msra.gmra.mrb[0].mxu0 %v399_v28  ;;  %v6080_v26 = vpack.c.bf16 %v1361_v18, %v1357_v17  ;;  %v1403_v17 = vld [vmem:[%s8525_s17 + $0x1eb0] sm:$0xff]  ;;  %v1406_v18 = vld [vmem:[%s8525_s17 + $0x1ec8] sm:$0xff] }
 0x282   : > { %6061 = vmatpush1.bf16.msra.mxu0 %v6060_v29  ;;  %4295 = vmatmul.mubr.f32.vlgmr.msra.gmra.mrb[0].mxu1 %v399_v28  ;;  %v6082_v28 = vpack.c.bf16 %v1370_v23, %v1366_v22  ;;  %v1365_v29 = vld [vmem:[%s8525_s17 + $0x1d80] sm:$0xff]  ;;  %v6102_v24 = vpack.c.bf16 %v1410_v19, %v1406_v18 }
 0x283   : > { %7149 = vmatpush1.bf16.msra.mxu1 %v7148_v30  ;;  %6063 = vmatprep.subr.bf16.mxu0 %v6062_v31  ;;  %v1369_v30 = vld [vmem:[%s8525_s17 + $0x1da0] sm:$0xff]  ;;  %v1367_v31 = vld [vmem:[%s8525_s17 + $0x1d90] sm:$0xff] }
 0x284   : > { %7151 = vmatprep.subr.bf16.mxu1 %v7150_v35  ;;  %3158 = vmatprep.mubr.f32.mxu0 %v402_v41  ;;  %v1378_v35 = vld [vmem:[%s8525_s17 + $0x1de8] sm:$0xff]  ;;  %v6084_v38 = vpack.c.bf16 %v1369_v30, %v1365_v29  ;;  %v7172_v39 = vpack.c.bf16 %v1371_v33, %v1367_v31  ;;  %v1411_v29 = vld [vmem:[%s8525_s17 + $0x1ef0] sm:$0xff]  ;;  %v1420_v33 = vld [vmem:[%s8525_s17 + $0x1f38] sm:$0xff] }
 0x285   : > { %4365 = vmatprep.mubr.f32.mxu1 %v402_v41  ;;  %v6086_v40 = vpack.c.bf16 %v1378_v35, %v1374_v34  ;;  %v1373_v41 = vld [vmem:[%s8525_s17 + $0x1dc0] sm:$0xff]  ;;  %v1414_v30 = vld [vmem:[%s8525_s17 + $0x1f08] sm:$0xff] }
 0x286   : > { %6065 = vmatpush1.bf16.msra.mxu0 %v6064_v42  ;;  %v1377_v42 = vld [vmem:[%s8525_s17 + $0x1de0] sm:$0xff]  ;;  %v1418_v31 = vld [vmem:[%s8525_s17 + $0x1f28] sm:$0xff] }
 0x287   : > { %7153 = vmatpush1.bf16.msra.mxu1 %v7152_v43  ;;  %6067 = vmatprep.subr.bf16.mxu0 %v6066_v44  ;;  %v1375_v43 = vld [vmem:[%s8525_s17 + $0x1dd0] sm:$0xff]  ;;  %v7174_v44 = vpack.c.bf16 %v1380_v37, %v1376_v36  ;;  %v6088_v50 = vpack.c.bf16 %v1377_v42, %v1373_v41  ;;  %v6106_v36 = vpack.c.bf16 %v1418_v31, %v1414_v30  ;;  %v1413_v37 = vld [vmem:[%s8525_s17 + $0x1f00] sm:$0xff]  ;;  %v1422_v42 = vld [vmem:[%s8525_s17 + $0x1f48] sm:$0xff] }
 0x288   : > { %7155 = vmatprep.subr.bf16.mxu1 %v7154_v48  ;;  %v1384_v48 = vld [vmem:[%s8525_s17 + $0x1e18] sm:$0xff]  ;;  %v7176_v51 = vpack.c.bf16 %v1379_v45, %v1375_v43  ;;  %v1419_v41 = vld [vmem:[%s8525_s17 + $0x1f30] sm:$0xff]  ;;  %v1426_v43 = vld [vmem:[%s8525_s17 + $0x1f68] sm:$0xff] }
 0x289   : > { %v1428_v45 = vld [vmem:[%s8525_s17 + $0x1f78] sm:$0xff]  ;;  %v401_v30 = vld [vmem:[%s8547_s14 + $0x70] sm:$0xff] }
 0x28a   : > { %6069 = vmatpush1.bf16.msra.mxu0 %v6068_v54  ;;  %v1385_v54 = vld [vmem:[%s8525_s17 + $0x1e20] sm:$0xff] }
 0x28b   : > { %7157 = vmatpush1.bf16.msra.mxu1 %v7156_v55  ;;  %6071 = vmatprep.subr.bf16.mxu0 %v6070_v56  ;;  %v1383_v55 = vld [vmem:[%s8525_s17 + $0x1e10] sm:$0xff]  ;;  %v7178_v56 = vpack.c.bf16 %v1388_v49, %v1384_v48  ;;  %v6092_v62 = vpack.c.bf16 %v1385_v54, %v1381_v53  ;;  %v6110_v48 = vpack.c.bf16 %v1426_v43, %v1422_v42  ;;  %v1421_v49 = vld [vmem:[%s8525_s17 + $0x1f40] sm:$0xff]  ;;  %v1430_v54 = vld [vmem:[%s8525_s17 + $0x1f88] sm:$0xff] }
 0x28c   : > { %7159 = vmatprep.subr.bf16.mxu1 %v7158_v60  ;;  %v1392_v60 = vld [vmem:[%s8525_s17 + $0x1e58] sm:$0xff]  ;;  %v7180_v63 = vpack.c.bf16 %v1387_v57, %v1383_v55  ;;  %v1427_v53 = vld [vmem:[%s8525_s17 + $0x1f70] sm:$0xff]  ;;  %v1434_v55 = vld [vmem:[%s8525_s17 + $0x1fa8] sm:$0xff] }
 0x28d   : > { %v1436_v57 = vld [vmem:[%s8525_s17 + $0x1fb8] sm:$0xff]  ;;  %v404_v43 = vld [vmem:[%s8547_s14 + $0x88] sm:$0xff] }
 0x28e   : > { %6073 = vmatpush1.bf16.msra.mxu0 %v6072_v2  ;;  %v1393_v2 = vld [vmem:[%s8525_s17 + $0x1e60] sm:$0xff]  ;;  %v1468_v42 = vld [vmem:[%s8525_s17 + $0x20b8] sm:$0xff] }
 0x28f   : > { %7161 = vmatpush1.bf16.msra.mxu1 %v7160_v3  ;;  %6075 = vmatprep.subr.bf16.mxu0 %v6074_v4  ;;  %v1391_v3 = vld [vmem:[%s8525_s17 + $0x1e50] sm:$0xff]  ;;  %v7182_v4 = vpack.c.bf16 %v1396_v61, %v1392_v60  ;;  %v6096_v10 = vpack.c.bf16 %v1393_v2, %v1389_v1  ;;  %v6114_v60 = vpack.c.bf16 %v1434_v55, %v1430_v54  ;;  %v1429_v61 = vld [vmem:[%s8525_s17 + $0x1f80] sm:$0xff]  ;;  %v1438_v2 = vld [vmem:[%s8525_s17 + $0x1fc8] sm:$0xff] }
 0x290   : > { %7163 = vmatprep.subr.bf16.mxu1 %v7162_v8  ;;  %v1400_v8 = vld [vmem:[%s8525_s17 + $0x1e98] sm:$0xff]  ;;  %v7184_v11 = vpack.c.bf16 %v1395_v5, %v1391_v3  ;;  %v1435_v1 = vld [vmem:[%s8525_s17 + $0x1fb0] sm:$0xff]  ;;  %v1442_v3 = vld [vmem:[%s8525_s17 + $0x1fe8] sm:$0xff] }
 0x291   : > { %v1444_v5 = vld [vmem:[%s8525_s17 + $0x1ff8] sm:$0xff] }
 0x292   : > { %6077 = vmatpush1.bf16.msra.mxu0 %v6076_v14  ;;  %v1401_v14 = vld [vmem:[%s8525_s17 + $0x1ea0] sm:$0xff]  ;;  %v1472_v54 = vld [vmem:[%s8525_s17 + $0x20d8] sm:$0xff] }
 0x293   : > { %7165 = vmatpush1.bf16.msra.mxu1 %v7164_v15  ;;  %6079 = vmatprep.subr.bf16.mxu0 %v6078_v16  ;;  %v1399_v15 = vld [vmem:[%s8525_s17 + $0x1e90] sm:$0xff]  ;;  %v7186_v16 = vpack.c.bf16 %v1404_v9, %v1400_v8  ;;  %v6100_v22 = vpack.c.bf16 %v1401_v14, %v1397_v13  ;;  %v6118_v8 = vpack.c.bf16 %v1442_v3, %v1438_v2  ;;  %v1437_v9 = vld [vmem:[%s8525_s17 + $0x1fc0] sm:$0xff]  ;;  %v1446_v14 = vld [vmem:[%s8525_s17 + $0x2008] sm:$0xff] }
 0x294   : > { %7167 = vmatprep.subr.bf16.mxu1 %v7166_v20  ;;  %v1408_v20 = vld [vmem:[%s8525_s17 + $0x1ed8] sm:$0xff]  ;;  %v7188_v23 = vpack.c.bf16 %v1403_v17, %v1399_v15  ;;  %v1443_v13 = vld [vmem:[%s8525_s17 + $0x1ff0] sm:$0xff]  ;;  %v1450_v15 = vld [vmem:[%s8525_s17 + $0x2028] sm:$0xff] }
 0x295   : > { %v1452_v17 = vld [vmem:[%s8525_s17 + $0x2038] sm:$0xff] }
 0x296   : > { %6081 = vmatpush1.bf16.msra.mxu0 %v6080_v26  ;;  %v1409_v26 = vld [vmem:[%s8525_s17 + $0x1ee0] sm:$0xff]  ;;  %v1476_v55 = vld [vmem:[%s8525_s17 + $0x20f8] sm:$0xff] }
 0x297   : > { %7169 = vmatpush1.bf16.msra.mxu1 %v7168_v27  ;;  %6083 = vmatprep.subr.bf16.mxu0 %v6082_v28  ;;  %v1407_v27 = vld [vmem:[%s8525_s17 + $0x1ed0] sm:$0xff]  ;;  %v7190_v28 = vpack.c.bf16 %v1412_v21, %v1408_v20  ;;  %v6104_v34 = vpack.c.bf16 %v1409_v26, %v1405_v25  ;;  %v6122_v20 = vpack.c.bf16 %v1450_v15, %v1446_v14  ;;  %v1445_v21 = vld [vmem:[%s8525_s17 + $0x2000] sm:$0xff]  ;;  %v1454_v26 = vld [vmem:[%s8525_s17 + $0x2048] sm:$0xff] }
 0x298   : > { %7171 = vmatprep.subr.bf16.mxu1 %v7170_v32  ;;  %v1416_v32 = vld [vmem:[%s8525_s17 + $0x1f18] sm:$0xff]  ;;  %v7192_v35 = vpack.c.bf16 %v1411_v29, %v1407_v27  ;;  %v1451_v25 = vld [vmem:[%s8525_s17 + $0x2030] sm:$0xff]  ;;  %v1458_v27 = vld [vmem:[%s8525_s17 + $0x2068] sm:$0xff] }
 0x299   : > { %v1460_v29 = vld [vmem:[%s8525_s17 + $0x2078] sm:$0xff] }
 0x29a   : > { %6085 = vmatpush1.bf16.msra.mxu0 %v6084_v38  ;;  %v1417_v38 = vld [vmem:[%s8525_s17 + $0x1f20] sm:$0xff]  ;;  %v1480_v2 = vld [vmem:[%s8525_s17 + $0x2118] sm:$0xff] }
 0x29b   : > { %7173 = vmatpush1.bf16.msra.mxu1 %v7172_v39  ;;  %6087 = vmatprep.subr.bf16.mxu0 %v6086_v40  ;;  %v1415_v39 = vld [vmem:[%s8525_s17 + $0x1f10] sm:$0xff]  ;;  %v7194_v40 = vpack.c.bf16 %v1420_v33, %v1416_v32  ;;  %v6108_v46 = vpack.c.bf16 %v1417_v38, %v1413_v37  ;;  %v6126_v33 = vpack.c.bf16 %v1458_v27, %v1454_v26  ;;  %v1484_v3 = vld [vmem:[%s8525_s17 + $0x2138] sm:$0xff] }
 0x29c   : > { %7175 = vmatprep.subr.bf16.mxu1 %v7174_v44  ;;  %v1424_v44 = vld [vmem:[%s8525_s17 + $0x1f58] sm:$0xff]  ;;  %v7196_v47 = vpack.c.bf16 %v1419_v41, %v1415_v39  ;;  %v1459_v38 = vld [vmem:[%s8525_s17 + $0x2070] sm:$0xff]  ;;  %v1462_v39 = vld [vmem:[%s8525_s17 + $0x2088] sm:$0xff] }
 0x29d   : > { %v1464_v41 = vld [vmem:[%s8525_s17 + $0x2098] sm:$0xff] }
 0x29e   : > { %6089 = vmatpush1.bf16.msra.mxu0 %v6088_v50  ;;  %v1425_v50 = vld [vmem:[%s8525_s17 + $0x1f60] sm:$0xff]  ;;  %v1488_v14 = vld [vmem:[%s8525_s17 + $0x2158] sm:$0xff] }
 0x29f   : > { %7177 = vmatpush1.bf16.msra.mxu1 %v7176_v51  ;;  %6091 = vmatprep.subr.bf16.mxu0 %v6090_v52  ;;  %v1423_v51 = vld [vmem:[%s8525_s17 + $0x1f50] sm:$0xff]  ;;  %v7198_v52 = vpack.c.bf16 %v1428_v45, %v1424_v44  ;;  %v6112_v58 = vpack.c.bf16 %v1425_v50, %v1421_v49  ;;  %v7218_v50 = vpack.c.bf16 %v1468_v42, %v1464_v41  ;;  %v1492_v15 = vld [vmem:[%s8525_s17 + $0x2178] sm:$0xff] }
 0x2a0   : > { %7179 = vmatprep.subr.bf16.mxu1 %v7178_v56  ;;  %v1432_v56 = vld [vmem:[%s8525_s17 + $0x1f98] sm:$0xff]  ;;  %v7200_v59 = vpack.c.bf16 %v1427_v53, %v1423_v51  ;;  %v1463_v49 = vld [vmem:[%s8525_s17 + $0x2090] sm:$0xff]  ;;  %v1474_v53 = vld [vmem:[%s8525_s17 + $0x20e8] sm:$0xff] }
 0x2a1   : > { %v1467_v51 = vld [vmem:[%s8525_s17 + $0x20b0] sm:$0xff]  ;;  %v1496_v26 = vld [vmem:[%s8525_s17 + $0x2198] sm:$0xff] }
 0x2a2   : > { %6093 = vmatpush1.bf16.msra.mxu0 %v6092_v62  ;;  %v1433_v62 = vld [vmem:[%s8525_s17 + $0x1fa0] sm:$0xff]  ;;  %v1500_v27 = vld [vmem:[%s8525_s17 + $0x21b8] sm:$0xff] }
 0x2a3   : > { %7181 = vmatpush1.bf16.msra.mxu1 %v7180_v63  ;;  %6095 = vmatprep.subr.bf16.mxu0 %v6094_v0  ;;  %v1431_v63 = vld [vmem:[%s8525_s17 + $0x1f90] sm:$0xff]  ;;  %v7202_v0 = vpack.c.bf16 %v1436_v57, %v1432_v56  ;;  %v6116_v6 = vpack.c.bf16 %v1433_v62, %v1429_v61  ;;  %v7220_v57 = vpack.c.bf16 %v1467_v51, %v1463_v49  ;;  %v1514_v49 = vld [vmem:[%s8525_s17 + $0x2228] sm:$0xff]  ;;  %v1516_v51 = vld [vmem:[%s8525_s17 + $0x2238] sm:$0xff] }
 0x2a4   : > { %7183 = vmatprep.subr.bf16.mxu1 %v7182_v4  ;;  %v1440_v4 = vld [vmem:[%s8525_s17 + $0x1fd8] sm:$0xff]  ;;  %v7204_v7 = vpack.c.bf16 %v1435_v1, %v1431_v63  ;;  %v1471_v61 = vld [vmem:[%s8525_s17 + $0x20d0] sm:$0xff]  ;;  %v7222_v62 = vpack.c.bf16 %v1476_v55, %v1472_v54  ;;  %v1482_v1 = vld [vmem:[%s8525_s17 + $0x2128] sm:$0xff] }
 0x2a5   : > { %v1475_v63 = vld [vmem:[%s8525_s17 + $0x20f0] sm:$0xff]  ;;  %v1509_v55 = vld [vmem:[%s8525_s17 + $0x2200] sm:$0xff] }
 0x2a6   : > { %6097 = vmatpush1.bf16.msra.mxu0 %v6096_v10  ;;  %v1441_v10 = vld [vmem:[%s8525_s17 + $0x1fe0] sm:$0xff] }
 0x2a7   : > { %7185 = vmatpush1.bf16.msra.mxu1 %v7184_v11  ;;  %6099 = vmatprep.subr.bf16.mxu0 %v6098_v12  ;;  %v1439_v11 = vld [vmem:[%s8525_s17 + $0x1fd0] sm:$0xff]  ;;  %v7206_v12 = vpack.c.bf16 %v1444_v5, %v1440_v4  ;;  %v6120_v18 = vpack.c.bf16 %v1441_v10, %v1437_v9  ;;  %v7224_v5 = vpack.c.bf16 %v1475_v63, %v1471_v61  ;;  %v1522_v61 = vld [vmem:[%s8525_s17 + $0x2268] sm:$0xff]  ;;  %v1524_v63 = vld [vmem:[%s8525_s17 + $0x2278] sm:$0xff] }
 0x2a8   : > { %7187 = vmatprep.subr.bf16.mxu1 %v7186_v16  ;;  %v1448_v16 = vld [vmem:[%s8525_s17 + $0x2018] sm:$0xff]  ;;  %v7208_v19 = vpack.c.bf16 %v1443_v13, %v1439_v11  ;;  %v1479_v9 = vld [vmem:[%s8525_s17 + $0x2110] sm:$0xff]  ;;  %v7226_v10 = vpack.c.bf16 %v1484_v3, %v1480_v2  ;;  %v1490_v13 = vld [vmem:[%s8525_s17 + $0x2168] sm:$0xff] }
 0x2a9   : > { %v1483_v11 = vld [vmem:[%s8525_s17 + $0x2130] sm:$0xff]  ;;  %v1517_v3 = vld [vmem:[%s8525_s17 + $0x2240] sm:$0xff] }
 0x2aa   : > { %6101 = vmatpush1.bf16.msra.mxu0 %v6100_v22  ;;  %v1449_v22 = vld [vmem:[%s8525_s17 + $0x2020] sm:$0xff] }
 0x2ab   : > { %7189 = vmatpush1.bf16.msra.mxu1 %v7188_v23  ;;  %6103 = vmatprep.subr.bf16.mxu0 %v6102_v24  ;;  %v1447_v23 = vld [vmem:[%s8525_s17 + $0x2010] sm:$0xff]  ;;  %v7210_v24 = vpack.c.bf16 %v1452_v17, %v1448_v16  ;;  %v6124_v31 = vpack.c.bf16 %v1449_v22, %v1445_v21  ;;  %v7228_v17 = vpack.c.bf16 %v1483_v11, %v1479_v9  ;;  %v1530_v9 = vld [vmem:[%s8525_s17 + $0x22a8] sm:$0xff]  ;;  %v1532_v11 = vld [vmem:[%s8525_s17 + $0x22b8] sm:$0xff] }
 0x2ac   : > { %7191 = vmatprep.subr.bf16.mxu1 %v7190_v28  ;;  %v1456_v28 = vld [vmem:[%s8525_s17 + $0x2058] sm:$0xff]  ;;  %v7212_v32 = vpack.c.bf16 %v1451_v25, %v1447_v23  ;;  %v1487_v21 = vld [vmem:[%s8525_s17 + $0x2150] sm:$0xff]  ;;  %v7230_v22 = vpack.c.bf16 %v1492_v15, %v1488_v14  ;;  %v1498_v25 = vld [vmem:[%s8525_s17 + $0x21a8] sm:$0xff] }
 0x2ad   : > { %v7214_v37 = vpack.c.bf16 %v1460_v29, %v1456_v28  ;;  %v1491_v23 = vld [vmem:[%s8525_s17 + $0x2170] sm:$0xff]  ;;  %v1525_v15 = vld [vmem:[%s8525_s17 + $0x2280] sm:$0xff] }
 0x2ae   : > { %6105 = vmatpush1.bf16.msra.mxu0 %v6104_v34  ;;  %v1453_v34 = vld [vmem:[%s8525_s17 + $0x2040] sm:$0xff]  ;;  %v7232_v29 = vpack.c.bf16 %v1491_v23, %v1487_v21  ;;  %v1538_v21 = vld [vmem:[%s8525_s17 + $0x22e8] sm:$0xff]  ;;  %v1540_v23 = vld [vmem:[%s8525_s17 + $0x22f8] sm:$0xff] }
 0x2af   : > { %7193 = vmatpush1.bf16.msra.mxu1 %v7192_v35  ;;  %6107 = vmatprep.subr.bf16.mxu0 %v6106_v36  ;;  %v1457_v35 = vld [vmem:[%s8525_s17 + $0x2060] sm:$0xff]  ;;  %v1455_v36 = vld [vmem:[%s8525_s17 + $0x2050] sm:$0xff] }
 0x2b0   : > { %7195 = vmatprep.subr.bf16.mxu1 %v7194_v40  ;;  %v1466_v40 = vld [vmem:[%s8525_s17 + $0x20a8] sm:$0xff]  ;;  %v6128_v44 = vpack.c.bf16 %v1457_v35, %v1453_v34  ;;  %v7216_v45 = vpack.c.bf16 %v1459_v38, %v1455_v36  ;;  %v7234_v34 = vpack.c.bf16 %v1500_v27, %v1496_v26  ;;  %v1499_v35 = vld [vmem:[%s8525_s17 + $0x21b0] sm:$0xff]  ;;  %v1504_v38 = vld [vmem:[%s8525_s17 + $0x21d8] sm:$0xff] }
 0x2b1   : > { %v1502_v36 = vld [vmem:[%s8525_s17 + $0x21c8] sm:$0xff]  ;;  %v1533_v27 = vld [vmem:[%s8525_s17 + $0x22c0] sm:$0xff] }
 0x2b2   : > { %6109 = vmatpush1.bf16.msra.mxu0 %v6108_v46  ;;  %v6130_v46 = vpack.c.bf16 %v1466_v40, %v1462_v39  ;;  %v1508_v39 = vld [vmem:[%s8525_s17 + $0x21f8] sm:$0xff] }
 0x2b3   : > { %7197 = vmatpush1.bf16.msra.mxu1 %v7196_v47  ;;  %6111 = vmatprep.subr.bf16.mxu0 %v6110_v48  ;;  %v1461_v47 = vld [vmem:[%s8525_s17 + $0x2080] sm:$0xff] }
 0x2b4   : > { %7199 = vmatprep.subr.bf16.mxu1 %v7198_v52  ;;  %v1465_v48 = vld [vmem:[%s8525_s17 + $0x20a0] sm:$0xff]  ;;  %v1470_v52 = vld [vmem:[%s8525_s17 + $0x20c8] sm:$0xff] }
 0x2b5   : > { %v6132_v56 = vpack.c.bf16 %v1465_v48, %v1461_v47  ;;  %v1507_v47 = vld [vmem:[%s8525_s17 + $0x21f0] sm:$0xff]  ;;  %v1510_v48 = vld [vmem:[%s8525_s17 + $0x2208] sm:$0xff] }
 0x2b6   : > { %6113 = vmatpush1.bf16.msra.mxu0 %v6112_v58  ;;  %v6134_v58 = vpack.c.bf16 %v1474_v53, %v1470_v52  ;;  %v6154_v54 = vpack.c.bf16 %v1514_v49, %v1510_v48 }
 0x2b7   : > { %7201 = vmatpush1.bf16.msra.mxu1 %v7200_v59  ;;  %6115 = vmatprep.subr.bf16.mxu0 %v6114_v60  ;;  %v1469_v59 = vld [vmem:[%s8525_s17 + $0x20c0] sm:$0xff] }
 0x2b8   : > { %7203 = vmatprep.subr.bf16.mxu1 %v7202_v0  ;;  %v1473_v60 = vld [vmem:[%s8525_s17 + $0x20e0] sm:$0xff]  ;;  %v1478_v0 = vld [vmem:[%s8525_s17 + $0x2108] sm:$0xff] }
 0x2b9   : > { %v6136_v4 = vpack.c.bf16 %v1473_v60, %v1469_v59  ;;  %v1515_v59 = vld [vmem:[%s8525_s17 + $0x2230] sm:$0xff]  ;;  %v1518_v60 = vld [vmem:[%s8525_s17 + $0x2248] sm:$0xff] }
 0x2ba   : > { %6117 = vmatpush1.bf16.msra.mxu0 %v6116_v6  ;;  %v6138_v6 = vpack.c.bf16 %v1482_v1, %v1478_v0  ;;  %v6158_v2 = vpack.c.bf16 %v1522_v61, %v1518_v60 }
 0x2bb   : > { %7205 = vmatpush1.bf16.msra.mxu1 %v7204_v7  ;;  %6119 = vmatprep.subr.bf16.mxu0 %v6118_v8  ;;  %v1477_v7 = vld [vmem:[%s8525_s17 + $0x2100] sm:$0xff] }
 0x2bc   : > { %7207 = vmatprep.subr.bf16.mxu1 %v7206_v12  ;;  %v1481_v8 = vld [vmem:[%s8525_s17 + $0x2120] sm:$0xff]  ;;  %v1486_v12 = vld [vmem:[%s8525_s17 + $0x2148] sm:$0xff] }
 0x2bd   : > { %v6140_v16 = vpack.c.bf16 %v1481_v8, %v1477_v7  ;;  %v1523_v7 = vld [vmem:[%s8525_s17 + $0x2270] sm:$0xff]  ;;  %v1526_v8 = vld [vmem:[%s8525_s17 + $0x2288] sm:$0xff] }
 0x2be   : > { %6121 = vmatpush1.bf16.msra.mxu0 %v6120_v18  ;;  %v6142_v18 = vpack.c.bf16 %v1490_v13, %v1486_v12  ;;  %v6162_v14 = vpack.c.bf16 %v1530_v9, %v1526_v8 }
 0x2bf   : > { %7209 = vmatpush1.bf16.msra.mxu1 %v7208_v19  ;;  %6123 = vmatprep.subr.bf16.mxu0 %v6122_v20  ;;  %v1485_v19 = vld [vmem:[%s8525_s17 + $0x2140] sm:$0xff] }
 0x2c0   : > { %7211 = vmatprep.subr.bf16.mxu1 %v7210_v24  ;;  %v1489_v20 = vld [vmem:[%s8525_s17 + $0x2160] sm:$0xff]  ;;  %v1494_v24 = vld [vmem:[%s8525_s17 + $0x2188] sm:$0xff] }
 0x2c1   : > { %3159 = vmatmul.mubr.f32.vlgmr.msra.gmra.mrb[0].mxu0 %v401_v30  ;;  %v6144_v28 = vpack.c.bf16 %v1489_v20, %v1485_v19  ;;  %v1531_v19 = vld [vmem:[%s8525_s17 + $0x22b0] sm:$0xff]  ;;  %v1534_v20 = vld [vmem:[%s8525_s17 + $0x22c8] sm:$0xff] }
 0x2c2   : > { %6125 = vmatpush1.bf16.msra.mxu0 %v6124_v31  ;;  %4366 = vmatmul.mubr.f32.vlgmr.msra.gmra.mrb[0].mxu1 %v401_v30  ;;  %v6146_v30 = vpack.c.bf16 %v1498_v25, %v1494_v24  ;;  %v1493_v31 = vld [vmem:[%s8525_s17 + $0x2180] sm:$0xff]  ;;  %v6166_v26 = vpack.c.bf16 %v1538_v21, %v1534_v20 }
 0x2c3   : > { %7213 = vmatpush1.bf16.msra.mxu1 %v7212_v32  ;;  %6127 = vmatprep.subr.bf16.mxu0 %v6126_v33  ;;  %v1497_v32 = vld [vmem:[%s8525_s17 + $0x21a0] sm:$0xff]  ;;  %v1495_v33 = vld [vmem:[%s8525_s17 + $0x2190] sm:$0xff] }
 0x2c4   : > { %7215 = vmatprep.subr.bf16.mxu1 %v7214_v37  ;;  %3229 = vmatprep.mubr.f32.mxu0 %v404_v43  ;;  %v1506_v37 = vld [vmem:[%s8525_s17 + $0x21e8] sm:$0xff]  ;;  %v6148_v40 = vpack.c.bf16 %v1497_v32, %v1493_v31  ;;  %v7236_v41 = vpack.c.bf16 %v1499_v35, %v1495_v33  ;;  %v1539_v31 = vld [vmem:[%s8525_s17 + $0x22f0] sm:$0xff]  ;;  %v1548_v35 = vld [vmem:[%s8525_s17 + $0x2338] sm:$0xff] }
 0x2c5   : > { %4436 = vmatprep.mubr.f32.mxu1 %v404_v43  ;;  %v6150_v42 = vpack.c.bf16 %v1506_v37, %v1502_v36  ;;  %v1501_v43 = vld [vmem:[%s8525_s17 + $0x21c0] sm:$0xff]  ;;  %v1542_v32 = vld [vmem:[%s8525_s17 + $0x2308] sm:$0xff] }
 0x2c6   : > { %6129 = vmatpush1.bf16.msra.mxu0 %v6128_v44  ;;  %v1505_v44 = vld [vmem:[%s8525_s17 + $0x21e0] sm:$0xff]  ;;  %v1546_v33 = vld [vmem:[%s8525_s17 + $0x2328] sm:$0xff] }
 0x2c7   : > { %7217 = vmatpush1.bf16.msra.mxu1 %v7216_v45  ;;  %6131 = vmatprep.subr.bf16.mxu0 %v6130_v46  ;;  %v1503_v45 = vld [vmem:[%s8525_s17 + $0x21d0] sm:$0xff]  ;;  %v7238_v46 = vpack.c.bf16 %v1508_v39, %v1504_v38  ;;  %v6152_v52 = vpack.c.bf16 %v1505_v44, %v1501_v43  ;;  %v6170_v38 = vpack.c.bf16 %v1546_v33, %v1542_v32  ;;  %v1541_v39 = vld [vmem:[%s8525_s17 + $0x2300] sm:$0xff]  ;;  %v1550_v44 = vld [vmem:[%s8525_s17 + $0x2348] sm:$0xff] }
 0x2c8   : > { %7219 = vmatprep.subr.bf16.mxu1 %v7218_v50  ;;  %v1512_v50 = vld [vmem:[%s8525_s17 + $0x2218] sm:$0xff]  ;;  %v7240_v53 = vpack.c.bf16 %v1507_v47, %v1503_v45  ;;  %v1547_v43 = vld [vmem:[%s8525_s17 + $0x2330] sm:$0xff]  ;;  %v1554_v45 = vld [vmem:[%s8525_s17 + $0x2368] sm:$0xff] }
 0x2c9   : > { %v1556_v47 = vld [vmem:[%s8525_s17 + $0x2378] sm:$0xff]  ;;  %v403_v32 = vld [vmem:[%s8547_s14 + $0x80] sm:$0xff] }
 0x2ca   : > { %6133 = vmatpush1.bf16.msra.mxu0 %v6132_v56  ;;  %v1513_v56 = vld [vmem:[%s8525_s17 + $0x2220] sm:$0xff] }
 0x2cb   : > { %7221 = vmatpush1.bf16.msra.mxu1 %v7220_v57  ;;  %6135 = vmatprep.subr.bf16.mxu0 %v6134_v58  ;;  %v1511_v57 = vld [vmem:[%s8525_s17 + $0x2210] sm:$0xff]  ;;  %v7242_v58 = vpack.c.bf16 %v1516_v51, %v1512_v50  ;;  %v6156_v0 = vpack.c.bf16 %v1513_v56, %v1509_v55  ;;  %v6174_v50 = vpack.c.bf16 %v1554_v45, %v1550_v44  ;;  %v1549_v51 = vld [vmem:[%s8525_s17 + $0x2340] sm:$0xff]  ;;  %v1558_v56 = vld [vmem:[%s8525_s17 + $0x2388] sm:$0xff] }
 0x2cc   : > { %7223 = vmatprep.subr.bf16.mxu1 %v7222_v62  ;;  %v1520_v62 = vld [vmem:[%s8525_s17 + $0x2258] sm:$0xff]  ;;  %v7244_v1 = vpack.c.bf16 %v1515_v59, %v1511_v57  ;;  %v1555_v55 = vld [vmem:[%s8525_s17 + $0x2370] sm:$0xff]  ;;  %v1562_v57 = vld [vmem:[%s8525_s17 + $0x23a8] sm:$0xff] }
 0x2cd   : > { %v1564_v59 = vld [vmem:[%s8525_s17 + $0x23b8] sm:$0xff] }
 0x2ce   : > { %6137 = vmatpush1.bf16.msra.mxu0 %v6136_v4  ;;  %v1521_v4 = vld [vmem:[%s8525_s17 + $0x2260] sm:$0xff]  ;;  %v1596_v44 = vld [vmem:[%s8525_s17 + $0x24b8] sm:$0xff] }
 0x2cf   : > { %7225 = vmatpush1.bf16.msra.mxu1 %v7224_v5  ;;  %6139 = vmatprep.subr.bf16.mxu0 %v6138_v6  ;;  %v1519_v5 = vld [vmem:[%s8525_s17 + $0x2250] sm:$0xff]  ;;  %v7246_v6 = vpack.c.bf16 %v1524_v63, %v1520_v62  ;;  %v6160_v12 = vpack.c.bf16 %v1521_v4, %v1517_v3  ;;  %v6178_v62 = vpack.c.bf16 %v1562_v57, %v1558_v56  ;;  %v1557_v63 = vld [vmem:[%s8525_s17 + $0x2380] sm:$0xff]  ;;  %v1566_v4 = vld [vmem:[%s8525_s17 + $0x23c8] sm:$0xff] }
 0x2d0   : > { %7227 = vmatprep.subr.bf16.mxu1 %v7226_v10  ;;  %v1528_v10 = vld [vmem:[%s8525_s17 + $0x2298] sm:$0xff]  ;;  %v7248_v13 = vpack.c.bf16 %v1523_v7, %v1519_v5  ;;  %v1563_v3 = vld [vmem:[%s8525_s17 + $0x23b0] sm:$0xff]  ;;  %v1570_v5 = vld [vmem:[%s8525_s17 + $0x23e8] sm:$0xff] }
 0x2d1   : > { %v1572_v7 = vld [vmem:[%s8525_s17 + $0x23f8] sm:$0xff] }
 0x2d2   : > { %6141 = vmatpush1.bf16.msra.mxu0 %v6140_v16  ;;  %v1529_v16 = vld [vmem:[%s8525_s17 + $0x22a0] sm:$0xff]  ;;  %v406_v45 = vld [vmem:[%s8547_s14 + $0x98] sm:$0xff] }
 0x2d3   : > { %7229 = vmatpush1.bf16.msra.mxu1 %v7228_v17  ;;  %6143 = vmatprep.subr.bf16.mxu0 %v6142_v18  ;;  %v1527_v17 = vld [vmem:[%s8525_s17 + $0x2290] sm:$0xff]  ;;  %v7250_v18 = vpack.c.bf16 %v1532_v11, %v1528_v10  ;;  %v6164_v24 = vpack.c.bf16 %v1529_v16, %v1525_v15  ;;  %v6182_v10 = vpack.c.bf16 %v1570_v5, %v1566_v4  ;;  %v1565_v11 = vld [vmem:[%s8525_s17 + $0x23c0] sm:$0xff]  ;;  %v1574_v16 = vld [vmem:[%s8525_s17 + $0x2408] sm:$0xff] }
 0x2d4   : > { %7231 = vmatprep.subr.bf16.mxu1 %v7230_v22  ;;  %v1536_v22 = vld [vmem:[%s8525_s17 + $0x22d8] sm:$0xff]  ;;  %v7252_v25 = vpack.c.bf16 %v1531_v19, %v1527_v17  ;;  %v1571_v15 = vld [vmem:[%s8525_s17 + $0x23f0] sm:$0xff]  ;;  %v1578_v17 = vld [vmem:[%s8525_s17 + $0x2428] sm:$0xff] }
 0x2d5   : > { %v1580_v19 = vld [vmem:[%s8525_s17 + $0x2438] sm:$0xff] }
 0x2d6   : > { %6145 = vmatpush1.bf16.msra.mxu0 %v6144_v28  ;;  %v1537_v28 = vld [vmem:[%s8525_s17 + $0x22e0] sm:$0xff]  ;;  %v1600_v56 = vld [vmem:[%s8525_s17 + $0x24d8] sm:$0xff] }
 0x2d7   : > { %7233 = vmatpush1.bf16.msra.mxu1 %v7232_v29  ;;  %6147 = vmatprep.subr.bf16.mxu0 %v6146_v30  ;;  %v1535_v29 = vld [vmem:[%s8525_s17 + $0x22d0] sm:$0xff]  ;;  %v7254_v30 = vpack.c.bf16 %v1540_v23, %v1536_v22  ;;  %v6168_v36 = vpack.c.bf16 %v1537_v28, %v1533_v27  ;;  %v6186_v22 = vpack.c.bf16 %v1578_v17, %v1574_v16  ;;  %v1573_v23 = vld [vmem:[%s8525_s17 + $0x2400] sm:$0xff]  ;;  %v1582_v28 = vld [vmem:[%s8525_s17 + $0x2448] sm:$0xff] }
 0x2d8   : > { %7235 = vmatprep.subr.bf16.mxu1 %v7234_v34  ;;  %v1544_v34 = vld [vmem:[%s8525_s17 + $0x2318] sm:$0xff]  ;;  %v7256_v37 = vpack.c.bf16 %v1539_v31, %v1535_v29  ;;  %v1579_v27 = vld [vmem:[%s8525_s17 + $0x2430] sm:$0xff]  ;;  %v1586_v29 = vld [vmem:[%s8525_s17 + $0x2468] sm:$0xff] }
 0x2d9   : > { %v1588_v31 = vld [vmem:[%s8525_s17 + $0x2478] sm:$0xff] }
 0x2da   : > { %6149 = vmatpush1.bf16.msra.mxu0 %v6148_v40  ;;  %v1545_v40 = vld [vmem:[%s8525_s17 + $0x2320] sm:$0xff]  ;;  %v1604_v57 = vld [vmem:[%s8525_s17 + $0x24f8] sm:$0xff] }
 0x2db   : > { %7237 = vmatpush1.bf16.msra.mxu1 %v7236_v41  ;;  %6151 = vmatprep.subr.bf16.mxu0 %v6150_v42  ;;  %v1543_v41 = vld [vmem:[%s8525_s17 + $0x2310] sm:$0xff]  ;;  %v7258_v42 = vpack.c.bf16 %v1548_v35, %v1544_v34  ;;  %v6172_v48 = vpack.c.bf16 %v1545_v40, %v1541_v39  ;;  %v6190_v35 = vpack.c.bf16 %v1586_v29, %v1582_v28  ;;  %v1608_v4 = vld [vmem:[%s8525_s17 + $0x2518] sm:$0xff] }
 0x2dc   : > { %7239 = vmatprep.subr.bf16.mxu1 %v7238_v46  ;;  %v1552_v46 = vld [vmem:[%s8525_s17 + $0x2358] sm:$0xff]  ;;  %v7260_v49 = vpack.c.bf16 %v1547_v43, %v1543_v41  ;;  %v1587_v40 = vld [vmem:[%s8525_s17 + $0x2470] sm:$0xff]  ;;  %v1590_v41 = vld [vmem:[%s8525_s17 + $0x2488] sm:$0xff] }
 0x2dd   : > { %v1592_v43 = vld [vmem:[%s8525_s17 + $0x2498] sm:$0xff] }
 0x2de   : > { %6153 = vmatpush1.bf16.msra.mxu0 %v6152_v52  ;;  %v1553_v52 = vld [vmem:[%s8525_s17 + $0x2360] sm:$0xff]  ;;  %v1612_v5 = vld [vmem:[%s8525_s17 + $0x2538] sm:$0xff] }
 0x2df   : > { %7241 = vmatpush1.bf16.msra.mxu1 %v7240_v53  ;;  %6155 = vmatprep.subr.bf16.mxu0 %v6154_v54  ;;  %v1551_v53 = vld [vmem:[%s8525_s17 + $0x2350] sm:$0xff]  ;;  %v7262_v54 = vpack.c.bf16 %v1556_v47, %v1552_v46  ;;  %v6176_v60 = vpack.c.bf16 %v1553_v52, %v1549_v51  ;;  %v7282_v52 = vpack.c.bf16 %v1596_v44, %v1592_v43  ;;  %v1616_v16 = vld [vmem:[%s8525_s17 + $0x2558] sm:$0xff] }
 0x2e0   : > { %7243 = vmatprep.subr.bf16.mxu1 %v7242_v58  ;;  %v1560_v58 = vld [vmem:[%s8525_s17 + $0x2398] sm:$0xff]  ;;  %v7264_v61 = vpack.c.bf16 %v1555_v55, %v1551_v53  ;;  %v1591_v51 = vld [vmem:[%s8525_s17 + $0x2490] sm:$0xff]  ;;  %v1602_v55 = vld [vmem:[%s8525_s17 + $0x24e8] sm:$0xff] }
 0x2e1   : > { %v1595_v53 = vld [vmem:[%s8525_s17 + $0x24b0] sm:$0xff]  ;;  %v1620_v17 = vld [vmem:[%s8525_s17 + $0x2578] sm:$0xff] }
 0x2e2   : > { %6157 = vmatpush1.bf16.msra.mxu0 %v6156_v0  ;;  %v1561_v0 = vld [vmem:[%s8525_s17 + $0x23a0] sm:$0xff]  ;;  %v1624_v28 = vld [vmem:[%s8525_s17 + $0x2598] sm:$0xff] }
 0x2e3   : > { %7245 = vmatpush1.bf16.msra.mxu1 %v7244_v1  ;;  %6159 = vmatprep.subr.bf16.mxu0 %v6158_v2  ;;  %v1559_v1 = vld [vmem:[%s8525_s17 + $0x2390] sm:$0xff]  ;;  %v7266_v2 = vpack.c.bf16 %v1564_v59, %v1560_v58  ;;  %v6180_v8 = vpack.c.bf16 %v1561_v0, %v1557_v63  ;;  %v7284_v59 = vpack.c.bf16 %v1595_v53, %v1591_v51  ;;  %v1628_v29 = vld [vmem:[%s8525_s17 + $0x25b8] sm:$0xff]  ;;  %v1642_v51 = vld [vmem:[%s8525_s17 + $0x2628] sm:$0xff] }
 0x2e4   : > { %7247 = vmatprep.subr.bf16.mxu1 %v7246_v6  ;;  %v1568_v6 = vld [vmem:[%s8525_s17 + $0x23d8] sm:$0xff]  ;;  %v7268_v9 = vpack.c.bf16 %v1563_v3, %v1559_v1  ;;  %v1599_v63 = vld [vmem:[%s8525_s17 + $0x24d0] sm:$0xff]  ;;  %v7286_v0 = vpack.c.bf16 %v1604_v57, %v1600_v56  ;;  %v1610_v3 = vld [vmem:[%s8525_s17 + $0x2528] sm:$0xff] }
 0x2e5   : > { %v1603_v1 = vld [vmem:[%s8525_s17 + $0x24f0] sm:$0xff]  ;;  %v1644_v53 = vld [vmem:[%s8525_s17 + $0x2638] sm:$0xff]  ;;  %v1637_v57 = vld [vmem:[%s8525_s17 + $0x2600] sm:$0xff] }
 0x2e6   : > { %6161 = vmatpush1.bf16.msra.mxu0 %v6160_v12  ;;  %v1569_v12 = vld [vmem:[%s8525_s17 + $0x23e0] sm:$0xff] }
 0x2e7   : > { %7249 = vmatpush1.bf16.msra.mxu1 %v7248_v13  ;;  %6163 = vmatprep.subr.bf16.mxu0 %v6162_v14  ;;  %v1567_v13 = vld [vmem:[%s8525_s17 + $0x23d0] sm:$0xff]  ;;  %v7270_v14 = vpack.c.bf16 %v1572_v7, %v1568_v6  ;;  %v6184_v20 = vpack.c.bf16 %v1569_v12, %v1565_v11  ;;  %v7288_v7 = vpack.c.bf16 %v1603_v1, %v1599_v63  ;;  %v1650_v63 = vld [vmem:[%s8525_s17 + $0x2668] sm:$0xff]  ;;  %v1652_v1 = vld [vmem:[%s8525_s17 + $0x2678] sm:$0xff] }
 0x2e8   : > { %7251 = vmatprep.subr.bf16.mxu1 %v7250_v18  ;;  %v1576_v18 = vld [vmem:[%s8525_s17 + $0x2418] sm:$0xff]  ;;  %v7272_v21 = vpack.c.bf16 %v1571_v15, %v1567_v13  ;;  %v1607_v11 = vld [vmem:[%s8525_s17 + $0x2510] sm:$0xff]  ;;  %v7290_v12 = vpack.c.bf16 %v1612_v5, %v1608_v4  ;;  %v1618_v15 = vld [vmem:[%s8525_s17 + $0x2568] sm:$0xff] }
 0x2e9   : > { %v1611_v13 = vld [vmem:[%s8525_s17 + $0x2530] sm:$0xff]  ;;  %v1645_v5 = vld [vmem:[%s8525_s17 + $0x2640] sm:$0xff] }
 0x2ea   : > { %6165 = vmatpush1.bf16.msra.mxu0 %v6164_v24  ;;  %v1577_v24 = vld [vmem:[%s8525_s17 + $0x2420] sm:$0xff] }
 0x2eb   : > { %7253 = vmatpush1.bf16.msra.mxu1 %v7252_v25  ;;  %6167 = vmatprep.subr.bf16.mxu0 %v6166_v26  ;;  %v1575_v25 = vld [vmem:[%s8525_s17 + $0x2410] sm:$0xff]  ;;  %v7274_v26 = vpack.c.bf16 %v1580_v19, %v1576_v18  ;;  %v6188_v33 = vpack.c.bf16 %v1577_v24, %v1573_v23  ;;  %v7292_v19 = vpack.c.bf16 %v1611_v13, %v1607_v11  ;;  %v1658_v11 = vld [vmem:[%s8525_s17 + $0x26a8] sm:$0xff]  ;;  %v1660_v13 = vld [vmem:[%s8525_s17 + $0x26b8] sm:$0xff] }
 0x2ec   : > { %7255 = vmatprep.subr.bf16.mxu1 %v7254_v30  ;;  %v1584_v30 = vld [vmem:[%s8525_s17 + $0x2458] sm:$0xff]  ;;  %v7276_v34 = vpack.c.bf16 %v1579_v27, %v1575_v25  ;;  %v1615_v23 = vld [vmem:[%s8525_s17 + $0x2550] sm:$0xff]  ;;  %v7294_v24 = vpack.c.bf16 %v1620_v17, %v1616_v16  ;;  %v1626_v27 = vld [vmem:[%s8525_s17 + $0x25a8] sm:$0xff] }
 0x2ed   : > { %v7278_v39 = vpack.c.bf16 %v1588_v31, %v1584_v30  ;;  %v1619_v25 = vld [vmem:[%s8525_s17 + $0x2570] sm:$0xff]  ;;  %v1653_v17 = vld [vmem:[%s8525_s17 + $0x2680] sm:$0xff] }
 0x2ee   : > { %6169 = vmatpush1.bf16.msra.mxu0 %v6168_v36  ;;  %v1581_v36 = vld [vmem:[%s8525_s17 + $0x2440] sm:$0xff]  ;;  %v7296_v31 = vpack.c.bf16 %v1619_v25, %v1615_v23  ;;  %v1666_v23 = vld [vmem:[%s8525_s17 + $0x26e8] sm:$0xff]  ;;  %v1668_v25 = vld [vmem:[%s8525_s17 + $0x26f8] sm:$0xff] }
 0x2ef   : > { %7257 = vmatpush1.bf16.msra.mxu1 %v7256_v37  ;;  %6171 = vmatprep.subr.bf16.mxu0 %v6170_v38  ;;  %v1585_v37 = vld [vmem:[%s8525_s17 + $0x2460] sm:$0xff]  ;;  %v1583_v38 = vld [vmem:[%s8525_s17 + $0x2450] sm:$0xff] }
 0x2f0   : > { %7259 = vmatprep.subr.bf16.mxu1 %v7258_v42  ;;  %v1594_v42 = vld [vmem:[%s8525_s17 + $0x24a8] sm:$0xff]  ;;  %v6192_v46 = vpack.c.bf16 %v1585_v37, %v1581_v36  ;;  %v7280_v47 = vpack.c.bf16 %v1587_v40, %v1583_v38  ;;  %v7298_v36 = vpack.c.bf16 %v1628_v29, %v1624_v28  ;;  %v1627_v37 = vld [vmem:[%s8525_s17 + $0x25b0] sm:$0xff]  ;;  %v1632_v40 = vld [vmem:[%s8525_s17 + $0x25d8] sm:$0xff] }
 0x2f1   : > { %v1630_v38 = vld [vmem:[%s8525_s17 + $0x25c8] sm:$0xff]  ;;  %v1661_v29 = vld [vmem:[%s8525_s17 + $0x26c0] sm:$0xff] }
 0x2f2   : > { %6173 = vmatpush1.bf16.msra.mxu0 %v6172_v48  ;;  %v6194_v48 = vpack.c.bf16 %v1594_v42, %v1590_v41  ;;  %v1636_v41 = vld [vmem:[%s8525_s17 + $0x25f8] sm:$0xff] }
 0x2f3   : > { %7261 = vmatpush1.bf16.msra.mxu1 %v7260_v49  ;;  %6175 = vmatprep.subr.bf16.mxu0 %v6174_v50  ;;  %v1589_v49 = vld [vmem:[%s8525_s17 + $0x2480] sm:$0xff] }
 0x2f4   : > { %7263 = vmatprep.subr.bf16.mxu1 %v7262_v54  ;;  %v1593_v50 = vld [vmem:[%s8525_s17 + $0x24a0] sm:$0xff]  ;;  %v1598_v54 = vld [vmem:[%s8525_s17 + $0x24c8] sm:$0xff] }
 0x2f5   : > { %v6196_v58 = vpack.c.bf16 %v1593_v50, %v1589_v49  ;;  %v1635_v49 = vld [vmem:[%s8525_s17 + $0x25f0] sm:$0xff]  ;;  %v1638_v50 = vld [vmem:[%s8525_s17 + $0x2608] sm:$0xff] }
 0x2f6   : > { %6177 = vmatpush1.bf16.msra.mxu0 %v6176_v60  ;;  %v6198_v60 = vpack.c.bf16 %v1602_v55, %v1598_v54  ;;  %v6218_v56 = vpack.c.bf16 %v1642_v51, %v1638_v50 }
 0x2f7   : > { %7265 = vmatpush1.bf16.msra.mxu1 %v7264_v61  ;;  %6179 = vmatprep.subr.bf16.mxu0 %v6178_v62  ;;  %v1597_v61 = vld [vmem:[%s8525_s17 + $0x24c0] sm:$0xff] }
 0x2f8   : > { %7267 = vmatprep.subr.bf16.mxu1 %v7266_v2  ;;  %v1601_v62 = vld [vmem:[%s8525_s17 + $0x24e0] sm:$0xff]  ;;  %v1606_v2 = vld [vmem:[%s8525_s17 + $0x2508] sm:$0xff] }
 0x2f9   : > { %v6200_v6 = vpack.c.bf16 %v1601_v62, %v1597_v61  ;;  %v1643_v61 = vld [vmem:[%s8525_s17 + $0x2630] sm:$0xff]  ;;  %v1646_v62 = vld [vmem:[%s8525_s17 + $0x2648] sm:$0xff] }
 0x2fa   : > { %6181 = vmatpush1.bf16.msra.mxu0 %v6180_v8  ;;  %v6202_v8 = vpack.c.bf16 %v1610_v3, %v1606_v2  ;;  %v6222_v4 = vpack.c.bf16 %v1650_v63, %v1646_v62 }
 0x2fb   : > { %7269 = vmatpush1.bf16.msra.mxu1 %v7268_v9  ;;  %6183 = vmatprep.subr.bf16.mxu0 %v6182_v10  ;;  %v1605_v9 = vld [vmem:[%s8525_s17 + $0x2500] sm:$0xff] }
 0x2fc   : > { %7271 = vmatprep.subr.bf16.mxu1 %v7270_v14  ;;  %v1609_v10 = vld [vmem:[%s8525_s17 + $0x2520] sm:$0xff]  ;;  %v1614_v14 = vld [vmem:[%s8525_s17 + $0x2548] sm:$0xff] }
 0x2fd   : > { %v6204_v18 = vpack.c.bf16 %v1609_v10, %v1605_v9  ;;  %v1651_v9 = vld [vmem:[%s8525_s17 + $0x2670] sm:$0xff]  ;;  %v1654_v10 = vld [vmem:[%s8525_s17 + $0x2688] sm:$0xff] }
 0x2fe   : > { %6185 = vmatpush1.bf16.msra.mxu0 %v6184_v20  ;;  %v6206_v20 = vpack.c.bf16 %v1618_v15, %v1614_v14  ;;  %v6226_v16 = vpack.c.bf16 %v1658_v11, %v1654_v10 }
 0x2ff   : > { %7273 = vmatpush1.bf16.msra.mxu1 %v7272_v21  ;;  %6187 = vmatprep.subr.bf16.mxu0 %v6186_v22  ;;  %v1613_v21 = vld [vmem:[%s8525_s17 + $0x2540] sm:$0xff] }
 0x300   : > { %7275 = vmatprep.subr.bf16.mxu1 %v7274_v26  ;;  %v1617_v22 = vld [vmem:[%s8525_s17 + $0x2560] sm:$0xff]  ;;  %v1622_v26 = vld [vmem:[%s8525_s17 + $0x2588] sm:$0xff] }
 0x301   : > { %3230 = vmatmul.mubr.f32.vlgmr.msra.gmra.mrb[0].mxu0 %v403_v32  ;;  %v6208_v30 = vpack.c.bf16 %v1617_v22, %v1613_v21  ;;  %v1659_v21 = vld [vmem:[%s8525_s17 + $0x26b0] sm:$0xff]  ;;  %v1662_v22 = vld [vmem:[%s8525_s17 + $0x26c8] sm:$0xff] }
 0x302   : > { %6189 = vmatpush1.bf16.msra.mxu0 %v6188_v33  ;;  %4437 = vmatmul.mubr.f32.vlgmr.msra.gmra.mrb[0].mxu1 %v403_v32  ;;  %v6210_v32 = vpack.c.bf16 %v1626_v27, %v1622_v26  ;;  %v1621_v33 = vld [vmem:[%s8525_s17 + $0x2580] sm:$0xff]  ;;  %v6230_v28 = vpack.c.bf16 %v1666_v23, %v1662_v22 }
 0x303   : > { %7277 = vmatpush1.bf16.msra.mxu1 %v7276_v34  ;;  %6191 = vmatprep.subr.bf16.mxu0 %v6190_v35  ;;  %v1625_v34 = vld [vmem:[%s8525_s17 + $0x25a0] sm:$0xff]  ;;  %v1623_v35 = vld [vmem:[%s8525_s17 + $0x2590] sm:$0xff] }
 0x304   : > { %7279 = vmatprep.subr.bf16.mxu1 %v7278_v39  ;;  %3300 = vmatprep.mubr.f32.mxu0 %v406_v45  ;;  %v1634_v39 = vld [vmem:[%s8525_s17 + $0x25e8] sm:$0xff]  ;;  %v6212_v42 = vpack.c.bf16 %v1625_v34, %v1621_v33  ;;  %v7300_v43 = vpack.c.bf16 %v1627_v37, %v1623_v35  ;;  %v1667_v33 = vld [vmem:[%s8525_s17 + $0x26f0] sm:$0xff]  ;;  %v1676_v37 = vld [vmem:[%s8525_s17 + $0x2738] sm:$0xff] }
 0x305   : > { %4507 = vmatprep.mubr.f32.mxu1 %v406_v45  ;;  %v6214_v44 = vpack.c.bf16 %v1634_v39, %v1630_v38  ;;  %v1629_v45 = vld [vmem:[%s8525_s17 + $0x25c0] sm:$0xff]  ;;  %v1670_v34 = vld [vmem:[%s8525_s17 + $0x2708] sm:$0xff] }
 0x306   : > { %6193 = vmatpush1.bf16.msra.mxu0 %v6192_v46  ;;  %v1633_v46 = vld [vmem:[%s8525_s17 + $0x25e0] sm:$0xff]  ;;  %v1674_v35 = vld [vmem:[%s8525_s17 + $0x2728] sm:$0xff] }
 0x307   : > { %7281 = vmatpush1.bf16.msra.mxu1 %v7280_v47  ;;  %6195 = vmatprep.subr.bf16.mxu0 %v6194_v48  ;;  %v1631_v47 = vld [vmem:[%s8525_s17 + $0x25d0] sm:$0xff]  ;;  %v7302_v48 = vpack.c.bf16 %v1636_v41, %v1632_v40  ;;  %v6216_v54 = vpack.c.bf16 %v1633_v46, %v1629_v45  ;;  %v6234_v40 = vpack.c.bf16 %v1674_v35, %v1670_v34  ;;  %v1669_v41 = vld [vmem:[%s8525_s17 + $0x2700] sm:$0xff]  ;;  %v1678_v46 = vld [vmem:[%s8525_s17 + $0x2748] sm:$0xff] }
 0x308   : > { %7283 = vmatprep.subr.bf16.mxu1 %v7282_v52  ;;  %v1640_v52 = vld [vmem:[%s8525_s17 + $0x2618] sm:$0xff]  ;;  %v7304_v55 = vpack.c.bf16 %v1635_v49, %v1631_v47  ;;  %v1675_v45 = vld [vmem:[%s8525_s17 + $0x2730] sm:$0xff]  ;;  %v1682_v47 = vld [vmem:[%s8525_s17 + $0x2768] sm:$0xff] }
 0x309   : > { %v1684_v49 = vld [vmem:[%s8525_s17 + $0x2778] sm:$0xff]  ;;  %v405_v34 = vld [vmem:[%s8547_s14 + $0x90] sm:$0xff] }
 0x30a   : > { %6197 = vmatpush1.bf16.msra.mxu0 %v6196_v58  ;;  %v1641_v58 = vld [vmem:[%s8525_s17 + $0x2620] sm:$0xff] }
 0x30b   : > { %7285 = vmatpush1.bf16.msra.mxu1 %v7284_v59  ;;  %6199 = vmatprep.subr.bf16.mxu0 %v6198_v60  ;;  %v1639_v59 = vld [vmem:[%s8525_s17 + $0x2610] sm:$0xff]  ;;  %v7306_v60 = vpack.c.bf16 %v1644_v53, %v1640_v52  ;;  %v6220_v2 = vpack.c.bf16 %v1641_v58, %v1637_v57  ;;  %v6238_v52 = vpack.c.bf16 %v1682_v47, %v1678_v46  ;;  %v1677_v53 = vld [vmem:[%s8525_s17 + $0x2740] sm:$0xff]  ;;  %v1686_v58 = vld [vmem:[%s8525_s17 + $0x2788] sm:$0xff] }
 0x30c   : > { %7287 = vmatprep.subr.bf16.mxu1 %v7286_v0  ;;  %v1648_v0 = vld [vmem:[%s8525_s17 + $0x2658] sm:$0xff]  ;;  %v7308_v3 = vpack.c.bf16 %v1643_v61, %v1639_v59  ;;  %v1683_v57 = vld [vmem:[%s8525_s17 + $0x2770] sm:$0xff]  ;;  %v1690_v59 = vld [vmem:[%s8525_s17 + $0x27a8] sm:$0xff] }
 0x30d   : > { %v1692_v61 = vld [vmem:[%s8525_s17 + $0x27b8] sm:$0xff]  ;;  %v408_v47 = vld [vmem:[%s8547_s14 + $0xa8] sm:$0xff] }
 0x30e   : > { %6201 = vmatpush1.bf16.msra.mxu0 %v6200_v6  ;;  %v1649_v6 = vld [vmem:[%s8525_s17 + $0x2660] sm:$0xff]  ;;  %v1724_v46 = vld [vmem:[%s8525_s17 + $0x28b8] sm:$0xff] }
 0x30f   : > { %7289 = vmatpush1.bf16.msra.mxu1 %v7288_v7  ;;  %6203 = vmatprep.subr.bf16.mxu0 %v6202_v8  ;;  %v1647_v7 = vld [vmem:[%s8525_s17 + $0x2650] sm:$0xff]  ;;  %v7310_v8 = vpack.c.bf16 %v1652_v1, %v1648_v0  ;;  %v6224_v14 = vpack.c.bf16 %v1649_v6, %v1645_v5  ;;  %v6242_v0 = vpack.c.bf16 %v1690_v59, %v1686_v58  ;;  %v1685_v1 = vld [vmem:[%s8525_s17 + $0x2780] sm:$0xff]  ;;  %v1694_v6 = vld [vmem:[%s8525_s17 + $0x27c8] sm:$0xff] }
 0x310   : > { %7291 = vmatprep.subr.bf16.mxu1 %v7290_v12  ;;  %v1656_v12 = vld [vmem:[%s8525_s17 + $0x2698] sm:$0xff]  ;;  %v7312_v15 = vpack.c.bf16 %v1651_v9, %v1647_v7  ;;  %v1691_v5 = vld [vmem:[%s8525_s17 + $0x27b0] sm:$0xff]  ;;  %v1698_v7 = vld [vmem:[%s8525_s17 + $0x27e8] sm:$0xff] }
 0x311   : > { %v1700_v9 = vld [vmem:[%s8525_s17 + $0x27f8] sm:$0xff] }
 0x312   : > { %6205 = vmatpush1.bf16.msra.mxu0 %v6204_v18  ;;  %v1657_v18 = vld [vmem:[%s8525_s17 + $0x26a0] sm:$0xff]  ;;  %v1728_v58 = vld [vmem:[%s8525_s17 + $0x28d8] sm:$0xff] }
 0x313   : > { %7293 = vmatpush1.bf16.msra.mxu1 %v7292_v19  ;;  %6207 = vmatprep.subr.bf16.mxu0 %v6206_v20  ;;  %v1655_v19 = vld [vmem:[%s8525_s17 + $0x2690] sm:$0xff]  ;;  %v7314_v20 = vpack.c.bf16 %v1660_v13, %v1656_v12  ;;  %v6228_v26 = vpack.c.bf16 %v1657_v18, %v1653_v17  ;;  %v6246_v12 = vpack.c.bf16 %v1698_v7, %v1694_v6  ;;  %v1693_v13 = vld [vmem:[%s8525_s17 + $0x27c0] sm:$0xff]  ;;  %v1702_v18 = vld [vmem:[%s8525_s17 + $0x2808] sm:$0xff] }
 0x314   : > { %7295 = vmatprep.subr.bf16.mxu1 %v7294_v24  ;;  %v1664_v24 = vld [vmem:[%s8525_s17 + $0x26d8] sm:$0xff]  ;;  %v7316_v27 = vpack.c.bf16 %v1659_v21, %v1655_v19  ;;  %v1699_v17 = vld [vmem:[%s8525_s17 + $0x27f0] sm:$0xff]  ;;  %v1706_v19 = vld [vmem:[%s8525_s17 + $0x2828] sm:$0xff] }
 0x315   : > { %v1708_v21 = vld [vmem:[%s8525_s17 + $0x2838] sm:$0xff] }
 0x316   : > { %6209 = vmatpush1.bf16.msra.mxu0 %v6208_v30  ;;  %v1665_v30 = vld [vmem:[%s8525_s17 + $0x26e0] sm:$0xff]  ;;  %v1732_v59 = vld [vmem:[%s8525_s17 + $0x28f8] sm:$0xff] }
 0x317   : > { %7297 = vmatpush1.bf16.msra.mxu1 %v7296_v31  ;;  %6211 = vmatprep.subr.bf16.mxu0 %v6210_v32  ;;  %v1663_v31 = vld [vmem:[%s8525_s17 + $0x26d0] sm:$0xff]  ;;  %v7318_v32 = vpack.c.bf16 %v1668_v25, %v1664_v24  ;;  %v6232_v38 = vpack.c.bf16 %v1665_v30, %v1661_v29  ;;  %v6250_v24 = vpack.c.bf16 %v1706_v19, %v1702_v18  ;;  %v1701_v25 = vld [vmem:[%s8525_s17 + $0x2800] sm:$0xff]  ;;  %v1710_v30 = vld [vmem:[%s8525_s17 + $0x2848] sm:$0xff] }
 0x318   : > { %7299 = vmatprep.subr.bf16.mxu1 %v7298_v36  ;;  %v1672_v36 = vld [vmem:[%s8525_s17 + $0x2718] sm:$0xff]  ;;  %v7320_v39 = vpack.c.bf16 %v1667_v33, %v1663_v31  ;;  %v1707_v29 = vld [vmem:[%s8525_s17 + $0x2830] sm:$0xff]  ;;  %v1714_v31 = vld [vmem:[%s8525_s17 + $0x2868] sm:$0xff] }
 0x319   : > { %v1716_v33 = vld [vmem:[%s8525_s17 + $0x2878] sm:$0xff] }
 0x31a   : > { %6213 = vmatpush1.bf16.msra.mxu0 %v6212_v42  ;;  %v1673_v42 = vld [vmem:[%s8525_s17 + $0x2720] sm:$0xff]  ;;  %v1736_v6 = vld [vmem:[%s8525_s17 + $0x2918] sm:$0xff] }
 0x31b   : > { %7301 = vmatpush1.bf16.msra.mxu1 %v7300_v43  ;;  %6215 = vmatprep.subr.bf16.mxu0 %v6214_v44  ;;  %v1671_v43 = vld [vmem:[%s8525_s17 + $0x2710] sm:$0xff]  ;;  %v7322_v44 = vpack.c.bf16 %v1676_v37, %v1672_v36  ;;  %v6236_v50 = vpack.c.bf16 %v1673_v42, %v1669_v41  ;;  %v6254_v37 = vpack.c.bf16 %v1714_v31, %v1710_v30  ;;  %v1740_v7 = vld [vmem:[%s8525_s17 + $0x2938] sm:$0xff] }
 0x31c   : > { %7303 = vmatprep.subr.bf16.mxu1 %v7302_v48  ;;  %v1680_v48 = vld [vmem:[%s8525_s17 + $0x2758] sm:$0xff]  ;;  %v7324_v51 = vpack.c.bf16 %v1675_v45, %v1671_v43  ;;  %v1715_v42 = vld [vmem:[%s8525_s17 + $0x2870] sm:$0xff]  ;;  %v1718_v43 = vld [vmem:[%s8525_s17 + $0x2888] sm:$0xff] }
 0x31d   : > { %v1720_v45 = vld [vmem:[%s8525_s17 + $0x2898] sm:$0xff] }
 0x31e   : > { %6217 = vmatpush1.bf16.msra.mxu0 %v6216_v54  ;;  %v1681_v54 = vld [vmem:[%s8525_s17 + $0x2760] sm:$0xff]  ;;  %v1744_v18 = vld [vmem:[%s8525_s17 + $0x2958] sm:$0xff] }
 0x31f   : > { %7305 = vmatpush1.bf16.msra.mxu1 %v7304_v55  ;;  %6219 = vmatprep.subr.bf16.mxu0 %v6218_v56  ;;  %v1679_v55 = vld [vmem:[%s8525_s17 + $0x2750] sm:$0xff]  ;;  %v7326_v56 = vpack.c.bf16 %v1684_v49, %v1680_v48  ;;  %v6240_v62 = vpack.c.bf16 %v1681_v54, %v1677_v53  ;;  %v7346_v54 = vpack.c.bf16 %v1724_v46, %v1720_v45  ;;  %v1748_v19 = vld [vmem:[%s8525_s17 + $0x2978] sm:$0xff] }
 0x320   : > { %7307 = vmatprep.subr.bf16.mxu1 %v7306_v60  ;;  %v1688_v60 = vld [vmem:[%s8525_s17 + $0x2798] sm:$0xff]  ;;  %v7328_v63 = vpack.c.bf16 %v1683_v57, %v1679_v55  ;;  %v1719_v53 = vld [vmem:[%s8525_s17 + $0x2890] sm:$0xff]  ;;  %v1730_v57 = vld [vmem:[%s8525_s17 + $0x28e8] sm:$0xff] }
 0x321   : > { %v1723_v55 = vld [vmem:[%s8525_s17 + $0x28b0] sm:$0xff]  ;;  %v1752_v30 = vld [vmem:[%s8525_s17 + $0x2998] sm:$0xff] }
 0x322   : > { %6221 = vmatpush1.bf16.msra.mxu0 %v6220_v2  ;;  %v1689_v2 = vld [vmem:[%s8525_s17 + $0x27a0] sm:$0xff]  ;;  %v1756_v31 = vld [vmem:[%s8525_s17 + $0x29b8] sm:$0xff] }
 0x323   : > { %7309 = vmatpush1.bf16.msra.mxu1 %v7308_v3  ;;  %6223 = vmatprep.subr.bf16.mxu0 %v6222_v4  ;;  %v1687_v3 = vld [vmem:[%s8525_s17 + $0x2790] sm:$0xff]  ;;  %v7330_v4 = vpack.c.bf16 %v1692_v61, %v1688_v60  ;;  %v6244_v10 = vpack.c.bf16 %v1689_v2, %v1685_v1  ;;  %v7348_v61 = vpack.c.bf16 %v1723_v55, %v1719_v53  ;;  %v1770_v53 = vld [vmem:[%s8525_s17 + $0x2a28] sm:$0xff]  ;;  %v1772_v55 = vld [vmem:[%s8525_s17 + $0x2a38] sm:$0xff] }
 0x324   : > { %7311 = vmatprep.subr.bf16.mxu1 %v7310_v8  ;;  %v1696_v8 = vld [vmem:[%s8525_s17 + $0x27d8] sm:$0xff]  ;;  %v7332_v11 = vpack.c.bf16 %v1691_v5, %v1687_v3  ;;  %v1727_v1 = vld [vmem:[%s8525_s17 + $0x28d0] sm:$0xff]  ;;  %v7350_v2 = vpack.c.bf16 %v1732_v59, %v1728_v58  ;;  %v1738_v5 = vld [vmem:[%s8525_s17 + $0x2928] sm:$0xff] }
 0x325   : > { %v1731_v3 = vld [vmem:[%s8525_s17 + $0x28f0] sm:$0xff]  ;;  %v1765_v59 = vld [vmem:[%s8525_s17 + $0x2a00] sm:$0xff] }
 0x326   : > { %6225 = vmatpush1.bf16.msra.mxu0 %v6224_v14  ;;  %v1697_v14 = vld [vmem:[%s8525_s17 + $0x27e0] sm:$0xff] }
 0x327   : > { %7313 = vmatpush1.bf16.msra.mxu1 %v7312_v15  ;;  %6227 = vmatprep.subr.bf16.mxu0 %v6226_v16  ;;  %v1695_v15 = vld [vmem:[%s8525_s17 + $0x27d0] sm:$0xff]  ;;  %v7334_v16 = vpack.c.bf16 %v1700_v9, %v1696_v8  ;;  %v6248_v22 = vpack.c.bf16 %v1697_v14, %v1693_v13  ;;  %v7352_v9 = vpack.c.bf16 %v1731_v3, %v1727_v1  ;;  %v1778_v1 = vld [vmem:[%s8525_s17 + $0x2a68] sm:$0xff]  ;;  %v1780_v3 = vld [vmem:[%s8525_s17 + $0x2a78] sm:$0xff] }
 0x328   : > { %7315 = vmatprep.subr.bf16.mxu1 %v7314_v20  ;;  %v1704_v20 = vld [vmem:[%s8525_s17 + $0x2818] sm:$0xff]  ;;  %v7336_v23 = vpack.c.bf16 %v1699_v17, %v1695_v15  ;;  %v1735_v13 = vld [vmem:[%s8525_s17 + $0x2910] sm:$0xff]  ;;  %v7354_v14 = vpack.c.bf16 %v1740_v7, %v1736_v6  ;;  %v1746_v17 = vld [vmem:[%s8525_s17 + $0x2968] sm:$0xff] }
 0x329   : > { %v1739_v15 = vld [vmem:[%s8525_s17 + $0x2930] sm:$0xff]  ;;  %v1773_v7 = vld [vmem:[%s8525_s17 + $0x2a40] sm:$0xff] }
 0x32a   : > { %6229 = vmatpush1.bf16.msra.mxu0 %v6228_v26  ;;  %v1705_v26 = vld [vmem:[%s8525_s17 + $0x2820] sm:$0xff] }
 0x32b   : > { %7317 = vmatpush1.bf16.msra.mxu1 %v7316_v27  ;;  %6231 = vmatprep.subr.bf16.mxu0 %v6230_v28  ;;  %v1703_v27 = vld [vmem:[%s8525_s17 + $0x2810] sm:$0xff]  ;;  %v7338_v28 = vpack.c.bf16 %v1708_v21, %v1704_v20  ;;  %v6252_v35 = vpack.c.bf16 %v1705_v26, %v1701_v25  ;;  %v7356_v21 = vpack.c.bf16 %v1739_v15, %v1735_v13  ;;  %v1786_v13 = vld [vmem:[%s8525_s17 + $0x2aa8] sm:$0xff]  ;;  %v1788_v15 = vld [vmem:[%s8525_s17 + $0x2ab8] sm:$0xff] }
 0x32c   : > { %7319 = vmatprep.subr.bf16.mxu1 %v7318_v32  ;;  %v1712_v32 = vld [vmem:[%s8525_s17 + $0x2858] sm:$0xff]  ;;  %v7340_v36 = vpack.c.bf16 %v1707_v29, %v1703_v27  ;;  %v1743_v25 = vld [vmem:[%s8525_s17 + $0x2950] sm:$0xff]  ;;  %v7358_v26 = vpack.c.bf16 %v1748_v19, %v1744_v18  ;;  %v1754_v29 = vld [vmem:[%s8525_s17 + $0x29a8] sm:$0xff] }
 0x32d   : > { %v7342_v41 = vpack.c.bf16 %v1716_v33, %v1712_v32  ;;  %v1747_v27 = vld [vmem:[%s8525_s17 + $0x2970] sm:$0xff]  ;;  %v1781_v19 = vld [vmem:[%s8525_s17 + $0x2a80] sm:$0xff] }
 0x32e   : > { %6233 = vmatpush1.bf16.msra.mxu0 %v6232_v38  ;;  %v1709_v38 = vld [vmem:[%s8525_s17 + $0x2840] sm:$0xff]  ;;  %v7360_v33 = vpack.c.bf16 %v1747_v27, %v1743_v25  ;;  %v1794_v25 = vld [vmem:[%s8525_s17 + $0x2ae8] sm:$0xff]  ;;  %v1796_v27 = vld [vmem:[%s8525_s17 + $0x2af8] sm:$0xff] }
 0x32f   : > { %7321 = vmatpush1.bf16.msra.mxu1 %v7320_v39  ;;  %6235 = vmatprep.subr.bf16.mxu0 %v6234_v40  ;;  %v1713_v39 = vld [vmem:[%s8525_s17 + $0x2860] sm:$0xff]  ;;  %v1711_v40 = vld [vmem:[%s8525_s17 + $0x2850] sm:$0xff] }
 0x330   : > { %7323 = vmatprep.subr.bf16.mxu1 %v7322_v44  ;;  %v1722_v44 = vld [vmem:[%s8525_s17 + $0x28a8] sm:$0xff]  ;;  %v6256_v48 = vpack.c.bf16 %v1713_v39, %v1709_v38  ;;  %v7344_v49 = vpack.c.bf16 %v1715_v42, %v1711_v40  ;;  %v7362_v38 = vpack.c.bf16 %v1756_v31, %v1752_v30  ;;  %v1755_v39 = vld [vmem:[%s8525_s17 + $0x29b0] sm:$0xff]  ;;  %v1760_v42 = vld [vmem:[%s8525_s17 + $0x29d8] sm:$0xff] }
 0x331   : > { %v1758_v40 = vld [vmem:[%s8525_s17 + $0x29c8] sm:$0xff]  ;;  %v1789_v31 = vld [vmem:[%s8525_s17 + $0x2ac0] sm:$0xff] }
 0x332   : > { %6237 = vmatpush1.bf16.msra.mxu0 %v6236_v50  ;;  %v6258_v50 = vpack.c.bf16 %v1722_v44, %v1718_v43  ;;  %v1764_v43 = vld [vmem:[%s8525_s17 + $0x29f8] sm:$0xff] }
 0x333   : > { %7325 = vmatpush1.bf16.msra.mxu1 %v7324_v51  ;;  %6239 = vmatprep.subr.bf16.mxu0 %v6238_v52  ;;  %v1717_v51 = vld [vmem:[%s8525_s17 + $0x2880] sm:$0xff] }
 0x334   : > { %7327 = vmatprep.subr.bf16.mxu1 %v7326_v56  ;;  %v1721_v52 = vld [vmem:[%s8525_s17 + $0x28a0] sm:$0xff]  ;;  %v1726_v56 = vld [vmem:[%s8525_s17 + $0x28c8] sm:$0xff] }
 0x335   : > { %v6260_v60 = vpack.c.bf16 %v1721_v52, %v1717_v51  ;;  %v1763_v51 = vld [vmem:[%s8525_s17 + $0x29f0] sm:$0xff]  ;;  %v1766_v52 = vld [vmem:[%s8525_s17 + $0x2a08] sm:$0xff] }
 0x336   : > { %6241 = vmatpush1.bf16.msra.mxu0 %v6240_v62  ;;  %v6262_v62 = vpack.c.bf16 %v1730_v57, %v1726_v56  ;;  %v6282_v58 = vpack.c.bf16 %v1770_v53, %v1766_v52 }
 0x337   : > { %7329 = vmatpush1.bf16.msra.mxu1 %v7328_v63  ;;  %6243 = vmatprep.subr.bf16.mxu0 %v6242_v0  ;;  %v1725_v63 = vld [vmem:[%s8525_s17 + $0x28c0] sm:$0xff] }
 0x338   : > { %7331 = vmatprep.subr.bf16.mxu1 %v7330_v4  ;;  %v1729_v0 = vld [vmem:[%s8525_s17 + $0x28e0] sm:$0xff]  ;;  %v1734_v4 = vld [vmem:[%s8525_s17 + $0x2908] sm:$0xff] }
 0x339   : > { %v6264_v8 = vpack.c.bf16 %v1729_v0, %v1725_v63  ;;  %v1771_v63 = vld [vmem:[%s8525_s17 + $0x2a30] sm:$0xff]  ;;  %v1774_v0 = vld [vmem:[%s8525_s17 + $0x2a48] sm:$0xff] }
 0x33a   : > { %6245 = vmatpush1.bf16.msra.mxu0 %v6244_v10  ;;  %v6266_v10 = vpack.c.bf16 %v1738_v5, %v1734_v4  ;;  %v6286_v6 = vpack.c.bf16 %v1778_v1, %v1774_v0 }
 0x33b   : > { %7333 = vmatpush1.bf16.msra.mxu1 %v7332_v11  ;;  %6247 = vmatprep.subr.bf16.mxu0 %v6246_v12  ;;  %v1733_v11 = vld [vmem:[%s8525_s17 + $0x2900] sm:$0xff] }
 0x33c   : > { %7335 = vmatprep.subr.bf16.mxu1 %v7334_v16  ;;  %v1737_v12 = vld [vmem:[%s8525_s17 + $0x2920] sm:$0xff]  ;;  %v1742_v16 = vld [vmem:[%s8525_s17 + $0x2948] sm:$0xff] }
 0x33d   : > { %v6268_v20 = vpack.c.bf16 %v1737_v12, %v1733_v11  ;;  %v1779_v11 = vld [vmem:[%s8525_s17 + $0x2a70] sm:$0xff]  ;;  %v1782_v12 = vld [vmem:[%s8525_s17 + $0x2a88] sm:$0xff] }
 0x33e   : > { %6249 = vmatpush1.bf16.msra.mxu0 %v6248_v22  ;;  %v6270_v22 = vpack.c.bf16 %v1746_v17, %v1742_v16  ;;  %v6290_v18 = vpack.c.bf16 %v1786_v13, %v1782_v12 }
 0x33f   : > { %7337 = vmatpush1.bf16.msra.mxu1 %v7336_v23  ;;  %6251 = vmatprep.subr.bf16.mxu0 %v6250_v24  ;;  %v1741_v23 = vld [vmem:[%s8525_s17 + $0x2940] sm:$0xff] }
 0x340   : > { %7339 = vmatprep.subr.bf16.mxu1 %v7338_v28  ;;  %v1745_v24 = vld [vmem:[%s8525_s17 + $0x2960] sm:$0xff]  ;;  %v1750_v28 = vld [vmem:[%s8525_s17 + $0x2988] sm:$0xff] }
 0x341   : > { %3301 = vmatmul.mubr.f32.vlgmr.msra.gmra.mrb[0].mxu0 %v405_v34  ;;  %v6272_v32 = vpack.c.bf16 %v1745_v24, %v1741_v23  ;;  %v1787_v23 = vld [vmem:[%s8525_s17 + $0x2ab0] sm:$0xff]  ;;  %v1790_v24 = vld [vmem:[%s8525_s17 + $0x2ac8] sm:$0xff] }
 0x342   : > { %6253 = vmatpush1.bf16.msra.mxu0 %v6252_v35  ;;  %4508 = vmatmul.mubr.f32.vlgmr.msra.gmra.mrb[0].mxu1 %v405_v34  ;;  %v6274_v34 = vpack.c.bf16 %v1754_v29, %v1750_v28  ;;  %v1749_v35 = vld [vmem:[%s8525_s17 + $0x2980] sm:$0xff]  ;;  %v6294_v30 = vpack.c.bf16 %v1794_v25, %v1790_v24 }
 0x343   : > { %7341 = vmatpush1.bf16.msra.mxu1 %v7340_v36  ;;  %6255 = vmatprep.subr.bf16.mxu0 %v6254_v37  ;;  %v1753_v36 = vld [vmem:[%s8525_s17 + $0x29a0] sm:$0xff]  ;;  %v1751_v37 = vld [vmem:[%s8525_s17 + $0x2990] sm:$0xff] }
 0x344   : > { %7343 = vmatprep.subr.bf16.mxu1 %v7342_v41  ;;  %3371 = vmatprep.mubr.f32.mxu0 %v408_v47  ;;  %v1762_v41 = vld [vmem:[%s8525_s17 + $0x29e8] sm:$0xff]  ;;  %v6276_v44 = vpack.c.bf16 %v1753_v36, %v1749_v35  ;;  %v7364_v45 = vpack.c.bf16 %v1755_v39, %v1751_v37  ;;  %v1795_v35 = vld [vmem:[%s8525_s17 + $0x2af0] sm:$0xff]  ;;  %v1804_v39 = vld [vmem:[%s8525_s17 + $0x2b38] sm:$0xff] }
 0x345   : > { %4578 = vmatprep.mubr.f32.mxu1 %v408_v47  ;;  %v6278_v46 = vpack.c.bf16 %v1762_v41, %v1758_v40  ;;  %v1757_v47 = vld [vmem:[%s8525_s17 + $0x29c0] sm:$0xff]  ;;  %v1798_v36 = vld [vmem:[%s8525_s17 + $0x2b08] sm:$0xff] }
 0x346   : > { %6257 = vmatpush1.bf16.msra.mxu0 %v6256_v48  ;;  %v1761_v48 = vld [vmem:[%s8525_s17 + $0x29e0] sm:$0xff]  ;;  %v1802_v37 = vld [vmem:[%s8525_s17 + $0x2b28] sm:$0xff] }
 0x347   : > { %7345 = vmatpush1.bf16.msra.mxu1 %v7344_v49  ;;  %6259 = vmatprep.subr.bf16.mxu0 %v6258_v50  ;;  %v1759_v49 = vld [vmem:[%s8525_s17 + $0x29d0] sm:$0xff]  ;;  %v7366_v50 = vpack.c.bf16 %v1764_v43, %v1760_v42  ;;  %v6280_v56 = vpack.c.bf16 %v1761_v48, %v1757_v47  ;;  %v6298_v42 = vpack.c.bf16 %v1802_v37, %v1798_v36  ;;  %v1797_v43 = vld [vmem:[%s8525_s17 + $0x2b00] sm:$0xff]  ;;  %v1806_v48 = vld [vmem:[%s8525_s17 + $0x2b48] sm:$0xff] }
 0x348   : > { %7347 = vmatprep.subr.bf16.mxu1 %v7346_v54  ;;  %v1768_v54 = vld [vmem:[%s8525_s17 + $0x2a18] sm:$0xff]  ;;  %v7368_v57 = vpack.c.bf16 %v1763_v51, %v1759_v49  ;;  %v1803_v47 = vld [vmem:[%s8525_s17 + $0x2b30] sm:$0xff]  ;;  %v1810_v49 = vld [vmem:[%s8525_s17 + $0x2b68] sm:$0xff] }
 0x349   : > { %v1812_v51 = vld [vmem:[%s8525_s17 + $0x2b78] sm:$0xff]  ;;  %v407_v36 = vld [vmem:[%s8547_s14 + $0xa0] sm:$0xff] }
 0x34a   : > { %6261 = vmatpush1.bf16.msra.mxu0 %v6260_v60  ;;  %v1769_v60 = vld [vmem:[%s8525_s17 + $0x2a20] sm:$0xff] }
 0x34b   : > { %7349 = vmatpush1.bf16.msra.mxu1 %v7348_v61  ;;  %6263 = vmatprep.subr.bf16.mxu0 %v6262_v62  ;;  %v1767_v61 = vld [vmem:[%s8525_s17 + $0x2a10] sm:$0xff]  ;;  %v7370_v62 = vpack.c.bf16 %v1772_v55, %v1768_v54  ;;  %v6284_v4 = vpack.c.bf16 %v1769_v60, %v1765_v59  ;;  %v6302_v54 = vpack.c.bf16 %v1810_v49, %v1806_v48  ;;  %v1805_v55 = vld [vmem:[%s8525_s17 + $0x2b40] sm:$0xff]  ;;  %v1814_v60 = vld [vmem:[%s8525_s17 + $0x2b88] sm:$0xff] }
 0x34c   : > { %7351 = vmatprep.subr.bf16.mxu1 %v7350_v2  ;;  %v1776_v2 = vld [vmem:[%s8525_s17 + $0x2a58] sm:$0xff]  ;;  %v7372_v5 = vpack.c.bf16 %v1771_v63, %v1767_v61  ;;  %v1811_v59 = vld [vmem:[%s8525_s17 + $0x2b70] sm:$0xff]  ;;  %v1818_v61 = vld [vmem:[%s8525_s17 + $0x2ba8] sm:$0xff] }
 0x34d   : > { %v1820_v63 = vld [vmem:[%s8525_s17 + $0x2bb8] sm:$0xff] }
 0x34e   : > { %6265 = vmatpush1.bf16.msra.mxu0 %v6264_v8  ;;  %v1777_v8 = vld [vmem:[%s8525_s17 + $0x2a60] sm:$0xff]  ;;  %v1852_v48 = vld [vmem:[%s8525_s17 + $0x2cb8] sm:$0xff] }
 0x34f   : > { %7353 = vmatpush1.bf16.msra.mxu1 %v7352_v9  ;;  %6267 = vmatprep.subr.bf16.mxu0 %v6266_v10  ;;  %v1775_v9 = vld [vmem:[%s8525_s17 + $0x2a50] sm:$0xff]  ;;  %v7374_v10 = vpack.c.bf16 %v1780_v3, %v1776_v2  ;;  %v6288_v16 = vpack.c.bf16 %v1777_v8, %v1773_v7  ;;  %v6306_v2 = vpack.c.bf16 %v1818_v61, %v1814_v60  ;;  %v1813_v3 = vld [vmem:[%s8525_s17 + $0x2b80] sm:$0xff]  ;;  %v1822_v8 = vld [vmem:[%s8525_s17 + $0x2bc8] sm:$0xff] }
 0x350   : > { %7355 = vmatprep.subr.bf16.mxu1 %v7354_v14  ;;  %v1784_v14 = vld [vmem:[%s8525_s17 + $0x2a98] sm:$0xff]  ;;  %v7376_v17 = vpack.c.bf16 %v1779_v11, %v1775_v9  ;;  %v1819_v7 = vld [vmem:[%s8525_s17 + $0x2bb0] sm:$0xff]  ;;  %v1826_v9 = vld [vmem:[%s8525_s17 + $0x2be8] sm:$0xff] }
 0x351   : > { %v1828_v11 = vld [vmem:[%s8525_s17 + $0x2bf8] sm:$0xff] }
 0x352   : > { %6269 = vmatpush1.bf16.msra.mxu0 %v6268_v20  ;;  %v1785_v20 = vld [vmem:[%s8525_s17 + $0x2aa0] sm:$0xff]  ;;  %v410_v49 = vld [vmem:[%s8547_s14 + $0xb8] sm:$0xff] }
 0x353   : > { %7357 = vmatpush1.bf16.msra.mxu1 %v7356_v21  ;;  %6271 = vmatprep.subr.bf16.mxu0 %v6270_v22  ;;  %v1783_v21 = vld [vmem:[%s8525_s17 + $0x2a90] sm:$0xff]  ;;  %v7378_v22 = vpack.c.bf16 %v1788_v15, %v1784_v14  ;;  %v6292_v28 = vpack.c.bf16 %v1785_v20, %v1781_v19  ;;  %v6310_v14 = vpack.c.bf16 %v1826_v9, %v1822_v8  ;;  %v1821_v15 = vld [vmem:[%s8525_s17 + $0x2bc0] sm:$0xff]  ;;  %v1830_v20 = vld [vmem:[%s8525_s17 + $0x2c08] sm:$0xff] }
 0x354   : > { %7359 = vmatprep.subr.bf16.mxu1 %v7358_v26  ;;  %v1792_v26 = vld [vmem:[%s8525_s17 + $0x2ad8] sm:$0xff]  ;;  %v7380_v29 = vpack.c.bf16 %v1787_v23, %v1783_v21  ;;  %v1827_v19 = vld [vmem:[%s8525_s17 + $0x2bf0] sm:$0xff]  ;;  %v1834_v21 = vld [vmem:[%s8525_s17 + $0x2c28] sm:$0xff] }
 0x355   : > { %v1836_v23 = vld [vmem:[%s8525_s17 + $0x2c38] sm:$0xff] }
 0x356   : > { %6273 = vmatpush1.bf16.msra.mxu0 %v6272_v32  ;;  %v1793_v32 = vld [vmem:[%s8525_s17 + $0x2ae0] sm:$0xff]  ;;  %v1856_v60 = vld [vmem:[%s8525_s17 + $0x2cd8] sm:$0xff] }
 0x357   : > { %7361 = vmatpush1.bf16.msra.mxu1 %v7360_v33  ;;  %6275 = vmatprep.subr.bf16.mxu0 %v6274_v34  ;;  %v1791_v33 = vld [vmem:[%s8525_s17 + $0x2ad0] sm:$0xff]  ;;  %v7382_v34 = vpack.c.bf16 %v1796_v27, %v1792_v26  ;;  %v6296_v40 = vpack.c.bf16 %v1793_v32, %v1789_v31  ;;  %v6314_v26 = vpack.c.bf16 %v1834_v21, %v1830_v20  ;;  %v1829_v27 = vld [vmem:[%s8525_s17 + $0x2c00] sm:$0xff]  ;;  %v1838_v32 = vld [vmem:[%s8525_s17 + $0x2c48] sm:$0xff] }
 0x358   : > { %7363 = vmatprep.subr.bf16.mxu1 %v7362_v38  ;;  %v1800_v38 = vld [vmem:[%s8525_s17 + $0x2b18] sm:$0xff]  ;;  %v7384_v41 = vpack.c.bf16 %v1795_v35, %v1791_v33  ;;  %v1835_v31 = vld [vmem:[%s8525_s17 + $0x2c30] sm:$0xff]  ;;  %v1842_v33 = vld [vmem:[%s8525_s17 + $0x2c68] sm:$0xff] }
 0x359   : > { %v1844_v35 = vld [vmem:[%s8525_s17 + $0x2c78] sm:$0xff] }
 0x35a   : > { %6277 = vmatpush1.bf16.msra.mxu0 %v6276_v44  ;;  %v1801_v44 = vld [vmem:[%s8525_s17 + $0x2b20] sm:$0xff]  ;;  %v1860_v61 = vld [vmem:[%s8525_s17 + $0x2cf8] sm:$0xff] }
 0x35b   : > { %7365 = vmatpush1.bf16.msra.mxu1 %v7364_v45  ;;  %6279 = vmatprep.subr.bf16.mxu0 %v6278_v46  ;;  %v1799_v45 = vld [vmem:[%s8525_s17 + $0x2b10] sm:$0xff]  ;;  %v7386_v46 = vpack.c.bf16 %v1804_v39, %v1800_v38  ;;  %v6300_v52 = vpack.c.bf16 %v1801_v44, %v1797_v43  ;;  %v6318_v39 = vpack.c.bf16 %v1842_v33, %v1838_v32  ;;  %v1864_v8 = vld [vmem:[%s8525_s17 + $0x2d18] sm:$0xff] }
 0x35c   : > { %7367 = vmatprep.subr.bf16.mxu1 %v7366_v50  ;;  %v1808_v50 = vld [vmem:[%s8525_s17 + $0x2b58] sm:$0xff]  ;;  %v7388_v53 = vpack.c.bf16 %v1803_v47, %v1799_v45  ;;  %v1843_v44 = vld [vmem:[%s8525_s17 + $0x2c70] sm:$0xff]  ;;  %v1846_v45 = vld [vmem:[%s8525_s17 + $0x2c88] sm:$0xff] }
 0x35d   : > { %v1848_v47 = vld [vmem:[%s8525_s17 + $0x2c98] sm:$0xff] }
 0x35e   : > { %6281 = vmatpush1.bf16.msra.mxu0 %v6280_v56  ;;  %v1809_v56 = vld [vmem:[%s8525_s17 + $0x2b60] sm:$0xff]  ;;  %v1868_v9 = vld [vmem:[%s8525_s17 + $0x2d38] sm:$0xff] }
 0x35f   : > { %7369 = vmatpush1.bf16.msra.mxu1 %v7368_v57  ;;  %6283 = vmatprep.subr.bf16.mxu0 %v6282_v58  ;;  %v1807_v57 = vld [vmem:[%s8525_s17 + $0x2b50] sm:$0xff]  ;;  %v7390_v58 = vpack.c.bf16 %v1812_v51, %v1808_v50  ;;  %v6304_v0 = vpack.c.bf16 %v1809_v56, %v1805_v55  ;;  %v7410_v56 = vpack.c.bf16 %v1852_v48, %v1848_v47  ;;  %v1872_v20 = vld [vmem:[%s8525_s17 + $0x2d58] sm:$0xff] }
 0x360   : > { %7371 = vmatprep.subr.bf16.mxu1 %v7370_v62  ;;  %v1816_v62 = vld [vmem:[%s8525_s17 + $0x2b98] sm:$0xff]  ;;  %v7392_v1 = vpack.c.bf16 %v1811_v59, %v1807_v57  ;;  %v1847_v55 = vld [vmem:[%s8525_s17 + $0x2c90] sm:$0xff]  ;;  %v1858_v59 = vld [vmem:[%s8525_s17 + $0x2ce8] sm:$0xff] }
 0x361   : > { %v1851_v57 = vld [vmem:[%s8525_s17 + $0x2cb0] sm:$0xff]  ;;  %v1876_v21 = vld [vmem:[%s8525_s17 + $0x2d78] sm:$0xff] }
 0x362   : > { %6285 = vmatpush1.bf16.msra.mxu0 %v6284_v4  ;;  %v1817_v4 = vld [vmem:[%s8525_s17 + $0x2ba0] sm:$0xff]  ;;  %v1880_v32 = vld [vmem:[%s8525_s17 + $0x2d98] sm:$0xff] }
 0x363   : > { %7373 = vmatpush1.bf16.msra.mxu1 %v7372_v5  ;;  %6287 = vmatprep.subr.bf16.mxu0 %v6286_v6  ;;  %v1815_v5 = vld [vmem:[%s8525_s17 + $0x2b90] sm:$0xff]  ;;  %v7394_v6 = vpack.c.bf16 %v1820_v63, %v1816_v62  ;;  %v6308_v12 = vpack.c.bf16 %v1817_v4, %v1813_v3  ;;  %v7412_v63 = vpack.c.bf16 %v1851_v57, %v1847_v55  ;;  %v1884_v33 = vld [vmem:[%s8525_s17 + $0x2db8] sm:$0xff]  ;;  %v1898_v55 = vld [vmem:[%s8525_s17 + $0x2e28] sm:$0xff] }
 0x364   : > { %7375 = vmatprep.subr.bf16.mxu1 %v7374_v10  ;;  %v1824_v10 = vld [vmem:[%s8525_s17 + $0x2bd8] sm:$0xff]  ;;  %v7396_v13 = vpack.c.bf16 %v1819_v7, %v1815_v5  ;;  %v1855_v3 = vld [vmem:[%s8525_s17 + $0x2cd0] sm:$0xff]  ;;  %v7414_v4 = vpack.c.bf16 %v1860_v61, %v1856_v60  ;;  %v1866_v7 = vld [vmem:[%s8525_s17 + $0x2d28] sm:$0xff] }
 0x365   : > { %v1859_v5 = vld [vmem:[%s8525_s17 + $0x2cf0] sm:$0xff]  ;;  %v1900_v57 = vld [vmem:[%s8525_s17 + $0x2e38] sm:$0xff]  ;;  %v1893_v61 = vld [vmem:[%s8525_s17 + $0x2e00] sm:$0xff] }
 0x366   : > { %6289 = vmatpush1.bf16.msra.mxu0 %v6288_v16  ;;  %v1825_v16 = vld [vmem:[%s8525_s17 + $0x2be0] sm:$0xff] }
 0x367   : > { %7377 = vmatpush1.bf16.msra.mxu1 %v7376_v17  ;;  %6291 = vmatprep.subr.bf16.mxu0 %v6290_v18  ;;  %v1823_v17 = vld [vmem:[%s8525_s17 + $0x2bd0] sm:$0xff]  ;;  %v7398_v18 = vpack.c.bf16 %v1828_v11, %v1824_v10  ;;  %v6312_v24 = vpack.c.bf16 %v1825_v16, %v1821_v15  ;;  %v7416_v11 = vpack.c.bf16 %v1859_v5, %v1855_v3  ;;  %v1906_v3 = vld [vmem:[%s8525_s17 + $0x2e68] sm:$0xff]  ;;  %v1908_v5 = vld [vmem:[%s8525_s17 + $0x2e78] sm:$0xff] }
 0x368   : > { %7379 = vmatprep.subr.bf16.mxu1 %v7378_v22  ;;  %v1832_v22 = vld [vmem:[%s8525_s17 + $0x2c18] sm:$0xff]  ;;  %v7400_v25 = vpack.c.bf16 %v1827_v19, %v1823_v17  ;;  %v1863_v15 = vld [vmem:[%s8525_s17 + $0x2d10] sm:$0xff]  ;;  %v7418_v16 = vpack.c.bf16 %v1868_v9, %v1864_v8  ;;  %v1874_v19 = vld [vmem:[%s8525_s17 + $0x2d68] sm:$0xff] }
 0x369   : > { %v1867_v17 = vld [vmem:[%s8525_s17 + $0x2d30] sm:$0xff]  ;;  %v1901_v9 = vld [vmem:[%s8525_s17 + $0x2e40] sm:$0xff] }
 0x36a   : > { %6293 = vmatpush1.bf16.msra.mxu0 %v6292_v28  ;;  %v1833_v28 = vld [vmem:[%s8525_s17 + $0x2c20] sm:$0xff] }
 0x36b   : > { %7381 = vmatpush1.bf16.msra.mxu1 %v7380_v29  ;;  %6295 = vmatprep.subr.bf16.mxu0 %v6294_v30  ;;  %v1831_v29 = vld [vmem:[%s8525_s17 + $0x2c10] sm:$0xff]  ;;  %v7402_v30 = vpack.c.bf16 %v1836_v23, %v1832_v22  ;;  %v6316_v37 = vpack.c.bf16 %v1833_v28, %v1829_v27  ;;  %v7420_v23 = vpack.c.bf16 %v1867_v17, %v1863_v15  ;;  %v1914_v15 = vld [vmem:[%s8525_s17 + $0x2ea8] sm:$0xff]  ;;  %v1916_v17 = vld [vmem:[%s8525_s17 + $0x2eb8] sm:$0xff] }
 0x36c   : > { %7383 = vmatprep.subr.bf16.mxu1 %v7382_v34  ;;  %v1840_v34 = vld [vmem:[%s8525_s17 + $0x2c58] sm:$0xff]  ;;  %v7404_v38 = vpack.c.bf16 %v1835_v31, %v1831_v29  ;;  %v1871_v27 = vld [vmem:[%s8525_s17 + $0x2d50] sm:$0xff]  ;;  %v7422_v28 = vpack.c.bf16 %v1876_v21, %v1872_v20  ;;  %v1882_v31 = vld [vmem:[%s8525_s17 + $0x2da8] sm:$0xff] }
 0x36d   : > { %v7406_v43 = vpack.c.bf16 %v1844_v35, %v1840_v34  ;;  %v1875_v29 = vld [vmem:[%s8525_s17 + $0x2d70] sm:$0xff]  ;;  %v1909_v21 = vld [vmem:[%s8525_s17 + $0x2e80] sm:$0xff] }
 0x36e   : > { %6297 = vmatpush1.bf16.msra.mxu0 %v6296_v40  ;;  %v1837_v40 = vld [vmem:[%s8525_s17 + $0x2c40] sm:$0xff]  ;;  %v7424_v35 = vpack.c.bf16 %v1875_v29, %v1871_v27  ;;  %v1922_v27 = vld [vmem:[%s8525_s17 + $0x2ee8] sm:$0xff]  ;;  %v1924_v29 = vld [vmem:[%s8525_s17 + $0x2ef8] sm:$0xff] }
 0x36f   : > { %7385 = vmatpush1.bf16.msra.mxu1 %v7384_v41  ;;  %6299 = vmatprep.subr.bf16.mxu0 %v6298_v42  ;;  %v1841_v41 = vld [vmem:[%s8525_s17 + $0x2c60] sm:$0xff]  ;;  %v1839_v42 = vld [vmem:[%s8525_s17 + $0x2c50] sm:$0xff] }
 0x370   : > { %7387 = vmatprep.subr.bf16.mxu1 %v7386_v46  ;;  %v1850_v46 = vld [vmem:[%s8525_s17 + $0x2ca8] sm:$0xff]  ;;  %v6320_v50 = vpack.c.bf16 %v1841_v41, %v1837_v40  ;;  %v7408_v51 = vpack.c.bf16 %v1843_v44, %v1839_v42  ;;  %v7426_v40 = vpack.c.bf16 %v1884_v33, %v1880_v32  ;;  %v1883_v41 = vld [vmem:[%s8525_s17 + $0x2db0] sm:$0xff]  ;;  %v1888_v44 = vld [vmem:[%s8525_s17 + $0x2dd8] sm:$0xff] }
 0x371   : > { %v1886_v42 = vld [vmem:[%s8525_s17 + $0x2dc8] sm:$0xff]  ;;  %v1917_v33 = vld [vmem:[%s8525_s17 + $0x2ec0] sm:$0xff] }
 0x372   : > { %6301 = vmatpush1.bf16.msra.mxu0 %v6300_v52  ;;  %v6322_v52 = vpack.c.bf16 %v1850_v46, %v1846_v45  ;;  %v1892_v45 = vld [vmem:[%s8525_s17 + $0x2df8] sm:$0xff] }
 0x373   : > { %7389 = vmatpush1.bf16.msra.mxu1 %v7388_v53  ;;  %6303 = vmatprep.subr.bf16.mxu0 %v6302_v54  ;;  %v1845_v53 = vld [vmem:[%s8525_s17 + $0x2c80] sm:$0xff] }
 0x374   : > { %7391 = vmatprep.subr.bf16.mxu1 %v7390_v58  ;;  %v1849_v54 = vld [vmem:[%s8525_s17 + $0x2ca0] sm:$0xff]  ;;  %v1854_v58 = vld [vmem:[%s8525_s17 + $0x2cc8] sm:$0xff] }
 0x375   : > { %v6324_v62 = vpack.c.bf16 %v1849_v54, %v1845_v53  ;;  %v1891_v53 = vld [vmem:[%s8525_s17 + $0x2df0] sm:$0xff]  ;;  %v1894_v54 = vld [vmem:[%s8525_s17 + $0x2e08] sm:$0xff] }
 0x376   : > { %6305 = vmatpush1.bf16.msra.mxu0 %v6304_v0  ;;  %v6326_v0 = vpack.c.bf16 %v1858_v59, %v1854_v58  ;;  %v6346_v60 = vpack.c.bf16 %v1898_v55, %v1894_v54 }
 0x377   : > { %7393 = vmatpush1.bf16.msra.mxu1 %v7392_v1  ;;  %6307 = vmatprep.subr.bf16.mxu0 %v6306_v2  ;;  %v1853_v1 = vld [vmem:[%s8525_s17 + $0x2cc0] sm:$0xff] }
 0x378   : > { %7395 = vmatprep.subr.bf16.mxu1 %v7394_v6  ;;  %v1857_v2 = vld [vmem:[%s8525_s17 + $0x2ce0] sm:$0xff]  ;;  %v1862_v6 = vld [vmem:[%s8525_s17 + $0x2d08] sm:$0xff] }
 0x379   : > { %v6328_v10 = vpack.c.bf16 %v1857_v2, %v1853_v1  ;;  %v1899_v1 = vld [vmem:[%s8525_s17 + $0x2e30] sm:$0xff]  ;;  %v1902_v2 = vld [vmem:[%s8525_s17 + $0x2e48] sm:$0xff] }
 0x37a   : > { %6309 = vmatpush1.bf16.msra.mxu0 %v6308_v12  ;;  %v6330_v12 = vpack.c.bf16 %v1866_v7, %v1862_v6  ;;  %v6350_v8 = vpack.c.bf16 %v1906_v3, %v1902_v2 }
 0x37b   : > { %7397 = vmatpush1.bf16.msra.mxu1 %v7396_v13  ;;  %6311 = vmatprep.subr.bf16.mxu0 %v6310_v14  ;;  %v1861_v13 = vld [vmem:[%s8525_s17 + $0x2d00] sm:$0xff] }
 0x37c   : > { %7399 = vmatprep.subr.bf16.mxu1 %v7398_v18  ;;  %v1865_v14 = vld [vmem:[%s8525_s17 + $0x2d20] sm:$0xff]  ;;  %v1870_v18 = vld [vmem:[%s8525_s17 + $0x2d48] sm:$0xff] }
 0x37d   : > { %v6332_v22 = vpack.c.bf16 %v1865_v14, %v1861_v13  ;;  %v1907_v13 = vld [vmem:[%s8525_s17 + $0x2e70] sm:$0xff]  ;;  %v1910_v14 = vld [vmem:[%s8525_s17 + $0x2e88] sm:$0xff] }
 0x37e   : > { %6313 = vmatpush1.bf16.msra.mxu0 %v6312_v24  ;;  %v6334_v24 = vpack.c.bf16 %v1874_v19, %v1870_v18  ;;  %v6354_v20 = vpack.c.bf16 %v1914_v15, %v1910_v14 }
 0x37f   : > { %7401 = vmatpush1.bf16.msra.mxu1 %v7400_v25  ;;  %6315 = vmatprep.subr.bf16.mxu0 %v6314_v26  ;;  %v1869_v25 = vld [vmem:[%s8525_s17 + $0x2d40] sm:$0xff] }
 0x380   : > { %7403 = vmatprep.subr.bf16.mxu1 %v7402_v30  ;;  %v1873_v26 = vld [vmem:[%s8525_s17 + $0x2d60] sm:$0xff]  ;;  %v1878_v30 = vld [vmem:[%s8525_s17 + $0x2d88] sm:$0xff] }
 0x381   : > { %3372 = vmatmul.mubr.f32.vlgmr.msra.gmra.mrb[0].mxu0 %v407_v36  ;;  %v6336_v34 = vpack.c.bf16 %v1873_v26, %v1869_v25  ;;  %v1915_v25 = vld [vmem:[%s8525_s17 + $0x2eb0] sm:$0xff]  ;;  %v1918_v26 = vld [vmem:[%s8525_s17 + $0x2ec8] sm:$0xff] }
 0x382   : > { %6317 = vmatpush1.bf16.msra.mxu0 %v6316_v37  ;;  %4579 = vmatmul.mubr.f32.vlgmr.msra.gmra.mrb[0].mxu1 %v407_v36  ;;  %v6338_v36 = vpack.c.bf16 %v1882_v31, %v1878_v30  ;;  %v1877_v37 = vld [vmem:[%s8525_s17 + $0x2d80] sm:$0xff]  ;;  %v6358_v32 = vpack.c.bf16 %v1922_v27, %v1918_v26 }
 0x383   : > { %7405 = vmatpush1.bf16.msra.mxu1 %v7404_v38  ;;  %6319 = vmatprep.subr.bf16.mxu0 %v6318_v39  ;;  %v1881_v38 = vld [vmem:[%s8525_s17 + $0x2da0] sm:$0xff]  ;;  %v1879_v39 = vld [vmem:[%s8525_s17 + $0x2d90] sm:$0xff] }
 0x384   : > { %7407 = vmatprep.subr.bf16.mxu1 %v7406_v43  ;;  %3442 = vmatprep.mubr.f32.mxu0 %v410_v49  ;;  %v1890_v43 = vld [vmem:[%s8525_s17 + $0x2de8] sm:$0xff]  ;;  %v6340_v46 = vpack.c.bf16 %v1881_v38, %v1877_v37  ;;  %v7428_v47 = vpack.c.bf16 %v1883_v41, %v1879_v39  ;;  %v1923_v37 = vld [vmem:[%s8525_s17 + $0x2ef0] sm:$0xff]  ;;  %v1932_v41 = vld [vmem:[%s8525_s17 + $0x2f38] sm:$0xff] }
 0x385   : > { %4649 = vmatprep.mubr.f32.mxu1 %v410_v49  ;;  %v6342_v48 = vpack.c.bf16 %v1890_v43, %v1886_v42  ;;  %v1885_v49 = vld [vmem:[%s8525_s17 + $0x2dc0] sm:$0xff]  ;;  %v1926_v38 = vld [vmem:[%s8525_s17 + $0x2f08] sm:$0xff] }
 0x386   : > { %6321 = vmatpush1.bf16.msra.mxu0 %v6320_v50  ;;  %v1889_v50 = vld [vmem:[%s8525_s17 + $0x2de0] sm:$0xff]  ;;  %v1930_v39 = vld [vmem:[%s8525_s17 + $0x2f28] sm:$0xff] }
 0x387   : > { %7409 = vmatpush1.bf16.msra.mxu1 %v7408_v51  ;;  %6323 = vmatprep.subr.bf16.mxu0 %v6322_v52  ;;  %v1887_v51 = vld [vmem:[%s8525_s17 + $0x2dd0] sm:$0xff]  ;;  %v7430_v52 = vpack.c.bf16 %v1892_v45, %v1888_v44  ;;  %v6344_v58 = vpack.c.bf16 %v1889_v50, %v1885_v49  ;;  %v6362_v44 = vpack.c.bf16 %v1930_v39, %v1926_v38  ;;  %v1925_v45 = vld [vmem:[%s8525_s17 + $0x2f00] sm:$0xff]  ;;  %v1934_v50 = vld [vmem:[%s8525_s17 + $0x2f48] sm:$0xff] }
 0x388   : > { %7411 = vmatprep.subr.bf16.mxu1 %v7410_v56  ;;  %v1896_v56 = vld [vmem:[%s8525_s17 + $0x2e18] sm:$0xff]  ;;  %v7432_v59 = vpack.c.bf16 %v1891_v53, %v1887_v51  ;;  %v1931_v49 = vld [vmem:[%s8525_s17 + $0x2f30] sm:$0xff]  ;;  %v1938_v51 = vld [vmem:[%s8525_s17 + $0x2f68] sm:$0xff] }
 0x389   : > { %v1940_v53 = vld [vmem:[%s8525_s17 + $0x2f78] sm:$0xff]  ;;  %v409_v38 = vld [vmem:[%s8547_s14 + $0xb0] sm:$0xff] }
 0x38a   : > { %6325 = vmatpush1.bf16.msra.mxu0 %v6324_v62  ;;  %v1897_v62 = vld [vmem:[%s8525_s17 + $0x2e20] sm:$0xff] }
 0x38b   : > { %7413 = vmatpush1.bf16.msra.mxu1 %v7412_v63  ;;  %6327 = vmatprep.subr.bf16.mxu0 %v6326_v0  ;;  %v1895_v63 = vld [vmem:[%s8525_s17 + $0x2e10] sm:$0xff]  ;;  %v7434_v0 = vpack.c.bf16 %v1900_v57, %v1896_v56  ;;  %v6348_v6 = vpack.c.bf16 %v1897_v62, %v1893_v61  ;;  %v6366_v56 = vpack.c.bf16 %v1938_v51, %v1934_v50  ;;  %v1933_v57 = vld [vmem:[%s8525_s17 + $0x2f40] sm:$0xff]  ;;  %v1942_v62 = vld [vmem:[%s8525_s17 + $0x2f88] sm:$0xff] }
 0x38c   : > { %7415 = vmatprep.subr.bf16.mxu1 %v7414_v4  ;;  %v1904_v4 = vld [vmem:[%s8525_s17 + $0x2e58] sm:$0xff]  ;;  %v7436_v7 = vpack.c.bf16 %v1899_v1, %v1895_v63  ;;  %v1939_v61 = vld [vmem:[%s8525_s17 + $0x2f70] sm:$0xff]  ;;  %v1946_v63 = vld [vmem:[%s8525_s17 + $0x2fa8] sm:$0xff] }
 0x38d   : > { %v1948_v1 = vld [vmem:[%s8525_s17 + $0x2fb8] sm:$0xff]  ;;  %v412_v51 = vld [vmem:[%s8547_s14 + $0xc8] sm:$0xff] }
 0x38e   : > { %6329 = vmatpush1.bf16.msra.mxu0 %v6328_v10  ;;  %v1905_v10 = vld [vmem:[%s8525_s17 + $0x2e60] sm:$0xff]  ;;  %v1980_v50 = vld [vmem:[%s8525_s17 + $0x30b8] sm:$0xff] }
 0x38f   : > { %7417 = vmatpush1.bf16.msra.mxu1 %v7416_v11  ;;  %6331 = vmatprep.subr.bf16.mxu0 %v6330_v12  ;;  %v1903_v11 = vld [vmem:[%s8525_s17 + $0x2e50] sm:$0xff]  ;;  %v7438_v12 = vpack.c.bf16 %v1908_v5, %v1904_v4  ;;  %v6352_v18 = vpack.c.bf16 %v1905_v10, %v1901_v9  ;;  %v6370_v4 = vpack.c.bf16 %v1946_v63, %v1942_v62  ;;  %v1941_v5 = vld [vmem:[%s8525_s17 + $0x2f80] sm:$0xff]  ;;  %v1950_v10 = vld [vmem:[%s8525_s17 + $0x2fc8] sm:$0xff] }
 0x390   : > { %7419 = vmatprep.subr.bf16.mxu1 %v7418_v16  ;;  %v1912_v16 = vld [vmem:[%s8525_s17 + $0x2e98] sm:$0xff]  ;;  %v7440_v19 = vpack.c.bf16 %v1907_v13, %v1903_v11  ;;  %v1947_v9 = vld [vmem:[%s8525_s17 + $0x2fb0] sm:$0xff]  ;;  %v1954_v11 = vld [vmem:[%s8525_s17 + $0x2fe8] sm:$0xff] }
 0x391   : > { %v1956_v13 = vld [vmem:[%s8525_s17 + $0x2ff8] sm:$0xff] }
 0x392   : > { %6333 = vmatpush1.bf16.msra.mxu0 %v6332_v22  ;;  %v1913_v22 = vld [vmem:[%s8525_s17 + $0x2ea0] sm:$0xff]  ;;  %v1984_v62 = vld [vmem:[%s8525_s17 + $0x30d8] sm:$0xff] }
 0x393   : > { %7421 = vmatpush1.bf16.msra.mxu1 %v7420_v23  ;;  %6335 = vmatprep.subr.bf16.mxu0 %v6334_v24  ;;  %v1911_v23 = vld [vmem:[%s8525_s17 + $0x2e90] sm:$0xff]  ;;  %v7442_v24 = vpack.c.bf16 %v1916_v17, %v1912_v16  ;;  %v6356_v30 = vpack.c.bf16 %v1913_v22, %v1909_v21  ;;  %v6374_v16 = vpack.c.bf16 %v1954_v11, %v1950_v10  ;;  %v1949_v17 = vld [vmem:[%s8525_s17 + $0x2fc0] sm:$0xff]  ;;  %v1958_v22 = vld [vmem:[%s8525_s17 + $0x3008] sm:$0xff] }
 0x394   : > { %7423 = vmatprep.subr.bf16.mxu1 %v7422_v28  ;;  %v1920_v28 = vld [vmem:[%s8525_s17 + $0x2ed8] sm:$0xff]  ;;  %v7444_v31 = vpack.c.bf16 %v1915_v25, %v1911_v23  ;;  %v1955_v21 = vld [vmem:[%s8525_s17 + $0x2ff0] sm:$0xff]  ;;  %v1962_v23 = vld [vmem:[%s8525_s17 + $0x3028] sm:$0xff] }
 0x395   : > { %v1964_v25 = vld [vmem:[%s8525_s17 + $0x3038] sm:$0xff] }
 0x396   : > { %6337 = vmatpush1.bf16.msra.mxu0 %v6336_v34  ;;  %v1921_v34 = vld [vmem:[%s8525_s17 + $0x2ee0] sm:$0xff]  ;;  %v1988_v63 = vld [vmem:[%s8525_s17 + $0x30f8] sm:$0xff] }
 0x397   : > { %7425 = vmatpush1.bf16.msra.mxu1 %v7424_v35  ;;  %6339 = vmatprep.subr.bf16.mxu0 %v6338_v36  ;;  %v1919_v35 = vld [vmem:[%s8525_s17 + $0x2ed0] sm:$0xff]  ;;  %v7446_v36 = vpack.c.bf16 %v1924_v29, %v1920_v28  ;;  %v6360_v42 = vpack.c.bf16 %v1921_v34, %v1917_v33  ;;  %v6378_v28 = vpack.c.bf16 %v1962_v23, %v1958_v22  ;;  %v1957_v29 = vld [vmem:[%s8525_s17 + $0x3000] sm:$0xff]  ;;  %v1966_v34 = vld [vmem:[%s8525_s17 + $0x3048] sm:$0xff] }
 0x398   : > { %7427 = vmatprep.subr.bf16.mxu1 %v7426_v40  ;;  %v1928_v40 = vld [vmem:[%s8525_s17 + $0x2f18] sm:$0xff]  ;;  %v7448_v43 = vpack.c.bf16 %v1923_v37, %v1919_v35  ;;  %v1963_v33 = vld [vmem:[%s8525_s17 + $0x3030] sm:$0xff]  ;;  %v1970_v35 = vld [vmem:[%s8525_s17 + $0x3068] sm:$0xff] }
 0x399   : > { %v1972_v37 = vld [vmem:[%s8525_s17 + $0x3078] sm:$0xff] }
 0x39a   : > { %6341 = vmatpush1.bf16.msra.mxu0 %v6340_v46  ;;  %v1929_v46 = vld [vmem:[%s8525_s17 + $0x2f20] sm:$0xff]  ;;  %v1992_v10 = vld [vmem:[%s8525_s17 + $0x3118] sm:$0xff] }
 0x39b   : > { %7429 = vmatpush1.bf16.msra.mxu1 %v7428_v47  ;;  %6343 = vmatprep.subr.bf16.mxu0 %v6342_v48  ;;  %v1927_v47 = vld [vmem:[%s8525_s17 + $0x2f10] sm:$0xff]  ;;  %v7450_v48 = vpack.c.bf16 %v1932_v41, %v1928_v40  ;;  %v6364_v54 = vpack.c.bf16 %v1929_v46, %v1925_v45  ;;  %v6382_v41 = vpack.c.bf16 %v1970_v35, %v1966_v34  ;;  %v1996_v11 = vld [vmem:[%s8525_s17 + $0x3138] sm:$0xff] }
 0x39c   : > { %7431 = vmatprep.subr.bf16.mxu1 %v7430_v52  ;;  %v1936_v52 = vld [vmem:[%s8525_s17 + $0x2f58] sm:$0xff]  ;;  %v7452_v55 = vpack.c.bf16 %v1931_v49, %v1927_v47  ;;  %v1971_v46 = vld [vmem:[%s8525_s17 + $0x3070] sm:$0xff]  ;;  %v1974_v47 = vld [vmem:[%s8525_s17 + $0x3088] sm:$0xff] }
 0x39d   : > { %v1976_v49 = vld [vmem:[%s8525_s17 + $0x3098] sm:$0xff] }
 0x39e   : > { %6345 = vmatpush1.bf16.msra.mxu0 %v6344_v58  ;;  %v1937_v58 = vld [vmem:[%s8525_s17 + $0x2f60] sm:$0xff]  ;;  %v2000_v22 = vld [vmem:[%s8525_s17 + $0x3158] sm:$0xff] }
 0x39f   : > { %7433 = vmatpush1.bf16.msra.mxu1 %v7432_v59  ;;  %6347 = vmatprep.subr.bf16.mxu0 %v6346_v60  ;;  %v1935_v59 = vld [vmem:[%s8525_s17 + $0x2f50] sm:$0xff]  ;;  %v7454_v60 = vpack.c.bf16 %v1940_v53, %v1936_v52  ;;  %v6368_v2 = vpack.c.bf16 %v1937_v58, %v1933_v57  ;;  %v7474_v58 = vpack.c.bf16 %v1980_v50, %v1976_v49  ;;  %v2004_v23 = vld [vmem:[%s8525_s17 + $0x3178] sm:$0xff] }
 0x3a0   : > { %7435 = vmatprep.subr.bf16.mxu1 %v7434_v0  ;;  %v1944_v0 = vld [vmem:[%s8525_s17 + $0x2f98] sm:$0xff]  ;;  %v7456_v3 = vpack.c.bf16 %v1939_v61, %v1935_v59  ;;  %v1975_v57 = vld [vmem:[%s8525_s17 + $0x3090] sm:$0xff]  ;;  %v1986_v61 = vld [vmem:[%s8525_s17 + $0x30e8] sm:$0xff] }
 0x3a1   : > { %v1979_v59 = vld [vmem:[%s8525_s17 + $0x30b0] sm:$0xff]  ;;  %v2008_v34 = vld [vmem:[%s8525_s17 + $0x3198] sm:$0xff] }
 0x3a2   : > { %6349 = vmatpush1.bf16.msra.mxu0 %v6348_v6  ;;  %v1945_v6 = vld [vmem:[%s8525_s17 + $0x2fa0] sm:$0xff]  ;;  %v2012_v35 = vld [vmem:[%s8525_s17 + $0x31b8] sm:$0xff] }
 0x3a3   : > { %7437 = vmatpush1.bf16.msra.mxu1 %v7436_v7  ;;  %6351 = vmatprep.subr.bf16.mxu0 %v6350_v8  ;;  %v1943_v7 = vld [vmem:[%s8525_s17 + $0x2f90] sm:$0xff]  ;;  %v7458_v8 = vpack.c.bf16 %v1948_v1, %v1944_v0  ;;  %v6372_v14 = vpack.c.bf16 %v1945_v6, %v1941_v5  ;;  %v7476_v1 = vpack.c.bf16 %v1979_v59, %v1975_v57  ;;  %v2026_v57 = vld [vmem:[%s8525_s17 + $0x3228] sm:$0xff]  ;;  %v2028_v59 = vld [vmem:[%s8525_s17 + $0x3238] sm:$0xff] }
 0x3a4   : > { %7439 = vmatprep.subr.bf16.mxu1 %v7438_v12  ;;  %v1952_v12 = vld [vmem:[%s8525_s17 + $0x2fd8] sm:$0xff]  ;;  %v7460_v15 = vpack.c.bf16 %v1947_v9, %v1943_v7  ;;  %v1983_v5 = vld [vmem:[%s8525_s17 + $0x30d0] sm:$0xff]  ;;  %v7478_v6 = vpack.c.bf16 %v1988_v63, %v1984_v62  ;;  %v1994_v9 = vld [vmem:[%s8525_s17 + $0x3128] sm:$0xff] }
 0x3a5   : > { %v1987_v7 = vld [vmem:[%s8525_s17 + $0x30f0] sm:$0xff]  ;;  %v2021_v63 = vld [vmem:[%s8525_s17 + $0x3200] sm:$0xff] }
 0x3a6   : > { %6353 = vmatpush1.bf16.msra.mxu0 %v6352_v18  ;;  %v1953_v18 = vld [vmem:[%s8525_s17 + $0x2fe0] sm:$0xff] }
 0x3a7   : > { %7441 = vmatpush1.bf16.msra.mxu1 %v7440_v19  ;;  %6355 = vmatprep.subr.bf16.mxu0 %v6354_v20  ;;  %v1951_v19 = vld [vmem:[%s8525_s17 + $0x2fd0] sm:$0xff]  ;;  %v7462_v20 = vpack.c.bf16 %v1956_v13, %v1952_v12  ;;  %v6376_v26 = vpack.c.bf16 %v1953_v18, %v1949_v17  ;;  %v7480_v13 = vpack.c.bf16 %v1987_v7, %v1983_v5  ;;  %v2034_v5 = vld [vmem:[%s8525_s17 + $0x3268] sm:$0xff]  ;;  %v2036_v7 = vld [vmem:[%s8525_s17 + $0x3278] sm:$0xff] }
 0x3a8   : > { %7443 = vmatprep.subr.bf16.mxu1 %v7442_v24  ;;  %v1960_v24 = vld [vmem:[%s8525_s17 + $0x3018] sm:$0xff]  ;;  %v7464_v27 = vpack.c.bf16 %v1955_v21, %v1951_v19  ;;  %v1991_v17 = vld [vmem:[%s8525_s17 + $0x3110] sm:$0xff]  ;;  %v7482_v18 = vpack.c.bf16 %v1996_v11, %v1992_v10  ;;  %v2002_v21 = vld [vmem:[%s8525_s17 + $0x3168] sm:$0xff] }
 0x3a9   : > { %v1995_v19 = vld [vmem:[%s8525_s17 + $0x3130] sm:$0xff]  ;;  %v2029_v11 = vld [vmem:[%s8525_s17 + $0x3240] sm:$0xff] }
 0x3aa   : > { %6357 = vmatpush1.bf16.msra.mxu0 %v6356_v30  ;;  %v1961_v30 = vld [vmem:[%s8525_s17 + $0x3020] sm:$0xff] }
 0x3ab   : > { %7445 = vmatpush1.bf16.msra.mxu1 %v7444_v31  ;;  %6359 = vmatprep.subr.bf16.mxu0 %v6358_v32  ;;  %v1959_v31 = vld [vmem:[%s8525_s17 + $0x3010] sm:$0xff]  ;;  %v7466_v32 = vpack.c.bf16 %v1964_v25, %v1960_v24  ;;  %v6380_v39 = vpack.c.bf16 %v1961_v30, %v1957_v29  ;;  %v7484_v25 = vpack.c.bf16 %v1995_v19, %v1991_v17  ;;  %v2042_v17 = vld [vmem:[%s8525_s17 + $0x32a8] sm:$0xff]  ;;  %v2044_v19 = vld [vmem:[%s8525_s17 + $0x32b8] sm:$0xff] }
 0x3ac   : > { %7447 = vmatprep.subr.bf16.mxu1 %v7446_v36  ;;  %v1968_v36 = vld [vmem:[%s8525_s17 + $0x3058] sm:$0xff]  ;;  %v7468_v40 = vpack.c.bf16 %v1963_v33, %v1959_v31  ;;  %v1999_v29 = vld [vmem:[%s8525_s17 + $0x3150] sm:$0xff]  ;;  %v7486_v30 = vpack.c.bf16 %v2004_v23, %v2000_v22  ;;  %v2010_v33 = vld [vmem:[%s8525_s17 + $0x31a8] sm:$0xff] }
 0x3ad   : > { %v7470_v45 = vpack.c.bf16 %v1972_v37, %v1968_v36  ;;  %v2003_v31 = vld [vmem:[%s8525_s17 + $0x3170] sm:$0xff]  ;;  %v2037_v23 = vld [vmem:[%s8525_s17 + $0x3280] sm:$0xff] }
 0x3ae   : > { %6361 = vmatpush1.bf16.msra.mxu0 %v6360_v42  ;;  %v1965_v42 = vld [vmem:[%s8525_s17 + $0x3040] sm:$0xff]  ;;  %v7488_v37 = vpack.c.bf16 %v2003_v31, %v1999_v29  ;;  %v2050_v29 = vld [vmem:[%s8525_s17 + $0x32e8] sm:$0xff]  ;;  %v2052_v31 = vld [vmem:[%s8525_s17 + $0x32f8] sm:$0xff] }
 0x3af   : > { %7449 = vmatpush1.bf16.msra.mxu1 %v7448_v43  ;;  %6363 = vmatprep.subr.bf16.mxu0 %v6362_v44  ;;  %v1969_v43 = vld [vmem:[%s8525_s17 + $0x3060] sm:$0xff]  ;;  %v1967_v44 = vld [vmem:[%s8525_s17 + $0x3050] sm:$0xff] }
 0x3b0   : > { %7451 = vmatprep.subr.bf16.mxu1 %v7450_v48  ;;  %v1978_v48 = vld [vmem:[%s8525_s17 + $0x30a8] sm:$0xff]  ;;  %v6384_v52 = vpack.c.bf16 %v1969_v43, %v1965_v42  ;;  %v7472_v53 = vpack.c.bf16 %v1971_v46, %v1967_v44  ;;  %v7490_v42 = vpack.c.bf16 %v2012_v35, %v2008_v34  ;;  %v2011_v43 = vld [vmem:[%s8525_s17 + $0x31b0] sm:$0xff]  ;;  %v2016_v46 = vld [vmem:[%s8525_s17 + $0x31d8] sm:$0xff] }
 0x3b1   : > { %v2014_v44 = vld [vmem:[%s8525_s17 + $0x31c8] sm:$0xff]  ;;  %v2045_v35 = vld [vmem:[%s8525_s17 + $0x32c0] sm:$0xff] }
 0x3b2   : > { %6365 = vmatpush1.bf16.msra.mxu0 %v6364_v54  ;;  %v6386_v54 = vpack.c.bf16 %v1978_v48, %v1974_v47  ;;  %v2020_v47 = vld [vmem:[%s8525_s17 + $0x31f8] sm:$0xff] }
 0x3b3   : > { %7453 = vmatpush1.bf16.msra.mxu1 %v7452_v55  ;;  %6367 = vmatprep.subr.bf16.mxu0 %v6366_v56  ;;  %v1973_v55 = vld [vmem:[%s8525_s17 + $0x3080] sm:$0xff] }
 0x3b4   : > { %7455 = vmatprep.subr.bf16.mxu1 %v7454_v60  ;;  %v1977_v56 = vld [vmem:[%s8525_s17 + $0x30a0] sm:$0xff]  ;;  %v1982_v60 = vld [vmem:[%s8525_s17 + $0x30c8] sm:$0xff] }
 0x3b5   : > { %v6388_v0 = vpack.c.bf16 %v1977_v56, %v1973_v55  ;;  %v2019_v55 = vld [vmem:[%s8525_s17 + $0x31f0] sm:$0xff]  ;;  %v2022_v56 = vld [vmem:[%s8525_s17 + $0x3208] sm:$0xff] }
 0x3b6   : > { %6369 = vmatpush1.bf16.msra.mxu0 %v6368_v2  ;;  %v6390_v2 = vpack.c.bf16 %v1986_v61, %v1982_v60  ;;  %v6410_v62 = vpack.c.bf16 %v2026_v57, %v2022_v56 }
 0x3b7   : > { %7457 = vmatpush1.bf16.msra.mxu1 %v7456_v3  ;;  %6371 = vmatprep.subr.bf16.mxu0 %v6370_v4  ;;  %v1981_v3 = vld [vmem:[%s8525_s17 + $0x30c0] sm:$0xff] }
 0x3b8   : > { %7459 = vmatprep.subr.bf16.mxu1 %v7458_v8  ;;  %v1985_v4 = vld [vmem:[%s8525_s17 + $0x30e0] sm:$0xff]  ;;  %v1990_v8 = vld [vmem:[%s8525_s17 + $0x3108] sm:$0xff] }
 0x3b9   : > { %v6392_v12 = vpack.c.bf16 %v1985_v4, %v1981_v3  ;;  %v2027_v3 = vld [vmem:[%s8525_s17 + $0x3230] sm:$0xff]  ;;  %v2030_v4 = vld [vmem:[%s8525_s17 + $0x3248] sm:$0xff] }
 0x3ba   : > { %6373 = vmatpush1.bf16.msra.mxu0 %v6372_v14  ;;  %v6394_v14 = vpack.c.bf16 %v1994_v9, %v1990_v8  ;;  %v6414_v10 = vpack.c.bf16 %v2034_v5, %v2030_v4 }
 0x3bb   : > { %7461 = vmatpush1.bf16.msra.mxu1 %v7460_v15  ;;  %6375 = vmatprep.subr.bf16.mxu0 %v6374_v16  ;;  %v1989_v15 = vld [vmem:[%s8525_s17 + $0x3100] sm:$0xff] }
 0x3bc   : > { %7463 = vmatprep.subr.bf16.mxu1 %v7462_v20  ;;  %v1993_v16 = vld [vmem:[%s8525_s17 + $0x3120] sm:$0xff]  ;;  %v1998_v20 = vld [vmem:[%s8525_s17 + $0x3148] sm:$0xff] }
 0x3bd   : > { %v6396_v24 = vpack.c.bf16 %v1993_v16, %v1989_v15  ;;  %v2035_v15 = vld [vmem:[%s8525_s17 + $0x3270] sm:$0xff]  ;;  %v2038_v16 = vld [vmem:[%s8525_s17 + $0x3288] sm:$0xff] }
 0x3be   : > { %6377 = vmatpush1.bf16.msra.mxu0 %v6376_v26  ;;  %v6398_v26 = vpack.c.bf16 %v2002_v21, %v1998_v20  ;;  %v6418_v22 = vpack.c.bf16 %v2042_v17, %v2038_v16 }
 0x3bf   : > { %7465 = vmatpush1.bf16.msra.mxu1 %v7464_v27  ;;  %6379 = vmatprep.subr.bf16.mxu0 %v6378_v28  ;;  %v1997_v27 = vld [vmem:[%s8525_s17 + $0x3140] sm:$0xff] }
 0x3c0   : > { %7467 = vmatprep.subr.bf16.mxu1 %v7466_v32  ;;  %v2001_v28 = vld [vmem:[%s8525_s17 + $0x3160] sm:$0xff]  ;;  %v2006_v32 = vld [vmem:[%s8525_s17 + $0x3188] sm:$0xff] }
 0x3c1   : > { %3443 = vmatmul.mubr.f32.vlgmr.msra.gmra.mrb[0].mxu0 %v409_v38  ;;  %v6400_v36 = vpack.c.bf16 %v2001_v28, %v1997_v27  ;;  %v2043_v27 = vld [vmem:[%s8525_s17 + $0x32b0] sm:$0xff]  ;;  %v2046_v28 = vld [vmem:[%s8525_s17 + $0x32c8] sm:$0xff] }
 0x3c2   : > { %6381 = vmatpush1.bf16.msra.mxu0 %v6380_v39  ;;  %4650 = vmatmul.mubr.f32.vlgmr.msra.gmra.mrb[0].mxu1 %v409_v38  ;;  %v6402_v38 = vpack.c.bf16 %v2010_v33, %v2006_v32  ;;  %v2005_v39 = vld [vmem:[%s8525_s17 + $0x3180] sm:$0xff]  ;;  %v6422_v34 = vpack.c.bf16 %v2050_v29, %v2046_v28 }
 0x3c3   : > { %7469 = vmatpush1.bf16.msra.mxu1 %v7468_v40  ;;  %6383 = vmatprep.subr.bf16.mxu0 %v6382_v41  ;;  %v2009_v40 = vld [vmem:[%s8525_s17 + $0x31a0] sm:$0xff]  ;;  %v2007_v41 = vld [vmem:[%s8525_s17 + $0x3190] sm:$0xff] }
 0x3c4   : > { %7471 = vmatprep.subr.bf16.mxu1 %v7470_v45  ;;  %3513 = vmatprep.mubr.f32.mxu0 %v412_v51  ;;  %v2018_v45 = vld [vmem:[%s8525_s17 + $0x31e8] sm:$0xff]  ;;  %v6404_v48 = vpack.c.bf16 %v2009_v40, %v2005_v39  ;;  %v7492_v49 = vpack.c.bf16 %v2011_v43, %v2007_v41  ;;  %v2051_v39 = vld [vmem:[%s8525_s17 + $0x32f0] sm:$0xff]  ;;  %v2060_v43 = vld [vmem:[%s8525_s17 + $0x3338] sm:$0xff] }
 0x3c5   : > { %4720 = vmatprep.mubr.f32.mxu1 %v412_v51  ;;  %v6406_v50 = vpack.c.bf16 %v2018_v45, %v2014_v44  ;;  %v2013_v51 = vld [vmem:[%s8525_s17 + $0x31c0] sm:$0xff]  ;;  %v2054_v40 = vld [vmem:[%s8525_s17 + $0x3308] sm:$0xff] }
 0x3c6   : > { %6385 = vmatpush1.bf16.msra.mxu0 %v6384_v52  ;;  %v2017_v52 = vld [vmem:[%s8525_s17 + $0x31e0] sm:$0xff]  ;;  %v2058_v41 = vld [vmem:[%s8525_s17 + $0x3328] sm:$0xff] }
 0x3c7   : > { %7473 = vmatpush1.bf16.msra.mxu1 %v7472_v53  ;;  %6387 = vmatprep.subr.bf16.mxu0 %v6386_v54  ;;  %v2015_v53 = vld [vmem:[%s8525_s17 + $0x31d0] sm:$0xff]  ;;  %v7494_v54 = vpack.c.bf16 %v2020_v47, %v2016_v46  ;;  %v6408_v60 = vpack.c.bf16 %v2017_v52, %v2013_v51  ;;  %v6426_v46 = vpack.c.bf16 %v2058_v41, %v2054_v40  ;;  %v2053_v47 = vld [vmem:[%s8525_s17 + $0x3300] sm:$0xff]  ;;  %v2062_v52 = vld [vmem:[%s8525_s17 + $0x3348] sm:$0xff] }
 0x3c8   : > { %7475 = vmatprep.subr.bf16.mxu1 %v7474_v58  ;;  %v2024_v58 = vld [vmem:[%s8525_s17 + $0x3218] sm:$0xff]  ;;  %v7496_v61 = vpack.c.bf16 %v2019_v55, %v2015_v53  ;;  %v2059_v51 = vld [vmem:[%s8525_s17 + $0x3330] sm:$0xff]  ;;  %v2066_v53 = vld [vmem:[%s8525_s17 + $0x3368] sm:$0xff] }
 0x3c9   : > { %v2068_v55 = vld [vmem:[%s8525_s17 + $0x3378] sm:$0xff]  ;;  %v411_v40 = vld [vmem:[%s8547_s14 + $0xc0] sm:$0xff] }
 0x3ca   : > { %6389 = vmatpush1.bf16.msra.mxu0 %v6388_v0  ;;  %v2025_v0 = vld [vmem:[%s8525_s17 + $0x3220] sm:$0xff] }
 0x3cb   : > { %7477 = vmatpush1.bf16.msra.mxu1 %v7476_v1  ;;  %6391 = vmatprep.subr.bf16.mxu0 %v6390_v2  ;;  %v2023_v1 = vld [vmem:[%s8525_s17 + $0x3210] sm:$0xff]  ;;  %v7498_v2 = vpack.c.bf16 %v2028_v59, %v2024_v58  ;;  %v6412_v8 = vpack.c.bf16 %v2025_v0, %v2021_v63  ;;  %v6430_v58 = vpack.c.bf16 %v2066_v53, %v2062_v52  ;;  %v2061_v59 = vld [vmem:[%s8525_s17 + $0x3340] sm:$0xff]  ;;  %v2070_v0 = vld [vmem:[%s8525_s17 + $0x3388] sm:$0xff] }
 0x3cc   : > { %7479 = vmatprep.subr.bf16.mxu1 %v7478_v6  ;;  %v2032_v6 = vld [vmem:[%s8525_s17 + $0x3258] sm:$0xff]  ;;  %v7500_v9 = vpack.c.bf16 %v2027_v3, %v2023_v1  ;;  %v2067_v63 = vld [vmem:[%s8525_s17 + $0x3370] sm:$0xff]  ;;  %v2074_v1 = vld [vmem:[%s8525_s17 + $0x33a8] sm:$0xff] }
 0x3cd   : > { %v2076_v3 = vld [vmem:[%s8525_s17 + $0x33b8] sm:$0xff] }
 0x3ce   : > { %6393 = vmatpush1.bf16.msra.mxu0 %v6392_v12  ;;  %v2033_v12 = vld [vmem:[%s8525_s17 + $0x3260] sm:$0xff]  ;;  %v2108_v52 = vld [vmem:[%s8525_s17 + $0x34b8] sm:$0xff] }
 0x3cf   : > { %7481 = vmatpush1.bf16.msra.mxu1 %v7480_v13  ;;  %6395 = vmatprep.subr.bf16.mxu0 %v6394_v14  ;;  %v2031_v13 = vld [vmem:[%s8525_s17 + $0x3250] sm:$0xff]  ;;  %v7502_v14 = vpack.c.bf16 %v2036_v7, %v2032_v6  ;;  %v6416_v20 = vpack.c.bf16 %v2033_v12, %v2029_v11  ;;  %v6434_v6 = vpack.c.bf16 %v2074_v1, %v2070_v0  ;;  %v2069_v7 = vld [vmem:[%s8525_s17 + $0x3380] sm:$0xff]  ;;  %v2078_v12 = vld [vmem:[%s8525_s17 + $0x33c8] sm:$0xff] }
 0x3d0   : > { %7483 = vmatprep.subr.bf16.mxu1 %v7482_v18  ;;  %v2040_v18 = vld [vmem:[%s8525_s17 + $0x3298] sm:$0xff]  ;;  %v7504_v21 = vpack.c.bf16 %v2035_v15, %v2031_v13  ;;  %v2075_v11 = vld [vmem:[%s8525_s17 + $0x33b0] sm:$0xff]  ;;  %v2082_v13 = vld [vmem:[%s8525_s17 + $0x33e8] sm:$0xff] }
 0x3d1   : > { %v2084_v15 = vld [vmem:[%s8525_s17 + $0x33f8] sm:$0xff] }
 0x3d2   : > { %6397 = vmatpush1.bf16.msra.mxu0 %v6396_v24  ;;  %v2041_v24 = vld [vmem:[%s8525_s17 + $0x32a0] sm:$0xff]  ;;  %v414_v53 = vld [vmem:[%s8547_s14 + $0xd8] sm:$0xff] }
 0x3d3   : > { %7485 = vmatpush1.bf16.msra.mxu1 %v7484_v25  ;;  %6399 = vmatprep.subr.bf16.mxu0 %v6398_v26  ;;  %v2039_v25 = vld [vmem:[%s8525_s17 + $0x3290] sm:$0xff]  ;;  %v7506_v26 = vpack.c.bf16 %v2044_v19, %v2040_v18  ;;  %v6420_v32 = vpack.c.bf16 %v2041_v24, %v2037_v23  ;;  %v6438_v18 = vpack.c.bf16 %v2082_v13, %v2078_v12  ;;  %v2077_v19 = vld [vmem:[%s8525_s17 + $0x33c0] sm:$0xff]  ;;  %v2086_v24 = vld [vmem:[%s8525_s17 + $0x3408] sm:$0xff] }
 0x3d4   : > { %7487 = vmatprep.subr.bf16.mxu1 %v7486_v30  ;;  %v2048_v30 = vld [vmem:[%s8525_s17 + $0x32d8] sm:$0xff]  ;;  %v7508_v33 = vpack.c.bf16 %v2043_v27, %v2039_v25  ;;  %v2083_v23 = vld [vmem:[%s8525_s17 + $0x33f0] sm:$0xff]  ;;  %v2090_v25 = vld [vmem:[%s8525_s17 + $0x3428] sm:$0xff] }
 0x3d5   : > { %v2092_v27 = vld [vmem:[%s8525_s17 + $0x3438] sm:$0xff] }
 0x3d6   : > { %6401 = vmatpush1.bf16.msra.mxu0 %v6400_v36  ;;  %v2049_v36 = vld [vmem:[%s8525_s17 + $0x32e0] sm:$0xff]  ;;  %v2112_v0 = vld [vmem:[%s8525_s17 + $0x34d8] sm:$0xff] }
 0x3d7   : > { %7489 = vmatpush1.bf16.msra.mxu1 %v7488_v37  ;;  %6403 = vmatprep.subr.bf16.mxu0 %v6402_v38  ;;  %v2047_v37 = vld [vmem:[%s8525_s17 + $0x32d0] sm:$0xff]  ;;  %v7510_v38 = vpack.c.bf16 %v2052_v31, %v2048_v30  ;;  %v6424_v44 = vpack.c.bf16 %v2049_v36, %v2045_v35  ;;  %v6442_v30 = vpack.c.bf16 %v2090_v25, %v2086_v24  ;;  %v2085_v31 = vld [vmem:[%s8525_s17 + $0x3400] sm:$0xff]  ;;  %v2094_v36 = vld [vmem:[%s8525_s17 + $0x3448] sm:$0xff] }
 0x3d8   : > { %7491 = vmatprep.subr.bf16.mxu1 %v7490_v42  ;;  %v2056_v42 = vld [vmem:[%s8525_s17 + $0x3318] sm:$0xff]  ;;  %v7512_v45 = vpack.c.bf16 %v2051_v39, %v2047_v37  ;;  %v2091_v35 = vld [vmem:[%s8525_s17 + $0x3430] sm:$0xff]  ;;  %v2098_v37 = vld [vmem:[%s8525_s17 + $0x3468] sm:$0xff] }
 0x3d9   : > { %v2100_v39 = vld [vmem:[%s8525_s17 + $0x3478] sm:$0xff] }
 0x3da   : > { %6405 = vmatpush1.bf16.msra.mxu0 %v6404_v48  ;;  %v2057_v48 = vld [vmem:[%s8525_s17 + $0x3320] sm:$0xff]  ;;  %v2116_v1 = vld [vmem:[%s8525_s17 + $0x34f8] sm:$0xff] }
 0x3db   : > { %7493 = vmatpush1.bf16.msra.mxu1 %v7492_v49  ;;  %6407 = vmatprep.subr.bf16.mxu0 %v6406_v50  ;;  %v2055_v49 = vld [vmem:[%s8525_s17 + $0x3310] sm:$0xff]  ;;  %v7514_v50 = vpack.c.bf16 %v2060_v43, %v2056_v42  ;;  %v6428_v56 = vpack.c.bf16 %v2057_v48, %v2053_v47  ;;  %v6446_v43 = vpack.c.bf16 %v2098_v37, %v2094_v36  ;;  %v2120_v12 = vld [vmem:[%s8525_s17 + $0x3518] sm:$0xff] }
 0x3dc   : > { %7495 = vmatprep.subr.bf16.mxu1 %v7494_v54  ;;  %v2064_v54 = vld [vmem:[%s8525_s17 + $0x3358] sm:$0xff]  ;;  %v7516_v57 = vpack.c.bf16 %v2059_v51, %v2055_v49  ;;  %v2099_v48 = vld [vmem:[%s8525_s17 + $0x3470] sm:$0xff]  ;;  %v2102_v49 = vld [vmem:[%s8525_s17 + $0x3488] sm:$0xff] }
 0x3dd   : > { %v2104_v51 = vld [vmem:[%s8525_s17 + $0x3498] sm:$0xff] }
 0x3de   : > { %6409 = vmatpush1.bf16.msra.mxu0 %v6408_v60  ;;  %v2065_v60 = vld [vmem:[%s8525_s17 + $0x3360] sm:$0xff]  ;;  %v2124_v13 = vld [vmem:[%s8525_s17 + $0x3538] sm:$0xff] }
 0x3df   : > { %7497 = vmatpush1.bf16.msra.mxu1 %v7496_v61  ;;  %6411 = vmatprep.subr.bf16.mxu0 %v6410_v62  ;;  %v2063_v61 = vld [vmem:[%s8525_s17 + $0x3350] sm:$0xff]  ;;  %v7518_v62 = vpack.c.bf16 %v2068_v55, %v2064_v54  ;;  %v6432_v4 = vpack.c.bf16 %v2065_v60, %v2061_v59  ;;  %v7538_v60 = vpack.c.bf16 %v2108_v52, %v2104_v51  ;;  %v2128_v24 = vld [vmem:[%s8525_s17 + $0x3558] sm:$0xff] }
 0x3e0   : > { %7499 = vmatprep.subr.bf16.mxu1 %v7498_v2  ;;  %v2072_v2 = vld [vmem:[%s8525_s17 + $0x3398] sm:$0xff]  ;;  %v7520_v5 = vpack.c.bf16 %v2067_v63, %v2063_v61  ;;  %v2103_v59 = vld [vmem:[%s8525_s17 + $0x3490] sm:$0xff]  ;;  %v2114_v63 = vld [vmem:[%s8525_s17 + $0x34e8] sm:$0xff] }
 0x3e1   : > { %v2107_v61 = vld [vmem:[%s8525_s17 + $0x34b0] sm:$0xff]  ;;  %v2132_v25 = vld [vmem:[%s8525_s17 + $0x3578] sm:$0xff] }
 0x3e2   : > { %6413 = vmatpush1.bf16.msra.mxu0 %v6412_v8  ;;  %v2073_v8 = vld [vmem:[%s8525_s17 + $0x33a0] sm:$0xff]  ;;  %v2136_v36 = vld [vmem:[%s8525_s17 + $0x3598] sm:$0xff] }
 0x3e3   : > { %7501 = vmatpush1.bf16.msra.mxu1 %v7500_v9  ;;  %6415 = vmatprep.subr.bf16.mxu0 %v6414_v10  ;;  %v2071_v9 = vld [vmem:[%s8525_s17 + $0x3390] sm:$0xff]  ;;  %v7522_v10 = vpack.c.bf16 %v2076_v3, %v2072_v2  ;;  %v6436_v16 = vpack.c.bf16 %v2073_v8, %v2069_v7  ;;  %v7540_v3 = vpack.c.bf16 %v2107_v61, %v2103_v59  ;;  %v2140_v37 = vld [vmem:[%s8525_s17 + $0x35b8] sm:$0xff]  ;;  %v2154_v59 = vld [vmem:[%s8525_s17 + $0x3628] sm:$0xff] }
 0x3e4   : > { %7503 = vmatprep.subr.bf16.mxu1 %v7502_v14  ;;  %v2080_v14 = vld [vmem:[%s8525_s17 + $0x33d8] sm:$0xff]  ;;  %v7524_v17 = vpack.c.bf16 %v2075_v11, %v2071_v9  ;;  %v2111_v7 = vld [vmem:[%s8525_s17 + $0x34d0] sm:$0xff]  ;;  %v7542_v8 = vpack.c.bf16 %v2116_v1, %v2112_v0  ;;  %v2122_v11 = vld [vmem:[%s8525_s17 + $0x3528] sm:$0xff] }
 0x3e5   : > { %v2115_v9 = vld [vmem:[%s8525_s17 + $0x34f0] sm:$0xff]  ;;  %v2156_v61 = vld [vmem:[%s8525_s17 + $0x3638] sm:$0xff]  ;;  %v2149_v1 = vld [vmem:[%s8525_s17 + $0x3600] sm:$0xff] }
 0x3e6   : > { %6417 = vmatpush1.bf16.msra.mxu0 %v6416_v20  ;;  %v2081_v20 = vld [vmem:[%s8525_s17 + $0x33e0] sm:$0xff] }
 0x3e7   : > { %7505 = vmatpush1.bf16.msra.mxu1 %v7504_v21  ;;  %6419 = vmatprep.subr.bf16.mxu0 %v6418_v22  ;;  %v2079_v21 = vld [vmem:[%s8525_s17 + $0x33d0] sm:$0xff]  ;;  %v7526_v22 = vpack.c.bf16 %v2084_v15, %v2080_v14  ;;  %v6440_v28 = vpack.c.bf16 %v2081_v20, %v2077_v19  ;;  %v7544_v15 = vpack.c.bf16 %v2115_v9, %v2111_v7  ;;  %v2162_v7 = vld [vmem:[%s8525_s17 + $0x3668] sm:$0xff]  ;;  %v2164_v9 = vld [vmem:[%s8525_s17 + $0x3678] sm:$0xff] }
 0x3e8   : > { %7507 = vmatprep.subr.bf16.mxu1 %v7506_v26  ;;  %v2088_v26 = vld [vmem:[%s8525_s17 + $0x3418] sm:$0xff]  ;;  %v7528_v29 = vpack.c.bf16 %v2083_v23, %v2079_v21  ;;  %v2119_v19 = vld [vmem:[%s8525_s17 + $0x3510] sm:$0xff]  ;;  %v7546_v20 = vpack.c.bf16 %v2124_v13, %v2120_v12  ;;  %v2130_v23 = vld [vmem:[%s8525_s17 + $0x3568] sm:$0xff] }
 0x3e9   : > { %v2123_v21 = vld [vmem:[%s8525_s17 + $0x3530] sm:$0xff]  ;;  %v2157_v13 = vld [vmem:[%s8525_s17 + $0x3640] sm:$0xff] }
 0x3ea   : > { %6421 = vmatpush1.bf16.msra.mxu0 %v6420_v32  ;;  %v2089_v32 = vld [vmem:[%s8525_s17 + $0x3420] sm:$0xff] }
 0x3eb   : > { %7509 = vmatpush1.bf16.msra.mxu1 %v7508_v33  ;;  %6423 = vmatprep.subr.bf16.mxu0 %v6422_v34  ;;  %v2087_v33 = vld [vmem:[%s8525_s17 + $0x3410] sm:$0xff]  ;;  %v7530_v34 = vpack.c.bf16 %v2092_v27, %v2088_v26  ;;  %v6444_v41 = vpack.c.bf16 %v2089_v32, %v2085_v31  ;;  %v7548_v27 = vpack.c.bf16 %v2123_v21, %v2119_v19  ;;  %v2170_v19 = vld [vmem:[%s8525_s17 + $0x36a8] sm:$0xff]  ;;  %v2172_v21 = vld [vmem:[%s8525_s17 + $0x36b8] sm:$0xff] }
 0x3ec   : > { %7511 = vmatprep.subr.bf16.mxu1 %v7510_v38  ;;  %v2096_v38 = vld [vmem:[%s8525_s17 + $0x3458] sm:$0xff]  ;;  %v7532_v42 = vpack.c.bf16 %v2091_v35, %v2087_v33  ;;  %v2127_v31 = vld [vmem:[%s8525_s17 + $0x3550] sm:$0xff]  ;;  %v7550_v32 = vpack.c.bf16 %v2132_v25, %v2128_v24  ;;  %v2138_v35 = vld [vmem:[%s8525_s17 + $0x35a8] sm:$0xff] }
 0x3ed   : > { %v7534_v47 = vpack.c.bf16 %v2100_v39, %v2096_v38  ;;  %v2131_v33 = vld [vmem:[%s8525_s17 + $0x3570] sm:$0xff]  ;;  %v2165_v25 = vld [vmem:[%s8525_s17 + $0x3680] sm:$0xff] }
 0x3ee   : > { %6425 = vmatpush1.bf16.msra.mxu0 %v6424_v44  ;;  %v2093_v44 = vld [vmem:[%s8525_s17 + $0x3440] sm:$0xff]  ;;  %v7552_v39 = vpack.c.bf16 %v2131_v33, %v2127_v31  ;;  %v2178_v31 = vld [vmem:[%s8525_s17 + $0x36e8] sm:$0xff]  ;;  %v2180_v33 = vld [vmem:[%s8525_s17 + $0x36f8] sm:$0xff] }
 0x3ef   : > { %7513 = vmatpush1.bf16.msra.mxu1 %v7512_v45  ;;  %6427 = vmatprep.subr.bf16.mxu0 %v6426_v46  ;;  %v2097_v45 = vld [vmem:[%s8525_s17 + $0x3460] sm:$0xff]  ;;  %v2095_v46 = vld [vmem:[%s8525_s17 + $0x3450] sm:$0xff] }
 0x3f0   : > { %7515 = vmatprep.subr.bf16.mxu1 %v7514_v50  ;;  %v2106_v50 = vld [vmem:[%s8525_s17 + $0x34a8] sm:$0xff]  ;;  %v6448_v54 = vpack.c.bf16 %v2097_v45, %v2093_v44  ;;  %v7536_v55 = vpack.c.bf16 %v2099_v48, %v2095_v46  ;;  %v7554_v44 = vpack.c.bf16 %v2140_v37, %v2136_v36  ;;  %v2139_v45 = vld [vmem:[%s8525_s17 + $0x35b0] sm:$0xff]  ;;  %v2144_v48 = vld [vmem:[%s8525_s17 + $0x35d8] sm:$0xff] }
 0x3f1   : > { %v2142_v46 = vld [vmem:[%s8525_s17 + $0x35c8] sm:$0xff]  ;;  %v2173_v37 = vld [vmem:[%s8525_s17 + $0x36c0] sm:$0xff] }
 0x3f2   : > { %6429 = vmatpush1.bf16.msra.mxu0 %v6428_v56  ;;  %v6450_v56 = vpack.c.bf16 %v2106_v50, %v2102_v49  ;;  %v2148_v49 = vld [vmem:[%s8525_s17 + $0x35f8] sm:$0xff] }
 0x3f3   : > { %7517 = vmatpush1.bf16.msra.mxu1 %v7516_v57  ;;  %6431 = vmatprep.subr.bf16.mxu0 %v6430_v58  ;;  %v2101_v57 = vld [vmem:[%s8525_s17 + $0x3480] sm:$0xff] }
 0x3f4   : > { %7519 = vmatprep.subr.bf16.mxu1 %v7518_v62  ;;  %v2105_v58 = vld [vmem:[%s8525_s17 + $0x34a0] sm:$0xff]  ;;  %v2110_v62 = vld [vmem:[%s8525_s17 + $0x34c8] sm:$0xff] }
 0x3f5   : > { %v6452_v2 = vpack.c.bf16 %v2105_v58, %v2101_v57  ;;  %v2147_v57 = vld [vmem:[%s8525_s17 + $0x35f0] sm:$0xff]  ;;  %v2150_v58 = vld [vmem:[%s8525_s17 + $0x3608] sm:$0xff] }
 0x3f6   : > { %6433 = vmatpush1.bf16.msra.mxu0 %v6432_v4  ;;  %v6454_v4 = vpack.c.bf16 %v2114_v63, %v2110_v62  ;;  %v6474_v0 = vpack.c.bf16 %v2154_v59, %v2150_v58 }
 0x3f7   : > { %7521 = vmatpush1.bf16.msra.mxu1 %v7520_v5  ;;  %6435 = vmatprep.subr.bf16.mxu0 %v6434_v6  ;;  %v2109_v5 = vld [vmem:[%s8525_s17 + $0x34c0] sm:$0xff] }
 0x3f8   : > { %7523 = vmatprep.subr.bf16.mxu1 %v7522_v10  ;;  %v2113_v6 = vld [vmem:[%s8525_s17 + $0x34e0] sm:$0xff]  ;;  %v2118_v10 = vld [vmem:[%s8525_s17 + $0x3508] sm:$0xff] }
 0x3f9   : > { %v6456_v14 = vpack.c.bf16 %v2113_v6, %v2109_v5  ;;  %v2155_v5 = vld [vmem:[%s8525_s17 + $0x3630] sm:$0xff]  ;;  %v2158_v6 = vld [vmem:[%s8525_s17 + $0x3648] sm:$0xff] }
 0x3fa   : > { %6437 = vmatpush1.bf16.msra.mxu0 %v6436_v16  ;;  %v6458_v16 = vpack.c.bf16 %v2122_v11, %v2118_v10  ;;  %v6478_v12 = vpack.c.bf16 %v2162_v7, %v2158_v6 }
 0x3fb   : > { %7525 = vmatpush1.bf16.msra.mxu1 %v7524_v17  ;;  %6439 = vmatprep.subr.bf16.mxu0 %v6438_v18  ;;  %v2117_v17 = vld [vmem:[%s8525_s17 + $0x3500] sm:$0xff] }
 0x3fc   : > { %7527 = vmatprep.subr.bf16.mxu1 %v7526_v22  ;;  %v2121_v18 = vld [vmem:[%s8525_s17 + $0x3520] sm:$0xff]  ;;  %v2126_v22 = vld [vmem:[%s8525_s17 + $0x3548] sm:$0xff] }
 0x3fd   : > { %v6460_v26 = vpack.c.bf16 %v2121_v18, %v2117_v17  ;;  %v2163_v17 = vld [vmem:[%s8525_s17 + $0x3670] sm:$0xff]  ;;  %v2166_v18 = vld [vmem:[%s8525_s17 + $0x3688] sm:$0xff] }
 0x3fe   : > { %6441 = vmatpush1.bf16.msra.mxu0 %v6440_v28  ;;  %v6462_v28 = vpack.c.bf16 %v2130_v23, %v2126_v22  ;;  %v6482_v24 = vpack.c.bf16 %v2170_v19, %v2166_v18 }
 0x3ff   : > { %7529 = vmatpush1.bf16.msra.mxu1 %v7528_v29  ;;  %6443 = vmatprep.subr.bf16.mxu0 %v6442_v30  ;;  %v2125_v29 = vld [vmem:[%s8525_s17 + $0x3540] sm:$0xff] }
 0x400   : > { %7531 = vmatprep.subr.bf16.mxu1 %v7530_v34  ;;  %v2129_v30 = vld [vmem:[%s8525_s17 + $0x3560] sm:$0xff]  ;;  %v2134_v34 = vld [vmem:[%s8525_s17 + $0x3588] sm:$0xff] }
 0x401   : > { %3514 = vmatmul.mubr.f32.vlgmr.msra.gmra.mrb[0].mxu0 %v411_v40  ;;  %v6464_v38 = vpack.c.bf16 %v2129_v30, %v2125_v29  ;;  %v2171_v29 = vld [vmem:[%s8525_s17 + $0x36b0] sm:$0xff]  ;;  %v2174_v30 = vld [vmem:[%s8525_s17 + $0x36c8] sm:$0xff] }
 0x402   : > { %6445 = vmatpush1.bf16.msra.mxu0 %v6444_v41  ;;  %4721 = vmatmul.mubr.f32.vlgmr.msra.gmra.mrb[0].mxu1 %v411_v40  ;;  %v6466_v40 = vpack.c.bf16 %v2138_v35, %v2134_v34  ;;  %v2133_v41 = vld [vmem:[%s8525_s17 + $0x3580] sm:$0xff]  ;;  %v6486_v36 = vpack.c.bf16 %v2178_v31, %v2174_v30 }
 0x403   : > { %7533 = vmatpush1.bf16.msra.mxu1 %v7532_v42  ;;  %6447 = vmatprep.subr.bf16.mxu0 %v6446_v43  ;;  %v2137_v42 = vld [vmem:[%s8525_s17 + $0x35a0] sm:$0xff]  ;;  %v2135_v43 = vld [vmem:[%s8525_s17 + $0x3590] sm:$0xff] }
 0x404   : > { %7535 = vmatprep.subr.bf16.mxu1 %v7534_v47  ;;  %3584 = vmatprep.mubr.f32.mxu0 %v414_v53  ;;  %v2146_v47 = vld [vmem:[%s8525_s17 + $0x35e8] sm:$0xff]  ;;  %v6468_v50 = vpack.c.bf16 %v2137_v42, %v2133_v41  ;;  %v7556_v51 = vpack.c.bf16 %v2139_v45, %v2135_v43  ;;  %v2179_v41 = vld [vmem:[%s8525_s17 + $0x36f0] sm:$0xff]  ;;  %v2188_v45 = vld [vmem:[%s8525_s17 + $0x3738] sm:$0xff] }
 0x405   : > { %4791 = vmatprep.mubr.f32.mxu1 %v414_v53  ;;  %v6470_v52 = vpack.c.bf16 %v2146_v47, %v2142_v46  ;;  %v2141_v53 = vld [vmem:[%s8525_s17 + $0x35c0] sm:$0xff]  ;;  %v2182_v42 = vld [vmem:[%s8525_s17 + $0x3708] sm:$0xff] }
 0x406   : > { %6449 = vmatpush1.bf16.msra.mxu0 %v6448_v54  ;;  %v2145_v54 = vld [vmem:[%s8525_s17 + $0x35e0] sm:$0xff]  ;;  %v2186_v43 = vld [vmem:[%s8525_s17 + $0x3728] sm:$0xff] }
 0x407   : > { %7537 = vmatpush1.bf16.msra.mxu1 %v7536_v55  ;;  %6451 = vmatprep.subr.bf16.mxu0 %v6450_v56  ;;  %v2143_v55 = vld [vmem:[%s8525_s17 + $0x35d0] sm:$0xff]  ;;  %v7558_v56 = vpack.c.bf16 %v2148_v49, %v2144_v48  ;;  %v6472_v62 = vpack.c.bf16 %v2145_v54, %v2141_v53  ;;  %v6490_v48 = vpack.c.bf16 %v2186_v43, %v2182_v42  ;;  %v2181_v49 = vld [vmem:[%s8525_s17 + $0x3700] sm:$0xff]  ;;  %v2190_v54 = vld [vmem:[%s8525_s17 + $0x3748] sm:$0xff] }
 0x408   : > { %7539 = vmatprep.subr.bf16.mxu1 %v7538_v60  ;;  %v2152_v60 = vld [vmem:[%s8525_s17 + $0x3618] sm:$0xff]  ;;  %v7560_v63 = vpack.c.bf16 %v2147_v57, %v2143_v55  ;;  %v2187_v53 = vld [vmem:[%s8525_s17 + $0x3730] sm:$0xff]  ;;  %v2194_v55 = vld [vmem:[%s8525_s17 + $0x3768] sm:$0xff] }
 0x409   : > { %v2196_v57 = vld [vmem:[%s8525_s17 + $0x3778] sm:$0xff]  ;;  %v413_v42 = vld [vmem:[%s8547_s14 + $0xd0] sm:$0xff] }
 0x40a   : > { %6453 = vmatpush1.bf16.msra.mxu0 %v6452_v2  ;;  %v2153_v2 = vld [vmem:[%s8525_s17 + $0x3620] sm:$0xff] }
 0x40b   : > { %7541 = vmatpush1.bf16.msra.mxu1 %v7540_v3  ;;  %6455 = vmatprep.subr.bf16.mxu0 %v6454_v4  ;;  %v2151_v3 = vld [vmem:[%s8525_s17 + $0x3610] sm:$0xff]  ;;  %v7562_v4 = vpack.c.bf16 %v2156_v61, %v2152_v60  ;;  %v6476_v10 = vpack.c.bf16 %v2153_v2, %v2149_v1  ;;  %v6494_v60 = vpack.c.bf16 %v2194_v55, %v2190_v54  ;;  %v2189_v61 = vld [vmem:[%s8525_s17 + $0x3740] sm:$0xff]  ;;  %v2198_v2 = vld [vmem:[%s8525_s17 + $0x3788] sm:$0xff] }
 0x40c   : > { %7543 = vmatprep.subr.bf16.mxu1 %v7542_v8  ;;  %v2160_v8 = vld [vmem:[%s8525_s17 + $0x3658] sm:$0xff]  ;;  %v7564_v11 = vpack.c.bf16 %v2155_v5, %v2151_v3  ;;  %v2195_v1 = vld [vmem:[%s8525_s17 + $0x3770] sm:$0xff]  ;;  %v2202_v3 = vld [vmem:[%s8525_s17 + $0x37a8] sm:$0xff] }
 0x40d   : > { %v2204_v5 = vld [vmem:[%s8525_s17 + $0x37b8] sm:$0xff]  ;;  %v416_v55 = vld [vmem:[%s8547_s14 + $0xe8] sm:$0xff] }
 0x40e   : > { %6457 = vmatpush1.bf16.msra.mxu0 %v6456_v14  ;;  %v2161_v14 = vld [vmem:[%s8525_s17 + $0x3660] sm:$0xff]  ;;  %v2236_v54 = vld [vmem:[%s8525_s17 + $0x38b8] sm:$0xff] }
 0x40f   : > { %7545 = vmatpush1.bf16.msra.mxu1 %v7544_v15  ;;  %6459 = vmatprep.subr.bf16.mxu0 %v6458_v16  ;;  %v2159_v15 = vld [vmem:[%s8525_s17 + $0x3650] sm:$0xff]  ;;  %v7566_v16 = vpack.c.bf16 %v2164_v9, %v2160_v8  ;;  %v6480_v22 = vpack.c.bf16 %v2161_v14, %v2157_v13  ;;  %v6498_v8 = vpack.c.bf16 %v2202_v3, %v2198_v2  ;;  %v2197_v9 = vld [vmem:[%s8525_s17 + $0x3780] sm:$0xff]  ;;  %v2206_v14 = vld [vmem:[%s8525_s17 + $0x37c8] sm:$0xff] }
 0x410   : > { %7547 = vmatprep.subr.bf16.mxu1 %v7546_v20  ;;  %v2168_v20 = vld [vmem:[%s8525_s17 + $0x3698] sm:$0xff]  ;;  %v7568_v23 = vpack.c.bf16 %v2163_v17, %v2159_v15  ;;  %v2203_v13 = vld [vmem:[%s8525_s17 + $0x37b0] sm:$0xff]  ;;  %v2210_v15 = vld [vmem:[%s8525_s17 + $0x37e8] sm:$0xff] }
 0x411   : > { %v2212_v17 = vld [vmem:[%s8525_s17 + $0x37f8] sm:$0xff] }
 0x412   : > { %6461 = vmatpush1.bf16.msra.mxu0 %v6460_v26  ;;  %v2169_v26 = vld [vmem:[%s8525_s17 + $0x36a0] sm:$0xff]  ;;  %v2240_v2 = vld [vmem:[%s8525_s17 + $0x38d8] sm:$0xff] }
 0x413   : > { %7549 = vmatpush1.bf16.msra.mxu1 %v7548_v27  ;;  %6463 = vmatprep.subr.bf16.mxu0 %v6462_v28  ;;  %v2167_v27 = vld [vmem:[%s8525_s17 + $0x3690] sm:$0xff]  ;;  %v7570_v28 = vpack.c.bf16 %v2172_v21, %v2168_v20  ;;  %v6484_v34 = vpack.c.bf16 %v2169_v26, %v2165_v25  ;;  %v6502_v20 = vpack.c.bf16 %v2210_v15, %v2206_v14  ;;  %v2205_v21 = vld [vmem:[%s8525_s17 + $0x37c0] sm:$0xff]  ;;  %v2214_v26 = vld [vmem:[%s8525_s17 + $0x3808] sm:$0xff] }
 0x414   : > { %7551 = vmatprep.subr.bf16.mxu1 %v7550_v32  ;;  %v2176_v32 = vld [vmem:[%s8525_s17 + $0x36d8] sm:$0xff]  ;;  %v7572_v35 = vpack.c.bf16 %v2171_v29, %v2167_v27  ;;  %v2211_v25 = vld [vmem:[%s8525_s17 + $0x37f0] sm:$0xff]  ;;  %v2218_v27 = vld [vmem:[%s8525_s17 + $0x3828] sm:$0xff] }
 0x415   : > { %v2220_v29 = vld [vmem:[%s8525_s17 + $0x3838] sm:$0xff] }
 0x416   : > { %6465 = vmatpush1.bf16.msra.mxu0 %v6464_v38  ;;  %v2177_v38 = vld [vmem:[%s8525_s17 + $0x36e0] sm:$0xff]  ;;  %v2244_v3 = vld [vmem:[%s8525_s17 + $0x38f8] sm:$0xff] }
 0x417   : > { %7553 = vmatpush1.bf16.msra.mxu1 %v7552_v39  ;;  %6467 = vmatprep.subr.bf16.mxu0 %v6466_v40  ;;  %v2175_v39 = vld [vmem:[%s8525_s17 + $0x36d0] sm:$0xff]  ;;  %v7574_v40 = vpack.c.bf16 %v2180_v33, %v2176_v32  ;;  %v6488_v46 = vpack.c.bf16 %v2177_v38, %v2173_v37  ;;  %v6506_v32 = vpack.c.bf16 %v2218_v27, %v2214_v26  ;;  %v2213_v33 = vld [vmem:[%s8525_s17 + $0x3800] sm:$0xff]  ;;  %v2222_v38 = vld [vmem:[%s8525_s17 + $0x3848] sm:$0xff] }
 0x418   : > { %7555 = vmatprep.subr.bf16.mxu1 %v7554_v44  ;;  %v2184_v44 = vld [vmem:[%s8525_s17 + $0x3718] sm:$0xff]  ;;  %v7576_v47 = vpack.c.bf16 %v2179_v41, %v2175_v39  ;;  %v2219_v37 = vld [vmem:[%s8525_s17 + $0x3830] sm:$0xff]  ;;  %v2226_v39 = vld [vmem:[%s8525_s17 + $0x3868] sm:$0xff] }
 0x419   : > { %v2228_v41 = vld [vmem:[%s8525_s17 + $0x3878] sm:$0xff] }
 0x41a   : > { %6469 = vmatpush1.bf16.msra.mxu0 %v6468_v50  ;;  %v2185_v50 = vld [vmem:[%s8525_s17 + $0x3720] sm:$0xff]  ;;  %v2248_v14 = vld [vmem:[%s8525_s17 + $0x3918] sm:$0xff] }
 0x41b   : > { %7557 = vmatpush1.bf16.msra.mxu1 %v7556_v51  ;;  %6471 = vmatprep.subr.bf16.mxu0 %v6470_v52  ;;  %v2183_v51 = vld [vmem:[%s8525_s17 + $0x3710] sm:$0xff]  ;;  %v7578_v52 = vpack.c.bf16 %v2188_v45, %v2184_v44  ;;  %v6492_v58 = vpack.c.bf16 %v2185_v50, %v2181_v49  ;;  %v6510_v45 = vpack.c.bf16 %v2226_v39, %v2222_v38  ;;  %v2252_v15 = vld [vmem:[%s8525_s17 + $0x3938] sm:$0xff] }
 0x41c   : > { %7559 = vmatprep.subr.bf16.mxu1 %v7558_v56  ;;  %v2192_v56 = vld [vmem:[%s8525_s17 + $0x3758] sm:$0xff]  ;;  %v7580_v59 = vpack.c.bf16 %v2187_v53, %v2183_v51  ;;  %v2227_v50 = vld [vmem:[%s8525_s17 + $0x3870] sm:$0xff]  ;;  %v2230_v51 = vld [vmem:[%s8525_s17 + $0x3888] sm:$0xff] }
 0x41d   : > { %v2232_v53 = vld [vmem:[%s8525_s17 + $0x3898] sm:$0xff] }
 0x41e   : > { %6473 = vmatpush1.bf16.msra.mxu0 %v6472_v62  ;;  %v2193_v62 = vld [vmem:[%s8525_s17 + $0x3760] sm:$0xff]  ;;  %v2256_v26 = vld [vmem:[%s8525_s17 + $0x3958] sm:$0xff] }
 0x41f   : > { %7561 = vmatpush1.bf16.msra.mxu1 %v7560_v63  ;;  %6475 = vmatprep.subr.bf16.mxu0 %v6474_v0  ;;  %v2191_v63 = vld [vmem:[%s8525_s17 + $0x3750] sm:$0xff]  ;;  %v7582_v0 = vpack.c.bf16 %v2196_v57, %v2192_v56  ;;  %v6496_v6 = vpack.c.bf16 %v2193_v62, %v2189_v61  ;;  %v7602_v62 = vpack.c.bf16 %v2236_v54, %v2232_v53  ;;  %v2260_v27 = vld [vmem:[%s8525_s17 + $0x3978] sm:$0xff] }
 0x420   : > { %7563 = vmatprep.subr.bf16.mxu1 %v7562_v4  ;;  %v2200_v4 = vld [vmem:[%s8525_s17 + $0x3798] sm:$0xff]  ;;  %v7584_v7 = vpack.c.bf16 %v2195_v1, %v2191_v63  ;;  %v2231_v61 = vld [vmem:[%s8525_s17 + $0x3890] sm:$0xff]  ;;  %v2242_v1 = vld [vmem:[%s8525_s17 + $0x38e8] sm:$0xff] }
 0x421   : > { %v2235_v63 = vld [vmem:[%s8525_s17 + $0x38b0] sm:$0xff]  ;;  %v2264_v38 = vld [vmem:[%s8525_s17 + $0x3998] sm:$0xff] }
 0x422   : > { %6477 = vmatpush1.bf16.msra.mxu0 %v6476_v10  ;;  %v2201_v10 = vld [vmem:[%s8525_s17 + $0x37a0] sm:$0xff]  ;;  %v2268_v39 = vld [vmem:[%s8525_s17 + $0x39b8] sm:$0xff] }
 0x423   : > { %7565 = vmatpush1.bf16.msra.mxu1 %v7564_v11  ;;  %6479 = vmatprep.subr.bf16.mxu0 %v6478_v12  ;;  %v2199_v11 = vld [vmem:[%s8525_s17 + $0x3790] sm:$0xff]  ;;  %v7586_v12 = vpack.c.bf16 %v2204_v5, %v2200_v4  ;;  %v6500_v18 = vpack.c.bf16 %v2201_v10, %v2197_v9  ;;  %v7604_v5 = vpack.c.bf16 %v2235_v63, %v2231_v61  ;;  %v2282_v61 = vld [vmem:[%s8525_s17 + $0x3a28] sm:$0xff]  ;;  %v2284_v63 = vld [vmem:[%s8525_s17 + $0x3a38] sm:$0xff] }
 0x424   : > { %7567 = vmatprep.subr.bf16.mxu1 %v7566_v16  ;;  %v2208_v16 = vld [vmem:[%s8525_s17 + $0x37d8] sm:$0xff]  ;;  %v7588_v19 = vpack.c.bf16 %v2203_v13, %v2199_v11  ;;  %v2239_v9 = vld [vmem:[%s8525_s17 + $0x38d0] sm:$0xff]  ;;  %v7606_v10 = vpack.c.bf16 %v2244_v3, %v2240_v2  ;;  %v2250_v13 = vld [vmem:[%s8525_s17 + $0x3928] sm:$0xff] }
 0x425   : > { %v2243_v11 = vld [vmem:[%s8525_s17 + $0x38f0] sm:$0xff]  ;;  %v2277_v3 = vld [vmem:[%s8525_s17 + $0x3a00] sm:$0xff] }
 0x426   : > { %6481 = vmatpush1.bf16.msra.mxu0 %v6480_v22  ;;  %v2209_v22 = vld [vmem:[%s8525_s17 + $0x37e0] sm:$0xff] }
 0x427   : > { %7569 = vmatpush1.bf16.msra.mxu1 %v7568_v23  ;;  %6483 = vmatprep.subr.bf16.mxu0 %v6482_v24  ;;  %v2207_v23 = vld [vmem:[%s8525_s17 + $0x37d0] sm:$0xff]  ;;  %v7590_v24 = vpack.c.bf16 %v2212_v17, %v2208_v16  ;;  %v6504_v30 = vpack.c.bf16 %v2209_v22, %v2205_v21  ;;  %v7608_v17 = vpack.c.bf16 %v2243_v11, %v2239_v9  ;;  %v2290_v9 = vld [vmem:[%s8525_s17 + $0x3a68] sm:$0xff]  ;;  %v2292_v11 = vld [vmem:[%s8525_s17 + $0x3a78] sm:$0xff] }
 0x428   : > { %7571 = vmatprep.subr.bf16.mxu1 %v7570_v28  ;;  %v2216_v28 = vld [vmem:[%s8525_s17 + $0x3818] sm:$0xff]  ;;  %v7592_v31 = vpack.c.bf16 %v2211_v25, %v2207_v23  ;;  %v2247_v21 = vld [vmem:[%s8525_s17 + $0x3910] sm:$0xff]  ;;  %v7610_v22 = vpack.c.bf16 %v2252_v15, %v2248_v14  ;;  %v2258_v25 = vld [vmem:[%s8525_s17 + $0x3968] sm:$0xff] }
 0x429   : > { %v2251_v23 = vld [vmem:[%s8525_s17 + $0x3930] sm:$0xff]  ;;  %v2285_v15 = vld [vmem:[%s8525_s17 + $0x3a40] sm:$0xff] }
 0x42a   : > { %6485 = vmatpush1.bf16.msra.mxu0 %v6484_v34  ;;  %v2217_v34 = vld [vmem:[%s8525_s17 + $0x3820] sm:$0xff] }
 0x42b   : > { %7573 = vmatpush1.bf16.msra.mxu1 %v7572_v35  ;;  %6487 = vmatprep.subr.bf16.mxu0 %v6486_v36  ;;  %v2215_v35 = vld [vmem:[%s8525_s17 + $0x3810] sm:$0xff]  ;;  %v7594_v36 = vpack.c.bf16 %v2220_v29, %v2216_v28  ;;  %v6508_v43 = vpack.c.bf16 %v2217_v34, %v2213_v33  ;;  %v7612_v29 = vpack.c.bf16 %v2251_v23, %v2247_v21  ;;  %v2298_v21 = vld [vmem:[%s8525_s17 + $0x3aa8] sm:$0xff]  ;;  %v2300_v23 = vld [vmem:[%s8525_s17 + $0x3ab8] sm:$0xff] }
 0x42c   : > { %7575 = vmatprep.subr.bf16.mxu1 %v7574_v40  ;;  %v2224_v40 = vld [vmem:[%s8525_s17 + $0x3858] sm:$0xff]  ;;  %v7596_v44 = vpack.c.bf16 %v2219_v37, %v2215_v35  ;;  %v2255_v33 = vld [vmem:[%s8525_s17 + $0x3950] sm:$0xff]  ;;  %v7614_v34 = vpack.c.bf16 %v2260_v27, %v2256_v26  ;;  %v2266_v37 = vld [vmem:[%s8525_s17 + $0x39a8] sm:$0xff] }
 0x42d   : > { %v7598_v49 = vpack.c.bf16 %v2228_v41, %v2224_v40  ;;  %v2259_v35 = vld [vmem:[%s8525_s17 + $0x3970] sm:$0xff]  ;;  %v2293_v27 = vld [vmem:[%s8525_s17 + $0x3a80] sm:$0xff] }
 0x42e   : > { %6489 = vmatpush1.bf16.msra.mxu0 %v6488_v46  ;;  %v2221_v46 = vld [vmem:[%s8525_s17 + $0x3840] sm:$0xff]  ;;  %v7616_v41 = vpack.c.bf16 %v2259_v35, %v2255_v33  ;;  %v2306_v33 = vld [vmem:[%s8525_s17 + $0x3ae8] sm:$0xff]  ;;  %v2308_v35 = vld [vmem:[%s8525_s17 + $0x3af8] sm:$0xff] }
 0x42f   : > { %7577 = vmatpush1.bf16.msra.mxu1 %v7576_v47  ;;  %6491 = vmatprep.subr.bf16.mxu0 %v6490_v48  ;;  %v2225_v47 = vld [vmem:[%s8525_s17 + $0x3860] sm:$0xff]  ;;  %v2223_v48 = vld [vmem:[%s8525_s17 + $0x3850] sm:$0xff] }
 0x430   : > { %7579 = vmatprep.subr.bf16.mxu1 %v7578_v52  ;;  %v2234_v52 = vld [vmem:[%s8525_s17 + $0x38a8] sm:$0xff]  ;;  %v6512_v56 = vpack.c.bf16 %v2225_v47, %v2221_v46  ;;  %v7600_v57 = vpack.c.bf16 %v2227_v50, %v2223_v48  ;;  %v7618_v46 = vpack.c.bf16 %v2268_v39, %v2264_v38  ;;  %v2267_v47 = vld [vmem:[%s8525_s17 + $0x39b0] sm:$0xff]  ;;  %v2272_v50 = vld [vmem:[%s8525_s17 + $0x39d8] sm:$0xff] }
 0x431   : > { %v2270_v48 = vld [vmem:[%s8525_s17 + $0x39c8] sm:$0xff]  ;;  %v2301_v39 = vld [vmem:[%s8525_s17 + $0x3ac0] sm:$0xff] }
 0x432   : > { %6493 = vmatpush1.bf16.msra.mxu0 %v6492_v58  ;;  %v6514_v58 = vpack.c.bf16 %v2234_v52, %v2230_v51  ;;  %v2276_v51 = vld [vmem:[%s8525_s17 + $0x39f8] sm:$0xff] }
 0x433   : > { %7581 = vmatpush1.bf16.msra.mxu1 %v7580_v59  ;;  %6495 = vmatprep.subr.bf16.mxu0 %v6494_v60  ;;  %v2229_v59 = vld [vmem:[%s8525_s17 + $0x3880] sm:$0xff] }
 0x434   : > { %7583 = vmatprep.subr.bf16.mxu1 %v7582_v0  ;;  %v2233_v60 = vld [vmem:[%s8525_s17 + $0x38a0] sm:$0xff]  ;;  %v2238_v0 = vld [vmem:[%s8525_s17 + $0x38c8] sm:$0xff] }
 0x435   : > { %v6516_v4 = vpack.c.bf16 %v2233_v60, %v2229_v59  ;;  %v2275_v59 = vld [vmem:[%s8525_s17 + $0x39f0] sm:$0xff]  ;;  %v2278_v60 = vld [vmem:[%s8525_s17 + $0x3a08] sm:$0xff] }
 0x436   : > { %6497 = vmatpush1.bf16.msra.mxu0 %v6496_v6  ;;  %v6518_v6 = vpack.c.bf16 %v2242_v1, %v2238_v0  ;;  %v6538_v2 = vpack.c.bf16 %v2282_v61, %v2278_v60 }
 0x437   : > { %7585 = vmatpush1.bf16.msra.mxu1 %v7584_v7  ;;  %6499 = vmatprep.subr.bf16.mxu0 %v6498_v8  ;;  %v2237_v7 = vld [vmem:[%s8525_s17 + $0x38c0] sm:$0xff] }
 0x438   : > { %7587 = vmatprep.subr.bf16.mxu1 %v7586_v12  ;;  %v2241_v8 = vld [vmem:[%s8525_s17 + $0x38e0] sm:$0xff]  ;;  %v2246_v12 = vld [vmem:[%s8525_s17 + $0x3908] sm:$0xff] }
 0x439   : > { %v6520_v16 = vpack.c.bf16 %v2241_v8, %v2237_v7  ;;  %v2283_v7 = vld [vmem:[%s8525_s17 + $0x3a30] sm:$0xff]  ;;  %v2286_v8 = vld [vmem:[%s8525_s17 + $0x3a48] sm:$0xff] }
 0x43a   : > { %6501 = vmatpush1.bf16.msra.mxu0 %v6500_v18  ;;  %v6522_v18 = vpack.c.bf16 %v2250_v13, %v2246_v12  ;;  %v6542_v14 = vpack.c.bf16 %v2290_v9, %v2286_v8 }
 0x43b   : > { %7589 = vmatpush1.bf16.msra.mxu1 %v7588_v19  ;;  %6503 = vmatprep.subr.bf16.mxu0 %v6502_v20  ;;  %v2245_v19 = vld [vmem:[%s8525_s17 + $0x3900] sm:$0xff] }
 0x43c   : > { %7591 = vmatprep.subr.bf16.mxu1 %v7590_v24  ;;  %v2249_v20 = vld [vmem:[%s8525_s17 + $0x3920] sm:$0xff]  ;;  %v2254_v24 = vld [vmem:[%s8525_s17 + $0x3948] sm:$0xff] }
 0x43d   : > { %v6524_v28 = vpack.c.bf16 %v2249_v20, %v2245_v19  ;;  %v2291_v19 = vld [vmem:[%s8525_s17 + $0x3a70] sm:$0xff]  ;;  %v2294_v20 = vld [vmem:[%s8525_s17 + $0x3a88] sm:$0xff] }
 0x43e   : > { %6505 = vmatpush1.bf16.msra.mxu0 %v6504_v30  ;;  %v6526_v30 = vpack.c.bf16 %v2258_v25, %v2254_v24  ;;  %v6546_v26 = vpack.c.bf16 %v2298_v21, %v2294_v20 }
 0x43f   : > { %7593 = vmatpush1.bf16.msra.mxu1 %v7592_v31  ;;  %6507 = vmatprep.subr.bf16.mxu0 %v6506_v32  ;;  %v2253_v31 = vld [vmem:[%s8525_s17 + $0x3940] sm:$0xff] }
 0x440   : > { %7595 = vmatprep.subr.bf16.mxu1 %v7594_v36  ;;  %v2257_v32 = vld [vmem:[%s8525_s17 + $0x3960] sm:$0xff]  ;;  %v2262_v36 = vld [vmem:[%s8525_s17 + $0x3988] sm:$0xff] }
 0x441   : > { %3585 = vmatmul.mubr.f32.vlgmr.msra.gmra.mrb[0].mxu0 %v413_v42  ;;  %v6528_v40 = vpack.c.bf16 %v2257_v32, %v2253_v31  ;;  %v2299_v31 = vld [vmem:[%s8525_s17 + $0x3ab0] sm:$0xff]  ;;  %v2302_v32 = vld [vmem:[%s8525_s17 + $0x3ac8] sm:$0xff] }
 0x442   : > { %6509 = vmatpush1.bf16.msra.mxu0 %v6508_v43  ;;  %4792 = vmatmul.mubr.f32.vlgmr.msra.gmra.mrb[0].mxu1 %v413_v42  ;;  %v6530_v42 = vpack.c.bf16 %v2266_v37, %v2262_v36  ;;  %v2261_v43 = vld [vmem:[%s8525_s17 + $0x3980] sm:$0xff]  ;;  %v6550_v38 = vpack.c.bf16 %v2306_v33, %v2302_v32 }
 0x443   : > { %7597 = vmatpush1.bf16.msra.mxu1 %v7596_v44  ;;  %6511 = vmatprep.subr.bf16.mxu0 %v6510_v45  ;;  %v2265_v44 = vld [vmem:[%s8525_s17 + $0x39a0] sm:$0xff]  ;;  %v2263_v45 = vld [vmem:[%s8525_s17 + $0x3990] sm:$0xff] }
 0x444   : > { %7599 = vmatprep.subr.bf16.mxu1 %v7598_v49  ;;  %3655 = vmatprep.mubr.f32.mxu0 %v416_v55  ;;  %v2274_v49 = vld [vmem:[%s8525_s17 + $0x39e8] sm:$0xff]  ;;  %v6532_v52 = vpack.c.bf16 %v2265_v44, %v2261_v43  ;;  %v7620_v53 = vpack.c.bf16 %v2267_v47, %v2263_v45  ;;  %v2307_v43 = vld [vmem:[%s8525_s17 + $0x3af0] sm:$0xff]  ;;  %v2316_v47 = vld [vmem:[%s8525_s17 + $0x3b38] sm:$0xff] }
 0x445   : > { %4862 = vmatprep.mubr.f32.mxu1 %v416_v55  ;;  %v6534_v54 = vpack.c.bf16 %v2274_v49, %v2270_v48  ;;  %v2269_v55 = vld [vmem:[%s8525_s17 + $0x39c0] sm:$0xff]  ;;  %v2310_v44 = vld [vmem:[%s8525_s17 + $0x3b08] sm:$0xff] }
 0x446   : > { %6513 = vmatpush1.bf16.msra.mxu0 %v6512_v56  ;;  %v2273_v56 = vld [vmem:[%s8525_s17 + $0x39e0] sm:$0xff]  ;;  %v2314_v45 = vld [vmem:[%s8525_s17 + $0x3b28] sm:$0xff] }
 0x447   : > { %7601 = vmatpush1.bf16.msra.mxu1 %v7600_v57  ;;  %6515 = vmatprep.subr.bf16.mxu0 %v6514_v58  ;;  %v2271_v57 = vld [vmem:[%s8525_s17 + $0x39d0] sm:$0xff]  ;;  %v7622_v58 = vpack.c.bf16 %v2276_v51, %v2272_v50  ;;  %v6536_v0 = vpack.c.bf16 %v2273_v56, %v2269_v55  ;;  %v6554_v50 = vpack.c.bf16 %v2314_v45, %v2310_v44  ;;  %v2309_v51 = vld [vmem:[%s8525_s17 + $0x3b00] sm:$0xff]  ;;  %v2318_v56 = vld [vmem:[%s8525_s17 + $0x3b48] sm:$0xff] }
 0x448   : > { %7603 = vmatprep.subr.bf16.mxu1 %v7602_v62  ;;  %v2280_v62 = vld [vmem:[%s8525_s17 + $0x3a18] sm:$0xff]  ;;  %v7624_v1 = vpack.c.bf16 %v2275_v59, %v2271_v57  ;;  %v2315_v55 = vld [vmem:[%s8525_s17 + $0x3b30] sm:$0xff]  ;;  %v2322_v57 = vld [vmem:[%s8525_s17 + $0x3b68] sm:$0xff] }
 0x449   : > { %v2324_v59 = vld [vmem:[%s8525_s17 + $0x3b78] sm:$0xff]  ;;  %v415_v44 = vld [vmem:[%s8547_s14 + $0xe0] sm:$0xff] }
 0x44a   : > { %6517 = vmatpush1.bf16.msra.mxu0 %v6516_v4  ;;  %v2281_v4 = vld [vmem:[%s8525_s17 + $0x3a20] sm:$0xff] }
 0x44b   : > { %7605 = vmatpush1.bf16.msra.mxu1 %v7604_v5  ;;  %6519 = vmatprep.subr.bf16.mxu0 %v6518_v6  ;;  %v2279_v5 = vld [vmem:[%s8525_s17 + $0x3a10] sm:$0xff]  ;;  %v7626_v6 = vpack.c.bf16 %v2284_v63, %v2280_v62  ;;  %v6540_v12 = vpack.c.bf16 %v2281_v4, %v2277_v3  ;;  %v6558_v62 = vpack.c.bf16 %v2322_v57, %v2318_v56  ;;  %v2317_v63 = vld [vmem:[%s8525_s17 + $0x3b40] sm:$0xff]  ;;  %v2326_v4 = vld [vmem:[%s8525_s17 + $0x3b88] sm:$0xff] }
 0x44c   : > { %7607 = vmatprep.subr.bf16.mxu1 %v7606_v10  ;;  %v2288_v10 = vld [vmem:[%s8525_s17 + $0x3a58] sm:$0xff]  ;;  %v7628_v13 = vpack.c.bf16 %v2283_v7, %v2279_v5  ;;  %v2323_v3 = vld [vmem:[%s8525_s17 + $0x3b70] sm:$0xff]  ;;  %v2330_v5 = vld [vmem:[%s8525_s17 + $0x3ba8] sm:$0xff] }
 0x44d   : > { %v2332_v7 = vld [vmem:[%s8525_s17 + $0x3bb8] sm:$0xff] }
 0x44e   : > { %6521 = vmatpush1.bf16.msra.mxu0 %v6520_v16  ;;  %v2289_v16 = vld [vmem:[%s8525_s17 + $0x3a60] sm:$0xff]  ;;  %v2364_v56 = vld [vmem:[%s8525_s17 + $0x3cb8] sm:$0xff] }
 0x44f   : > { %7609 = vmatpush1.bf16.msra.mxu1 %v7608_v17  ;;  %6523 = vmatprep.subr.bf16.mxu0 %v6522_v18  ;;  %v2287_v17 = vld [vmem:[%s8525_s17 + $0x3a50] sm:$0xff]  ;;  %v7630_v18 = vpack.c.bf16 %v2292_v11, %v2288_v10  ;;  %v6544_v24 = vpack.c.bf16 %v2289_v16, %v2285_v15  ;;  %v6562_v10 = vpack.c.bf16 %v2330_v5, %v2326_v4  ;;  %v2325_v11 = vld [vmem:[%s8525_s17 + $0x3b80] sm:$0xff]  ;;  %v2334_v16 = vld [vmem:[%s8525_s17 + $0x3bc8] sm:$0xff] }
 0x450   : > { %7611 = vmatprep.subr.bf16.mxu1 %v7610_v22  ;;  %v2296_v22 = vld [vmem:[%s8525_s17 + $0x3a98] sm:$0xff]  ;;  %v7632_v25 = vpack.c.bf16 %v2291_v19, %v2287_v17  ;;  %v2331_v15 = vld [vmem:[%s8525_s17 + $0x3bb0] sm:$0xff]  ;;  %v2338_v17 = vld [vmem:[%s8525_s17 + $0x3be8] sm:$0xff] }
 0x451   : > { %v2340_v19 = vld [vmem:[%s8525_s17 + $0x3bf8] sm:$0xff] }
 0x452   : > { %6525 = vmatpush1.bf16.msra.mxu0 %v6524_v28  ;;  %v2297_v28 = vld [vmem:[%s8525_s17 + $0x3aa0] sm:$0xff]  ;;  %v418_v57 = vld [vmem:[%s8547_s14 + $0xf8] sm:$0xff] }
 0x453   : > { %7613 = vmatpush1.bf16.msra.mxu1 %v7612_v29  ;;  %6527 = vmatprep.subr.bf16.mxu0 %v6526_v30  ;;  %v2295_v29 = vld [vmem:[%s8525_s17 + $0x3a90] sm:$0xff]  ;;  %v7634_v30 = vpack.c.bf16 %v2300_v23, %v2296_v22  ;;  %v6548_v36 = vpack.c.bf16 %v2297_v28, %v2293_v27  ;;  %v6566_v22 = vpack.c.bf16 %v2338_v17, %v2334_v16  ;;  %v2333_v23 = vld [vmem:[%s8525_s17 + $0x3bc0] sm:$0xff]  ;;  %v2342_v28 = vld [vmem:[%s8525_s17 + $0x3c08] sm:$0xff] }
 0x454   : > { %7615 = vmatprep.subr.bf16.mxu1 %v7614_v34  ;;  %v2304_v34 = vld [vmem:[%s8525_s17 + $0x3ad8] sm:$0xff]  ;;  %v7636_v37 = vpack.c.bf16 %v2299_v31, %v2295_v29  ;;  %v2339_v27 = vld [vmem:[%s8525_s17 + $0x3bf0] sm:$0xff]  ;;  %v2346_v29 = vld [vmem:[%s8525_s17 + $0x3c28] sm:$0xff] }
 0x455   : > { %v2348_v31 = vld [vmem:[%s8525_s17 + $0x3c38] sm:$0xff] }
 0x456   : > { %6529 = vmatpush1.bf16.msra.mxu0 %v6528_v40  ;;  %v2305_v40 = vld [vmem:[%s8525_s17 + $0x3ae0] sm:$0xff]  ;;  %v2368_v4 = vld [vmem:[%s8525_s17 + $0x3cd8] sm:$0xff] }
 0x457   : > { %7617 = vmatpush1.bf16.msra.mxu1 %v7616_v41  ;;  %6531 = vmatprep.subr.bf16.mxu0 %v6530_v42  ;;  %v2303_v41 = vld [vmem:[%s8525_s17 + $0x3ad0] sm:$0xff]  ;;  %v7638_v42 = vpack.c.bf16 %v2308_v35, %v2304_v34  ;;  %v6552_v48 = vpack.c.bf16 %v2305_v40, %v2301_v39  ;;  %v6570_v34 = vpack.c.bf16 %v2346_v29, %v2342_v28  ;;  %v2341_v35 = vld [vmem:[%s8525_s17 + $0x3c00] sm:$0xff]  ;;  %v2350_v40 = vld [vmem:[%s8525_s17 + $0x3c48] sm:$0xff] }
 0x458   : > { %7619 = vmatprep.subr.bf16.mxu1 %v7618_v46  ;;  %v2312_v46 = vld [vmem:[%s8525_s17 + $0x3b18] sm:$0xff]  ;;  %v7640_v49 = vpack.c.bf16 %v2307_v43, %v2303_v41  ;;  %v2347_v39 = vld [vmem:[%s8525_s17 + $0x3c30] sm:$0xff]  ;;  %v2354_v41 = vld [vmem:[%s8525_s17 + $0x3c68] sm:$0xff] }
 0x459   : > { %v2356_v43 = vld [vmem:[%s8525_s17 + $0x3c78] sm:$0xff] }
 0x45a   : > { %6533 = vmatpush1.bf16.msra.mxu0 %v6532_v52  ;;  %v2313_v52 = vld [vmem:[%s8525_s17 + $0x3b20] sm:$0xff]  ;;  %v2372_v5 = vld [vmem:[%s8525_s17 + $0x3cf8] sm:$0xff] }
 0x45b   : > { %7621 = vmatpush1.bf16.msra.mxu1 %v7620_v53  ;;  %6535 = vmatprep.subr.bf16.mxu0 %v6534_v54  ;;  %v2311_v53 = vld [vmem:[%s8525_s17 + $0x3b10] sm:$0xff]  ;;  %v7642_v54 = vpack.c.bf16 %v2316_v47, %v2312_v46  ;;  %v6556_v60 = vpack.c.bf16 %v2313_v52, %v2309_v51  ;;  %v6574_v47 = vpack.c.bf16 %v2354_v41, %v2350_v40  ;;  %v2376_v16 = vld [vmem:[%s8525_s17 + $0x3d18] sm:$0xff] }
 0x45c   : > { %7623 = vmatprep.subr.bf16.mxu1 %v7622_v58  ;;  %v2320_v58 = vld [vmem:[%s8525_s17 + $0x3b58] sm:$0xff]  ;;  %v7644_v61 = vpack.c.bf16 %v2315_v55, %v2311_v53  ;;  %v2355_v52 = vld [vmem:[%s8525_s17 + $0x3c70] sm:$0xff]  ;;  %v2358_v53 = vld [vmem:[%s8525_s17 + $0x3c88] sm:$0xff] }
 0x45d   : > { %v2360_v55 = vld [vmem:[%s8525_s17 + $0x3c98] sm:$0xff] }
 0x45e   : > { %6537 = vmatpush1.bf16.msra.mxu0 %v6536_v0  ;;  %v2321_v0 = vld [vmem:[%s8525_s17 + $0x3b60] sm:$0xff]  ;;  %v2380_v17 = vld [vmem:[%s8525_s17 + $0x3d38] sm:$0xff] }
 0x45f   : > { %7625 = vmatpush1.bf16.msra.mxu1 %v7624_v1  ;;  %6539 = vmatprep.subr.bf16.mxu0 %v6538_v2  ;;  %v2319_v1 = vld [vmem:[%s8525_s17 + $0x3b50] sm:$0xff]  ;;  %v7646_v2 = vpack.c.bf16 %v2324_v59, %v2320_v58  ;;  %v6560_v8 = vpack.c.bf16 %v2321_v0, %v2317_v63  ;;  %v7666_v0 = vpack.c.bf16 %v2364_v56, %v2360_v55  ;;  %v2384_v28 = vld [vmem:[%s8525_s17 + $0x3d58] sm:$0xff] }
 0x460   : > { %7627 = vmatprep.subr.bf16.mxu1 %v7626_v6  ;;  %v2328_v6 = vld [vmem:[%s8525_s17 + $0x3b98] sm:$0xff]  ;;  %v7648_v9 = vpack.c.bf16 %v2323_v3, %v2319_v1  ;;  %v2359_v63 = vld [vmem:[%s8525_s17 + $0x3c90] sm:$0xff]  ;;  %v2370_v3 = vld [vmem:[%s8525_s17 + $0x3ce8] sm:$0xff] }
 0x461   : > { %v2363_v1 = vld [vmem:[%s8525_s17 + $0x3cb0] sm:$0xff]  ;;  %v2388_v29 = vld [vmem:[%s8525_s17 + $0x3d78] sm:$0xff] }
 0x462   : > { %6541 = vmatpush1.bf16.msra.mxu0 %v6540_v12  ;;  %v2329_v12 = vld [vmem:[%s8525_s17 + $0x3ba0] sm:$0xff]  ;;  %v2392_v40 = vld [vmem:[%s8525_s17 + $0x3d98] sm:$0xff] }
 0x463   : > { %7629 = vmatpush1.bf16.msra.mxu1 %v7628_v13  ;;  %6543 = vmatprep.subr.bf16.mxu0 %v6542_v14  ;;  %v2327_v13 = vld [vmem:[%s8525_s17 + $0x3b90] sm:$0xff]  ;;  %v7650_v14 = vpack.c.bf16 %v2332_v7, %v2328_v6  ;;  %v6564_v20 = vpack.c.bf16 %v2329_v12, %v2325_v11  ;;  %v7668_v7 = vpack.c.bf16 %v2363_v1, %v2359_v63  ;;  %v2396_v41 = vld [vmem:[%s8525_s17 + $0x3db8] sm:$0xff]  ;;  %v2410_v63 = vld [vmem:[%s8525_s17 + $0x3e28] sm:$0xff] }
 0x464   : > { %7631 = vmatprep.subr.bf16.mxu1 %v7630_v18  ;;  %v2336_v18 = vld [vmem:[%s8525_s17 + $0x3bd8] sm:$0xff]  ;;  %v7652_v21 = vpack.c.bf16 %v2331_v15, %v2327_v13  ;;  %v2367_v11 = vld [vmem:[%s8525_s17 + $0x3cd0] sm:$0xff]  ;;  %v7670_v12 = vpack.c.bf16 %v2372_v5, %v2368_v4  ;;  %v2378_v15 = vld [vmem:[%s8525_s17 + $0x3d28] sm:$0xff] }
 0x465   : > { %v2371_v13 = vld [vmem:[%s8525_s17 + $0x3cf0] sm:$0xff]  ;;  %v2412_v1 = vld [vmem:[%s8525_s17 + $0x3e38] sm:$0xff]  ;;  %v2405_v5 = vld [vmem:[%s8525_s17 + $0x3e00] sm:$0xff] }
 0x466   : > { %6545 = vmatpush1.bf16.msra.mxu0 %v6544_v24  ;;  %v2337_v24 = vld [vmem:[%s8525_s17 + $0x3be0] sm:$0xff] }
 0x467   : > { %7633 = vmatpush1.bf16.msra.mxu1 %v7632_v25  ;;  %6547 = vmatprep.subr.bf16.mxu0 %v6546_v26  ;;  %v2335_v25 = vld [vmem:[%s8525_s17 + $0x3bd0] sm:$0xff]  ;;  %v7654_v26 = vpack.c.bf16 %v2340_v19, %v2336_v18  ;;  %v6568_v32 = vpack.c.bf16 %v2337_v24, %v2333_v23  ;;  %v7672_v19 = vpack.c.bf16 %v2371_v13, %v2367_v11  ;;  %v2418_v11 = vld [vmem:[%s8525_s17 + $0x3e68] sm:$0xff]  ;;  %v2420_v13 = vld [vmem:[%s8525_s17 + $0x3e78] sm:$0xff] }
 0x468   : > { %7635 = vmatprep.subr.bf16.mxu1 %v7634_v30  ;;  %v2344_v30 = vld [vmem:[%s8525_s17 + $0x3c18] sm:$0xff]  ;;  %v7656_v33 = vpack.c.bf16 %v2339_v27, %v2335_v25  ;;  %v2375_v23 = vld [vmem:[%s8525_s17 + $0x3d10] sm:$0xff]  ;;  %v7674_v24 = vpack.c.bf16 %v2380_v17, %v2376_v16  ;;  %v2386_v27 = vld [vmem:[%s8525_s17 + $0x3d68] sm:$0xff] }
 0x469   : > { %v2379_v25 = vld [vmem:[%s8525_s17 + $0x3d30] sm:$0xff]  ;;  %v2413_v17 = vld [vmem:[%s8525_s17 + $0x3e40] sm:$0xff] }
 0x46a   : > { %6549 = vmatpush1.bf16.msra.mxu0 %v6548_v36  ;;  %v2345_v36 = vld [vmem:[%s8525_s17 + $0x3c20] sm:$0xff] }
 0x46b   : > { %7637 = vmatpush1.bf16.msra.mxu1 %v7636_v37  ;;  %6551 = vmatprep.subr.bf16.mxu0 %v6550_v38  ;;  %v2343_v37 = vld [vmem:[%s8525_s17 + $0x3c10] sm:$0xff]  ;;  %v7658_v38 = vpack.c.bf16 %v2348_v31, %v2344_v30  ;;  %v6572_v45 = vpack.c.bf16 %v2345_v36, %v2341_v35  ;;  %v7676_v31 = vpack.c.bf16 %v2379_v25, %v2375_v23  ;;  %v2426_v23 = vld [vmem:[%s8525_s17 + $0x3ea8] sm:$0xff]  ;;  %v2428_v25 = vld [vmem:[%s8525_s17 + $0x3eb8] sm:$0xff] }
 0x46c   : > { %7639 = vmatprep.subr.bf16.mxu1 %v7638_v42  ;;  %v2352_v42 = vld [vmem:[%s8525_s17 + $0x3c58] sm:$0xff]  ;;  %v7660_v46 = vpack.c.bf16 %v2347_v39, %v2343_v37  ;;  %v2383_v35 = vld [vmem:[%s8525_s17 + $0x3d50] sm:$0xff]  ;;  %v7678_v36 = vpack.c.bf16 %v2388_v29, %v2384_v28  ;;  %v2394_v39 = vld [vmem:[%s8525_s17 + $0x3da8] sm:$0xff] }
 0x46d   : > { %v7662_v51 = vpack.c.bf16 %v2356_v43, %v2352_v42  ;;  %v2387_v37 = vld [vmem:[%s8525_s17 + $0x3d70] sm:$0xff]  ;;  %v2421_v29 = vld [vmem:[%s8525_s17 + $0x3e80] sm:$0xff] }
 0x46e   : > { %6553 = vmatpush1.bf16.msra.mxu0 %v6552_v48  ;;  %v2349_v48 = vld [vmem:[%s8525_s17 + $0x3c40] sm:$0xff]  ;;  %v7680_v43 = vpack.c.bf16 %v2387_v37, %v2383_v35  ;;  %v2434_v35 = vld [vmem:[%s8525_s17 + $0x3ee8] sm:$0xff]  ;;  %v2436_v37 = vld [vmem:[%s8525_s17 + $0x3ef8] sm:$0xff] }
 0x46f   : > { %7641 = vmatpush1.bf16.msra.mxu1 %v7640_v49  ;;  %6555 = vmatprep.subr.bf16.mxu0 %v6554_v50  ;;  %v2353_v49 = vld [vmem:[%s8525_s17 + $0x3c60] sm:$0xff]  ;;  %v2351_v50 = vld [vmem:[%s8525_s17 + $0x3c50] sm:$0xff] }
 0x470   : > { %7643 = vmatprep.subr.bf16.mxu1 %v7642_v54  ;;  %v2362_v54 = vld [vmem:[%s8525_s17 + $0x3ca8] sm:$0xff]  ;;  %v6576_v58 = vpack.c.bf16 %v2353_v49, %v2349_v48  ;;  %v7664_v59 = vpack.c.bf16 %v2355_v52, %v2351_v50  ;;  %v7682_v48 = vpack.c.bf16 %v2396_v41, %v2392_v40  ;;  %v2395_v49 = vld [vmem:[%s8525_s17 + $0x3db0] sm:$0xff]  ;;  %v2400_v52 = vld [vmem:[%s8525_s17 + $0x3dd8] sm:$0xff] }
 0x471   : > { %v2398_v50 = vld [vmem:[%s8525_s17 + $0x3dc8] sm:$0xff]  ;;  %v2429_v41 = vld [vmem:[%s8525_s17 + $0x3ec0] sm:$0xff] }
 0x472   : > { %6557 = vmatpush1.bf16.msra.mxu0 %v6556_v60  ;;  %v6578_v60 = vpack.c.bf16 %v2362_v54, %v2358_v53  ;;  %v2404_v53 = vld [vmem:[%s8525_s17 + $0x3df8] sm:$0xff] }
 0x473   : > { %7645 = vmatpush1.bf16.msra.mxu1 %v7644_v61  ;;  %6559 = vmatprep.subr.bf16.mxu0 %v6558_v62  ;;  %v2357_v61 = vld [vmem:[%s8525_s17 + $0x3c80] sm:$0xff] }
 0x474   : > { %7647 = vmatprep.subr.bf16.mxu1 %v7646_v2  ;;  %v2361_v62 = vld [vmem:[%s8525_s17 + $0x3ca0] sm:$0xff]  ;;  %v2366_v2 = vld [vmem:[%s8525_s17 + $0x3cc8] sm:$0xff] }
 0x475   : > { %v6580_v6 = vpack.c.bf16 %v2361_v62, %v2357_v61  ;;  %v2403_v61 = vld [vmem:[%s8525_s17 + $0x3df0] sm:$0xff]  ;;  %v2406_v62 = vld [vmem:[%s8525_s17 + $0x3e08] sm:$0xff] }
 0x476   : > { %6561 = vmatpush1.bf16.msra.mxu0 %v6560_v8  ;;  %v6582_v8 = vpack.c.bf16 %v2370_v3, %v2366_v2  ;;  %v6602_v4 = vpack.c.bf16 %v2410_v63, %v2406_v62 }
 0x477   : > { %7649 = vmatpush1.bf16.msra.mxu1 %v7648_v9  ;;  %6563 = vmatprep.subr.bf16.mxu0 %v6562_v10  ;;  %v2365_v9 = vld [vmem:[%s8525_s17 + $0x3cc0] sm:$0xff] }
 0x478   : > { %7651 = vmatprep.subr.bf16.mxu1 %v7650_v14  ;;  %v2369_v10 = vld [vmem:[%s8525_s17 + $0x3ce0] sm:$0xff]  ;;  %v2374_v14 = vld [vmem:[%s8525_s17 + $0x3d08] sm:$0xff] }
 0x479   : > { %v6584_v18 = vpack.c.bf16 %v2369_v10, %v2365_v9  ;;  %v2411_v9 = vld [vmem:[%s8525_s17 + $0x3e30] sm:$0xff]  ;;  %v2414_v10 = vld [vmem:[%s8525_s17 + $0x3e48] sm:$0xff] }
 0x47a   : > { %6565 = vmatpush1.bf16.msra.mxu0 %v6564_v20  ;;  %v6586_v20 = vpack.c.bf16 %v2378_v15, %v2374_v14  ;;  %v6606_v16 = vpack.c.bf16 %v2418_v11, %v2414_v10 }
 0x47b   : > { %7653 = vmatpush1.bf16.msra.mxu1 %v7652_v21  ;;  %6567 = vmatprep.subr.bf16.mxu0 %v6566_v22  ;;  %v2373_v21 = vld [vmem:[%s8525_s17 + $0x3d00] sm:$0xff] }
 0x47c   : > { %7655 = vmatprep.subr.bf16.mxu1 %v7654_v26  ;;  %v2377_v22 = vld [vmem:[%s8525_s17 + $0x3d20] sm:$0xff]  ;;  %v2382_v26 = vld [vmem:[%s8525_s17 + $0x3d48] sm:$0xff] }
 0x47d   : > { %v6588_v30 = vpack.c.bf16 %v2377_v22, %v2373_v21  ;;  %v2419_v21 = vld [vmem:[%s8525_s17 + $0x3e70] sm:$0xff]  ;;  %v2422_v22 = vld [vmem:[%s8525_s17 + $0x3e88] sm:$0xff] }
 0x47e   : > { %6569 = vmatpush1.bf16.msra.mxu0 %v6568_v32  ;;  %v6590_v32 = vpack.c.bf16 %v2386_v27, %v2382_v26  ;;  %v6610_v28 = vpack.c.bf16 %v2426_v23, %v2422_v22 }
 0x47f   : > { %7657 = vmatpush1.bf16.msra.mxu1 %v7656_v33  ;;  %6571 = vmatprep.subr.bf16.mxu0 %v6570_v34  ;;  %v2381_v33 = vld [vmem:[%s8525_s17 + $0x3d40] sm:$0xff] }
 0x480   : > { %7659 = vmatprep.subr.bf16.mxu1 %v7658_v38  ;;  %v2385_v34 = vld [vmem:[%s8525_s17 + $0x3d60] sm:$0xff]  ;;  %v2390_v38 = vld [vmem:[%s8525_s17 + $0x3d88] sm:$0xff] }
 0x481   : > { %3656 = vmatmul.mubr.f32.vlgmr.msra.gmra.mrb[0].mxu0 %v415_v44  ;;  %v6592_v42 = vpack.c.bf16 %v2385_v34, %v2381_v33  ;;  %v2427_v33 = vld [vmem:[%s8525_s17 + $0x3eb0] sm:$0xff]  ;;  %v2430_v34 = vld [vmem:[%s8525_s17 + $0x3ec8] sm:$0xff] }
 0x482   : > { %6573 = vmatpush1.bf16.msra.mxu0 %v6572_v45  ;;  %4863 = vmatmul.mubr.f32.vlgmr.msra.gmra.mrb[0].mxu1 %v415_v44  ;;  %v6594_v44 = vpack.c.bf16 %v2394_v39, %v2390_v38  ;;  %v2389_v45 = vld [vmem:[%s8525_s17 + $0x3d80] sm:$0xff]  ;;  %v6614_v40 = vpack.c.bf16 %v2434_v35, %v2430_v34 }
 0x483   : > { %7661 = vmatpush1.bf16.msra.mxu1 %v7660_v46  ;;  %6575 = vmatprep.subr.bf16.mxu0 %v6574_v47  ;;  %v2393_v46 = vld [vmem:[%s8525_s17 + $0x3da0] sm:$0xff]  ;;  %v2391_v47 = vld [vmem:[%s8525_s17 + $0x3d90] sm:$0xff] }
 0x484   : > { %7663 = vmatprep.subr.bf16.mxu1 %v7662_v51  ;;  %3726 = vmatprep.mubr.f32.mxu0 %v418_v57  ;;  %v2402_v51 = vld [vmem:[%s8525_s17 + $0x3de8] sm:$0xff]  ;;  %v6596_v54 = vpack.c.bf16 %v2393_v46, %v2389_v45  ;;  %v7684_v55 = vpack.c.bf16 %v2395_v49, %v2391_v47  ;;  %v2435_v45 = vld [vmem:[%s8525_s17 + $0x3ef0] sm:$0xff]  ;;  %v2444_v49 = vld [vmem:[%s8525_s17 + $0x3f38] sm:$0xff] }
 0x485   : > { %4933 = vmatprep.mubr.f32.mxu1 %v418_v57  ;;  %v6598_v56 = vpack.c.bf16 %v2402_v51, %v2398_v50  ;;  %v2397_v57 = vld [vmem:[%s8525_s17 + $0x3dc0] sm:$0xff]  ;;  %v2438_v46 = vld [vmem:[%s8525_s17 + $0x3f08] sm:$0xff] }
 0x486   : > { %6577 = vmatpush1.bf16.msra.mxu0 %v6576_v58  ;;  %v2401_v58 = vld [vmem:[%s8525_s17 + $0x3de0] sm:$0xff]  ;;  %v2442_v47 = vld [vmem:[%s8525_s17 + $0x3f28] sm:$0xff] }
 0x487   : > { %7665 = vmatpush1.bf16.msra.mxu1 %v7664_v59  ;;  %6579 = vmatprep.subr.bf16.mxu0 %v6578_v60  ;;  %v2399_v59 = vld [vmem:[%s8525_s17 + $0x3dd0] sm:$0xff]  ;;  %v7686_v60 = vpack.c.bf16 %v2404_v53, %v2400_v52  ;;  %v6600_v2 = vpack.c.bf16 %v2401_v58, %v2397_v57  ;;  %v6618_v52 = vpack.c.bf16 %v2442_v47, %v2438_v46  ;;  %v2437_v53 = vld [vmem:[%s8525_s17 + $0x3f00] sm:$0xff]  ;;  %v2446_v58 = vld [vmem:[%s8525_s17 + $0x3f48] sm:$0xff] }
 0x488   : > { %7667 = vmatprep.subr.bf16.mxu1 %v7666_v0  ;;  %v2408_v0 = vld [vmem:[%s8525_s17 + $0x3e18] sm:$0xff]  ;;  %v7688_v3 = vpack.c.bf16 %v2403_v61, %v2399_v59  ;;  %v2443_v57 = vld [vmem:[%s8525_s17 + $0x3f30] sm:$0xff]  ;;  %v2450_v59 = vld [vmem:[%s8525_s17 + $0x3f68] sm:$0xff] }
 0x489   : > { %v2452_v61 = vld [vmem:[%s8525_s17 + $0x3f78] sm:$0xff]  ;;  %v417_v46 = vld [vmem:[%s8547_s14 + $0xf0] sm:$0xff] }
 0x48a   : > { %6581 = vmatpush1.bf16.msra.mxu0 %v6580_v6  ;;  %v2409_v6 = vld [vmem:[%s8525_s17 + $0x3e20] sm:$0xff] }
 0x48b   : > { %7669 = vmatpush1.bf16.msra.mxu1 %v7668_v7  ;;  %6583 = vmatprep.subr.bf16.mxu0 %v6582_v8  ;;  %v2407_v7 = vld [vmem:[%s8525_s17 + $0x3e10] sm:$0xff]  ;;  %v7690_v8 = vpack.c.bf16 %v2412_v1, %v2408_v0  ;;  %v6604_v14 = vpack.c.bf16 %v2409_v6, %v2405_v5  ;;  %v6622_v0 = vpack.c.bf16 %v2450_v59, %v2446_v58  ;;  %v2445_v1 = vld [vmem:[%s8525_s17 + $0x3f40] sm:$0xff]  ;;  %v2454_v6 = vld [vmem:[%s8525_s17 + $0x3f88] sm:$0xff] }
 0x48c   : > { %7671 = vmatprep.subr.bf16.mxu1 %v7670_v12  ;;  %v2416_v12 = vld [vmem:[%s8525_s17 + $0x3e58] sm:$0xff]  ;;  %v7692_v15 = vpack.c.bf16 %v2411_v9, %v2407_v7  ;;  %v2451_v5 = vld [vmem:[%s8525_s17 + $0x3f70] sm:$0xff]  ;;  %v2458_v7 = vld [vmem:[%s8525_s17 + $0x3fa8] sm:$0xff] }
 0x48d   : > { %v2460_v9 = vld [vmem:[%s8525_s17 + $0x3fb8] sm:$0xff]  ;;  %v420_v59 = vld [vmem:[%s8547_s14 + $0x108] sm:$0xff] }
 0x48e   : > { %6585 = vmatpush1.bf16.msra.mxu0 %v6584_v18  ;;  %v2417_v18 = vld [vmem:[%s8525_s17 + $0x3e60] sm:$0xff]  ;;  %v2492_v58 = vld [vmem:[%s8525_s17 + $0x40b8] sm:$0xff] }
 0x48f   : > { %7673 = vmatpush1.bf16.msra.mxu1 %v7672_v19  ;;  %6587 = vmatprep.subr.bf16.mxu0 %v6586_v20  ;;  %v2415_v19 = vld [vmem:[%s8525_s17 + $0x3e50] sm:$0xff]  ;;  %v7694_v20 = vpack.c.bf16 %v2420_v13, %v2416_v12  ;;  %v6608_v26 = vpack.c.bf16 %v2417_v18, %v2413_v17  ;;  %v6626_v12 = vpack.c.bf16 %v2458_v7, %v2454_v6  ;;  %v2453_v13 = vld [vmem:[%s8525_s17 + $0x3f80] sm:$0xff]  ;;  %v2462_v18 = vld [vmem:[%s8525_s17 + $0x3fc8] sm:$0xff] }
 0x490   : > { %7675 = vmatprep.subr.bf16.mxu1 %v7674_v24  ;;  %v2424_v24 = vld [vmem:[%s8525_s17 + $0x3e98] sm:$0xff]  ;;  %v7696_v27 = vpack.c.bf16 %v2419_v21, %v2415_v19  ;;  %v2459_v17 = vld [vmem:[%s8525_s17 + $0x3fb0] sm:$0xff]  ;;  %v2466_v19 = vld [vmem:[%s8525_s17 + $0x3fe8] sm:$0xff] }
 0x491   : > { %v2468_v21 = vld [vmem:[%s8525_s17 + $0x3ff8] sm:$0xff] }
 0x492   : > { %6589 = vmatpush1.bf16.msra.mxu0 %v6588_v30  ;;  %v2425_v30 = vld [vmem:[%s8525_s17 + $0x3ea0] sm:$0xff]  ;;  %v2496_v6 = vld [vmem:[%s8525_s17 + $0x40d8] sm:$0xff] }
 0x493   : > { %7677 = vmatpush1.bf16.msra.mxu1 %v7676_v31  ;;  %6591 = vmatprep.subr.bf16.mxu0 %v6590_v32  ;;  %v2423_v31 = vld [vmem:[%s8525_s17 + $0x3e90] sm:$0xff]  ;;  %v7698_v32 = vpack.c.bf16 %v2428_v25, %v2424_v24  ;;  %v6612_v38 = vpack.c.bf16 %v2425_v30, %v2421_v29  ;;  %v6630_v24 = vpack.c.bf16 %v2466_v19, %v2462_v18  ;;  %v2461_v25 = vld [vmem:[%s8525_s17 + $0x3fc0] sm:$0xff]  ;;  %v2470_v30 = vld [vmem:[%s8525_s17 + $0x4008] sm:$0xff] }
 0x494   : > { %7679 = vmatprep.subr.bf16.mxu1 %v7678_v36  ;;  %v2432_v36 = vld [vmem:[%s8525_s17 + $0x3ed8] sm:$0xff]  ;;  %v7700_v39 = vpack.c.bf16 %v2427_v33, %v2423_v31  ;;  %v2467_v29 = vld [vmem:[%s8525_s17 + $0x3ff0] sm:$0xff]  ;;  %v2474_v31 = vld [vmem:[%s8525_s17 + $0x4028] sm:$0xff] }
 0x495   : > { %v2476_v33 = vld [vmem:[%s8525_s17 + $0x4038] sm:$0xff] }
 0x496   : > { %6593 = vmatpush1.bf16.msra.mxu0 %v6592_v42  ;;  %v2433_v42 = vld [vmem:[%s8525_s17 + $0x3ee0] sm:$0xff]  ;;  %v2500_v7 = vld [vmem:[%s8525_s17 + $0x40f8] sm:$0xff] }
 0x497   : > { %7681 = vmatpush1.bf16.msra.mxu1 %v7680_v43  ;;  %6595 = vmatprep.subr.bf16.mxu0 %v6594_v44  ;;  %v2431_v43 = vld [vmem:[%s8525_s17 + $0x3ed0] sm:$0xff]  ;;  %v7702_v44 = vpack.c.bf16 %v2436_v37, %v2432_v36  ;;  %v6616_v50 = vpack.c.bf16 %v2433_v42, %v2429_v41  ;;  %v6634_v36 = vpack.c.bf16 %v2474_v31, %v2470_v30  ;;  %v2469_v37 = vld [vmem:[%s8525_s17 + $0x4000] sm:$0xff]  ;;  %v2478_v42 = vld [vmem:[%s8525_s17 + $0x4048] sm:$0xff] }
 0x498   : > { %7683 = vmatprep.subr.bf16.mxu1 %v7682_v48  ;;  %v2440_v48 = vld [vmem:[%s8525_s17 + $0x3f18] sm:$0xff]  ;;  %v7704_v51 = vpack.c.bf16 %v2435_v45, %v2431_v43  ;;  %v2475_v41 = vld [vmem:[%s8525_s17 + $0x4030] sm:$0xff]  ;;  %v2482_v43 = vld [vmem:[%s8525_s17 + $0x4068] sm:$0xff] }
 0x499   : > { %v2484_v45 = vld [vmem:[%s8525_s17 + $0x4078] sm:$0xff] }
 0x49a   : > { %6597 = vmatpush1.bf16.msra.mxu0 %v6596_v54  ;;  %v2441_v54 = vld [vmem:[%s8525_s17 + $0x3f20] sm:$0xff]  ;;  %v2504_v18 = vld [vmem:[%s8525_s17 + $0x4118] sm:$0xff] }
 0x49b   : > { %7685 = vmatpush1.bf16.msra.mxu1 %v7684_v55  ;;  %6599 = vmatprep.subr.bf16.mxu0 %v6598_v56  ;;  %v2439_v55 = vld [vmem:[%s8525_s17 + $0x3f10] sm:$0xff]  ;;  %v7706_v56 = vpack.c.bf16 %v2444_v49, %v2440_v48  ;;  %v6620_v62 = vpack.c.bf16 %v2441_v54, %v2437_v53  ;;  %v6638_v49 = vpack.c.bf16 %v2482_v43, %v2478_v42  ;;  %v2508_v19 = vld [vmem:[%s8525_s17 + $0x4138] sm:$0xff] }
 0x49c   : > { %7687 = vmatprep.subr.bf16.mxu1 %v7686_v60  ;;  %v2448_v60 = vld [vmem:[%s8525_s17 + $0x3f58] sm:$0xff]  ;;  %v7708_v63 = vpack.c.bf16 %v2443_v57, %v2439_v55  ;;  %v2483_v54 = vld [vmem:[%s8525_s17 + $0x4070] sm:$0xff]  ;;  %v2486_v55 = vld [vmem:[%s8525_s17 + $0x4088] sm:$0xff] }
 0x49d   : > { %v2488_v57 = vld [vmem:[%s8525_s17 + $0x4098] sm:$0xff] }
 0x49e   : > { %6601 = vmatpush1.bf16.msra.mxu0 %v6600_v2  ;;  %v2449_v2 = vld [vmem:[%s8525_s17 + $0x3f60] sm:$0xff]  ;;  %v2512_v30 = vld [vmem:[%s8525_s17 + $0x4158] sm:$0xff] }
 0x49f   : > { %7689 = vmatpush1.bf16.msra.mxu1 %v7688_v3  ;;  %6603 = vmatprep.subr.bf16.mxu0 %v6602_v4  ;;  %v2447_v3 = vld [vmem:[%s8525_s17 + $0x3f50] sm:$0xff]  ;;  %v7710_v4 = vpack.c.bf16 %v2452_v61, %v2448_v60  ;;  %v6624_v10 = vpack.c.bf16 %v2449_v2, %v2445_v1  ;;  %v7730_v2 = vpack.c.bf16 %v2492_v58, %v2488_v57  ;;  %v2516_v31 = vld [vmem:[%s8525_s17 + $0x4178] sm:$0xff] }
 0x4a0   : > { %7691 = vmatprep.subr.bf16.mxu1 %v7690_v8  ;;  %v2456_v8 = vld [vmem:[%s8525_s17 + $0x3f98] sm:$0xff]  ;;  %v7712_v11 = vpack.c.bf16 %v2451_v5, %v2447_v3  ;;  %v2487_v1 = vld [vmem:[%s8525_s17 + $0x4090] sm:$0xff]  ;;  %v2498_v5 = vld [vmem:[%s8525_s17 + $0x40e8] sm:$0xff] }
 0x4a1   : > { %v2491_v3 = vld [vmem:[%s8525_s17 + $0x40b0] sm:$0xff]  ;;  %v2520_v42 = vld [vmem:[%s8525_s17 + $0x4198] sm:$0xff] }
 0x4a2   : > { %6605 = vmatpush1.bf16.msra.mxu0 %v6604_v14  ;;  %v2457_v14 = vld [vmem:[%s8525_s17 + $0x3fa0] sm:$0xff]  ;;  %v2524_v43 = vld [vmem:[%s8525_s17 + $0x41b8] sm:$0xff] }
 0x4a3   : > { %7693 = vmatpush1.bf16.msra.mxu1 %v7692_v15  ;;  %6607 = vmatprep.subr.bf16.mxu0 %v6606_v16  ;;  %v2455_v15 = vld [vmem:[%s8525_s17 + $0x3f90] sm:$0xff]  ;;  %v7714_v16 = vpack.c.bf16 %v2460_v9, %v2456_v8  ;;  %v6628_v22 = vpack.c.bf16 %v2457_v14, %v2453_v13  ;;  %v7732_v9 = vpack.c.bf16 %v2491_v3, %v2487_v1  ;;  %v2538_v1 = vld [vmem:[%s8525_s17 + $0x4228] sm:$0xff]  ;;  %v2540_v3 = vld [vmem:[%s8525_s17 + $0x4238] sm:$0xff] }
 0x4a4   : > { %7695 = vmatprep.subr.bf16.mxu1 %v7694_v20  ;;  %v2464_v20 = vld [vmem:[%s8525_s17 + $0x3fd8] sm:$0xff]  ;;  %v7716_v23 = vpack.c.bf16 %v2459_v17, %v2455_v15  ;;  %v2495_v13 = vld [vmem:[%s8525_s17 + $0x40d0] sm:$0xff]  ;;  %v7734_v14 = vpack.c.bf16 %v2500_v7, %v2496_v6  ;;  %v2506_v17 = vld [vmem:[%s8525_s17 + $0x4128] sm:$0xff] }
 0x4a5   : > { %v2499_v15 = vld [vmem:[%s8525_s17 + $0x40f0] sm:$0xff]  ;;  %v2533_v7 = vld [vmem:[%s8525_s17 + $0x4200] sm:$0xff] }
 0x4a6   : > { %6609 = vmatpush1.bf16.msra.mxu0 %v6608_v26  ;;  %v2465_v26 = vld [vmem:[%s8525_s17 + $0x3fe0] sm:$0xff] }
 0x4a7   : > { %7697 = vmatpush1.bf16.msra.mxu1 %v7696_v27  ;;  %6611 = vmatprep.subr.bf16.mxu0 %v6610_v28  ;;  %v2463_v27 = vld [vmem:[%s8525_s17 + $0x3fd0] sm:$0xff]  ;;  %v7718_v28 = vpack.c.bf16 %v2468_v21, %v2464_v20  ;;  %v6632_v34 = vpack.c.bf16 %v2465_v26, %v2461_v25  ;;  %v7736_v21 = vpack.c.bf16 %v2499_v15, %v2495_v13  ;;  %v2546_v13 = vld [vmem:[%s8525_s17 + $0x4268] sm:$0xff]  ;;  %v2548_v15 = vld [vmem:[%s8525_s17 + $0x4278] sm:$0xff] }
 0x4a8   : > { %7699 = vmatprep.subr.bf16.mxu1 %v7698_v32  ;;  %v2472_v32 = vld [vmem:[%s8525_s17 + $0x4018] sm:$0xff]  ;;  %v7720_v35 = vpack.c.bf16 %v2467_v29, %v2463_v27  ;;  %v2503_v25 = vld [vmem:[%s8525_s17 + $0x4110] sm:$0xff]  ;;  %v7738_v26 = vpack.c.bf16 %v2508_v19, %v2504_v18  ;;  %v2514_v29 = vld [vmem:[%s8525_s17 + $0x4168] sm:$0xff] }
 0x4a9   : > { %v2507_v27 = vld [vmem:[%s8525_s17 + $0x4130] sm:$0xff]  ;;  %v2541_v19 = vld [vmem:[%s8525_s17 + $0x4240] sm:$0xff] }
 0x4aa   : > { %6613 = vmatpush1.bf16.msra.mxu0 %v6612_v38  ;;  %v2473_v38 = vld [vmem:[%s8525_s17 + $0x4020] sm:$0xff] }
 0x4ab   : > { %7701 = vmatpush1.bf16.msra.mxu1 %v7700_v39  ;;  %6615 = vmatprep.subr.bf16.mxu0 %v6614_v40  ;;  %v2471_v39 = vld [vmem:[%s8525_s17 + $0x4010] sm:$0xff]  ;;  %v7722_v40 = vpack.c.bf16 %v2476_v33, %v2472_v32  ;;  %v6636_v47 = vpack.c.bf16 %v2473_v38, %v2469_v37  ;;  %v7740_v33 = vpack.c.bf16 %v2507_v27, %v2503_v25  ;;  %v2554_v25 = vld [vmem:[%s8525_s17 + $0x42a8] sm:$0xff]  ;;  %v2556_v27 = vld [vmem:[%s8525_s17 + $0x42b8] sm:$0xff] }
 0x4ac   : > { %7703 = vmatprep.subr.bf16.mxu1 %v7702_v44  ;;  %v2480_v44 = vld [vmem:[%s8525_s17 + $0x4058] sm:$0xff]  ;;  %v7724_v48 = vpack.c.bf16 %v2475_v41, %v2471_v39  ;;  %v2511_v37 = vld [vmem:[%s8525_s17 + $0x4150] sm:$0xff]  ;;  %v7742_v38 = vpack.c.bf16 %v2516_v31, %v2512_v30  ;;  %v2522_v41 = vld [vmem:[%s8525_s17 + $0x41a8] sm:$0xff] }
 0x4ad   : > { %v7726_v53 = vpack.c.bf16 %v2484_v45, %v2480_v44  ;;  %v2515_v39 = vld [vmem:[%s8525_s17 + $0x4170] sm:$0xff]  ;;  %v2549_v31 = vld [vmem:[%s8525_s17 + $0x4280] sm:$0xff] }
 0x4ae   : > { %6617 = vmatpush1.bf16.msra.mxu0 %v6616_v50  ;;  %v2477_v50 = vld [vmem:[%s8525_s17 + $0x4040] sm:$0xff]  ;;  %v7744_v45 = vpack.c.bf16 %v2515_v39, %v2511_v37  ;;  %v2562_v37 = vld [vmem:[%s8525_s17 + $0x42e8] sm:$0xff]  ;;  %v2564_v39 = vld [vmem:[%s8525_s17 + $0x42f8] sm:$0xff] }
 0x4af   : > { %7705 = vmatpush1.bf16.msra.mxu1 %v7704_v51  ;;  %6619 = vmatprep.subr.bf16.mxu0 %v6618_v52  ;;  %v2481_v51 = vld [vmem:[%s8525_s17 + $0x4060] sm:$0xff]  ;;  %v2479_v52 = vld [vmem:[%s8525_s17 + $0x4050] sm:$0xff] }
 0x4b0   : > { %7707 = vmatprep.subr.bf16.mxu1 %v7706_v56  ;;  %v2490_v56 = vld [vmem:[%s8525_s17 + $0x40a8] sm:$0xff]  ;;  %v6640_v60 = vpack.c.bf16 %v2481_v51, %v2477_v50  ;;  %v7728_v61 = vpack.c.bf16 %v2483_v54, %v2479_v52  ;;  %v7746_v50 = vpack.c.bf16 %v2524_v43, %v2520_v42  ;;  %v2523_v51 = vld [vmem:[%s8525_s17 + $0x41b0] sm:$0xff]  ;;  %v2528_v54 = vld [vmem:[%s8525_s17 + $0x41d8] sm:$0xff] }
 0x4b1   : > { %v2526_v52 = vld [vmem:[%s8525_s17 + $0x41c8] sm:$0xff]  ;;  %v2557_v43 = vld [vmem:[%s8525_s17 + $0x42c0] sm:$0xff] }
 0x4b2   : > { %6621 = vmatpush1.bf16.msra.mxu0 %v6620_v62  ;;  %v6642_v62 = vpack.c.bf16 %v2490_v56, %v2486_v55  ;;  %v2532_v55 = vld [vmem:[%s8525_s17 + $0x41f8] sm:$0xff] }
 0x4b3   : > { %7709 = vmatpush1.bf16.msra.mxu1 %v7708_v63  ;;  %6623 = vmatprep.subr.bf16.mxu0 %v6622_v0  ;;  %v2485_v63 = vld [vmem:[%s8525_s17 + $0x4080] sm:$0xff] }
 0x4b4   : > { %7711 = vmatprep.subr.bf16.mxu1 %v7710_v4  ;;  %v2489_v0 = vld [vmem:[%s8525_s17 + $0x40a0] sm:$0xff]  ;;  %v2494_v4 = vld [vmem:[%s8525_s17 + $0x40c8] sm:$0xff] }
 0x4b5   : > { %v6644_v8 = vpack.c.bf16 %v2489_v0, %v2485_v63  ;;  %v2531_v63 = vld [vmem:[%s8525_s17 + $0x41f0] sm:$0xff]  ;;  %v2534_v0 = vld [vmem:[%s8525_s17 + $0x4208] sm:$0xff] }
 0x4b6   : > { %6625 = vmatpush1.bf16.msra.mxu0 %v6624_v10  ;;  %v6646_v10 = vpack.c.bf16 %v2498_v5, %v2494_v4  ;;  %v6666_v6 = vpack.c.bf16 %v2538_v1, %v2534_v0 }
 0x4b7   : > { %7713 = vmatpush1.bf16.msra.mxu1 %v7712_v11  ;;  %6627 = vmatprep.subr.bf16.mxu0 %v6626_v12  ;;  %v2493_v11 = vld [vmem:[%s8525_s17 + $0x40c0] sm:$0xff] }
 0x4b8   : > { %7715 = vmatprep.subr.bf16.mxu1 %v7714_v16  ;;  %v2497_v12 = vld [vmem:[%s8525_s17 + $0x40e0] sm:$0xff]  ;;  %v2502_v16 = vld [vmem:[%s8525_s17 + $0x4108] sm:$0xff] }
 0x4b9   : > { %v6648_v20 = vpack.c.bf16 %v2497_v12, %v2493_v11  ;;  %v2539_v11 = vld [vmem:[%s8525_s17 + $0x4230] sm:$0xff]  ;;  %v2542_v12 = vld [vmem:[%s8525_s17 + $0x4248] sm:$0xff] }
 0x4ba   : > { %6629 = vmatpush1.bf16.msra.mxu0 %v6628_v22  ;;  %v6650_v22 = vpack.c.bf16 %v2506_v17, %v2502_v16  ;;  %v6670_v18 = vpack.c.bf16 %v2546_v13, %v2542_v12 }
 0x4bb   : > { %7717 = vmatpush1.bf16.msra.mxu1 %v7716_v23  ;;  %6631 = vmatprep.subr.bf16.mxu0 %v6630_v24  ;;  %v2501_v23 = vld [vmem:[%s8525_s17 + $0x4100] sm:$0xff] }
 0x4bc   : > { %7719 = vmatprep.subr.bf16.mxu1 %v7718_v28  ;;  %v2505_v24 = vld [vmem:[%s8525_s17 + $0x4120] sm:$0xff]  ;;  %v2510_v28 = vld [vmem:[%s8525_s17 + $0x4148] sm:$0xff] }
 0x4bd   : > { %v6652_v32 = vpack.c.bf16 %v2505_v24, %v2501_v23  ;;  %v2547_v23 = vld [vmem:[%s8525_s17 + $0x4270] sm:$0xff]  ;;  %v2550_v24 = vld [vmem:[%s8525_s17 + $0x4288] sm:$0xff] }
 0x4be   : > { %6633 = vmatpush1.bf16.msra.mxu0 %v6632_v34  ;;  %v6654_v34 = vpack.c.bf16 %v2514_v29, %v2510_v28  ;;  %v6674_v30 = vpack.c.bf16 %v2554_v25, %v2550_v24 }
 0x4bf   : > { %7721 = vmatpush1.bf16.msra.mxu1 %v7720_v35  ;;  %6635 = vmatprep.subr.bf16.mxu0 %v6634_v36  ;;  %v2509_v35 = vld [vmem:[%s8525_s17 + $0x4140] sm:$0xff] }
 0x4c0   : > { %7723 = vmatprep.subr.bf16.mxu1 %v7722_v40  ;;  %v2513_v36 = vld [vmem:[%s8525_s17 + $0x4160] sm:$0xff]  ;;  %v2518_v40 = vld [vmem:[%s8525_s17 + $0x4188] sm:$0xff] }
 0x4c1   : > { %3727 = vmatmul.mubr.f32.vlgmr.msra.gmra.mrb[0].mxu0 %v417_v46  ;;  %v6656_v44 = vpack.c.bf16 %v2513_v36, %v2509_v35  ;;  %v2555_v35 = vld [vmem:[%s8525_s17 + $0x42b0] sm:$0xff]  ;;  %v2558_v36 = vld [vmem:[%s8525_s17 + $0x42c8] sm:$0xff] }
 0x4c2   : > { %6637 = vmatpush1.bf16.msra.mxu0 %v6636_v47  ;;  %4934 = vmatmul.mubr.f32.vlgmr.msra.gmra.mrb[0].mxu1 %v417_v46  ;;  %v6658_v46 = vpack.c.bf16 %v2522_v41, %v2518_v40  ;;  %v2517_v47 = vld [vmem:[%s8525_s17 + $0x4180] sm:$0xff]  ;;  %v6678_v42 = vpack.c.bf16 %v2562_v37, %v2558_v36  ;;  %v385_v36 = vld [vmem:[#allocation2 + $0x10] sm:$0xff]  ;;  %v384_v37 = vld [vmem:[#allocation2 + $0x8] sm:$0xff] }
 0x4c3   : > { %7725 = vmatpush1.bf16.msra.mxu1 %v7724_v48  ;;  %6639 = vmatprep.subr.bf16.mxu0 %v6638_v49  ;;  %v2521_v48 = vld [vmem:[%s8525_s17 + $0x41a0] sm:$0xff]  ;;  %v2519_v49 = vld [vmem:[%s8525_s17 + $0x4190] sm:$0xff] }
 0x4c4   : > { %7727 = vmatprep.subr.bf16.mxu1 %v7726_v53  ;;  %3797 = vmatprep.mubr.f32.mxu0 %v420_v59  ;;  %v2530_v53 = vld [vmem:[%s8525_s17 + $0x41e8] sm:$0xff]  ;;  %v6660_v56 = vpack.c.bf16 %v2521_v48, %v2517_v47  ;;  %v7748_v57 = vpack.c.bf16 %v2523_v51, %v2519_v49  ;;  %v2563_v47 = vld [vmem:[%s8525_s17 + $0x42f0] sm:$0xff]  ;;  %v2572_v51 = vld [vmem:[%s8525_s17 + $0x4338] sm:$0xff] }
 0x4c5   : > { %5004 = vmatprep.mubr.f32.mxu1 %v420_v59  ;;  %v6662_v58 = vpack.c.bf16 %v2530_v53, %v2526_v52  ;;  %v2525_v59 = vld [vmem:[%s8525_s17 + $0x41c0] sm:$0xff]  ;;  %v2566_v48 = vld [vmem:[%s8525_s17 + $0x4308] sm:$0xff] }
 0x4c6   : > { %6641 = vmatpush1.bf16.msra.mxu0 %v6640_v60  ;;  %v2529_v60 = vld [vmem:[%s8525_s17 + $0x41e0] sm:$0xff]  ;;  %v2570_v49 = vld [vmem:[%s8525_s17 + $0x4328] sm:$0xff] }
 0x4c7   : > { %7729 = vmatpush1.bf16.msra.mxu1 %v7728_v61  ;;  %6643 = vmatprep.subr.bf16.mxu0 %v6642_v62  ;;  %v2527_v61 = vld [vmem:[%s8525_s17 + $0x41d0] sm:$0xff]  ;;  %v7750_v62 = vpack.c.bf16 %v2532_v55, %v2528_v54  ;;  %v6664_v4 = vpack.c.bf16 %v2529_v60, %v2525_v59  ;;  %v6682_v54 = vpack.c.bf16 %v2570_v49, %v2566_v48  ;;  %v2565_v55 = vld [vmem:[%s8525_s17 + $0x4300] sm:$0xff]  ;;  %v2574_v60 = vld [vmem:[%s8525_s17 + $0x4348] sm:$0xff] }
 0x4c8   : > { %7731 = vmatprep.subr.bf16.mxu1 %v7730_v2  ;;  %v2536_v2 = vld [vmem:[%s8525_s17 + $0x4218] sm:$0xff]  ;;  %v7752_v5 = vpack.c.bf16 %v2531_v63, %v2527_v61  ;;  %v2571_v59 = vld [vmem:[%s8525_s17 + $0x4330] sm:$0xff]  ;;  %v2578_v61 = vld [vmem:[%s8525_s17 + $0x4368] sm:$0xff] }
 0x4c9   : > { %v2580_v63 = vld [vmem:[%s8525_s17 + $0x4378] sm:$0xff]  ;;  %v5074_v48 = vld [vmem:[#allocation7 + $0x88] sm:$0xff] (!%p5480_p12)  ;;  %v5057_v49 = vld [vmem:[#allocation7] sm:$0xff] (!%p5480_p12) }
 0x4ca   : > { %6645 = vmatpush1.bf16.msra.mxu0 %v6644_v8  ;;  %v2537_v8 = vld [vmem:[%s8525_s17 + $0x4220] sm:$0xff] }
 0x4cb   : > { %7733 = vmatpush1.bf16.msra.mxu1 %v7732_v9  ;;  %6647 = vmatprep.subr.bf16.mxu0 %v6646_v10  ;;  %v2535_v9 = vld [vmem:[%s8525_s17 + $0x4210] sm:$0xff]  ;;  %v7754_v10 = vpack.c.bf16 %v2540_v3, %v2536_v2  ;;  %v6668_v16 = vpack.c.bf16 %v2537_v8, %v2533_v7  ;;  %v6686_v2 = vpack.c.bf16 %v2578_v61, %v2574_v60  ;;  %v2573_v3 = vld [vmem:[%s8525_s17 + $0x4340] sm:$0xff]  ;;  %v2582_v8 = vld [vmem:[%s8525_s17 + $0x4388] sm:$0xff] }
 0x4cc   : > { %7735 = vmatprep.subr.bf16.mxu1 %v7734_v14  ;;  %v2544_v14 = vld [vmem:[%s8525_s17 + $0x4258] sm:$0xff]  ;;  %v7756_v17 = vpack.c.bf16 %v2539_v11, %v2535_v9  ;;  %v2579_v7 = vld [vmem:[%s8525_s17 + $0x4370] sm:$0xff]  ;;  %v2586_v9 = vld [vmem:[%s8525_s17 + $0x43a8] sm:$0xff] }
 0x4cd   : > { %v2588_v11 = vld [vmem:[%s8525_s17 + $0x43b8] sm:$0xff] }
 0x4ce   : > { %6649 = vmatpush1.bf16.msra.mxu0 %v6648_v20  ;;  %v2545_v20 = vld [vmem:[%s8525_s17 + $0x4260] sm:$0xff]  ;;  %v5059_v61 = vld [vmem:[#allocation7 + $0x10] sm:$0xff] (!%p5480_p12) }
 0x4cf   : > { %7737 = vmatpush1.bf16.msra.mxu1 %v7736_v21  ;;  %6651 = vmatprep.subr.bf16.mxu0 %v6650_v22  ;;  %v2543_v21 = vld [vmem:[%s8525_s17 + $0x4250] sm:$0xff]  ;;  %v7758_v22 = vpack.c.bf16 %v2548_v15, %v2544_v14  ;;  %v6672_v28 = vpack.c.bf16 %v2545_v20, %v2541_v19  ;;  %v6690_v14 = vpack.c.bf16 %v2586_v9, %v2582_v8  ;;  %v2581_v15 = vld [vmem:[%s8525_s17 + $0x4380] sm:$0xff]  ;;  %v2590_v20 = vld [vmem:[%s8525_s17 + $0x43c8] sm:$0xff] }
 0x4d0   : > { %7739 = vmatprep.subr.bf16.mxu1 %v7738_v26  ;;  %v2552_v26 = vld [vmem:[%s8525_s17 + $0x4298] sm:$0xff]  ;;  %v7760_v29 = vpack.c.bf16 %v2547_v23, %v2543_v21  ;;  %v2587_v19 = vld [vmem:[%s8525_s17 + $0x43b0] sm:$0xff]  ;;  %v2594_v21 = vld [vmem:[%s8525_s17 + $0x43e8] sm:$0xff] }
 0x4d1   : > { %v2596_v23 = vld [vmem:[%s8525_s17 + $0x43f8] sm:$0xff] }
 0x4d2   : > { %6653 = vmatpush1.bf16.msra.mxu0 %v6652_v32  ;;  %v2553_v32 = vld [vmem:[%s8525_s17 + $0x42a0] sm:$0xff] }
 0x4d3   : > { %7741 = vmatpush1.bf16.msra.mxu1 %v7740_v33  ;;  %6655 = vmatprep.subr.bf16.mxu0 %v6654_v34  ;;  %v2551_v33 = vld [vmem:[%s8525_s17 + $0x4290] sm:$0xff]  ;;  %v7762_v34 = vpack.c.bf16 %v2556_v27, %v2552_v26  ;;  %v6676_v40 = vpack.c.bf16 %v2553_v32, %v2549_v31  ;;  %v6694_v26 = vpack.c.bf16 %v2594_v21, %v2590_v20  ;;  %v2589_v27 = vld [vmem:[%s8525_s17 + $0x43c0] sm:$0xff] }
 0x4d4   : > { %7743 = vmatprep.subr.bf16.mxu1 %v7742_v38  ;;  %v2560_v38 = vld [vmem:[%s8525_s17 + $0x42d8] sm:$0xff]  ;;  %v7764_v41 = vpack.c.bf16 %v2555_v35, %v2551_v33  ;;  %v2595_v31 = vld [vmem:[%s8525_s17 + $0x43f0] sm:$0xff]  ;;  %v383_v35 = vld [vmem:[#allocation2] sm:$0xff] }
 0x4d5   : > { %v5076_v60 = vld [vmem:[#allocation7 + $0x98] sm:$0xff] (!%p5480_p12)  ;;  %v5063_v20 = vld [vmem:[#allocation7 + $0x30] sm:$0xff] (!%p5480_p12) }
 0x4d6   : > { %6657 = vmatpush1.bf16.msra.mxu0 %v6656_v44  ;;  %v2561_v44 = vld [vmem:[%s8525_s17 + $0x42e0] sm:$0xff] }
 0x4d7   : > { %7745 = vmatpush1.bf16.msra.mxu1 %v7744_v45  ;;  %6659 = vmatprep.subr.bf16.mxu0 %v6658_v46  ;;  %v2559_v45 = vld [vmem:[%s8525_s17 + $0x42d0] sm:$0xff]  ;;  %v7766_v46 = vpack.c.bf16 %v2564_v39, %v2560_v38  ;;  %v6680_v52 = vpack.c.bf16 %v2561_v44, %v2557_v43  ;;  %v386_v39 = vld [vmem:[#allocation2 + $0x18] sm:$0xff] }
 0x4d8   : > { %7747 = vmatprep.subr.bf16.mxu1 %v7746_v50  ;;  %v2568_v50 = vld [vmem:[%s8525_s17 + $0x4318] sm:$0xff]  ;;  %v7768_v53 = vpack.c.bf16 %v2563_v47, %v2559_v45  ;;  %v5073_v47 = vld [vmem:[#allocation7 + $0x80] sm:$0xff] (!%p5480_p12) }
 0x4da   : > { %6661 = vmatpush1.bf16.msra.mxu0 %v6660_v56  ;;  %v2569_v56 = vld [vmem:[%s8525_s17 + $0x4320] sm:$0xff] }
 0x4db   : > { %7749 = vmatpush1.bf16.msra.mxu1 %v7748_v57  ;;  %6663 = vmatprep.subr.bf16.mxu0 %v6662_v58  ;;  %v2567_v57 = vld [vmem:[%s8525_s17 + $0x4310] sm:$0xff]  ;;  %v7770_v58 = vpack.c.bf16 %v2572_v51, %v2568_v50  ;;  %v6684_v0 = vpack.c.bf16 %v2569_v56, %v2565_v55  ;;  %v7786_v50 = vpack.c.bf16 (!%p5480_p12), %v5074_v48, %v5073_v47  ;;  %v5089_v56 = vld [vmem:[#allocation7 + $0x100] sm:$0xff] (!%p5480_p12) }
 0x4dc   : > { %7751 = vmatprep.subr.bf16.mxu1 %v7750_v62  ;;  %v2576_v62 = vld [vmem:[%s8525_s17 + $0x4358] sm:$0xff]  ;;  %v7772_v1 = vpack.c.bf16 %v2571_v59, %v2567_v57  ;;  %v5058_v51 = vld [vmem:[#allocation7 + $0x8] sm:$0xff] (!%p5480_p12) }
 0x4dd   : > { %v5090_v57 = vld [vmem:[#allocation7 + $0x108] sm:$0xff] (!%p5480_p12) }
 0x4de   : > { %6665 = vmatpush1.bf16.msra.mxu0 %v6664_v4  ;;  %v2577_v4 = vld [vmem:[%s8525_s17 + $0x4360] sm:$0xff]  ;;  %v7820_v59 = vpack.c.bf16 (!%p5480_p12), %v5090_v57, %v5089_v56  ;;  %v5086_v56 = vld [vmem:[#allocation7 + $0xe8] sm:$0xff] (!%p5480_p12) }
 0x4df   : > { %7753 = vmatpush1.bf16.msra.mxu1 %v7752_v5  ;;  %6667 = vmatprep.subr.bf16.mxu0 %v6666_v6  ;;  %v2575_v5 = vld [vmem:[%s8525_s17 + $0x4350] sm:$0xff]  ;;  %v7774_v6 = vpack.c.bf16 %v2580_v63, %v2576_v62  ;;  %v6688_v12 = vpack.c.bf16 %v2577_v4, %v2573_v3  ;;  %v5060_v62 = vld [vmem:[#allocation7 + $0x18] sm:$0xff] (!%p5480_p12) }
 0x4e0   : > { %7755 = vmatprep.subr.bf16.mxu1 %v7754_v10  ;;  %v2584_v10 = vld [vmem:[%s8525_s17 + $0x4398] sm:$0xff]  ;;  %v7776_v13 = vpack.c.bf16 %v2579_v7, %v2575_v5  ;;  %v5078_v7 = vld [vmem:[#allocation7 + $0xa8] sm:$0xff] (!%p5480_p12) }
 0x4e1   : > { %v5091_v3 = vld [vmem:[#allocation7 + $0x110] sm:$0xff] (!%p5480_p12)  ;;  %v5092_v5 = vld [vmem:[#allocation7 + $0x118] sm:$0xff] (!%p5480_p12) }
 0x4e2   : > { %6669 = vmatpush1.bf16.msra.mxu0 %v6668_v16  ;;  %v2585_v16 = vld [vmem:[%s8525_s17 + $0x43a0] sm:$0xff]  ;;  %v7824_v8 = vpack.c.bf16 (!%p5480_p12), %v5092_v5, %v5091_v3  ;;  %v5102_v5 = vld [vmem:[#allocation7 + $0x168] sm:$0xff] (!%p5480_p12) }
 0x4e3   : > { %7757 = vmatpush1.bf16.msra.mxu1 %v7756_v17  ;;  %6671 = vmatprep.subr.bf16.mxu0 %v6670_v18  ;;  %v2583_v17 = vld [vmem:[%s8525_s17 + $0x4390] sm:$0xff]  ;;  %v7778_v18 = vpack.c.bf16 %v2588_v11, %v2584_v10  ;;  %v6692_v24 = vpack.c.bf16 %v2585_v16, %v2581_v15  ;;  %v5061_v10 = vld [vmem:[#allocation7 + $0x20] sm:$0xff] (!%p5480_p12) }
 0x4e4   : > { %7759 = vmatprep.subr.bf16.mxu1 %v7758_v22  ;;  %v2592_v22 = vld [vmem:[%s8525_s17 + $0x43d8] sm:$0xff]  ;;  %v7780_v25 = vpack.c.bf16 %v2587_v19, %v2583_v17  ;;  %v5062_v11 = vld [vmem:[#allocation7 + $0x28] sm:$0xff] (!%p5480_p12) }
 0x4e5   : > { %v5094_v15 = vld [vmem:[#allocation7 + $0x128] sm:$0xff] (!%p5480_p12)  ;;  %v7796_v16 = vpack.c.bf16 (!%p5480_p12), %v5062_v11, %v5061_v10  ;;  %v5080_v19 = vld [vmem:[#allocation7 + $0xb8] sm:$0xff] (!%p5480_p12) }
 0x4e6   : > { %6673 = vmatpush1.bf16.msra.mxu0 %v6672_v28  ;;  %v2593_v28 = vld [vmem:[%s8525_s17 + $0x43e0] sm:$0xff] }
 0x4e7   : > { %7761 = vmatpush1.bf16.msra.mxu1 %v7760_v29  ;;  %6675 = vmatprep.subr.bf16.mxu0 %v6674_v30  ;;  %v7782_v29 = vpack.c.bf16 %v2596_v23, %v2592_v22  ;;  %v2591_v30 = vld [vmem:[%s8525_s17 + $0x43d0] sm:$0xff]  ;;  %v6696_v32 = vpack.c.bf16 %v2593_v28, %v2589_v27  ;;  %v5064_v23 = vld [vmem:[#allocation7 + $0x38] sm:$0xff] (!%p5480_p12) }
 0x4e8   : > { %7763 = vmatprep.subr.bf16.mxu1 %v7762_v34  ;;  %v7784_v33 = vpack.c.bf16 %v2595_v31, %v2591_v30  ;;  %v419_v34 = vld [vmem:[%s8547_s14 + $0x100] sm:$0xff]  ;;  %v5095_v27 = vld [vmem:[#allocation7 + $0x130] sm:$0xff] (!%p5480_p12)  ;;  %v5029_v30 = vlaneseq (!%p5480_p12)  ;;  %v5082_v31 = vld [vmem:[#allocation7 + $0xc8] sm:$0xff] (!%p5480_p12) }
 0x4e9   : > { %v5096_v28 = vld [vmem:[#allocation7 + $0x138] sm:$0xff] (!%p5480_p12) }
 0x4ea   : > { %6677 = vmatpush1.bf16.msra.mxu0 %v6676_v40  ;;  %v5088_v10 = vld [vmem:[#allocation7 + $0xf8] sm:$0xff] (!%p5480_p12) }
 0x4eb   : > { %7765 = vmatpush1.bf16.msra.mxu1 %v7764_v41  ;;  %6679 = vmatprep.subr.bf16.mxu0 %v6678_v42 }
 0x4ec   : > { %7767 = vmatprep.subr.bf16.mxu1 %v7766_v46 }
 0x4ee   : > { %6681 = vmatpush1.bf16.msra.mxu0 %v6680_v52  ;;  %v5105_v52 = vld [vmem:[#allocation7 + $0x180] sm:$0xff] (!%p5480_p12) }
 0x4ef   : > { %7769 = vmatpush1.bf16.msra.mxu1 %v7768_v53  ;;  %6683 = vmatprep.subr.bf16.mxu0 %v6682_v54  ;;  %v5106_v53 = vld [vmem:[#allocation7 + $0x188] sm:$0xff] (!%p5480_p12)  ;;  %v7788_v54 = vpack.c.bf16 (!%p5480_p12), %v5058_v51, %v5057_v49  ;;  %v5068_v51 = vld [vmem:[#allocation7 + $0x58] sm:$0xff] (!%p5480_p12) }
 0x4f0   : > { %7771 = vmatprep.subr.bf16.mxu1 %v7770_v58  ;;  %v7818_v55 = vpack.c.bf16 (!%p5480_p12), %v5106_v53, %v5105_v52  ;;  %v5075_v58 = vld [vmem:[#allocation7 + $0x90] sm:$0xff] (!%p5480_p12) }
 0x4f1   : > { %v7790_v63 = vpack.c.bf16 (!%p5480_p12), %v5076_v60, %v5075_v58  ;;  %v5099_v52 = vld [vmem:[#allocation7 + $0x150] sm:$0xff] (!%p5480_p12)  ;;  %v5118_v60 = vld [vmem:[#allocation7 + $0x1e8] sm:$0xff] (!%p5480_p12) }
 0x4f2   : > { %6685 = vmatpush1.bf16.msra.mxu0 %v6684_v0  ;;  %v7792_v0 = vpack.c.bf16 (!%p5480_p12), %v5060_v62, %v5059_v61 }
 0x4f3   : > { %7773 = vmatpush1.bf16.msra.mxu1 %v7772_v1  ;;  %6687 = vmatprep.subr.bf16.mxu0 %v6686_v2  ;;  %v5107_v1 = vld [vmem:[#allocation7 + $0x190] sm:$0xff] (!%p5480_p12)  ;;  %v5108_v2 = vld [vmem:[#allocation7 + $0x198] sm:$0xff] (!%p5480_p12) }
 0x4f4   : > { %7775 = vmatprep.subr.bf16.mxu1 %v7774_v6  ;;  %v7822_v4 = vpack.c.bf16 (!%p5480_p12), %v5108_v2, %v5107_v1  ;;  %v5077_v6 = vld [vmem:[#allocation7 + $0xa0] sm:$0xff] (!%p5480_p12) }
 0x4f5   : > { %v7794_v9 = vpack.c.bf16 (!%p5480_p12), %v5078_v7, %v5077_v6  ;;  %v5101_v1 = vld [vmem:[#allocation7 + $0x160] sm:$0xff] (!%p5480_p12)  ;;  %v5027_v7 = vld [vmem:[#allocation5] sm:$0xf] (!%p5480_p12) }
 0x4f6   : > { %6689 = vmatpush1.bf16.msra.mxu0 %v6688_v12  ;;  %v5109_v12 = vld [vmem:[#allocation7 + $0x1a0] sm:$0xff] (!%p5480_p12) }
 0x4f7   : > { %7777 = vmatpush1.bf16.msra.mxu1 %v7776_v13  ;;  %6691 = vmatprep.subr.bf16.mxu0 %v6690_v14  ;;  %v5110_v13 = vld [vmem:[#allocation7 + $0x1a8] sm:$0xff] (!%p5480_p12)  ;;  %v5093_v14 = vld [vmem:[#allocation7 + $0x120] sm:$0xff] (!%p5480_p12) }
 0x4f8   : > { %7779 = vmatprep.subr.bf16.mxu1 %v7778_v18  ;;  %v7826_v17 = vpack.c.bf16 (!%p5480_p12), %v5110_v13, %v5109_v12  ;;  %v5079_v18 = vld [vmem:[#allocation7 + $0xb0] sm:$0xff] (!%p5480_p12)  ;;  %v7828_v21 = vpack.c.bf16 (!%p5480_p12), %v5094_v15, %v5093_v14  ;;  %v5120_v15 = vld [vmem:[#allocation7 + $0x1f8] sm:$0xff] (!%p5480_p12) }
 0x4f9   : > { %v7798_v22 = vpack.c.bf16 (!%p5480_p12), %v5080_v19, %v5079_v18  ;;  %v5119_v14 = vld [vmem:[#allocation7 + $0x1f0] sm:$0xff] (!%p5480_p12) }
 0x4fa   : > { %6693 = vmatpush1.bf16.msra.mxu0 %v6692_v24  ;;  %v5111_v24 = vld [vmem:[#allocation7 + $0x1b0] sm:$0xff] (!%p5480_p12) }
 0x4fb   : > { %7781 = vmatpush1.bf16.msra.mxu1 %v7780_v25  ;;  %6695 = vmatprep.subr.bf16.mxu0 %v6694_v26  ;;  %v5112_v25 = vld [vmem:[#allocation7 + $0x1b8] sm:$0xff] (!%p5480_p12) }
 0x4fc   : > { %7783 = vmatprep.subr.bf16.mxu1 %v7782_v29  ;;  %v7830_v26 = vpack.c.bf16 (!%p5480_p12), %v5112_v25, %v5111_v24  ;;  %v5081_v29 = vld [vmem:[#allocation7 + $0xc0] sm:$0xff] (!%p5480_p12)  ;;  %v5071_v24 = vld [vmem:[#allocation7 + $0x70] sm:$0xff] (!%p5480_p12)  ;;  %v5072_v25 = vld [vmem:[#allocation7 + $0x78] sm:$0xff] (!%p5480_p12) }
 0x4fe   : > { %6697 = vmatpush1.bf16.msra.mxu0 %v6696_v32  ;;  %v7800_v32 = vpack.c.bf16 (!%p5480_p12), %v5064_v23, %v5063_v20 }
 0x4ff   : > { %7785 = vmatpush1.bf16.msra.mxu1 %v7784_v33  ;;  %7787 = vmatprep.subr.bf16.mxu0 (!%p5480_p12), %v7786_v50  ;;  %v5113_v33 = vld [vmem:[#allocation7 + $0x1c0] sm:$0xff] (!%p5480_p12)  ;;  %v5067_v50 = vld [vmem:[#allocation7 + $0x50] sm:$0xff] (!%p5480_p12) }
 0x500   : > { %7819 = vmatprep.subr.bf16.mxu1 (!%p5480_p12), %v7818_v55  ;;  %v5085_v55 = vld [vmem:[#allocation7 + $0xe0] sm:$0xff] (!%p5480_p12)  ;;  %v7808_v62 = vpack.c.bf16 (!%p5480_p12), %v5068_v51, %v5067_v50 }
 0x501   : > { %3798 = vmatmul.mubr.f32.vlgmr.msra.gmra.mrb[0].mxu0 %v419_v34  ;;  %v5277_v51 = vld [vmem:[#allocation10 + $0x40] sm:$0xff] (!%p5480_p12) }
 0x502   : > { %5005 = vmatmul.mubr.f32.vlgmr.msra.gmra.mrb[0].mxu1 %v419_v34  ;;  %7789 = vmatpush3.bf16.msra.mxu0 (!%p5480_p12), %v7788_v54  ;;  %v5114_v34 = vld [vmem:[#allocation7 + $0x1c8] sm:$0xff] (!%p5480_p12)  ;;  %v5100_v54 = vld [vmem:[#allocation7 + $0x158] sm:$0xff] (!%p5480_p12) }
 0x503   : > { %7821 = vmatpush3.bf16.msra.mxu1 (!%p5480_p12), %v7820_v59  ;;  %7791 = vmatprep.subr.bf16.mxu0 (!%p5480_p12), %v7790_v63  ;;  %v5117_v59 = vld [vmem:[#allocation7 + $0x1e0] sm:$0xff] (!%p5480_p12)  ;;  %v7840_v3 = vpack.c.bf16 (!%p5480_p12), %v5100_v54, %v5099_v52  ;;  %v5278_v52 = vld [vmem:[#allocation10 + $0x48] sm:$0xff] (!%p5480_p12)  ;;  %v5279_v54 = vld [vmem:[#allocation10 + $0x50] sm:$0xff] (!%p5480_p12) }
 0x504   : > { %7823 = vmatprep.subr.bf16.mxu1 (!%p5480_p12), %v7822_v4  ;;  %v5069_v63 = vld [vmem:[#allocation7 + $0x60] sm:$0xff] (!%p5480_p12)  ;;  %v7810_v4 = vpack.c.bf16 (!%p5480_p12), %v5086_v56, %v5085_v55 }
 0x505   : > { %v5280_v55 = vld [vmem:[#allocation10 + $0x58] sm:$0xff] (!%p5480_p12) }
 0x506   : > { %7793 = vmatpush3.bf16.msra.mxu0 (!%p5480_p12), %v7792_v0  ;;  %v5070_v0 = vld [vmem:[#allocation7 + $0x68] sm:$0xff] (!%p5480_p12)  ;;  %v7866_v56 = vpack.c.bf16 (!%p5480_p12), %v5280_v55, %v5279_v54 }
 0x507   : > { %7825 = vmatpush3.bf16.msra.mxu1 (!%p5480_p12), %v7824_v8  ;;  %7795 = vmatprep.subr.bf16.mxu0 (!%p5480_p12), %v7794_v9  ;;  %v7842_v8 = vpack.c.bf16 (!%p5480_p12), %v5118_v60, %v5117_v59  ;;  %v5087_v9 = vld [vmem:[#allocation7 + $0xf0] sm:$0xff] (!%p5480_p12) }
 0x508   : > { %7827 = vmatprep.subr.bf16.mxu1 (!%p5480_p12), %v7826_v17  ;;  %v7812_v17 = vpack.c.bf16 (!%p5480_p12), %v5070_v0, %v5069_v63  ;;  %v7814_v23 = vpack.c.bf16 (!%p5480_p12), %v5088_v10, %v5087_v9  ;;  %v5283_v60 = vld [vmem:[#allocation10 + $0x70] sm:$0xff] (!%p5480_p12)  ;;  %v8269_v63 = vmov (!%p5480_p12), 0.0   ;;  %v5482_v10 = vld [vmem:[#allocation11] ss:$0 sm:$0xff] (!%p5480_p12) }
 0x50a   : > { %7797 = vmatpush3.bf16.msra.mxu0 (!%p5480_p12), %v7796_v16 }
 0x50b   : > { %7829 = vmatpush3.bf16.msra.mxu1 (!%p5480_p12), %v7828_v21  ;;  %7799 = vmatprep.subr.bf16.mxu0 (!%p5480_p12), %v7798_v22  ;;  %v7844_v22 = vpack.c.bf16 (!%p5480_p12), %v5102_v5, %v5101_v1  ;;  %v5481_v1 = vld [vmem:[#allocation8] ss:$0 sm:$0xff] (!%p5480_p12) }
 0x50c   : > { %7831 = vmatprep.subr.bf16.mxu1 (!%p5480_p12), %v7830_v26 }
 0x50e   : > { %7801 = vmatpush3.bf16.msra.mxu0 (!%p5480_p12), %v7800_v32 }
 0x5d3   : > { %5022 = sbr.rel (%p5480_p12) target bundleno = 1948 (0x79c), region = 80 }
 0x5d4   : > { %v3799_v38 = vpop.f32.mrb[0].mxu0 }
 0x5d5   : > { %v5011_v40 = vadd.f32 %v3799_v38, %v383_v35  ;;  %v5006_v41 = vpop.f32.mrb[0].mxu1  ;;  %v3801_v42 = vpop.f32.mrb[1].mxu0  ;;  %v7832_v35 = vpack.c.bf16 (!%p5480_p12), %v5096_v28, %v5095_v27  ;;  %v5066_v38 = vld [vmem:[#allocation7 + $0x48] sm:$0xff] (!%p5480_p12)  ;;  %v7846_v27 = vpack.c.bf16 (!%p5480_p12), %v5120_v15, %v5119_v14  ;;  %v5103_v28 = vld [vmem:[#allocation7 + $0x170] sm:$0xff] (!%p5480_p12) }
 0x5d6   : > { %v5013_v43 = vadd.f32 %v5006_v41, %v385_v36  ;;  %v5012_v44 = vadd.f32 %v3801_v42, %v384_v37  ;;  %v5008_v45 = vpop.f32.mrb[1].mxu1  ;;  %v7802_v36 = vpack.c.bf16 (!%p5480_p12), %v5082_v31, %v5081_v29  ;;  %v5065_v37 = vld [vmem:[#allocation7 + $0x40] sm:$0xff] (!%p5480_p12)  ;;  %v5098_v41 = vld [vmem:[#allocation7 + $0x148] sm:$0xff] (!%p5480_p12)  ;;  %v5083_v42 = vld [vmem:[#allocation7 + $0xd0] sm:$0xff] (!%p5480_p12) }
 0x5d7   : > { %5015 = vst [vmem:[#allocation2] sm:$0xff] %v5011_v40  ;;  %v5014_v46 = vadd.f32 %v5008_v45, %v386_v39  ;;  %v5097_v39 = vld [vmem:[#allocation7 + $0x140] sm:$0xff] (!%p5480_p12)  ;;  %v7834_v40 = vpack.c.bf16 (!%p5480_p12), %v5114_v34, %v5113_v33  ;;  %v5115_v45 = vld [vmem:[#allocation7 + $0x1d0] sm:$0xff] (!%p5480_p12)  ;;  %v7804_v47 = vpack.c.bf16 (!%p5480_p12), %v5066_v38, %v5065_v37  ;;  %7833 = vmatpush3.bf16.msra.mxu1 (!%p5480_p12), %v7832_v35  ;;  %v5104_v29 = vld [vmem:[#allocation7 + $0x178] sm:$0xff] (!%p5480_p12) }
 0x5d8   : > { %5017 = vst [vmem:[#allocation2 + $0x10] sm:$0xff] %v5013_v43  ;;  %5016 = vst [vmem:[#allocation2 + $0x8] sm:$0xff] %v5012_v44  ;;  %v5084_v43 = vld [vmem:[#allocation7 + $0xd8] sm:$0xff] (!%p5480_p12)  ;;  %v5030_v44 = vshrl.u32 (!%p5480_p12), %v5029_v30, 7  ;;  %7803 = vmatprep.subr.bf16.mxu0 (!%p5480_p12), %v7802_v36  ;;  %v7836_v48 = vpack.c.bf16 (!%p5480_p12), %v5098_v41, %v5097_v39  ;;  %v7816_v33 = vpack.c.bf16 (!%p5480_p12), %v5072_v25, %v5071_v24  ;;  %v5269_v36 = vld [vmem:[#allocation10] sm:$0xff] (!%p5480_p12)  ;;  %v8267_v41 = vmov (!%p5480_p12), 0.0|0.0  }
 0x5d9   : > { %5018 = vst [vmem:[#allocation2 + $0x18] sm:$0xff] %v5014_v46  ;;  %v5116_v46 = vld [vmem:[#allocation7 + $0x1d8] sm:$0xff] (!%p5480_p12)  ;;  %v7806_v49 = vpack.c.bf16 (!%p5480_p12), %v5084_v43, %v5083_v42  ;;  %7835 = vmatprep.subr.bf16.mxu1 (!%p5480_p12), %v7834_v40  ;;  %7805 = vmatpush3.bf16.msra.mxu0 (!%p5480_p12), %v7804_v47  ;;  %v7848_v35 = vpack.c.bf16 (!%p5480_p12), %v5104_v29, %v5103_v28  ;;  %v5270_v37 = vld [vmem:[#allocation10 + $0x8] sm:$0xff] (!%p5480_p12) }
 0x5da   : > { %v7838_v53 = vpack.c.bf16 %v5116_v46, %v5115_v45  ;;  %v5035_v57 = vsub.s32 1, %v5030_v44  ;;  %v5043_v58 = vsub.s32 3, %v5030_v44  ;;  %v5031_v61 = vsub.s32 0, %v5030_v44  ;;  %v5271_v42 = vld [vmem:[#allocation10 + $0x10] sm:$0xff]  ;;  %v5272_v43 = vld [vmem:[#allocation10 + $0x18] sm:$0xff]  ;;  %v5273_v45 = vld [vmem:[#allocation10 + $0x20] sm:$0xff] }
 0x5db   : > { %v5039_v2 = vsub.s32 2, %v5030_v44  ;;  %7837 = vmatpush3.bf16.msra.mxu1 %v7836_v48  ;;  %7807 = vmatprep.subr.bf16.mxu0 %v7806_v49  ;;  %v7851_v40 = vpack.c.bf16 %v5270_v37, %v5269_v36  ;;  %v7854_v44 = vpack.c.bf16 %v5272_v43, %v5271_v42  ;;  %v5274_v46 = vld [vmem:[#allocation10 + $0x28] sm:$0xff]  ;;  %v5275_v48 = vld [vmem:[#allocation10 + $0x30] sm:$0xff]  ;;  %v5276_v49 = vld [vmem:[#allocation10 + $0x38] sm:$0xff] }
 0x5dc   : > { %7839 = vmatprep.subr.bf16.mxu1 %v7838_v53  ;;  %v5036_v11 = vrot.slane %v5027_v7, %v5035_v57  ;;  %v5044_v13 = vrot.slane %v5027_v7, %v5043_v58  ;;  %v5032_v16 = vrot.slane %v5027_v7, %v5031_v61  ;;  %v7857_v47 = vpack.c.bf16 %v5274_v46, %v5273_v45  ;;  %v5281_v57 = vld [vmem:[#allocation10 + $0x60] sm:$0xff]  ;;  %v5282_v58 = vld [vmem:[#allocation10 + $0x68] sm:$0xff]  ;;  %v5284_v61 = vld [vmem:[#allocation10 + $0x78] sm:$0xff] }
 0x5dd   : > { %7809 = vmatpush3.bf16.msra.mxu0 %v7808_v62  ;;  %v5040_v21 = vrot.slane %v5027_v7, %v5039_v2  ;;  %v7860_v50 = vpack.c.bf16 %v5276_v49, %v5275_v48  ;;  %v7863_v53 = vpack.c.bf16 %v5278_v52, %v5277_v51  ;;  %v7869_v59 = vpack.c.bf16 %v5282_v58, %v5281_v57 }
 0x5de   : > { %v5023_v19 = vld [vmem:[#allocation2] sm:$0xff]  ;;  %7811 = vmatprep.subr.bf16.mxu0 %v7810_v4  ;;  %v7872_v62 = vpack.c.bf16 %v5284_v61, %v5283_v60 }
 0x5df   : > { %v5024_v6 = vld [vmem:[#allocation2 + $0x8] sm:$0xff]  ;;  %7841 = vmatpush3.bf16.msra.mxu1 %v7840_v3  ;;  %v5025_v26 = vld [vmem:[#allocation2 + $0x10] sm:$0xff]  ;;  %v5049_v32 = vadd.f32 %v5032_v16, %v5023_v19 }
 0x5e0   : > { %v5026_v12 = vld [vmem:[#allocation2 + $0x18] sm:$0xff]  ;;  %v5050_v18 = vadd.f32 %v5036_v11, %v5024_v6  ;;  %7843 = vmatprep.subr.bf16.mxu1 %v7842_v8  ;;  %v5051_v34 = vadd.f32 %v5040_v21, %v5025_v26 }
 0x5e1   : > { %v5052_v20 = vadd.f32 %v5044_v13, %v5026_v12  ;;  %7813 = vmatpush3.bf16.msra.mxu0 %v7812_v17  ;;  %v5053_v38 = vmax.f32 %v5049_v32, 0.0 }
 0x5e2   : > { %v5054_v30 = vmax.f32 %v5050_v18, 0.0  ;;  %7815 = vmatprep.subr.bf16.mxu0 %v7814_v23  ;;  %v5055_v39 = vmax.f32 %v5051_v34, 0.0 }
 0x5e3   : > { %v5056_v31 = vmax.f32 %v5052_v20, 0.0  ;;  %7845 = vmatpush3.bf16.msra.mxu1 %v7844_v22 }
 0x5e4   : > { %5192 = vmatprep.mubr.f32.mxu0 %v5054_v30  ;;  %7847 = vmatprep.subr.bf16.mxu1 %v7846_v27 }
 0x5e5   : > { %5262 = vmatprep.mubr.f32.mxu1 %v5056_v31  ;;  %7817 = vmatpush3.bf16.msra.mxu0 %v7816_v33 }
 0x5e6   : > { %7850 = vmatprep.subr.bf16.mxu0 %v8267_v41 }
 0x5e7   : > { %7849 = vmatpush3.bf16.msra.mxu1 %v7848_v35 }
 0x5e8   : > { %5193 = vmatmul.mubr.f32.vlgmr.msra.gmra.mrb[0].mxu0 %v5053_v38 }
 0x5e9   : > { %7852 = vmatpush3.bf16.msra.mxu0 %v7851_v40  ;;  %5607 = vmatprep.mubr.msk.f32.mxu0 %vm8268_vm0, %v8269_v63 }
 0x5ea   : > { %5263 = vmatmul.mubr.f32.vlgmr.msra.gmra.mrb[0].mxu1 %v5055_v39  ;;  %7853 = vmatprep.subr.bf16.mxu0 %v8267_v41 }
 0x5ed   : > { %7855 = vmatpush3.bf16.msra.mxu0 %v7854_v44 }
 0x5ee   : > { %7856 = vmatprep.subr.bf16.mxu0 %v8267_v41 }
 0x5f1   : > { %7858 = vmatpush3.bf16.msra.mxu0 %v7857_v47 }
 0x5f2   : > { %7859 = vmatprep.subr.bf16.mxu0 %v8267_v41 }
 0x5f5   : > { %7861 = vmatpush3.bf16.msra.mxu0 %v7860_v50 }
 0x5f6   : > { %7862 = vmatprep.subr.bf16.mxu0 %v8267_v41 }
 0x5f9   : > { %7864 = vmatpush3.bf16.msra.mxu0 %v7863_v53 }
 0x5fa   : > { %7865 = vmatprep.subr.bf16.mxu0 %v8267_v41 }
 0x5fd   : > { %7867 = vmatpush3.bf16.msra.mxu0 %v7866_v56 }
 0x5fe   : > { %7868 = vmatprep.subr.bf16.mxu0 %v8267_v41 }
 0x601   : > { %7870 = vmatpush3.bf16.msra.mxu0 %v7869_v59 }
 0x602   : > { %7871 = vmatprep.subr.bf16.mxu0 %v8267_v41 }
 0x605   : > { %7873 = vmatpush3.bf16.msra.mxu0 %v7872_v62 }
 0x6bb   : > { %v5520_v0 = vpop.f32.mrb[0].mxu0 }
 0x6bc   : > { %v5521_v2 = vpop.f32.mrb[1].mxu0 }
 0x6bd   : > { %v5555_v3 = vpop.f32.mrb[0].mxu1  ;;  %v5522_v4 = vadd.f32 %v5521_v2, %v5520_v0 }
 0x6be   : > { %v5556_v5 = vpop.f32.mrb[1].mxu1 }
 0x6bf   : > { %v5557_v6 = vadd.f32 %v5556_v5, %v5555_v3  ;;  %v5195_v7 = vadd.f32 %v5522_v4, %v5481_v1 }
 0x6c1   : > { %v5265_v8 = vadd.f32 %v5557_v6, %v5195_v7 }
 0x6c3   : > { %v5268_v9 = vmax.f32 %v5265_v8, 0.0 }
 0x6c5   : > { %5608 = vmatmul.mubr.f32.vlgmr.msra.gmra.mrb[2].mxu0 %v5268_v9 }
 0x798   : > { %v5358_v11 = vpop.f32.mrb[2].mxu0 }
 0x799   : > { %v5359_v12 = vadd.f32 %v5482_v10, %v5358_v11  ;;  %v5609_v13 = vpop.f32.mrb[3].mxu0 }
 0x79b   : > { %5362 = vst [vmem:[%s10785_s7] sm:$0xff] %v5359_v12 }
 0x79c PF: > { %p20_p0 = scmp.ge.s32.totalorder %s8461_s19, 6   ;;  %s10804_s24 = smov %s8246_s25 }
 0x79d   : > { %s10805_s25 = smov %s8250_s26  ;;  %s10806_s26 = smov %s8472_s12 }
 0x79e   : > { %s10807_s27 = smov %s8461_s19  ;;  %22 = sbr.rel (!%p20_p0) target bundleno = 8 (0x8), region = 115 }
 0x7a5   :  { %5374 = vsyncpa [#allocation4], 1 }
 0x7a6   :  { %5376 = vsyncpa [#allocation4 + $0x1], 1 }
 0x7a7   :  { %5377 = vsyncpa [#allocation6], 1 }
 0x7a8   :  { %5378 = vsyncpa [#allocation9], 1 }
 0x7a9   :  { %5379 = vsyncpa [#allocation12], 1 }

</bundles_post_ra>
